<compile_context>
chip_gen: v5e
topology: v5e:2x2
jax: 0.10.0
libtpu: 0.0.40
codegen_flags: <defaults>
</compile_context>

<pallas_src>
import collections
import functools
import math

import jax
import jax.numpy as jnp
from jax.experimental import pallas as pl
from jax.experimental.pallas import tpu as pltpu

BN_EPS = 1e-5
VMEM_LIMIT = 32 * 1024 * 1024      # explicit scoped-VMEM cap (safe on v7x's 64 MiB)
TILE_TARGET = 256                  # target M-tile (rows of the im2col matrix)

# ModelWrapper: dict output -> namedtuple with sorted keys ('desc', 'semi').
ModelEndpoints = collections.namedtuple("ModelEndpoints", ["desc", "semi"])


def _pick_tile(m, target=TILE_TARGET):
    """Largest divisor of m that is <= target and a multiple of 8 (else m)."""
    if m <= target:
        return m
    for t in range(target, 7, -8):
        if m % t == 0:
            return t
    return m


# ----------------------------------------------------------------------------
# Pallas kernels
# ----------------------------------------------------------------------------
def conv_stats_kernel(xt_ref, w_ref, y_ref, ssum_ref, ssq_ref):
    """Conv pass 1: one big-K matmul (9 taps fused into K) in bf16 with f32
    accumulation + per-tile partial sum / sum-of-squares for training-mode BN.

    xt_ref : (TM, 9*Cin) bf16      w_ref : (9*Cin, Cout) bf16 (resident)
    y_ref  : (TM, Cout)  f32       ssum_ref/ssq_ref : (1, 1, Cout) f32 partials
    """
    y = jnp.dot(xt_ref[...], w_ref[...], preferred_element_type=jnp.float32)
    y_ref[...] = y
    s = jnp.sum(y, axis=0, keepdims=True)        # (1, Cout)
    sq = jnp.sum(y * y, axis=0, keepdims=True)   # (1, Cout)
    ssum_ref[...] = s[None]
    ssq_ref[...] = sq[None]


def bn_relu_kernel(y_ref, scale_ref, shift_ref, o_ref):
    """Conv pass 2: folded BatchNorm affine (scale/shift) + ReLU, stored bf16."""
    y = y_ref[...] * scale_ref[...] + shift_ref[...]
    o_ref[...] = jnp.maximum(y, 0.0).astype(o_ref.dtype)


def head_kernel(x_ref, w_ref, b_ref, o_ref, *, normalize):
    """1x1 conv + bias (convPb / convDb); convDb fuses the per-pixel descriptor
    L2 normalization as rsqrt * multiply (EUP, no divide chain)."""
    y = jnp.dot(x_ref[...], w_ref[...],
                preferred_element_type=jnp.float32) + b_ref[...]
    if normalize:
        y = y * jax.lax.rsqrt(jnp.sum(y * y, axis=-1, keepdims=True))
    o_ref[...] = y


# ----------------------------------------------------------------------------
# Wrappers (glue: tap construction / reshapes in plain JAX)
# ----------------------------------------------------------------------------
def _im2col_3x3(x):
    """(N,H,W,C) bf16 -> (N*H*W, 9*C) bf16: the 9 conv taps concatenated along
    channels so the 3x3 conv becomes ONE matmul with K = 9*C."""
    n, h, w, c = x.shape
    xp = jnp.pad(x, ((0, 0), (1, 1), (1, 1), (0, 0)))   # padding=1
    taps = [xp[:, dy:dy + h, dx:dx + w, :] for dy in range(3) for dx in range(3)]
    return jnp.concatenate(taps, axis=-1).reshape(n * h * w, 9 * c)


def conv3x3_bn_relu(x, w_mat, gamma, beta):
    """x: (N,H,W,Cin) bf16; w_mat: (9*Cin, Cout) bf16; gamma/beta: (Cout,) f32."""
    n, h, w, cin = x.shape
    k, cout = w_mat.shape
    m = n * h * w
    xt = _im2col_3x3(x)                                  # (M, 9*Cin) bf16
    tm = _pick_tile(m)
    nt = m // tm

    # Pass 1: matmul + BN partial statistics, M axis tiled & parallel.
    y, ssum, ssq = pl.pallas_call(
        conv_stats_kernel,
        out_shape=(jax.ShapeDtypeStruct((m, cout), jnp.float32),
                   jax.ShapeDtypeStruct((nt, 1, cout), jnp.float32),
                   jax.ShapeDtypeStruct((nt, 1, cout), jnp.float32)),
        grid=(nt,),
        in_specs=[pl.BlockSpec((tm, k), lambda i: (i, 0)),
                  pl.BlockSpec((k, cout), lambda i: (0, 0))],  # weights resident
        out_specs=(pl.BlockSpec((tm, cout), lambda i: (i, 0)),
                   pl.BlockSpec((1, 1, cout), lambda i: (i, 0, 0)),
                   pl.BlockSpec((1, 1, cout), lambda i: (i, 0, 0))),
        compiler_params=pltpu.CompilerParams(
            dimension_semantics=("parallel",),
            vmem_limit_bytes=VMEM_LIMIT),
    )(xt, w_mat)

    # Combine tiny per-tile partials; fold BN into per-channel scale/shift (f32).
    mean = jnp.sum(ssum, axis=0) / m                     # (1, Cout)
    var = jnp.sum(ssq, axis=0) / m - mean * mean         # biased (training) var
    scale = gamma.reshape(1, -1) * jax.lax.rsqrt(var + BN_EPS)
    shift = beta.reshape(1, -1) - mean * scale

    # Pass 2: affine + ReLU, stored bf16 for the next layer's matmul.
    out = pl.pallas_call(
        bn_relu_kernel,
        out_shape=jax.ShapeDtypeStruct((m, cout), jnp.bfloat16),
        grid=(nt,),
        in_specs=[pl.BlockSpec((tm, cout), lambda i: (i, 0)),
                  pl.BlockSpec((1, cout), lambda i: (0, 0)),
                  pl.BlockSpec((1, cout), lambda i: (0, 0))],
        out_specs=pl.BlockSpec((tm, cout), lambda i: (i, 0)),
        compiler_params=pltpu.CompilerParams(
            dimension_semantics=("parallel",),
            vmem_limit_bytes=VMEM_LIMIT),
    )(y, scale, shift)
    return out.reshape(n, h, w, cout)


def conv1x1_head(x, w, b, cout_true, *, normalize):
    """x: (N,H,W,Cin) bf16; w: (Cin, Cpad) bf16 with lane-dense Cpad (>=128);
    b: (Cpad,) f32.  Returns (N,H,W,cout_true) f32."""
    n, h, wd, cin = x.shape
    cpad = w.shape[1]
    assert (not normalize) or cpad == cout_true   # normalization needs no padding
    m = n * h * wd
    xf = x.reshape(m, cin)
    tm = _pick_tile(m, 512)
    nt = m // tm
    out = pl.pallas_call(
        functools.partial(head_kernel, normalize=normalize),
        out_shape=jax.ShapeDtypeStruct((m, cpad), jnp.float32),
        grid=(nt,),
        in_specs=[pl.BlockSpec((tm, cin), lambda i: (i, 0)),
                  pl.BlockSpec((cin, cpad), lambda i: (0, 0)),
                  pl.BlockSpec((1, cpad), lambda i: (0, 0))],
        out_specs=pl.BlockSpec((tm, cpad), lambda i: (i, 0)),
        compiler_params=pltpu.CompilerParams(
            dimension_semantics=("parallel",),
            vmem_limit_bytes=VMEM_LIMIT),
    )(xf, w, b.reshape(1, -1))
    return out[:, :cout_true].reshape(n, h, wd, cout_true)


def maxpool2x2(x):
    # Per the perf review: the tiny-block Pallas pool kernel was pure per-grid-step
    # overhead (masked sub-128-lane stores); plain reshape+max fuses into the XLA
    # glue that builds the next layer's im2col taps.
    n, h, w, c = x.shape
    return jnp.max(x.reshape(n, h // 2, 2, w // 2, 2, c), axis=(2, 4))


# ----------------------------------------------------------------------------
# Parameter initialization (deterministic, synthetic)
# ----------------------------------------------------------------------------
CONV_LAYERS = [
    ("conv1a", 1, 64), ("conv1b", 64, 64),
    ("conv2a", 64, 64), ("conv2b", 64, 64),
    ("conv3a", 64, 128), ("conv3b", 128, 128),
    ("conv4a", 128, 128), ("conv4b", 128, 128),
    ("convPa", 128, 256), ("convDa", 128, 256),
]
HEAD_LAYERS = [("convPb", 256, 65), ("convDb", 256, 256)]


def init_params(key):
    params, ref_params = {}, {}
    for name, cin, cout in CONV_LAYERS:
        key, k1, k2, k3 = jax.random.split(key, 4)
        w = jax.random.normal(k1, (3, 3, cin, cout), jnp.float32) / math.sqrt(9 * cin)
        g = 1.0 + 0.1 * jax.random.normal(k2, (cout,), jnp.float32)
        b = 0.1 * jax.random.normal(k3, (cout,), jnp.float32)
        params[name] = (w.reshape(9 * cin, cout).astype(jnp.bfloat16), g, b)
        ref_params[name] = (w, g, b)                       # HWIO f32 for reference
    for name, cin, cout in HEAD_LAYERS:
        key, k1, k2 = jax.random.split(key, 3)
        w = jax.random.normal(k1, (cin, cout), jnp.float32) / math.sqrt(cin)
        b = 0.1 * jax.random.normal(k2, (cout,), jnp.float32)
        cpad = ((cout + 127) // 128) * 128                 # lane-dense output width
        wp = jnp.pad(w, ((0, 0), (0, cpad - cout))).astype(jnp.bfloat16)
        bp = jnp.pad(b, (0, cpad - cout))
        params[name] = (wp, bp, cout)
        ref_params[name] = (w, b)
    return params, ref_params


# ----------------------------------------------------------------------------
# Full forward (Pallas)
# ----------------------------------------------------------------------------
def superpoint_forward(x_nchw, params):
    x = jnp.transpose(x_nchw, (0, 2, 3, 1)).astype(jnp.bfloat16)   # NCHW -> NHWC

    x = conv3x3_bn_relu(x, *params["conv1a"])
    x = conv3x3_bn_relu(x, *params["conv1b"])
    x = maxpool2x2(x)
    x = conv3x3_bn_relu(x, *params["conv2a"])
    x = conv3x3_bn_relu(x, *params["conv2b"])
    x = maxpool2x2(x)
    x = conv3x3_bn_relu(x, *params["conv3a"])
    x = conv3x3_bn_relu(x, *params["conv3b"])
    x = maxpool2x2(x)
    x = conv3x3_bn_relu(x, *params["conv4a"])
    x = conv3x3_bn_relu(x, *params["conv4b"])

    cPa = conv3x3_bn_relu(x, *params["convPa"])
    semi = conv1x1_head(cPa, *params["convPb"], normalize=False)
    cDa = conv3x3_bn_relu(x, *params["convDa"])
    desc = conv1x1_head(cDa, *params["convDb"], normalize=True)

    # Back to PyTorch NCHW; ModelWrapper turns the dict into a sorted namedtuple.
    return ModelEndpoints(desc=jnp.transpose(desc, (0, 3, 1, 2)),
                          semi=jnp.transpose(semi, (0, 3, 1, 2)))


# ----------------------------------------------------------------------------
# Pure-JAX f32 reference (for correctness check)
# ----------------------------------------------------------------------------
def ref_forward(x_nchw, rp):
    hi = jax.lax.Precision.HIGHEST
    x = jnp.transpose(x_nchw, (0, 2, 3, 1))

    def cbr(x, p):
        w, g, b = p
        y = jax.lax.conv_general_dilated(
            x, w, (1, 1), "SAME",
            dimension_numbers=("NHWC", "HWIO", "NHWC"), precision=hi)
        m = jnp.mean(y, axis=(0, 1, 2), keepdims=True)
        v = jnp.mean((y - m) ** 2, axis=(0, 1, 2), keepdims=True)
        return jnp.maximum((y - m) * jax.lax.rsqrt(v + BN_EPS) * g + b, 0.0)

    def pool(x):
        n, h, w, c = x.shape
        return jnp.max(x.reshape(n, h // 2, 2, w // 2, 2, c), axis=(2, 4))

    x = cbr(x, rp["conv1a"]); x = cbr(x, rp["conv1b"]); x = pool(x)
    x = cbr(x, rp["conv2a"]); x = cbr(x, rp["conv2b"]); x = pool(x)
    x = cbr(x, rp["conv3a"]); x = cbr(x, rp["conv3b"]); x = pool(x)
    x = cbr(x, rp["conv4a"]); x = cbr(x, rp["conv4b"])
    cPa = cbr(x, rp["convPa"])
    semi = jnp.einsum("nhwc,co->nhwo", cPa, rp["convPb"][0],
                      precision=hi) + rp["convPb"][1]
    cDa = cbr(x, rp["convDa"])
    desc = jnp.einsum("nhwc,co->nhwo", cDa, rp["convDb"][0],
                      precision=hi) + rp["convDb"][1]
    dn = jnp.sqrt(jnp.sum(desc * desc, axis=-1, keepdims=True))
    desc = desc / dn
    return ModelEndpoints(desc=jnp.transpose(desc, (0, 3, 1, 2)),
                          semi=jnp.transpose(semi, (0, 3, 1, 2)))


# ----------------------------------------------------------------------------
if __name__ == "__main__":
    key = jax.random.PRNGKey(0)
    kx, kp = jax.random.split(key)
    # SuperPoint input: N x 1 x H x W; H=W=16 so the heads run at 2x2.
    x = jax.random.normal(kx, (2, 1, 16, 16), jnp.float32)
    params, ref_params = init_params(kp)

    fwd = jax.jit(lambda inp: superpoint_forward(inp, params))
    out = fwd(x)
    jax.block_until_ready(out)

    assert out.semi.shape == (2, 65, 2, 2)
    assert out.desc.shape == (2, 256, 2, 2)

    ref = ref_forward(x, ref_params)
    for name in ("semi", "desc"):
        a, b = getattr(out, name), getattr(ref, name)
        assert a.shape == b.shape
        if not jnp.allclose(a, b, rtol=5e-2, atol=5e-2):
            max_err = float(jnp.max(jnp.abs(a - b)))
            raise AssertionError(f"mismatch in {name}: max abs err = {max_err}")

    print("KERNEL_OK")
</pallas_src>

<mosaic_0001>
module attributes {stable_mosaic.version = 11 : i64} {
  func.func @conv_stats_kernel(%arg0: i32, %arg1: memref<256x9xbf16, #tpu.memory_space<vmem>>, %arg2: memref<9x64xbf16, #tpu.memory_space<vmem>>, %arg3: memref<256x64xf32, #tpu.memory_space<vmem>>, %arg4: memref<1x1x64xf32, #tpu.memory_space<vmem>>, %arg5: memref<1x1x64xf32, #tpu.memory_space<vmem>>) attributes {dimension_semantics = [#tpu.dimension_semantics<parallel>], iteration_bounds = array<i64: 2>, scalar_prefetch = 0 : i64, scratch_operands = 0 : i64, tpu.core_type = #tpu.core_type<tc>, window_params = [{transform_indices = @transform_0, window_bounds = array<i64: 256, 9>}, {pipeline_mode = #tpu.pipeline_mode<synchronous>, transform_indices = @transform_1, window_bounds = array<i64: 9, 64>}, {transform_indices = @transform_2, window_bounds = array<i64: 256, 64>}, {transform_indices = @transform_3, window_bounds = array<i64: 1, 1, 64>}, {transform_indices = @transform_4, window_bounds = array<i64: 1, 1, 64>}]} {
    %c0 = arith.constant 0 : index
    %c0_0 = arith.constant 0 : index
    %0 = vector.load %arg1[%c0, %c0_0] : memref<256x9xbf16, #tpu.memory_space<vmem>>, vector<256x9xbf16>
    %c0_1 = arith.constant 0 : index
    %c0_2 = arith.constant 0 : index
    %1 = vector.load %arg2[%c0_1, %c0_2] : memref<9x64xbf16, #tpu.memory_space<vmem>>, vector<9x64xbf16>
    %cst = arith.constant dense<0.000000e+00> : vector<256x64xf32>
    %2 = tpu.matmul %0, %1, %cst {dimension_numbers = #tpu.dot_dimension_numbers<[1], [0], [0], [1], [0, 0, 1, 1], [], []>} : vector<256x9xbf16>, vector<9x64xbf16>, vector<256x64xf32> -> vector<256x64xf32>
    %c0_3 = arith.constant 0 : index
    %c0_4 = arith.constant 0 : index
    %3 = vector.load %arg3[%c0_3, %c0_4] : memref<256x64xf32, #tpu.memory_space<vmem>>, vector<256x64xf32>
    tpu.vector_store %arg3[%c0_3, %c0_4], %2 {strides = array<i32>} : memref<256x64xf32, #tpu.memory_space<vmem>>, vector<256x64xf32>,
    %cst_5 = arith.constant dense<0.000000e+00> : vector<64xf32>
    %4 = vector.multi_reduction <add>, %2, %cst_5 [0] : vector<256x64xf32> to vector<64xf32>
    %5 = vector.shape_cast %4 : vector<64xf32> to vector<1x64xf32>
    %6 = arith.mulf %2, %2 : vector<256x64xf32>
    %cst_6 = arith.constant dense<0.000000e+00> : vector<64xf32>
    %7 = vector.multi_reduction <add>, %6, %cst_6 [0] : vector<256x64xf32> to vector<64xf32>
    %8 = vector.shape_cast %7 : vector<64xf32> to vector<1x64xf32>
    %9 = vector.shape_cast %5 : vector<1x64xf32> to vector<1x1x64xf32>
    %c0_7 = arith.constant 0 : index
    %c0_8 = arith.constant 0 : index
    %c0_9 = arith.constant 0 : index
    %10 = vector.load %arg4[%c0_7, %c0_8, %c0_9] : memref<1x1x64xf32, #tpu.memory_space<vmem>>, vector<1x1x64xf32>
    tpu.vector_store %arg4[%c0_7, %c0_8, %c0_9], %9 {strides = array<i32>} : memref<1x1x64xf32, #tpu.memory_space<vmem>>, vector<1x1x64xf32>,
    %11 = vector.shape_cast %8 : vector<1x64xf32> to vector<1x1x64xf32>
    %c0_10 = arith.constant 0 : index
    %c0_11 = arith.constant 0 : index
    %c0_12 = arith.constant 0 : index
    %12 = vector.load %arg5[%c0_10, %c0_11, %c0_12] : memref<1x1x64xf32, #tpu.memory_space<vmem>>, vector<1x1x64xf32>
    tpu.vector_store %arg5[%c0_10, %c0_11, %c0_12], %11 {strides = array<i32>} : memref<1x1x64xf32, #tpu.memory_space<vmem>>, vector<1x1x64xf32>,
    return
  }
  func.func @transform_0(%arg0: i32) -> (i32, i32) {
    %c0_i32 = arith.constant 0 : i32
    %c0_i32_0 = arith.constant 0 : i32
    return %arg0, %c0_i32 : i32, i32
  }
  func.func @transform_1(%arg0: i32) -> (i32, i32) {
    %c0_i32 = arith.constant 0 : i32
    %c0_i32_0 = arith.constant 0 : i32
    %c0_i32_1 = arith.constant 0 : i32
    return %c0_i32, %c0_i32_0 : i32, i32
  }
  func.func @transform_2(%arg0: i32) -> (i32, i32) {
    %c0_i32 = arith.constant 0 : i32
    %c0_i32_0 = arith.constant 0 : i32
    return %arg0, %c0_i32 : i32, i32
  }
  func.func @transform_3(%arg0: i32) -> (i32, i32, i32) {
    %c0_i32 = arith.constant 0 : i32
    %c0_i32_0 = arith.constant 0 : i32
    %c0_i32_1 = arith.constant 0 : i32
    return %arg0, %c0_i32, %c0_i32_0 : i32, i32, i32
  }
  func.func @transform_4(%arg0: i32) -> (i32, i32, i32) {
    %c0_i32 = arith.constant 0 : i32
    %c0_i32_0 = arith.constant 0 : i32
    %c0_i32_1 = arith.constant 0 : i32
    return %arg0, %c0_i32, %c0_i32_0 : i32, i32, i32
  }
}

module attributes {stable_mosaic.version = 11 : i64} {
  func.func @bn_relu_kernel(%arg0: i32, %arg1: memref<256x64xf32, #tpu.memory_space<vmem>>, %arg2: memref<1x64xf32, #tpu.memory_space<vmem>>, %arg3: memref<1x64xf32, #tpu.memory_space<vmem>>, %arg4: memref<256x64xbf16, #tpu.memory_space<vmem>>) attributes {dimension_semantics = [#tpu.dimension_semantics<parallel>], iteration_bounds = array<i64: 2>, scalar_prefetch = 0 : i64, scratch_operands = 0 : i64, tpu.core_type = #tpu.core_type<tc>, window_params = [{transform_indices = @transform_0, window_bounds = array<i64: 256, 64>}, {pipeline_mode = #tpu.pipeline_mode<synchronous>, transform_indices = @transform_1, window_bounds = array<i64: 1, 64>}, {pipeline_mode = #tpu.pipeline_mode<synchronous>, transform_indices = @transform_2, window_bounds = array<i64: 1, 64>}, {transform_indices = @transform_3, window_bounds = array<i64: 256, 64>}]} {
    %c0 = arith.constant 0 : index
    %c0_0 = arith.constant 0 : index
    %0 = vector.load %arg1[%c0, %c0_0] : memref<256x64xf32, #tpu.memory_space<vmem>>, vector<256x64xf32>
    %c0_1 = arith.constant 0 : index
    %c0_2 = arith.constant 0 : index
    %1 = vector.load %arg2[%c0_1, %c0_2] : memref<1x64xf32, #tpu.memory_space<vmem>>, vector<1x64xf32>
    %2 = vector.broadcast %1 : vector<1x64xf32> to vector<256x64xf32>
    %3 = arith.mulf %0, %2 : vector<256x64xf32>
    %c0_3 = arith.constant 0 : index
    %c0_4 = arith.constant 0 : index
    %4 = vector.load %arg3[%c0_3, %c0_4] : memref<1x64xf32, #tpu.memory_space<vmem>>, vector<1x64xf32>
    %5 = vector.broadcast %4 : vector<1x64xf32> to vector<256x64xf32>
    %6 = arith.addf %3, %5 : vector<256x64xf32>
    %cst = arith.constant 0.000000e+00 : f32
    %7 = vector.broadcast %cst : f32 to vector<256x64xf32>
    %8 = arith.maximumf %6, %7 : vector<256x64xf32>
    %9 = arith.truncf %8 : vector<256x64xf32> to vector<256x64xbf16>
    %c0_5 = arith.constant 0 : index
    %c0_6 = arith.constant 0 : index
    %10 = vector.load %arg4[%c0_5, %c0_6] : memref<256x64xbf16, #tpu.memory_space<vmem>>, vector<256x64xbf16>
    tpu.vector_store %arg4[%c0_5, %c0_6], %9 {strides = array<i32>} : memref<256x64xbf16, #tpu.memory_space<vmem>>, vector<256x64xbf16>,
    return
  }
  func.func @transform_0(%arg0: i32) -> (i32, i32) {
    %c0_i32 = arith.constant 0 : i32
    %c0_i32_0 = arith.constant 0 : i32
    return %arg0, %c0_i32 : i32, i32
  }
  func.func @transform_1(%arg0: i32) -> (i32, i32) {
    %c0_i32 = arith.constant 0 : i32
    %c0_i32_0 = arith.constant 0 : i32
    %c0_i32_1 = arith.constant 0 : i32
    return %c0_i32, %c0_i32_0 : i32, i32
  }
  func.func @transform_2(%arg0: i32) -> (i32, i32) {
    %c0_i32 = arith.constant 0 : i32
    %c0_i32_0 = arith.constant 0 : i32
    %c0_i32_1 = arith.constant 0 : i32
    return %c0_i32, %c0_i32_0 : i32, i32
  }
  func.func @transform_3(%arg0: i32) -> (i32, i32) {
    %c0_i32 = arith.constant 0 : i32
    %c0_i32_0 = arith.constant 0 : i32
    return %arg0, %c0_i32 : i32, i32
  }
}

module attributes {stable_mosaic.version = 11 : i64} {
  func.func @conv_stats_kernel(%arg0: i32, %arg1: memref<256x576xbf16, #tpu.memory_space<vmem>>, %arg2: memref<576x64xbf16, #tpu.memory_space<vmem>>, %arg3: memref<256x64xf32, #tpu.memory_space<vmem>>, %arg4: memref<1x1x64xf32, #tpu.memory_space<vmem>>, %arg5: memref<1x1x64xf32, #tpu.memory_space<vmem>>) attributes {dimension_semantics = [#tpu.dimension_semantics<parallel>], iteration_bounds = array<i64: 2>, scalar_prefetch = 0 : i64, scratch_operands = 0 : i64, tpu.core_type = #tpu.core_type<tc>, window_params = [{transform_indices = @transform_0, window_bounds = array<i64: 256, 576>}, {pipeline_mode = #tpu.pipeline_mode<synchronous>, transform_indices = @transform_1, window_bounds = array<i64: 576, 64>}, {transform_indices = @transform_2, window_bounds = array<i64: 256, 64>}, {transform_indices = @transform_3, window_bounds = array<i64: 1, 1, 64>}, {transform_indices = @transform_4, window_bounds = array<i64: 1, 1, 64>}]} {
    %c0 = arith.constant 0 : index
    %c0_0 = arith.constant 0 : index
    %0 = vector.load %arg1[%c0, %c0_0] : memref<256x576xbf16, #tpu.memory_space<vmem>>, vector<256x576xbf16>
    %c0_1 = arith.constant 0 : index
    %c0_2 = arith.constant 0 : index
    %1 = vector.load %arg2[%c0_1, %c0_2] : memref<576x64xbf16, #tpu.memory_space<vmem>>, vector<576x64xbf16>
    %cst = arith.constant dense<0.000000e+00> : vector<256x64xf32>
    %2 = tpu.matmul %0, %1, %cst {dimension_numbers = #tpu.dot_dimension_numbers<[1], [0], [0], [1], [0, 0, 1, 1], [], []>} : vector<256x576xbf16>, vector<576x64xbf16>, vector<256x64xf32> -> vector<256x64xf32>
    %c0_3 = arith.constant 0 : index
    %c0_4 = arith.constant 0 : index
    %3 = vector.load %arg3[%c0_3, %c0_4] : memref<256x64xf32, #tpu.memory_space<vmem>>, vector<256x64xf32>
    tpu.vector_store %arg3[%c0_3, %c0_4], %2 {strides = array<i32>} : memref<256x64xf32, #tpu.memory_space<vmem>>, vector<256x64xf32>,
    %cst_5 = arith.constant dense<0.000000e+00> : vector<64xf32>
    %4 = vector.multi_reduction <add>, %2, %cst_5 [0] : vector<256x64xf32> to vector<64xf32>
    %5 = vector.shape_cast %4 : vector<64xf32> to vector<1x64xf32>
    %6 = arith.mulf %2, %2 : vector<256x64xf32>
    %cst_6 = arith.constant dense<0.000000e+00> : vector<64xf32>
    %7 = vector.multi_reduction <add>, %6, %cst_6 [0] : vector<256x64xf32> to vector<64xf32>
    %8 = vector.shape_cast %7 : vector<64xf32> to vector<1x64xf32>
    %9 = vector.shape_cast %5 : vector<1x64xf32> to vector<1x1x64xf32>
    %c0_7 = arith.constant 0 : index
    %c0_8 = arith.constant 0 : index
    %c0_9 = arith.constant 0 : index
    %10 = vector.load %arg4[%c0_7, %c0_8, %c0_9] : memref<1x1x64xf32, #tpu.memory_space<vmem>>, vector<1x1x64xf32>
    tpu.vector_store %arg4[%c0_7, %c0_8, %c0_9], %9 {strides = array<i32>} : memref<1x1x64xf32, #tpu.memory_space<vmem>>, vector<1x1x64xf32>,
    %11 = vector.shape_cast %8 : vector<1x64xf32> to vector<1x1x64xf32>
    %c0_10 = arith.constant 0 : index
    %c0_11 = arith.constant 0 : index
    %c0_12 = arith.constant 0 : index
    %12 = vector.load %arg5[%c0_10, %c0_11, %c0_12] : memref<1x1x64xf32, #tpu.memory_space<vmem>>, vector<1x1x64xf32>
    tpu.vector_store %arg5[%c0_10, %c0_11, %c0_12], %11 {strides = array<i32>} : memref<1x1x64xf32, #tpu.memory_space<vmem>>, vector<1x1x64xf32>,
    return
  }
  func.func @transform_0(%arg0: i32) -> (i32, i32) {
    %c0_i32 = arith.constant 0 : i32
    %c0_i32_0 = arith.constant 0 : i32
    return %arg0, %c0_i32 : i32, i32
  }
  func.func @transform_1(%arg0: i32) -> (i32, i32) {
    %c0_i32 = arith.constant 0 : i32
    %c0_i32_0 = arith.constant 0 : i32
    %c0_i32_1 = arith.constant 0 : i32
    return %c0_i32, %c0_i32_0 : i32, i32
  }
  func.func @transform_2(%arg0: i32) -> (i32, i32) {
    %c0_i32 = arith.constant 0 : i32
    %c0_i32_0 = arith.constant 0 : i32
    return %arg0, %c0_i32 : i32, i32
  }
  func.func @transform_3(%arg0: i32) -> (i32, i32, i32) {
    %c0_i32 = arith.constant 0 : i32
    %c0_i32_0 = arith.constant 0 : i32
    %c0_i32_1 = arith.constant 0 : i32
    return %arg0, %c0_i32, %c0_i32_0 : i32, i32, i32
  }
  func.func @transform_4(%arg0: i32) -> (i32, i32, i32) {
    %c0_i32 = arith.constant 0 : i32
    %c0_i32_0 = arith.constant 0 : i32
    %c0_i32_1 = arith.constant 0 : i32
    return %arg0, %c0_i32, %c0_i32_0 : i32, i32, i32
  }
}

module attributes {stable_mosaic.version = 11 : i64} {
  func.func @conv_stats_kernel(%arg0: i32, %arg1: memref<128x576xbf16, #tpu.memory_space<vmem>>, %arg2: memref<576x64xbf16, #tpu.memory_space<vmem>>, %arg3: memref<128x64xf32, #tpu.memory_space<vmem>>, %arg4: memref<1x1x64xf32, #tpu.memory_space<vmem>>, %arg5: memref<1x1x64xf32, #tpu.memory_space<vmem>>) attributes {dimension_semantics = [#tpu.dimension_semantics<parallel>], iteration_bounds = array<i64: 1>, scalar_prefetch = 0 : i64, scratch_operands = 0 : i64, tpu.core_type = #tpu.core_type<tc>, window_params = [{transform_indices = @transform_0, window_bounds = array<i64: 128, 576>}, {pipeline_mode = #tpu.pipeline_mode<synchronous>, transform_indices = @transform_1, window_bounds = array<i64: 576, 64>}, {transform_indices = @transform_2, window_bounds = array<i64: 128, 64>}, {transform_indices = @transform_3, window_bounds = array<i64: 1, 1, 64>}, {transform_indices = @transform_4, window_bounds = array<i64: 1, 1, 64>}]} {
    %c0 = arith.constant 0 : index
    %c0_0 = arith.constant 0 : index
    %0 = vector.load %arg1[%c0, %c0_0] : memref<128x576xbf16, #tpu.memory_space<vmem>>, vector<128x576xbf16>
    %c0_1 = arith.constant 0 : index
    %c0_2 = arith.constant 0 : index
    %1 = vector.load %arg2[%c0_1, %c0_2] : memref<576x64xbf16, #tpu.memory_space<vmem>>, vector<576x64xbf16>
    %cst = arith.constant dense<0.000000e+00> : vector<128x64xf32>
    %2 = tpu.matmul %0, %1, %cst {dimension_numbers = #tpu.dot_dimension_numbers<[1], [0], [0], [1], [0, 0, 1, 1], [], []>} : vector<128x576xbf16>, vector<576x64xbf16>, vector<128x64xf32> -> vector<128x64xf32>
    %c0_3 = arith.constant 0 : index
    %c0_4 = arith.constant 0 : index
    %3 = vector.load %arg3[%c0_3, %c0_4] : memref<128x64xf32, #tpu.memory_space<vmem>>, vector<128x64xf32>
    tpu.vector_store %arg3[%c0_3, %c0_4], %2 {strides = array<i32>} : memref<128x64xf32, #tpu.memory_space<vmem>>, vector<128x64xf32>,
    %cst_5 = arith.constant dense<0.000000e+00> : vector<64xf32>
    %4 = vector.multi_reduction <add>, %2, %cst_5 [0] : vector<128x64xf32> to vector<64xf32>
    %5 = vector.shape_cast %4 : vector<64xf32> to vector<1x64xf32>
    %6 = arith.mulf %2, %2 : vector<128x64xf32>
    %cst_6 = arith.constant dense<0.000000e+00> : vector<64xf32>
    %7 = vector.multi_reduction <add>, %6, %cst_6 [0] : vector<128x64xf32> to vector<64xf32>
    %8 = vector.shape_cast %7 : vector<64xf32> to vector<1x64xf32>
    %9 = vector.shape_cast %5 : vector<1x64xf32> to vector<1x1x64xf32>
    %c0_7 = arith.constant 0 : index
    %c0_8 = arith.constant 0 : index
    %c0_9 = arith.constant 0 : index
    %10 = vector.load %arg4[%c0_7, %c0_8, %c0_9] : memref<1x1x64xf32, #tpu.memory_space<vmem>>, vector<1x1x64xf32>
    tpu.vector_store %arg4[%c0_7, %c0_8, %c0_9], %9 {strides = array<i32>} : memref<1x1x64xf32, #tpu.memory_space<vmem>>, vector<1x1x64xf32>,
    %11 = vector.shape_cast %8 : vector<1x64xf32> to vector<1x1x64xf32>
    %c0_10 = arith.constant 0 : index
    %c0_11 = arith.constant 0 : index
    %c0_12 = arith.constant 0 : index
    %12 = vector.load %arg5[%c0_10, %c0_11, %c0_12] : memref<1x1x64xf32, #tpu.memory_space<vmem>>, vector<1x1x64xf32>
    tpu.vector_store %arg5[%c0_10, %c0_11, %c0_12], %11 {strides = array<i32>} : memref<1x1x64xf32, #tpu.memory_space<vmem>>, vector<1x1x64xf32>,
    return
  }
  func.func @transform_0(%arg0: i32) -> (i32, i32) {
    %c0_i32 = arith.constant 0 : i32
    %c0_i32_0 = arith.constant 0 : i32
    return %arg0, %c0_i32 : i32, i32
  }
  func.func @transform_1(%arg0: i32) -> (i32, i32) {
    %c0_i32 = arith.constant 0 : i32
    %c0_i32_0 = arith.constant 0 : i32
    %c0_i32_1 = arith.constant 0 : i32
    return %c0_i32, %c0_i32_0 : i32, i32
  }
  func.func @transform_2(%arg0: i32) -> (i32, i32) {
    %c0_i32 = arith.constant 0 : i32
    %c0_i32_0 = arith.constant 0 : i32
    return %arg0, %c0_i32 : i32, i32
  }
  func.func @transform_3(%arg0: i32) -> (i32, i32, i32) {
    %c0_i32 = arith.constant 0 : i32
    %c0_i32_0 = arith.constant 0 : i32
    %c0_i32_1 = arith.constant 0 : i32
    return %arg0, %c0_i32, %c0_i32_0 : i32, i32, i32
  }
  func.func @transform_4(%arg0: i32) -> (i32, i32, i32) {
    %c0_i32 = arith.constant 0 : i32
    %c0_i32_0 = arith.constant 0 : i32
    %c0_i32_1 = arith.constant 0 : i32
    return %arg0, %c0_i32, %c0_i32_0 : i32, i32, i32
  }
}

module attributes {stable_mosaic.version = 11 : i64} {
  func.func @bn_relu_kernel(%arg0: i32, %arg1: memref<128x64xf32, #tpu.memory_space<vmem>>, %arg2: memref<1x64xf32, #tpu.memory_space<vmem>>, %arg3: memref<1x64xf32, #tpu.memory_space<vmem>>, %arg4: memref<128x64xbf16, #tpu.memory_space<vmem>>) attributes {dimension_semantics = [#tpu.dimension_semantics<parallel>], iteration_bounds = array<i64: 1>, scalar_prefetch = 0 : i64, scratch_operands = 0 : i64, tpu.core_type = #tpu.core_type<tc>, window_params = [{transform_indices = @transform_0, window_bounds = array<i64: 128, 64>}, {pipeline_mode = #tpu.pipeline_mode<synchronous>, transform_indices = @transform_1, window_bounds = array<i64: 1, 64>}, {pipeline_mode = #tpu.pipeline_mode<synchronous>, transform_indices = @transform_2, window_bounds = array<i64: 1, 64>}, {transform_indices = @transform_3, window_bounds = array<i64: 128, 64>}]} {
    %c0 = arith.constant 0 : index
    %c0_0 = arith.constant 0 : index
    %0 = vector.load %arg1[%c0, %c0_0] : memref<128x64xf32, #tpu.memory_space<vmem>>, vector<128x64xf32>
    %c0_1 = arith.constant 0 : index
    %c0_2 = arith.constant 0 : index
    %1 = vector.load %arg2[%c0_1, %c0_2] : memref<1x64xf32, #tpu.memory_space<vmem>>, vector<1x64xf32>
    %2 = vector.broadcast %1 : vector<1x64xf32> to vector<128x64xf32>
    %3 = arith.mulf %0, %2 : vector<128x64xf32>
    %c0_3 = arith.constant 0 : index
    %c0_4 = arith.constant 0 : index
    %4 = vector.load %arg3[%c0_3, %c0_4] : memref<1x64xf32, #tpu.memory_space<vmem>>, vector<1x64xf32>
    %5 = vector.broadcast %4 : vector<1x64xf32> to vector<128x64xf32>
    %6 = arith.addf %3, %5 : vector<128x64xf32>
    %cst = arith.constant 0.000000e+00 : f32
    %7 = vector.broadcast %cst : f32 to vector<128x64xf32>
    %8 = arith.maximumf %6, %7 : vector<128x64xf32>
    %9 = arith.truncf %8 : vector<128x64xf32> to vector<128x64xbf16>
    %c0_5 = arith.constant 0 : index
    %c0_6 = arith.constant 0 : index
    %10 = vector.load %arg4[%c0_5, %c0_6] : memref<128x64xbf16, #tpu.memory_space<vmem>>, vector<128x64xbf16>
    tpu.vector_store %arg4[%c0_5, %c0_6], %9 {strides = array<i32>} : memref<128x64xbf16, #tpu.memory_space<vmem>>, vector<128x64xbf16>,
    return
  }
  func.func @transform_0(%arg0: i32) -> (i32, i32) {
    %c0_i32 = arith.constant 0 : i32
    %c0_i32_0 = arith.constant 0 : i32
    return %arg0, %c0_i32 : i32, i32
  }
  func.func @transform_1(%arg0: i32) -> (i32, i32) {
    %c0_i32 = arith.constant 0 : i32
    %c0_i32_0 = arith.constant 0 : i32
    %c0_i32_1 = arith.constant 0 : i32
    return %c0_i32, %c0_i32_0 : i32, i32
  }
  func.func @transform_2(%arg0: i32) -> (i32, i32) {
    %c0_i32 = arith.constant 0 : i32
    %c0_i32_0 = arith.constant 0 : i32
    %c0_i32_1 = arith.constant 0 : i32
    return %c0_i32, %c0_i32_0 : i32, i32
  }
  func.func @transform_3(%arg0: i32) -> (i32, i32) {
    %c0_i32 = arith.constant 0 : i32
    %c0_i32_0 = arith.constant 0 : i32
    return %arg0, %c0_i32 : i32, i32
  }
}

module attributes {stable_mosaic.version = 11 : i64} {
  func.func @conv_stats_kernel(%arg0: i32, %arg1: memref<32x576xbf16, #tpu.memory_space<vmem>>, %arg2: memref<576x128xbf16, #tpu.memory_space<vmem>>, %arg3: memref<32x128xf32, #tpu.memory_space<vmem>>, %arg4: memref<1x1x128xf32, #tpu.memory_space<vmem>>, %arg5: memref<1x1x128xf32, #tpu.memory_space<vmem>>) attributes {dimension_semantics = [#tpu.dimension_semantics<parallel>], iteration_bounds = array<i64: 1>, scalar_prefetch = 0 : i64, scratch_operands = 0 : i64, tpu.core_type = #tpu.core_type<tc>, window_params = [{transform_indices = @transform_0, window_bounds = array<i64: 32, 576>}, {pipeline_mode = #tpu.pipeline_mode<synchronous>, transform_indices = @transform_1, window_bounds = array<i64: 576, 128>}, {transform_indices = @transform_2, window_bounds = array<i64: 32, 128>}, {transform_indices = @transform_3, window_bounds = array<i64: 1, 1, 128>}, {transform_indices = @transform_4, window_bounds = array<i64: 1, 1, 128>}]} {
    %c0 = arith.constant 0 : index
    %c0_0 = arith.constant 0 : index
    %0 = vector.load %arg1[%c0, %c0_0] : memref<32x576xbf16, #tpu.memory_space<vmem>>, vector<32x576xbf16>
    %c0_1 = arith.constant 0 : index
    %c0_2 = arith.constant 0 : index
    %1 = vector.load %arg2[%c0_1, %c0_2] : memref<576x128xbf16, #tpu.memory_space<vmem>>, vector<576x128xbf16>
    %cst = arith.constant dense<0.000000e+00> : vector<32x128xf32>
    %2 = tpu.matmul %0, %1, %cst {dimension_numbers = #tpu.dot_dimension_numbers<[1], [0], [0], [1], [0, 0, 1, 1], [], []>} : vector<32x576xbf16>, vector<576x128xbf16>, vector<32x128xf32> -> vector<32x128xf32>
    %c0_3 = arith.constant 0 : index
    %c0_4 = arith.constant 0 : index
    %3 = vector.load %arg3[%c0_3, %c0_4] : memref<32x128xf32, #tpu.memory_space<vmem>>, vector<32x128xf32>
    tpu.vector_store %arg3[%c0_3, %c0_4], %2 {strides = array<i32>} : memref<32x128xf32, #tpu.memory_space<vmem>>, vector<32x128xf32>,
    %cst_5 = arith.constant dense<0.000000e+00> : vector<128xf32>
    %4 = vector.multi_reduction <add>, %2, %cst_5 [0] : vector<32x128xf32> to vector<128xf32>
    %5 = vector.shape_cast %4 : vector<128xf32> to vector<1x128xf32>
    %6 = arith.mulf %2, %2 : vector<32x128xf32>
    %cst_6 = arith.constant dense<0.000000e+00> : vector<128xf32>
    %7 = vector.multi_reduction <add>, %6, %cst_6 [0] : vector<32x128xf32> to vector<128xf32>
    %8 = vector.shape_cast %7 : vector<128xf32> to vector<1x128xf32>
    %9 = vector.shape_cast %5 : vector<1x128xf32> to vector<1x1x128xf32>
    %c0_7 = arith.constant 0 : index
    %c0_8 = arith.constant 0 : index
    %c0_9 = arith.constant 0 : index
    %10 = vector.load %arg4[%c0_7, %c0_8, %c0_9] : memref<1x1x128xf32, #tpu.memory_space<vmem>>, vector<1x1x128xf32>
    tpu.vector_store %arg4[%c0_7, %c0_8, %c0_9], %9 {strides = array<i32>} : memref<1x1x128xf32, #tpu.memory_space<vmem>>, vector<1x1x128xf32>,
    %11 = vector.shape_cast %8 : vector<1x128xf32> to vector<1x1x128xf32>
    %c0_10 = arith.constant 0 : index
    %c0_11 = arith.constant 0 : index
    %c0_12 = arith.constant 0 : index
    %12 = vector.load %arg5[%c0_10, %c0_11, %c0_12] : memref<1x1x128xf32, #tpu.memory_space<vmem>>, vector<1x1x128xf32>
    tpu.vector_store %arg5[%c0_10, %c0_11, %c0_12], %11 {strides = array<i32>} : memref<1x1x128xf32, #tpu.memory_space<vmem>>, vector<1x1x128xf32>,
    return
  }
  func.func @transform_0(%arg0: i32) -> (i32, i32) {
    %c0_i32 = arith.constant 0 : i32
    %c0_i32_0 = arith.constant 0 : i32
    return %arg0, %c0_i32 : i32, i32
  }
  func.func @transform_1(%arg0: i32) -> (i32, i32) {
    %c0_i32 = arith.constant 0 : i32
    %c0_i32_0 = arith.constant 0 : i32
    %c0_i32_1 = arith.constant 0 : i32
    return %c0_i32, %c0_i32_0 : i32, i32
  }
  func.func @transform_2(%arg0: i32) -> (i32, i32) {
    %c0_i32 = arith.constant 0 : i32
    %c0_i32_0 = arith.constant 0 : i32
    return %arg0, %c0_i32 : i32, i32
  }
  func.func @transform_3(%arg0: i32) -> (i32, i32, i32) {
    %c0_i32 = arith.constant 0 : i32
    %c0_i32_0 = arith.constant 0 : i32
    %c0_i32_1 = arith.constant 0 : i32
    return %arg0, %c0_i32, %c0_i32_0 : i32, i32, i32
  }
  func.func @transform_4(%arg0: i32) -> (i32, i32, i32) {
    %c0_i32 = arith.constant 0 : i32
    %c0_i32_0 = arith.constant 0 : i32
    %c0_i32_1 = arith.constant 0 : i32
    return %arg0, %c0_i32, %c0_i32_0 : i32, i32, i32
  }
}

module attributes {stable_mosaic.version = 11 : i64} {
  func.func @bn_relu_kernel(%arg0: i32, %arg1: memref<32x128xf32, #tpu.memory_space<vmem>>, %arg2: memref<1x128xf32, #tpu.memory_space<vmem>>, %arg3: memref<1x128xf32, #tpu.memory_space<vmem>>, %arg4: memref<32x128xbf16, #tpu.memory_space<vmem>>) attributes {dimension_semantics = [#tpu.dimension_semantics<parallel>], iteration_bounds = array<i64: 1>, scalar_prefetch = 0 : i64, scratch_operands = 0 : i64, tpu.core_type = #tpu.core_type<tc>, window_params = [{transform_indices = @transform_0, window_bounds = array<i64: 32, 128>}, {pipeline_mode = #tpu.pipeline_mode<synchronous>, transform_indices = @transform_1, window_bounds = array<i64: 1, 128>}, {pipeline_mode = #tpu.pipeline_mode<synchronous>, transform_indices = @transform_2, window_bounds = array<i64: 1, 128>}, {transform_indices = @transform_3, window_bounds = array<i64: 32, 128>}]} {
    %c0 = arith.constant 0 : index
    %c0_0 = arith.constant 0 : index
    %0 = vector.load %arg1[%c0, %c0_0] : memref<32x128xf32, #tpu.memory_space<vmem>>, vector<32x128xf32>
    %c0_1 = arith.constant 0 : index
    %c0_2 = arith.constant 0 : index
    %1 = vector.load %arg2[%c0_1, %c0_2] : memref<1x128xf32, #tpu.memory_space<vmem>>, vector<1x128xf32>
    %2 = vector.broadcast %1 : vector<1x128xf32> to vector<32x128xf32>
    %3 = arith.mulf %0, %2 : vector<32x128xf32>
    %c0_3 = arith.constant 0 : index
    %c0_4 = arith.constant 0 : index
    %4 = vector.load %arg3[%c0_3, %c0_4] : memref<1x128xf32, #tpu.memory_space<vmem>>, vector<1x128xf32>
    %5 = vector.broadcast %4 : vector<1x128xf32> to vector<32x128xf32>
    %6 = arith.addf %3, %5 : vector<32x128xf32>
    %cst = arith.constant 0.000000e+00 : f32
    %7 = vector.broadcast %cst : f32 to vector<32x128xf32>
    %8 = arith.maximumf %6, %7 : vector<32x128xf32>
    %9 = arith.truncf %8 : vector<32x128xf32> to vector<32x128xbf16>
    %c0_5 = arith.constant 0 : index
    %c0_6 = arith.constant 0 : index
    %10 = vector.load %arg4[%c0_5, %c0_6] : memref<32x128xbf16, #tpu.memory_space<vmem>>, vector<32x128xbf16>
    tpu.vector_store %arg4[%c0_5, %c0_6], %9 {strides = array<i32>} : memref<32x128xbf16, #tpu.memory_space<vmem>>, vector<32x128xbf16>,
    return
  }
  func.func @transform_0(%arg0: i32) -> (i32, i32) {
    %c0_i32 = arith.constant 0 : i32
    %c0_i32_0 = arith.constant 0 : i32
    return %arg0, %c0_i32 : i32, i32
  }
  func.func @transform_1(%arg0: i32) -> (i32, i32) {
    %c0_i32 = arith.constant 0 : i32
    %c0_i32_0 = arith.constant 0 : i32
    %c0_i32_1 = arith.constant 0 : i32
    return %c0_i32, %c0_i32_0 : i32, i32
  }
  func.func @transform_2(%arg0: i32) -> (i32, i32) {
    %c0_i32 = arith.constant 0 : i32
    %c0_i32_0 = arith.constant 0 : i32
    %c0_i32_1 = arith.constant 0 : i32
    return %c0_i32, %c0_i32_0 : i32, i32
  }
  func.func @transform_3(%arg0: i32) -> (i32, i32) {
    %c0_i32 = arith.constant 0 : i32
    %c0_i32_0 = arith.constant 0 : i32
    return %arg0, %c0_i32 : i32, i32
  }
}

module attributes {stable_mosaic.version = 11 : i64} {
  func.func @conv_stats_kernel(%arg0: i32, %arg1: memref<32x1152xbf16, #tpu.memory_space<vmem>>, %arg2: memref<1152x128xbf16, #tpu.memory_space<vmem>>, %arg3: memref<32x128xf32, #tpu.memory_space<vmem>>, %arg4: memref<1x1x128xf32, #tpu.memory_space<vmem>>, %arg5: memref<1x1x128xf32, #tpu.memory_space<vmem>>) attributes {dimension_semantics = [#tpu.dimension_semantics<parallel>], iteration_bounds = array<i64: 1>, scalar_prefetch = 0 : i64, scratch_operands = 0 : i64, tpu.core_type = #tpu.core_type<tc>, window_params = [{transform_indices = @transform_0, window_bounds = array<i64: 32, 1152>}, {pipeline_mode = #tpu.pipeline_mode<synchronous>, transform_indices = @transform_1, window_bounds = array<i64: 1152, 128>}, {transform_indices = @transform_2, window_bounds = array<i64: 32, 128>}, {transform_indices = @transform_3, window_bounds = array<i64: 1, 1, 128>}, {transform_indices = @transform_4, window_bounds = array<i64: 1, 1, 128>}]} {
    %c0 = arith.constant 0 : index
    %c0_0 = arith.constant 0 : index
    %0 = vector.load %arg1[%c0, %c0_0] : memref<32x1152xbf16, #tpu.memory_space<vmem>>, vector<32x1152xbf16>
    %c0_1 = arith.constant 0 : index
    %c0_2 = arith.constant 0 : index
    %1 = vector.load %arg2[%c0_1, %c0_2] : memref<1152x128xbf16, #tpu.memory_space<vmem>>, vector<1152x128xbf16>
    %cst = arith.constant dense<0.000000e+00> : vector<32x128xf32>
    %2 = tpu.matmul %0, %1, %cst {dimension_numbers = #tpu.dot_dimension_numbers<[1], [0], [0], [1], [0, 0, 1, 1], [], []>} : vector<32x1152xbf16>, vector<1152x128xbf16>, vector<32x128xf32> -> vector<32x128xf32>
    %c0_3 = arith.constant 0 : index
    %c0_4 = arith.constant 0 : index
    %3 = vector.load %arg3[%c0_3, %c0_4] : memref<32x128xf32, #tpu.memory_space<vmem>>, vector<32x128xf32>
    tpu.vector_store %arg3[%c0_3, %c0_4], %2 {strides = array<i32>} : memref<32x128xf32, #tpu.memory_space<vmem>>, vector<32x128xf32>,
    %cst_5 = arith.constant dense<0.000000e+00> : vector<128xf32>
    %4 = vector.multi_reduction <add>, %2, %cst_5 [0] : vector<32x128xf32> to vector<128xf32>
    %5 = vector.shape_cast %4 : vector<128xf32> to vector<1x128xf32>
    %6 = arith.mulf %2, %2 : vector<32x128xf32>
    %cst_6 = arith.constant dense<0.000000e+00> : vector<128xf32>
    %7 = vector.multi_reduction <add>, %6, %cst_6 [0] : vector<32x128xf32> to vector<128xf32>
    %8 = vector.shape_cast %7 : vector<128xf32> to vector<1x128xf32>
    %9 = vector.shape_cast %5 : vector<1x128xf32> to vector<1x1x128xf32>
    %c0_7 = arith.constant 0 : index
    %c0_8 = arith.constant 0 : index
    %c0_9 = arith.constant 0 : index
    %10 = vector.load %arg4[%c0_7, %c0_8, %c0_9] : memref<1x1x128xf32, #tpu.memory_space<vmem>>, vector<1x1x128xf32>
    tpu.vector_store %arg4[%c0_7, %c0_8, %c0_9], %9 {strides = array<i32>} : memref<1x1x128xf32, #tpu.memory_space<vmem>>, vector<1x1x128xf32>,
    %11 = vector.shape_cast %8 : vector<1x128xf32> to vector<1x1x128xf32>
    %c0_10 = arith.constant 0 : index
    %c0_11 = arith.constant 0 : index
    %c0_12 = arith.constant 0 : index
    %12 = vector.load %arg5[%c0_10, %c0_11, %c0_12] : memref<1x1x128xf32, #tpu.memory_space<vmem>>, vector<1x1x128xf32>
    tpu.vector_store %arg5[%c0_10, %c0_11, %c0_12], %11 {strides = array<i32>} : memref<1x1x128xf32, #tpu.memory_space<vmem>>, vector<1x1x128xf32>,
    return
  }
  func.func @transform_0(%arg0: i32) -> (i32, i32) {
    %c0_i32 = arith.constant 0 : i32
    %c0_i32_0 = arith.constant 0 : i32
    return %arg0, %c0_i32 : i32, i32
  }
  func.func @transform_1(%arg0: i32) -> (i32, i32) {
    %c0_i32 = arith.constant 0 : i32
    %c0_i32_0 = arith.constant 0 : i32
    %c0_i32_1 = arith.constant 0 : i32
    return %c0_i32, %c0_i32_0 : i32, i32
  }
  func.func @transform_2(%arg0: i32) -> (i32, i32) {
    %c0_i32 = arith.constant 0 : i32
    %c0_i32_0 = arith.constant 0 : i32
    return %arg0, %c0_i32 : i32, i32
  }
  func.func @transform_3(%arg0: i32) -> (i32, i32, i32) {
    %c0_i32 = arith.constant 0 : i32
    %c0_i32_0 = arith.constant 0 : i32
    %c0_i32_1 = arith.constant 0 : i32
    return %arg0, %c0_i32, %c0_i32_0 : i32, i32, i32
  }
  func.func @transform_4(%arg0: i32) -> (i32, i32, i32) {
    %c0_i32 = arith.constant 0 : i32
    %c0_i32_0 = arith.constant 0 : i32
    %c0_i32_1 = arith.constant 0 : i32
    return %arg0, %c0_i32, %c0_i32_0 : i32, i32, i32
  }
}

module attributes {stable_mosaic.version = 11 : i64} {
  func.func @conv_stats_kernel(%arg0: i32, %arg1: memref<8x1152xbf16, #tpu.memory_space<vmem>>, %arg2: memref<1152x128xbf16, #tpu.memory_space<vmem>>, %arg3: memref<8x128xf32, #tpu.memory_space<vmem>>, %arg4: memref<1x1x128xf32, #tpu.memory_space<vmem>>, %arg5: memref<1x1x128xf32, #tpu.memory_space<vmem>>) attributes {dimension_semantics = [#tpu.dimension_semantics<parallel>], iteration_bounds = array<i64: 1>, scalar_prefetch = 0 : i64, scratch_operands = 0 : i64, tpu.core_type = #tpu.core_type<tc>, window_params = [{transform_indices = @transform_0, window_bounds = array<i64: 8, 1152>}, {pipeline_mode = #tpu.pipeline_mode<synchronous>, transform_indices = @transform_1, window_bounds = array<i64: 1152, 128>}, {transform_indices = @transform_2, window_bounds = array<i64: 8, 128>}, {transform_indices = @transform_3, window_bounds = array<i64: 1, 1, 128>}, {transform_indices = @transform_4, window_bounds = array<i64: 1, 1, 128>}]} {
    %c0 = arith.constant 0 : index
    %c0_0 = arith.constant 0 : index
    %0 = vector.load %arg1[%c0, %c0_0] : memref<8x1152xbf16, #tpu.memory_space<vmem>>, vector<8x1152xbf16>
    %c0_1 = arith.constant 0 : index
    %c0_2 = arith.constant 0 : index
    %1 = vector.load %arg2[%c0_1, %c0_2] : memref<1152x128xbf16, #tpu.memory_space<vmem>>, vector<1152x128xbf16>
    %cst = arith.constant dense<0.000000e+00> : vector<8x128xf32>
    %2 = tpu.matmul %0, %1, %cst {dimension_numbers = #tpu.dot_dimension_numbers<[1], [0], [0], [1], [0, 0, 1, 1], [], []>} : vector<8x1152xbf16>, vector<1152x128xbf16>, vector<8x128xf32> -> vector<8x128xf32>
    %c0_3 = arith.constant 0 : index
    %c0_4 = arith.constant 0 : index
    %3 = vector.load %arg3[%c0_3, %c0_4] : memref<8x128xf32, #tpu.memory_space<vmem>>, vector<8x128xf32>
    tpu.vector_store %arg3[%c0_3, %c0_4], %2 {strides = array<i32>} : memref<8x128xf32, #tpu.memory_space<vmem>>, vector<8x128xf32>,
    %cst_5 = arith.constant dense<0.000000e+00> : vector<128xf32>
    %4 = vector.multi_reduction <add>, %2, %cst_5 [0] : vector<8x128xf32> to vector<128xf32>
    %5 = vector.shape_cast %4 : vector<128xf32> to vector<1x128xf32>
    %6 = arith.mulf %2, %2 : vector<8x128xf32>
    %cst_6 = arith.constant dense<0.000000e+00> : vector<128xf32>
    %7 = vector.multi_reduction <add>, %6, %cst_6 [0] : vector<8x128xf32> to vector<128xf32>
    %8 = vector.shape_cast %7 : vector<128xf32> to vector<1x128xf32>
    %9 = vector.shape_cast %5 : vector<1x128xf32> to vector<1x1x128xf32>
    %c0_7 = arith.constant 0 : index
    %c0_8 = arith.constant 0 : index
    %c0_9 = arith.constant 0 : index
    %10 = vector.load %arg4[%c0_7, %c0_8, %c0_9] : memref<1x1x128xf32, #tpu.memory_space<vmem>>, vector<1x1x128xf32>
    tpu.vector_store %arg4[%c0_7, %c0_8, %c0_9], %9 {strides = array<i32>} : memref<1x1x128xf32, #tpu.memory_space<vmem>>, vector<1x1x128xf32>,
    %11 = vector.shape_cast %8 : vector<1x128xf32> to vector<1x1x128xf32>
    %c0_10 = arith.constant 0 : index
    %c0_11 = arith.constant 0 : index
    %c0_12 = arith.constant 0 : index
    %12 = vector.load %arg5[%c0_10, %c0_11, %c0_12] : memref<1x1x128xf32, #tpu.memory_space<vmem>>, vector<1x1x128xf32>
    tpu.vector_store %arg5[%c0_10, %c0_11, %c0_12], %11 {strides = array<i32>} : memref<1x1x128xf32, #tpu.memory_space<vmem>>, vector<1x1x128xf32>,
    return
  }
  func.func @transform_0(%arg0: i32) -> (i32, i32) {
    %c0_i32 = arith.constant 0 : i32
    %c0_i32_0 = arith.constant 0 : i32
    return %arg0, %c0_i32 : i32, i32
  }
  func.func @transform_1(%arg0: i32) -> (i32, i32) {
    %c0_i32 = arith.constant 0 : i32
    %c0_i32_0 = arith.constant 0 : i32
    %c0_i32_1 = arith.constant 0 : i32
    return %c0_i32, %c0_i32_0 : i32, i32
  }
  func.func @transform_2(%arg0: i32) -> (i32, i32) {
    %c0_i32 = arith.constant 0 : i32
    %c0_i32_0 = arith.constant 0 : i32
    return %arg0, %c0_i32 : i32, i32
  }
  func.func @transform_3(%arg0: i32) -> (i32, i32, i32) {
    %c0_i32 = arith.constant 0 : i32
    %c0_i32_0 = arith.constant 0 : i32
    %c0_i32_1 = arith.constant 0 : i32
    return %arg0, %c0_i32, %c0_i32_0 : i32, i32, i32
  }
  func.func @transform_4(%arg0: i32) -> (i32, i32, i32) {
    %c0_i32 = arith.constant 0 : i32
    %c0_i32_0 = arith.constant 0 : i32
    %c0_i32_1 = arith.constant 0 : i32
    return %arg0, %c0_i32, %c0_i32_0 : i32, i32, i32
  }
}

module attributes {stable_mosaic.version = 11 : i64} {
  func.func @bn_relu_kernel(%arg0: i32, %arg1: memref<8x128xf32, #tpu.memory_space<vmem>>, %arg2: memref<1x128xf32, #tpu.memory_space<vmem>>, %arg3: memref<1x128xf32, #tpu.memory_space<vmem>>, %arg4: memref<8x128xbf16, #tpu.memory_space<vmem>>) attributes {dimension_semantics = [#tpu.dimension_semantics<parallel>], iteration_bounds = array<i64: 1>, scalar_prefetch = 0 : i64, scratch_operands = 0 : i64, tpu.core_type = #tpu.core_type<tc>, window_params = [{transform_indices = @transform_0, window_bounds = array<i64: 8, 128>}, {pipeline_mode = #tpu.pipeline_mode<synchronous>, transform_indices = @transform_1, window_bounds = array<i64: 1, 128>}, {pipeline_mode = #tpu.pipeline_mode<synchronous>, transform_indices = @transform_2, window_bounds = array<i64: 1, 128>}, {transform_indices = @transform_3, window_bounds = array<i64: 8, 128>}]} {
    %c0 = arith.constant 0 : index
    %c0_0 = arith.constant 0 : index
    %0 = vector.load %arg1[%c0, %c0_0] : memref<8x128xf32, #tpu.memory_space<vmem>>, vector<8x128xf32>
    %c0_1 = arith.constant 0 : index
    %c0_2 = arith.constant 0 : index
    %1 = vector.load %arg2[%c0_1, %c0_2] : memref<1x128xf32, #tpu.memory_space<vmem>>, vector<1x128xf32>
    %2 = vector.broadcast %1 : vector<1x128xf32> to vector<8x128xf32>
    %3 = arith.mulf %0, %2 : vector<8x128xf32>
    %c0_3 = arith.constant 0 : index
    %c0_4 = arith.constant 0 : index
    %4 = vector.load %arg3[%c0_3, %c0_4] : memref<1x128xf32, #tpu.memory_space<vmem>>, vector<1x128xf32>
    %5 = vector.broadcast %4 : vector<1x128xf32> to vector<8x128xf32>
    %6 = arith.addf %3, %5 : vector<8x128xf32>
    %cst = arith.constant 0.000000e+00 : f32
    %7 = vector.broadcast %cst : f32 to vector<8x128xf32>
    %8 = arith.maximumf %6, %7 : vector<8x128xf32>
    %9 = arith.truncf %8 : vector<8x128xf32> to vector<8x128xbf16>
    %c0_5 = arith.constant 0 : index
    %c0_6 = arith.constant 0 : index
    %10 = vector.load %arg4[%c0_5, %c0_6] : memref<8x128xbf16, #tpu.memory_space<vmem>>, vector<8x128xbf16>
    tpu.vector_store %arg4[%c0_5, %c0_6], %9 {strides = array<i32>} : memref<8x128xbf16, #tpu.memory_space<vmem>>, vector<8x128xbf16>,
    return
  }
  func.func @transform_0(%arg0: i32) -> (i32, i32) {
    %c0_i32 = arith.constant 0 : i32
    %c0_i32_0 = arith.constant 0 : i32
    return %arg0, %c0_i32 : i32, i32
  }
  func.func @transform_1(%arg0: i32) -> (i32, i32) {
    %c0_i32 = arith.constant 0 : i32
    %c0_i32_0 = arith.constant 0 : i32
    %c0_i32_1 = arith.constant 0 : i32
    return %c0_i32, %c0_i32_0 : i32, i32
  }
  func.func @transform_2(%arg0: i32) -> (i32, i32) {
    %c0_i32 = arith.constant 0 : i32
    %c0_i32_0 = arith.constant 0 : i32
    %c0_i32_1 = arith.constant 0 : i32
    return %c0_i32, %c0_i32_0 : i32, i32
  }
  func.func @transform_3(%arg0: i32) -> (i32, i32) {
    %c0_i32 = arith.constant 0 : i32
    %c0_i32_0 = arith.constant 0 : i32
    return %arg0, %c0_i32 : i32, i32
  }
}

module attributes {stable_mosaic.version = 11 : i64} {
  func.func @conv_stats_kernel(%arg0: i32, %arg1: memref<8x1152xbf16, #tpu.memory_space<vmem>>, %arg2: memref<1152x256xbf16, #tpu.memory_space<vmem>>, %arg3: memref<8x256xf32, #tpu.memory_space<vmem>>, %arg4: memref<1x1x256xf32, #tpu.memory_space<vmem>>, %arg5: memref<1x1x256xf32, #tpu.memory_space<vmem>>) attributes {dimension_semantics = [#tpu.dimension_semantics<parallel>], iteration_bounds = array<i64: 1>, scalar_prefetch = 0 : i64, scratch_operands = 0 : i64, tpu.core_type = #tpu.core_type<tc>, window_params = [{transform_indices = @transform_0, window_bounds = array<i64: 8, 1152>}, {pipeline_mode = #tpu.pipeline_mode<synchronous>, transform_indices = @transform_1, window_bounds = array<i64: 1152, 256>}, {transform_indices = @transform_2, window_bounds = array<i64: 8, 256>}, {transform_indices = @transform_3, window_bounds = array<i64: 1, 1, 256>}, {transform_indices = @transform_4, window_bounds = array<i64: 1, 1, 256>}]} {
    %c0 = arith.constant 0 : index
    %c0_0 = arith.constant 0 : index
    %0 = vector.load %arg1[%c0, %c0_0] : memref<8x1152xbf16, #tpu.memory_space<vmem>>, vector<8x1152xbf16>
    %c0_1 = arith.constant 0 : index
    %c0_2 = arith.constant 0 : index
    %1 = vector.load %arg2[%c0_1, %c0_2] : memref<1152x256xbf16, #tpu.memory_space<vmem>>, vector<1152x256xbf16>
    %cst = arith.constant dense<0.000000e+00> : vector<8x256xf32>
    %2 = tpu.matmul %0, %1, %cst {dimension_numbers = #tpu.dot_dimension_numbers<[1], [0], [0], [1], [0, 0, 1, 1], [], []>} : vector<8x1152xbf16>, vector<1152x256xbf16>, vector<8x256xf32> -> vector<8x256xf32>
    %c0_3 = arith.constant 0 : index
    %c0_4 = arith.constant 0 : index
    %3 = vector.load %arg3[%c0_3, %c0_4] : memref<8x256xf32, #tpu.memory_space<vmem>>, vector<8x256xf32>
    tpu.vector_store %arg3[%c0_3, %c0_4], %2 {strides = array<i32>} : memref<8x256xf32, #tpu.memory_space<vmem>>, vector<8x256xf32>,
    %cst_5 = arith.constant dense<0.000000e+00> : vector<256xf32>
    %4 = vector.multi_reduction <add>, %2, %cst_5 [0] : vector<8x256xf32> to vector<256xf32>
    %5 = vector.shape_cast %4 : vector<256xf32> to vector<1x256xf32>
    %6 = arith.mulf %2, %2 : vector<8x256xf32>
    %cst_6 = arith.constant dense<0.000000e+00> : vector<256xf32>
    %7 = vector.multi_reduction <add>, %6, %cst_6 [0] : vector<8x256xf32> to vector<256xf32>
    %8 = vector.shape_cast %7 : vector<256xf32> to vector<1x256xf32>
    %9 = vector.shape_cast %5 : vector<1x256xf32> to vector<1x1x256xf32>
    %c0_7 = arith.constant 0 : index
    %c0_8 = arith.constant 0 : index
    %c0_9 = arith.constant 0 : index
    %10 = vector.load %arg4[%c0_7, %c0_8, %c0_9] : memref<1x1x256xf32, #tpu.memory_space<vmem>>, vector<1x1x256xf32>
    tpu.vector_store %arg4[%c0_7, %c0_8, %c0_9], %9 {strides = array<i32>} : memref<1x1x256xf32, #tpu.memory_space<vmem>>, vector<1x1x256xf32>,
    %11 = vector.shape_cast %8 : vector<1x256xf32> to vector<1x1x256xf32>
    %c0_10 = arith.constant 0 : index
    %c0_11 = arith.constant 0 : index
    %c0_12 = arith.constant 0 : index
    %12 = vector.load %arg5[%c0_10, %c0_11, %c0_12] : memref<1x1x256xf32, #tpu.memory_space<vmem>>, vector<1x1x256xf32>
    tpu.vector_store %arg5[%c0_10, %c0_11, %c0_12], %11 {strides = array<i32>} : memref<1x1x256xf32, #tpu.memory_space<vmem>>, vector<1x1x256xf32>,
    return
  }
  func.func @transform_0(%arg0: i32) -> (i32, i32) {
    %c0_i32 = arith.constant 0 : i32
    %c0_i32_0 = arith.constant 0 : i32
    return %arg0, %c0_i32 : i32, i32
  }
  func.func @transform_1(%arg0: i32) -> (i32, i32) {
    %c0_i32 = arith.constant 0 : i32
    %c0_i32_0 = arith.constant 0 : i32
    %c0_i32_1 = arith.constant 0 : i32
    return %c0_i32, %c0_i32_0 : i32, i32
  }
  func.func @transform_2(%arg0: i32) -> (i32, i32) {
    %c0_i32 = arith.constant 0 : i32
    %c0_i32_0 = arith.constant 0 : i32
    return %arg0, %c0_i32 : i32, i32
  }
  func.func @transform_3(%arg0: i32) -> (i32, i32, i32) {
    %c0_i32 = arith.constant 0 : i32
    %c0_i32_0 = arith.constant 0 : i32
    %c0_i32_1 = arith.constant 0 : i32
    return %arg0, %c0_i32, %c0_i32_0 : i32, i32, i32
  }
  func.func @transform_4(%arg0: i32) -> (i32, i32, i32) {
    %c0_i32 = arith.constant 0 : i32
    %c0_i32_0 = arith.constant 0 : i32
    %c0_i32_1 = arith.constant 0 : i32
    return %arg0, %c0_i32, %c0_i32_0 : i32, i32, i32
  }
}

module attributes {stable_mosaic.version = 11 : i64} {
  func.func @bn_relu_kernel(%arg0: i32, %arg1: memref<8x256xf32, #tpu.memory_space<vmem>>, %arg2: memref<1x256xf32, #tpu.memory_space<vmem>>, %arg3: memref<1x256xf32, #tpu.memory_space<vmem>>, %arg4: memref<8x256xbf16, #tpu.memory_space<vmem>>) attributes {dimension_semantics = [#tpu.dimension_semantics<parallel>], iteration_bounds = array<i64: 1>, scalar_prefetch = 0 : i64, scratch_operands = 0 : i64, tpu.core_type = #tpu.core_type<tc>, window_params = [{transform_indices = @transform_0, window_bounds = array<i64: 8, 256>}, {pipeline_mode = #tpu.pipeline_mode<synchronous>, transform_indices = @transform_1, window_bounds = array<i64: 1, 256>}, {pipeline_mode = #tpu.pipeline_mode<synchronous>, transform_indices = @transform_2, window_bounds = array<i64: 1, 256>}, {transform_indices = @transform_3, window_bounds = array<i64: 8, 256>}]} {
    %c0 = arith.constant 0 : index
    %c0_0 = arith.constant 0 : index
    %0 = vector.load %arg1[%c0, %c0_0] : memref<8x256xf32, #tpu.memory_space<vmem>>, vector<8x256xf32>
    %c0_1 = arith.constant 0 : index
    %c0_2 = arith.constant 0 : index
    %1 = vector.load %arg2[%c0_1, %c0_2] : memref<1x256xf32, #tpu.memory_space<vmem>>, vector<1x256xf32>
    %2 = vector.broadcast %1 : vector<1x256xf32> to vector<8x256xf32>
    %3 = arith.mulf %0, %2 : vector<8x256xf32>
    %c0_3 = arith.constant 0 : index
    %c0_4 = arith.constant 0 : index
    %4 = vector.load %arg3[%c0_3, %c0_4] : memref<1x256xf32, #tpu.memory_space<vmem>>, vector<1x256xf32>
    %5 = vector.broadcast %4 : vector<1x256xf32> to vector<8x256xf32>
    %6 = arith.addf %3, %5 : vector<8x256xf32>
    %cst = arith.constant 0.000000e+00 : f32
    %7 = vector.broadcast %cst : f32 to vector<8x256xf32>
    %8 = arith.maximumf %6, %7 : vector<8x256xf32>
    %9 = arith.truncf %8 : vector<8x256xf32> to vector<8x256xbf16>
    %c0_5 = arith.constant 0 : index
    %c0_6 = arith.constant 0 : index
    %10 = vector.load %arg4[%c0_5, %c0_6] : memref<8x256xbf16, #tpu.memory_space<vmem>>, vector<8x256xbf16>
    tpu.vector_store %arg4[%c0_5, %c0_6], %9 {strides = array<i32>} : memref<8x256xbf16, #tpu.memory_space<vmem>>, vector<8x256xbf16>,
    return
  }
  func.func @transform_0(%arg0: i32) -> (i32, i32) {
    %c0_i32 = arith.constant 0 : i32
    %c0_i32_0 = arith.constant 0 : i32
    return %arg0, %c0_i32 : i32, i32
  }
  func.func @transform_1(%arg0: i32) -> (i32, i32) {
    %c0_i32 = arith.constant 0 : i32
    %c0_i32_0 = arith.constant 0 : i32
    %c0_i32_1 = arith.constant 0 : i32
    return %c0_i32, %c0_i32_0 : i32, i32
  }
  func.func @transform_2(%arg0: i32) -> (i32, i32) {
    %c0_i32 = arith.constant 0 : i32
    %c0_i32_0 = arith.constant 0 : i32
    %c0_i32_1 = arith.constant 0 : i32
    return %c0_i32, %c0_i32_0 : i32, i32
  }
  func.func @transform_3(%arg0: i32) -> (i32, i32) {
    %c0_i32 = arith.constant 0 : i32
    %c0_i32_0 = arith.constant 0 : i32
    return %arg0, %c0_i32 : i32, i32
  }
}

module attributes {stable_mosaic.version = 11 : i64} {
  func.func @head_kernel(%arg0: i32, %arg1: memref<8x256xbf16, #tpu.memory_space<vmem>>, %arg2: memref<256x128xbf16, #tpu.memory_space<vmem>>, %arg3: memref<1x128xf32, #tpu.memory_space<vmem>>, %arg4: memref<8x128xf32, #tpu.memory_space<vmem>>) attributes {dimension_semantics = [#tpu.dimension_semantics<parallel>], iteration_bounds = array<i64: 1>, scalar_prefetch = 0 : i64, scratch_operands = 0 : i64, tpu.core_type = #tpu.core_type<tc>, window_params = [{transform_indices = @transform_0, window_bounds = array<i64: 8, 256>}, {pipeline_mode = #tpu.pipeline_mode<synchronous>, transform_indices = @transform_1, window_bounds = array<i64: 256, 128>}, {pipeline_mode = #tpu.pipeline_mode<synchronous>, transform_indices = @transform_2, window_bounds = array<i64: 1, 128>}, {transform_indices = @transform_3, window_bounds = array<i64: 8, 128>}]} {
    %c0 = arith.constant 0 : index
    %c0_0 = arith.constant 0 : index
    %0 = vector.load %arg1[%c0, %c0_0] : memref<8x256xbf16, #tpu.memory_space<vmem>>, vector<8x256xbf16>
    %c0_1 = arith.constant 0 : index
    %c0_2 = arith.constant 0 : index
    %1 = vector.load %arg2[%c0_1, %c0_2] : memref<256x128xbf16, #tpu.memory_space<vmem>>, vector<256x128xbf16>
    %cst = arith.constant dense<0.000000e+00> : vector<8x128xf32>
    %2 = tpu.matmul %0, %1, %cst {dimension_numbers = #tpu.dot_dimension_numbers<[1], [0], [0], [1], [0, 0, 1, 1], [], []>} : vector<8x256xbf16>, vector<256x128xbf16>, vector<8x128xf32> -> vector<8x128xf32>
    %c0_3 = arith.constant 0 : index
    %c0_4 = arith.constant 0 : index
    %3 = vector.load %arg3[%c0_3, %c0_4] : memref<1x128xf32, #tpu.memory_space<vmem>>, vector<1x128xf32>
    %4 = vector.broadcast %3 : vector<1x128xf32> to vector<8x128xf32>
    %5 = arith.addf %2, %4 : vector<8x128xf32>
    %c0_5 = arith.constant 0 : index
    %c0_6 = arith.constant 0 : index
    %6 = vector.load %arg4[%c0_5, %c0_6] : memref<8x128xf32, #tpu.memory_space<vmem>>, vector<8x128xf32>
    tpu.vector_store %arg4[%c0_5, %c0_6], %5 {strides = array<i32>} : memref<8x128xf32, #tpu.memory_space<vmem>>, vector<8x128xf32>,
    return
  }
  func.func @transform_0(%arg0: i32) -> (i32, i32) {
    %c0_i32 = arith.constant 0 : i32
    %c0_i32_0 = arith.constant 0 : i32
    return %arg0, %c0_i32 : i32, i32
  }
  func.func @transform_1(%arg0: i32) -> (i32, i32) {
    %c0_i32 = arith.constant 0 : i32
    %c0_i32_0 = arith.constant 0 : i32
    %c0_i32_1 = arith.constant 0 : i32
    return %c0_i32, %c0_i32_0 : i32, i32
  }
  func.func @transform_2(%arg0: i32) -> (i32, i32) {
    %c0_i32 = arith.constant 0 : i32
    %c0_i32_0 = arith.constant 0 : i32
    %c0_i32_1 = arith.constant 0 : i32
    return %c0_i32, %c0_i32_0 : i32, i32
  }
  func.func @transform_3(%arg0: i32) -> (i32, i32) {
    %c0_i32 = arith.constant 0 : i32
    %c0_i32_0 = arith.constant 0 : i32
    return %arg0, %c0_i32 : i32, i32
  }
}

module attributes {stable_mosaic.version = 11 : i64} {
  func.func @head_kernel(%arg0: i32, %arg1: memref<8x256xbf16, #tpu.memory_space<vmem>>, %arg2: memref<256x256xbf16, #tpu.memory_space<vmem>>, %arg3: memref<1x256xf32, #tpu.memory_space<vmem>>, %arg4: memref<8x256xf32, #tpu.memory_space<vmem>>) attributes {dimension_semantics = [#tpu.dimension_semantics<parallel>], iteration_bounds = array<i64: 1>, scalar_prefetch = 0 : i64, scratch_operands = 0 : i64, tpu.core_type = #tpu.core_type<tc>, window_params = [{transform_indices = @transform_0, window_bounds = array<i64: 8, 256>}, {pipeline_mode = #tpu.pipeline_mode<synchronous>, transform_indices = @transform_1, window_bounds = array<i64: 256, 256>}, {pipeline_mode = #tpu.pipeline_mode<synchronous>, transform_indices = @transform_2, window_bounds = array<i64: 1, 256>}, {transform_indices = @transform_3, window_bounds = array<i64: 8, 256>}]} {
    %c0 = arith.constant 0 : index
    %c0_0 = arith.constant 0 : index
    %0 = vector.load %arg1[%c0, %c0_0] : memref<8x256xbf16, #tpu.memory_space<vmem>>, vector<8x256xbf16>
    %c0_1 = arith.constant 0 : index
    %c0_2 = arith.constant 0 : index
    %1 = vector.load %arg2[%c0_1, %c0_2] : memref<256x256xbf16, #tpu.memory_space<vmem>>, vector<256x256xbf16>
    %cst = arith.constant dense<0.000000e+00> : vector<8x256xf32>
    %2 = tpu.matmul %0, %1, %cst {dimension_numbers = #tpu.dot_dimension_numbers<[1], [0], [0], [1], [0, 0, 1, 1], [], []>} : vector<8x256xbf16>, vector<256x256xbf16>, vector<8x256xf32> -> vector<8x256xf32>
    %c0_3 = arith.constant 0 : index
    %c0_4 = arith.constant 0 : index
    %3 = vector.load %arg3[%c0_3, %c0_4] : memref<1x256xf32, #tpu.memory_space<vmem>>, vector<1x256xf32>
    %4 = vector.broadcast %3 : vector<1x256xf32> to vector<8x256xf32>
    %5 = arith.addf %2, %4 : vector<8x256xf32>
    %6 = arith.mulf %5, %5 : vector<8x256xf32>
    %cst_5 = arith.constant dense<0.000000e+00> : vector<8xf32>
    %7 = vector.multi_reduction <add>, %6, %cst_5 [1] : vector<8x256xf32> to vector<8xf32>
    %8 = vector.shape_cast %7 : vector<8xf32> to vector<8x1xf32>
    %9 = math.rsqrt %8 : vector<8x1xf32>
    %10 = vector.broadcast %9 : vector<8x1xf32> to vector<8x256xf32>
    %11 = arith.mulf %5, %10 : vector<8x256xf32>
    %c0_6 = arith.constant 0 : index
    %c0_7 = arith.constant 0 : index
    %12 = vector.load %arg4[%c0_6, %c0_7] : memref<8x256xf32, #tpu.memory_space<vmem>>, vector<8x256xf32>
    tpu.vector_store %arg4[%c0_6, %c0_7], %11 {strides = array<i32>} : memref<8x256xf32, #tpu.memory_space<vmem>>, vector<8x256xf32>,
    return
  }
  func.func @transform_0(%arg0: i32) -> (i32, i32) {
    %c0_i32 = arith.constant 0 : i32
    %c0_i32_0 = arith.constant 0 : i32
    return %arg0, %c0_i32 : i32, i32
  }
  func.func @transform_1(%arg0: i32) -> (i32, i32) {
    %c0_i32 = arith.constant 0 : i32
    %c0_i32_0 = arith.constant 0 : i32
    %c0_i32_1 = arith.constant 0 : i32
    return %c0_i32, %c0_i32_0 : i32, i32
  }
  func.func @transform_2(%arg0: i32) -> (i32, i32) {
    %c0_i32 = arith.constant 0 : i32
    %c0_i32_0 = arith.constant 0 : i32
    %c0_i32_1 = arith.constant 0 : i32
    return %c0_i32, %c0_i32_0 : i32, i32
  }
  func.func @transform_3(%arg0: i32) -> (i32, i32) {
    %c0_i32 = arith.constant 0 : i32
    %c0_i32_0 = arith.constant 0 : i32
    return %arg0, %c0_i32 : i32, i32
  }
}

</mosaic_0001>

<bundles_post_ra>
// kernel: _lambda_.23
= control target key start
LH: loop header
LB: loop body
LE: loop exit
PB: predicated region body
PF: predicated region fallthrough
CT: control target
= control target key end

     0   :  { %s480_s12 = smov 0   ;;  %s675_s0 = inlined_call_operand.vmem [shape: f32[512,64], index: 0, kind: input, shape index: {}]   ;;  %s676_s1 = inlined_call_operand.vmem [shape: f32[1,64], index: 1, kind: input, shape index: {}]   ;;  %s677_s2 = inlined_call_operand.vmem [shape: f32[1,64], index: 2, kind: input, shape index: {}]   ;;  %s678_s3 = inlined_call_operand.vmem [shape: bf16[512,64], index: 3, kind: output, shape index: {}]  }
   0x1 LB: > { %s431_s13 = sadd.s32 4294967295, %s458_s12   ;;  %p435_p0 = scmp.ge.s32.totalorder %s458_s12, 1  ;;  %s458_s12 = sphi %s480_s12, %s13_s12  }
   0x2   : > { %p138_p1 = scmp.lt.s32.totalorder %s458_s12, 3 }
   0x4   : > { %p139_p2 = pnand %p435_p0, %p138_p1 }
   0x5   : > { %s436_s14 = sshll.u32 (!%p139_p2), %s431_s13, 5 }
   0x6   : > { %142 = sbr.rel (%p139_p2) target bundleno = 55 (0x37), region = 32  ;;  %p163_p3 = scmp.lt.s32.totalorder (!%p139_p2), %s436_s14, 63 }
   0xb   : > { %s680_s14 = smov (!%p163_p3, %s436_s14), 63  ;;  %v493_v0 = vld [vmem:[%s676_s1] ss:$0 sm:$0xff]  ;;  %vm342_vm0 = vcmask 519168  }
   0xc   : > { %s437_s17 = sshll.u32 %s680_s14, 3  ;;  %v504_v1 = vld [vmem:[%s677_s2] ss:$0 sm:$0xff]  ;;  %s439_s23 = sshll.u32 %s680_s14, 2 }
   0xd   : > { %s499_s20 = scalar_lea.vmem %s675_s0, %s437_s17  ;;  %s533_s26 = scalar_lea.vmem %s678_s3, %s439_s23 }
   0xe   : > { %v174_v2 = vld [vmem:[%s499_s20] sm:$0xff]  ;;  %v175_v3 = vld [vmem:[%s499_s20 + $0x8] sm:$0xff]  ;;  %v176_v4 = vld [vmem:[%s499_s20 + $0x10] sm:$0xff] }
   0xf   : > { %v210_v5 = vmul.f32 %v493_v0, %v174_v2  ;;  %v211_v6 = vmul.f32 %v493_v0, %v175_v3  ;;  %v212_v7 = vmul.f32 %v493_v0, %v176_v4  ;;  %v177_v8 = vld [vmem:[%s499_s20 + $0x18] sm:$0xff]  ;;  %v178_v9 = vld [vmem:[%s499_s20 + $0x20] sm:$0xff]  ;;  %v179_v10 = vld [vmem:[%s499_s20 + $0x28] sm:$0xff] }
  0x10   : > { %v213_v11 = vmul.f32 %v493_v0, %v177_v8  ;;  %v214_v12 = vmul.f32 %v493_v0, %v178_v9  ;;  %v215_v13 = vmul.f32 %v493_v0, %v179_v10  ;;  %v180_v14 = vld [vmem:[%s499_s20 + $0x30] sm:$0xff]  ;;  %v181_v15 = vld [vmem:[%s499_s20 + $0x38] sm:$0xff]  ;;  %v182_v32 = vld [vmem:[%s499_s20 + $0x40] sm:$0xff] }
  0x11   : > { %v246_v16 = vadd.f32 %v504_v1, %v210_v5  ;;  %v247_v17 = vadd.f32 %v504_v1, %v211_v6  ;;  %v248_v18 = vadd.f32 %v504_v1, %v212_v7  ;;  %v216_v19 = vmul.f32 %v493_v0, %v180_v14  ;;  %v183_v33 = vld [vmem:[%s499_s20 + $0x48] sm:$0xff]  ;;  %v184_v34 = vld [vmem:[%s499_s20 + $0x50] sm:$0xff]  ;;  %v185_v39 = vld [vmem:[%s499_s20 + $0x58] sm:$0xff] }
  0x12   : > { %v249_v20 = vadd.f32 %v504_v1, %v213_v11  ;;  %v250_v21 = vadd.f32 %v504_v1, %v214_v12  ;;  %v251_v22 = vadd.f32 %v504_v1, %v215_v13  ;;  %v217_v23 = vmul.f32 %v493_v0, %v181_v15  ;;  %v186_v40 = vld [vmem:[%s499_s20 + $0x60] sm:$0xff]  ;;  %v187_v41 = vld [vmem:[%s499_s20 + $0x68] sm:$0xff]  ;;  %v188_v46 = vld [vmem:[%s499_s20 + $0x70] sm:$0xff] }
  0x13   : > { %v278_v24 = vmax.f32 %v246_v16, 0.0  ;;  %v279_v25 = vmax.f32 %v247_v17, 0.0  ;;  %v280_v26 = vmax.f32 %v248_v18, 0.0  ;;  %v252_v27 = vadd.f32 %v504_v1, %v216_v19  ;;  %v189_v51 = vld [vmem:[%s499_s20 + $0x78] sm:$0xff]  ;;  %v190_v2 = vld [vmem:[%s499_s20 + $0x80] sm:$0xff]  ;;  %v191_v7 = vld [vmem:[%s499_s20 + $0x88] sm:$0xff] }
  0x14   : > { %v281_v28 = vmax.f32 %v249_v20, 0.0  ;;  %v282_v29 = vmax.f32 %v250_v21, 0.0  ;;  %v283_v30 = vmax.f32 %v251_v22, 0.0  ;;  %v253_v31 = vadd.f32 %v504_v1, %v217_v23  ;;  %v192_v12 = vld [vmem:[%s499_s20 + $0x90] sm:$0xff]  ;;  %v193_v17 = vld [vmem:[%s499_s20 + $0x98] sm:$0xff]  ;;  %v194_v18 = vld [vmem:[%s499_s20 + $0xa0] sm:$0xff] }
  0x15   : > { %v310_v35 = vpack.c.bf16 %v278_v24, %v278_v24  ;;  %v311_v36 = vpack.c.bf16 %v279_v25, %v279_v25  ;;  %v312_v37 = vpack.c.bf16 %v280_v26, %v280_v26  ;;  %v284_v38 = vmax.f32 %v252_v27, 0.0  ;;  %v195_v19 = vld [vmem:[%s499_s20 + $0xa8] sm:$0xff]  ;;  %v196_v24 = vld [vmem:[%s499_s20 + $0xb0] sm:$0xff] }
  0x16   : > { %v313_v42 = vpack.c.bf16 %v281_v28, %v281_v28  ;;  %v314_v43 = vpack.c.bf16 %v282_v29, %v282_v29  ;;  %v315_v44 = vpack.c.bf16 %v283_v30, %v283_v30  ;;  %v285_v45 = vmax.f32 %v253_v31, 0.0  ;;  %v197_v29 = vld [vmem:[%s499_s20 + $0xb8] sm:$0xff] }
  0x17   : > { %343 = vst.msk [vmem:[%s533_s26] sm:$0xf] %vm342_vm0, %v310_v35  ;;  %v316_v47 = vpack.c.bf16 %v284_v38, %v284_v38  ;;  %v218_v48 = vmul.f32 %v493_v0, %v182_v32  ;;  %v219_v49 = vmul.f32 %v493_v0, %v183_v33  ;;  %v220_v50 = vmul.f32 %v493_v0, %v184_v34 }
  0x18   : > { %344 = vst.msk [vmem:[%s533_s26 + $0x4] sm:$0xf] %vm342_vm0, %v311_v36  ;;  %v317_v52 = vpack.c.bf16 %v285_v45, %v285_v45  ;;  %v221_v53 = vmul.f32 %v493_v0, %v185_v39  ;;  %v222_v54 = vmul.f32 %v493_v0, %v186_v40  ;;  %v223_v55 = vmul.f32 %v493_v0, %v187_v41 }
  0x19   : > { %345 = vst.msk [vmem:[%s533_s26 + $0x8] sm:$0xf] %vm342_vm0, %v312_v37  ;;  %v254_v56 = vadd.f32 %v504_v1, %v218_v48  ;;  %v255_v57 = vadd.f32 %v504_v1, %v219_v49  ;;  %v256_v58 = vadd.f32 %v504_v1, %v220_v50  ;;  %v224_v59 = vmul.f32 %v493_v0, %v188_v46 }
  0x1a   : > { %346 = vst.msk [vmem:[%s533_s26 + $0xc] sm:$0xf] %vm342_vm0, %v313_v42  ;;  %v257_v60 = vadd.f32 %v504_v1, %v221_v53  ;;  %v258_v61 = vadd.f32 %v504_v1, %v222_v54  ;;  %v259_v62 = vadd.f32 %v504_v1, %v223_v55  ;;  %v225_v63 = vmul.f32 %v493_v0, %v189_v51  ;;  %v198_v42 = vld [vmem:[%s499_s20 + $0xc0] sm:$0xff] }
  0x1b   : > { %347 = vst.msk [vmem:[%s533_s26 + $0x10] sm:$0xf] %vm342_vm0, %v314_v43  ;;  %v286_v3 = vmax.f32 %v254_v56, 0.0  ;;  %v287_v4 = vmax.f32 %v255_v57, 0.0  ;;  %v288_v5 = vmax.f32 %v256_v58, 0.0  ;;  %v260_v6 = vadd.f32 %v504_v1, %v224_v59  ;;  %v201_v57 = vld [vmem:[%s499_s20 + $0xd8] sm:$0xff] }
  0x1c   : > { %348 = vst.msk [vmem:[%s533_s26 + $0x14] sm:$0xf] %vm342_vm0, %v315_v44  ;;  %v289_v8 = vmax.f32 %v257_v60, 0.0  ;;  %v290_v9 = vmax.f32 %v258_v61, 0.0  ;;  %v291_v10 = vmax.f32 %v259_v62, 0.0  ;;  %v261_v11 = vadd.f32 %v504_v1, %v225_v63  ;;  %v202_v58 = vld [vmem:[%s499_s20 + $0xe0] sm:$0xff] }
  0x1d   : > { %349 = vst.msk [vmem:[%s533_s26 + $0x18] sm:$0xf] %vm342_vm0, %v316_v47  ;;  %v318_v13 = vpack.c.bf16 %v286_v3, %v286_v3  ;;  %v319_v14 = vpack.c.bf16 %v287_v4, %v287_v4  ;;  %v320_v15 = vpack.c.bf16 %v288_v5, %v288_v5  ;;  %v292_v16 = vmax.f32 %v260_v6, 0.0  ;;  %v199_v47 = vld [vmem:[%s499_s20 + $0xc8] sm:$0xff] }
  0x1e   : > { %350 = vst.msk [vmem:[%s533_s26 + $0x1c] sm:$0xf] %vm342_vm0, %v317_v52  ;;  %v321_v20 = vpack.c.bf16 %v289_v8, %v289_v8  ;;  %v322_v21 = vpack.c.bf16 %v290_v9, %v290_v9  ;;  %v323_v22 = vpack.c.bf16 %v291_v10, %v291_v10  ;;  %v293_v23 = vmax.f32 %v261_v11, 0.0  ;;  %v200_v52 = vld [vmem:[%s499_s20 + $0xd0] sm:$0xff]  ;;  %v203_v59 = vld [vmem:[%s499_s20 + $0xe8] sm:$0xff] }
  0x1f   : > { %351 = vst.msk [vmem:[%s533_s26 + $0x20] sm:$0xf] %vm342_vm0, %v318_v13  ;;  %v324_v25 = vpack.c.bf16 %v292_v16, %v292_v16  ;;  %v226_v26 = vmul.f32 %v493_v0, %v190_v2  ;;  %v227_v27 = vmul.f32 %v493_v0, %v191_v7  ;;  %v228_v28 = vmul.f32 %v493_v0, %v192_v12  ;;  %v204_v2 = vld [vmem:[%s499_s20 + $0xf0] sm:$0xff]  ;;  %v205_v7 = vld [vmem:[%s499_s20 + $0xf8] sm:$0xff] }
  0x20   : > { %352 = vst.msk [vmem:[%s533_s26 + $0x24] sm:$0xf] %vm342_vm0, %v319_v14  ;;  %v325_v30 = vpack.c.bf16 %v293_v23, %v293_v23  ;;  %v229_v31 = vmul.f32 %v493_v0, %v193_v17  ;;  %v230_v32 = vmul.f32 %v493_v0, %v194_v18  ;;  %v231_v33 = vmul.f32 %v493_v0, %v195_v19 }
  0x21   : > { %353 = vst.msk [vmem:[%s533_s26 + $0x28] sm:$0xf] %vm342_vm0, %v320_v15  ;;  %v262_v34 = vadd.f32 %v504_v1, %v226_v26  ;;  %v263_v35 = vadd.f32 %v504_v1, %v227_v27  ;;  %v264_v36 = vadd.f32 %v504_v1, %v228_v28  ;;  %v232_v37 = vmul.f32 %v493_v0, %v196_v24 }
  0x22   : > { %354 = vst.msk [vmem:[%s533_s26 + $0x2c] sm:$0xf] %vm342_vm0, %v321_v20  ;;  %v265_v38 = vadd.f32 %v504_v1, %v229_v31  ;;  %v266_v39 = vadd.f32 %v504_v1, %v230_v32  ;;  %v267_v40 = vadd.f32 %v504_v1, %v231_v33  ;;  %v233_v41 = vmul.f32 %v493_v0, %v197_v29 }
  0x23   : > { %355 = vst.msk [vmem:[%s533_s26 + $0x30] sm:$0xf] %vm342_vm0, %v322_v21  ;;  %v294_v43 = vmax.f32 %v262_v34, 0.0  ;;  %v295_v44 = vmax.f32 %v263_v35, 0.0  ;;  %v296_v45 = vmax.f32 %v264_v36, 0.0  ;;  %v268_v46 = vadd.f32 %v504_v1, %v232_v37 }
  0x24   : > { %356 = vst.msk [vmem:[%s533_s26 + $0x34] sm:$0xf] %vm342_vm0, %v323_v22  ;;  %v297_v48 = vmax.f32 %v265_v38, 0.0  ;;  %v298_v49 = vmax.f32 %v266_v39, 0.0  ;;  %v299_v50 = vmax.f32 %v267_v40, 0.0  ;;  %v269_v51 = vadd.f32 %v504_v1, %v233_v41 }
  0x25   : > { %357 = vst.msk [vmem:[%s533_s26 + $0x38] sm:$0xf] %vm342_vm0, %v324_v25  ;;  %v326_v53 = vpack.c.bf16 %v294_v43, %v294_v43  ;;  %v327_v54 = vpack.c.bf16 %v295_v44, %v295_v44  ;;  %v328_v55 = vpack.c.bf16 %v296_v45, %v296_v45  ;;  %v300_v56 = vmax.f32 %v268_v46, 0.0 }
  0x26   : > { %358 = vst.msk [vmem:[%s533_s26 + $0x3c] sm:$0xf] %vm342_vm0, %v325_v30  ;;  %v329_v60 = vpack.c.bf16 %v297_v48, %v297_v48  ;;  %v330_v61 = vpack.c.bf16 %v298_v49, %v298_v49  ;;  %v331_v62 = vpack.c.bf16 %v299_v50, %v299_v50  ;;  %v301_v63 = vmax.f32 %v269_v51, 0.0 }
  0x27   : > { %359 = vst.msk [vmem:[%s533_s26 + $0x40] sm:$0xf] %vm342_vm0, %v326_v53  ;;  %v332_v3 = vpack.c.bf16 %v300_v56, %v300_v56  ;;  %v234_v4 = vmul.f32 %v493_v0, %v198_v42  ;;  %v235_v5 = vmul.f32 %v493_v0, %v199_v47  ;;  %v236_v6 = vmul.f32 %v493_v0, %v200_v52 }
  0x28   : > { %360 = vst.msk [vmem:[%s533_s26 + $0x44] sm:$0xf] %vm342_vm0, %v327_v54  ;;  %v333_v8 = vpack.c.bf16 %v301_v63, %v301_v63  ;;  %v237_v9 = vmul.f32 %v493_v0, %v201_v57  ;;  %v238_v10 = vmul.f32 %v493_v0, %v202_v58  ;;  %v239_v11 = vmul.f32 %v493_v0, %v203_v59 }
  0x29   : > { %361 = vst.msk [vmem:[%s533_s26 + $0x48] sm:$0xf] %vm342_vm0, %v328_v55  ;;  %v270_v12 = vadd.f32 %v504_v1, %v234_v4  ;;  %v271_v13 = vadd.f32 %v504_v1, %v235_v5  ;;  %v272_v14 = vadd.f32 %v504_v1, %v236_v6  ;;  %v240_v15 = vmul.f32 %v493_v0, %v204_v2 }
  0x2a   : > { %362 = vst.msk [vmem:[%s533_s26 + $0x4c] sm:$0xf] %vm342_vm0, %v329_v60  ;;  %v273_v16 = vadd.f32 %v504_v1, %v237_v9  ;;  %v274_v17 = vadd.f32 %v504_v1, %v238_v10  ;;  %v275_v18 = vadd.f32 %v504_v1, %v239_v11  ;;  %v241_v19 = vmul.f32 %v493_v0, %v205_v7 }
  0x2b   : > { %363 = vst.msk [vmem:[%s533_s26 + $0x50] sm:$0xf] %vm342_vm0, %v330_v61  ;;  %v302_v20 = vmax.f32 %v270_v12, 0.0  ;;  %v303_v21 = vmax.f32 %v271_v13, 0.0  ;;  %v304_v22 = vmax.f32 %v272_v14, 0.0  ;;  %v276_v23 = vadd.f32 %v504_v1, %v240_v15 }
  0x2c   : > { %364 = vst.msk [vmem:[%s533_s26 + $0x54] sm:$0xf] %vm342_vm0, %v331_v62  ;;  %v305_v24 = vmax.f32 %v273_v16, 0.0  ;;  %v306_v25 = vmax.f32 %v274_v17, 0.0  ;;  %v307_v26 = vmax.f32 %v275_v18, 0.0  ;;  %v277_v27 = vadd.f32 %v504_v1, %v241_v19 }
  0x2d   : > { %365 = vst.msk [vmem:[%s533_s26 + $0x58] sm:$0xf] %vm342_vm0, %v332_v3  ;;  %v334_v0 = vpack.c.bf16 %v302_v20, %v302_v20  ;;  %v335_v28 = vpack.c.bf16 %v303_v21, %v303_v21  ;;  %v336_v29 = vpack.c.bf16 %v304_v22, %v304_v22  ;;  %v308_v30 = vmax.f32 %v276_v23, 0.0 }
  0x2e   : > { %366 = vst.msk [vmem:[%s533_s26 + $0x5c] sm:$0xf] %vm342_vm0, %v333_v8  ;;  %v337_v31 = vpack.c.bf16 %v305_v24, %v305_v24  ;;  %v309_v32 = vmax.f32 %v277_v27, 0.0  ;;  %v338_v33 = vpack.c.bf16 %v306_v25, %v306_v25  ;;  %v339_v1 = vpack.c.bf16 %v307_v26, %v307_v26 }
  0x2f   : > { %367 = vst.msk [vmem:[%s533_s26 + $0x60] sm:$0xf] %vm342_vm0, %v334_v0  ;;  %v340_v34 = vpack.c.bf16 %v308_v30, %v308_v30 }
  0x30   : > { %368 = vst.msk [vmem:[%s533_s26 + $0x64] sm:$0xf] %vm342_vm0, %v335_v28  ;;  %v341_v35 = vpack.c.bf16 %v309_v32, %v309_v32 }
  0x31   : > { %369 = vst.msk [vmem:[%s533_s26 + $0x68] sm:$0xf] %vm342_vm0, %v336_v29 }
  0x32   : > { %370 = vst.msk [vmem:[%s533_s26 + $0x6c] sm:$0xf] %vm342_vm0, %v337_v31 }
  0x33   : > { %371 = vst.msk [vmem:[%s533_s26 + $0x70] sm:$0xf] %vm342_vm0, %v338_v33 }
  0x34   : > { %372 = vst.msk [vmem:[%s533_s26 + $0x74] sm:$0xf] %vm342_vm0, %v339_v1 }
  0x35   : > { %373 = vst.msk [vmem:[%s533_s26 + $0x78] sm:$0xf] %vm342_vm0, %v340_v34 }
  0x36   : > { %374 = vst.msk [vmem:[%s533_s26 + $0x7c] sm:$0xf] %vm342_vm0, %v341_v35 }
  0x37 PF: > { %s13_s12 = sadd.s32 1, %s458_s12  }
  0x38   : > { %p10_p4 = scmp.ge.s32.totalorder %s13_s12, 4  }
  0x3a   :  { %12 = sbr.rel (!%p10_p4) target bundleno = 1 (0x1), region = 62 }

// kernel: _lambda_.22
= control target key start
LH: loop header
LB: loop body
LE: loop exit
PB: predicated region body
PF: predicated region fallthrough
CT: control target
= control target key end

     0   :  { %s953_s15 = smov 0   ;;  %s1293_s0 = inlined_call_operand.vmem [shape: bf16[512,9], index: 0, kind: input, shape index: {}]   ;;  %s1294_s1 = inlined_call_operand.vmem [shape: bf16[9,64], index: 1, kind: input, shape index: {}]   ;;  %s1295_s2 = inlined_call_operand.vmem [shape: f32[512,64], index: 2, kind: output, shape index: {0}]   ;;  %s1296_s3 = inlined_call_operand.vmem [shape: f32[2,1,64], index: 3, kind: output, shape index: {1}]   ;;  %s1297_s4 = inlined_call_operand.vmem [shape: f32[2,1,64], index: 4, kind: output, shape index: {2}]  }
   0x1 LB: > { %s959_s16 = sadd.s32 4294967295, %s925_s15   ;;  %p799_p0 = scmp.ge.s32.totalorder %s925_s15, 1  ;;  %s925_s15 = sphi %s953_s15, %s15_s15  }
   0x2   : > { %p168_p1 = scmp.lt.s32.totalorder %s925_s15, 3 }
   0x4   : > { %p169_p2 = pnand %p799_p0, %p168_p1 }
   0x5   : > { %s800_s21 = sshll.u32 (!%p169_p2), %s959_s16, 5  ;;  %p212_p4 = scmp.lt.s32.totalorder (!%p169_p2), %s959_s16, 1 }
   0x6   : > { %172 = sbr.rel (%p169_p2) target bundleno = 268 (0x10c), region = 28  ;;  %p201_p3 = scmp.lt.s32.totalorder (!%p169_p2), %s800_s21, 63 }
   0xb   : > { %v870_v0 = vld [vmem:[%s1294_s1] sm:$0xf]  ;;  %v906_v1 = vld [vmem:[%s1294_s1] sm:$0x10]  ;;  %vm387_vm0 = vcmask 1043456   ;;  %vm388_vm1 = vcmask 1044480  }
   0xc   : > { %v871_v2 = vor.u32 %v906_v1, %v870_v0  ;;  %v927_v3 = vmov 65535   ;;  %s1299_s21 = smov (!%p201_p3, %s800_s21), 63  ;;  %vm338_vm2 = vcmask 72704   ;;  %vm483_vm3 = vcmask 523264   ;;  %s1301_s16 = smov (!%p212_p4, %s959_s16), 1 }
   0xd   : > { %v389_v4 = vsel %vm387_vm0, 4294967295, %v927_v3  ;;  %s801_s22 = sshll.u32 %s1299_s21, 2  ;;  %s803_s26 = sshll.u32 %s1299_s21, 3  ;;  %vm686_vm4 = vcmask 516096  }
   0xe   : > { %v390_v5 = vsel %vm388_vm1, %v389_v4, 0  ;;  %s976_s25 = scalar_lea.vmem %s1293_s0, %s801_s22  ;;  %s1014_s29 = scalar_lea.vmem %s1295_s2, %s803_s26 }
   0xf   : > { %v392_v6 = vand.u32 %v871_v2, %v390_v5  ;;  %v890_v7 = vld [vmem:[%s976_s25] sm:$0xff]  ;;  %v891_v11 = vld [vmem:[%s976_s25 + $0x8] sm:$0xff]  ;;  %v892_v15 = vld [vmem:[%s976_s25 + $0x10] sm:$0xff]  ;;  %s214_s6 = scalar_lea.vmem %s1296_s3, %s1301_s16  ;;  %s217_s9 = scalar_lea.vmem %s1297_s4, %s1301_s16 }
  0x10   : > { %v894_v8 = vld [vmem:[%s976_s25 + $0x20] sm:$0xff]  ;;  %v895_v12 = vld [vmem:[%s976_s25 + $0x28] sm:$0xff]  ;;  %v896_v16 = vld [vmem:[%s976_s25 + $0x30] sm:$0xff] }
  0x11   : > { %401 = vmatpush.bf16.msra.mxu0 %v392_v6  ;;  %907 = vmatpush.bf16.msra.mxu1 %v392_v6  ;;  %v898_v9 = vld [vmem:[%s976_s25 + $0x40] sm:$0xff]  ;;  %v899_v13 = vld [vmem:[%s976_s25 + $0x48] sm:$0xff]  ;;  %v900_v17 = vld [vmem:[%s976_s25 + $0x50] sm:$0xff] }
  0x12   : > { %908 = vmatpush.bf16.msra.mxu2 %v392_v6  ;;  %909 = vmatpush.bf16.msra.mxu3 %v392_v6  ;;  %v902_v10 = vld [vmem:[%s976_s25 + $0x60] sm:$0xff]  ;;  %v903_v14 = vld [vmem:[%s976_s25 + $0x68] sm:$0xff]  ;;  %v904_v18 = vld [vmem:[%s976_s25 + $0x70] sm:$0xff] }
  0x13   : > { %v893_v19 = vld [vmem:[%s976_s25 + $0x18] sm:$0xff] }
  0x14   : > { %872 = vmatmul.msk.bf16.vlgmr.msra.gmra.mxu0 %vm338_vm2, %v890_v7  ;;  %876 = vmatmul.msk.bf16.vlgmr.msra.gmra.mxu1 %vm338_vm2, %v894_v8  ;;  %v897_v20 = vld [vmem:[%s976_s25 + $0x38] sm:$0xff] }
  0x15   : > { %880 = vmatmul.msk.bf16.vlgmr.msra.gmra.mxu2 %vm338_vm2, %v898_v9  ;;  %884 = vmatmul.msk.bf16.vlgmr.msra.gmra.mxu3 %vm338_vm2, %v902_v10  ;;  %v901_v21 = vld [vmem:[%s976_s25 + $0x58] sm:$0xff] }
  0x16   : > { %v905_v22 = vld [vmem:[%s976_s25 + $0x78] sm:$0xff] }
  0x24   : > { %873 = vmatmul.msk.bf16.gmra.mxu0 %vm338_vm2, %v891_v11  ;;  %877 = vmatmul.msk.bf16.gmra.mxu1 %vm338_vm2, %v895_v12 }
  0x25   : > { %881 = vmatmul.msk.bf16.gmra.mxu2 %vm338_vm2, %v899_v13  ;;  %885 = vmatmul.msk.bf16.gmra.mxu3 %vm338_vm2, %v903_v14 }
  0x34   : > { %874 = vmatmul.msk.bf16.gmra.mxu0 %vm338_vm2, %v892_v15  ;;  %878 = vmatmul.msk.bf16.gmra.mxu1 %vm338_vm2, %v896_v16 }
  0x35   : > { %882 = vmatmul.msk.bf16.gmra.mxu2 %vm338_vm2, %v900_v17  ;;  %886 = vmatmul.msk.bf16.gmra.mxu3 %vm338_vm2, %v904_v18 }
  0x44   : > { %875 = vmatmul.msk.bf16.gmra.mxu0 %vm338_vm2, %v893_v19  ;;  %879 = vmatmul.msk.bf16.gmra.mxu1 %vm338_vm2, %v897_v20 }
  0x45   : > { %883 = vmatmul.msk.bf16.gmra.mxu2 %vm338_vm2, %v901_v21  ;;  %887 = vmatmul.msk.bf16.gmra.mxu3 %vm338_vm2, %v905_v22 }
  0x91   : > { %v403_v23 = vpop.f32.mrf.mxu0  ;;  %v1016_v24 = vpop.f32.mrf.mxu1 }
  0x92   : > { %484 = vst.msk [vmem:[%s1014_s29] sm:$0xff] %vm483_vm3, %v403_v23  ;;  %v585_v46 = vmul.f32 %v403_v23, %v403_v23  ;;  %v516_v49 = vsel %vm483_vm3, %v403_v23, 0.0  ;;  %v593_v20 = vmul.f32 %v1016_v24, %v1016_v24 }
  0x93   : > { %492 = vst.msk [vmem:[%s1014_s29 + $0x40] sm:$0xff] %vm483_vm3, %v1016_v24 }
  0x94   : > { %v617_v54 = vsel %vm483_vm3, %v585_v46, 0.0 }
  0x98   : > { %v1023_v25 = vpop.f32.mrf.mxu2  ;;  %v1032_v28 = vpop.f32.mrf.mxu3 }
  0x99   : > { %v405_v26 = vpop.f32.mrf.mxu0  ;;  %v1025_v27 = vpop.f32.mrf.mxu1  ;;  %500 = vst.msk [vmem:[%s1014_s29 + $0x80] sm:$0xff] %vm483_vm3, %v1023_v25 }
  0x9a   : > { %485 = vst.msk [vmem:[%s1014_s29 + $0x8] sm:$0xff] %vm483_vm3, %v405_v26  ;;  %v586_v44 = vmul.f32 %v405_v26, %v405_v26  ;;  %v517_v47 = vsel %vm483_vm3, %v405_v26, 0.0 }
  0x9b   : > { %493 = vst.msk [vmem:[%s1014_s29 + $0x48] sm:$0xff] %vm483_vm3, %v1025_v27  ;;  %v518_v53 = vadd.f32 %v517_v47, %v516_v49  ;;  %v632_v47 = vsel %vm483_vm3, %v593_v20, 0.0 }
  0x9c   : > { %508 = vst.msk [vmem:[%s1014_s29 + $0xc0] sm:$0xff] %vm483_vm3, %v1032_v28  ;;  %v618_v50 = vsel %vm483_vm3, %v586_v44, 0.0 }
  0x9d   : > { %v619_v59 = vadd.f32 %v618_v50, %v617_v54 }
  0xa0   : > { %v1040_v29 = vpop.f32.mrf.mxu2  ;;  %v1049_v32 = vpop.f32.mrf.mxu3 }
  0xa1   : > { %v408_v30 = vpop.f32.mrf.mxu0  ;;  %v1042_v31 = vpop.f32.mrf.mxu1  ;;  %501 = vst.msk [vmem:[%s1014_s29 + $0x88] sm:$0xff] %vm483_vm3, %v1040_v29  ;;  %v602_v20 = vmul.f32 %v1040_v29, %v1040_v29 }
  0xa2   : > { %486 = vst.msk [vmem:[%s1014_s29 + $0x10] sm:$0xff] %vm483_vm3, %v408_v30  ;;  %v587_v48 = vmul.f32 %v408_v30, %v408_v30  ;;  %v519_v51 = vsel %vm483_vm3, %v408_v30, 0.0  ;;  %v595_v49 = vmul.f32 %v1042_v31, %v1042_v31 }
  0xa3   : > { %494 = vst.msk [vmem:[%s1014_s29 + $0x50] sm:$0xff] %vm483_vm3, %v1042_v31  ;;  %v520_v60 = vadd.f32 %v519_v51, %v518_v53 }
  0xa4   : > { %509 = vst.msk [vmem:[%s1014_s29 + $0xc8] sm:$0xff] %vm483_vm3, %v1049_v32  ;;  %v620_v55 = vsel %vm483_vm3, %v587_v48, 0.0  ;;  %v533_v48 = vsel %vm483_vm3, %v1025_v27, 0.0 }
  0xa5   : > { %v621_v3 = vadd.f32 %v620_v55, %v619_v59 }
  0xa8   : > { %v1057_v33 = vpop.f32.mrf.mxu2  ;;  %v1066_v36 = vpop.f32.mrf.mxu3 }
  0xa9   : > { %v410_v34 = vpop.f32.mrf.mxu0  ;;  %v1059_v35 = vpop.f32.mrf.mxu1  ;;  %502 = vst.msk [vmem:[%s1014_s29 + $0x90] sm:$0xff] %vm483_vm3, %v1057_v33 }
  0xaa   : > { %487 = vst.msk [vmem:[%s1014_s29 + $0x18] sm:$0xff] %vm483_vm3, %v410_v34  ;;  %v588_v52 = vmul.f32 %v410_v34, %v410_v34  ;;  %v521_v56 = vsel %vm483_vm3, %v410_v34, 0.0  ;;  %v531_v34 = vsel %vm483_vm3, %v1016_v24, 0.0  ;;  %v596_v53 = vmul.f32 %v1059_v35, %v1059_v35 }
  0xab   : > { %495 = vst.msk [vmem:[%s1014_s29 + $0x58] sm:$0xff] %vm483_vm3, %v1059_v35  ;;  %v522_v4 = vadd.f32 %v521_v56, %v520_v60 }
  0xac   : > { %510 = vst.msk [vmem:[%s1014_s29 + $0xd0] sm:$0xff] %vm483_vm3, %v1066_v36  ;;  %v622_v63 = vsel %vm483_vm3, %v588_v52, 0.0  ;;  %v535_v52 = vsel %vm483_vm3, %v1042_v31, 0.0 }
  0xad   : > { %v623_v8 = vadd.f32 %v622_v63, %v621_v3  ;;  %v638_v63 = vsel %vm483_vm3, %v596_v53, 0.0 }
  0xb0   : > { %v1074_v37 = vpop.f32.mrf.mxu2  ;;  %v1083_v40 = vpop.f32.mrf.mxu3 }
  0xb1   : > { %v413_v38 = vpop.f32.mrf.mxu0  ;;  %v1076_v39 = vpop.f32.mrf.mxu1  ;;  %503 = vst.msk [vmem:[%s1014_s29 + $0x98] sm:$0xff] %vm483_vm3, %v1074_v37 }
  0xb2   : > { %488 = vst.msk [vmem:[%s1014_s29 + $0x20] sm:$0xff] %vm483_vm3, %v413_v38  ;;  %v589_v57 = vmul.f32 %v413_v38, %v413_v38  ;;  %v523_v0 = vsel %vm483_vm3, %v413_v38, 0.0  ;;  %v594_v38 = vmul.f32 %v1025_v27, %v1025_v27  ;;  %v636_v27 = vsel %vm483_vm3, %v595_v49, 0.0 }
  0xb3   : > { %496 = vst.msk [vmem:[%s1014_s29 + $0x60] sm:$0xff] %vm483_vm3, %v1076_v39  ;;  %v524_v9 = vadd.f32 %v523_v0, %v522_v4  ;;  %v597_v59 = vmul.f32 %v1076_v39, %v1076_v39  ;;  %v539_v0 = vsel %vm483_vm3, %v1076_v39, 0.0 }
  0xb4   : > { %511 = vst.msk [vmem:[%s1014_s29 + $0xd8] sm:$0xff] %vm483_vm3, %v1083_v40  ;;  %v624_v5 = vsel %vm483_vm3, %v589_v57, 0.0  ;;  %v634_v51 = vsel %vm483_vm3, %v594_v38, 0.0  ;;  %v537_v57 = vsel %vm483_vm3, %v1059_v35, 0.0 }
  0xb5   : > { %v625_v12 = vadd.f32 %v624_v5, %v623_v8  ;;  %v640_v4 = vsel %vm483_vm3, %v597_v59, 0.0 }
  0xb8   : > { %v1091_v41 = vpop.f32.mrf.mxu2  ;;  %v1100_v45 = vpop.f32.mrf.mxu3 }
  0xb9   : > { %v415_v42 = vpop.f32.mrf.mxu0  ;;  %v1093_v43 = vpop.f32.mrf.mxu1  ;;  %504 = vst.msk [vmem:[%s1014_s29 + $0xa0] sm:$0xff] %vm483_vm3, %v1091_v41  ;;  %v605_v49 = vmul.f32 %v1091_v41, %v1091_v41 }
  0xba   : > { %489 = vst.msk [vmem:[%s1014_s29 + $0x28] sm:$0xff] %vm483_vm3, %v415_v42  ;;  %v590_v1 = vmul.f32 %v415_v42, %v415_v42  ;;  %v525_v6 = vsel %vm483_vm3, %v415_v42, 0.0  ;;  %v541_v5 = vsel %vm483_vm3, %v1093_v43, 0.0 }
  0xbb   : > { %497 = vst.msk [vmem:[%s1014_s29 + $0x68] sm:$0xff] %vm483_vm3, %v1093_v43  ;;  %v526_v13 = vadd.f32 %v525_v6, %v524_v9 }
  0xbc   : > { %512 = vst.msk [vmem:[%s1014_s29 + $0xe0] sm:$0xff] %vm483_vm3, %v1100_v45  ;;  %v626_v10 = vsel %vm483_vm3, %v590_v1, 0.0  ;;  %v598_v1 = vmul.f32 %v1093_v43, %v1093_v43 }
  0xbd   : > { %v627_v16 = vadd.f32 %v626_v10, %v625_v12 }
  0xbe   : > { %v642_v9 = vsel %vm483_vm3, %v598_v1, 0.0  ;;  %v609_v1 = vmul.f32 %v1032_v28, %v1032_v28 }
  0xc0   : > { %v1115_v58 = vpop.f32.mrf.mxu2  ;;  %v1126_v2 = vpop.f32.mrf.mxu3 }
  0xc1   : > { %v418_v61 = vpop.f32.mrf.mxu0  ;;  %v1117_v62 = vpop.f32.mrf.mxu1  ;;  %505 = vst.msk [vmem:[%s1014_s29 + $0xa8] sm:$0xff] %vm483_vm3, %v1115_v58 }
  0xc2   : > { %490 = vst.msk [vmem:[%s1014_s29 + $0x30] sm:$0xff] %vm483_vm3, %v418_v61  ;;  %v591_v7 = vmul.f32 %v418_v61, %v418_v61  ;;  %v527_v11 = vsel %vm483_vm3, %v418_v61, 0.0  ;;  %v599_v6 = vmul.f32 %v1117_v62, %v1117_v62  ;;  %v543_v39 = vsel %vm483_vm3, %v1117_v62, 0.0 }
  0xc3   : > { %498 = vst.msk [vmem:[%s1014_s29 + $0x70] sm:$0xff] %vm483_vm3, %v1117_v62  ;;  %v528_v17 = vadd.f32 %v527_v11, %v526_v13  ;;  %v601_v13 = vmul.f32 %v1023_v25, %v1023_v25 }
  0xc4   : > { %513 = vst.msk [vmem:[%s1014_s29 + $0xe8] sm:$0xff] %vm483_vm3, %v1126_v2  ;;  %v628_v14 = vsel %vm483_vm3, %v591_v7, 0.0 }
  0xc5   : > { %v629_v26 = vadd.f32 %v628_v14, %v627_v16  ;;  %v644_v14 = vsel %vm483_vm3, %v599_v6, 0.0 }
  0xc8   : > { %v1139_v15 = vpop.f32.mrf.mxu2  ;;  %v1149_v23 = vpop.f32.mrf.mxu3 }
  0xc9   : > { %v420_v18 = vpop.f32.mrf.mxu0  ;;  %v440_v19 = vpop.f32.mrf.mxu1  ;;  %506 = vst.msk [vmem:[%s1014_s29 + $0xb0] sm:$0xff] %vm483_vm3, %v1139_v15 }
  0xca   : > { %491 = vst.msk [vmem:[%s1014_s29 + $0x38] sm:$0xff] %vm483_vm3, %v420_v18  ;;  %v529_v21 = vsel %vm483_vm3, %v420_v18, 0.0  ;;  %v592_v22 = vmul.f32 %v420_v18, %v420_v18  ;;  %v600_v10 = vmul.f32 %v440_v19, %v440_v19  ;;  %v545_v43 = vsel %vm483_vm3, %v440_v19, 0.0 }
  0xcb   : > { %v530_v30 = vadd.f32 %v529_v21, %v528_v17  ;;  %499 = vst.msk [vmem:[%s1014_s29 + $0x78] sm:$0xff] %vm483_vm3, %v440_v19  ;;  %v547_v18 = vsel %vm483_vm3, %v1023_v25, 0.0  ;;  %v603_v19 = vmul.f32 %v1057_v33, %v1057_v33  ;;  %v551_v25 = vsel %vm483_vm3, %v1057_v33, 0.0 }
  0xcc   : > { %v630_v42 = vsel %vm483_vm3, %v592_v22, 0.0  ;;  %514 = vst.msk [vmem:[%s1014_s29 + $0xf0] sm:$0xff] %vm483_vm3, %v1149_v23  ;;  %v646_v62 = vsel %vm483_vm3, %v600_v10, 0.0  ;;  %v555_v33 = vsel %vm483_vm3, %v1091_v41, 0.0  ;;  %v559_v41 = vsel %vm483_vm3, %v1139_v15, 0.0 }
  0xcd   : > { %v532_v44 = vadd.f32 %v531_v34, %v530_v30  ;;  %v631_v46 = vadd.f32 %v630_v42, %v629_v26  ;;  %v648_v26 = vsel %vm483_vm3, %v601_v13, 0.0  ;;  %v549_v30 = vsel %vm483_vm3, %v1040_v29, 0.0 }
  0xce   : > { %v650_v42 = vsel %vm483_vm3, %v602_v20, 0.0  ;;  %v553_v29 = vsel %vm483_vm3, %v1074_v37, 0.0  ;;  %v612_v13 = vmul.f32 %v1083_v40, %v1083_v40 }
  0xcf   : > { %v534_v24 = vadd.f32 %v533_v48, %v532_v44  ;;  %v633_v50 = vadd.f32 %v632_v47, %v631_v46  ;;  %v604_v44 = vmul.f32 %v1074_v37, %v1074_v37  ;;  %v652_v48 = vsel %vm483_vm3, %v603_v19, 0.0 }
  0xd0   : > { %v1171_v54 = vpop.f32.mrf.mxu2  ;;  %v1181_v60 = vpop.f32.mrf.mxu3  ;;  %v557_v37 = vsel %vm483_vm3, %v1115_v58, 0.0  ;;  %v615_v19 = vmul.f32 %v1149_v23, %v1149_v23 }
  0xd1   : > { %v536_v55 = vadd.f32 %v535_v52, %v534_v24  ;;  %v635_v56 = vadd.f32 %v634_v51, %v633_v50  ;;  %507 = vst.msk [vmem:[%s1014_s29 + $0xb8] sm:$0xff] %vm483_vm3, %v1171_v54  ;;  %v654_v51 = vsel %vm483_vm3, %v604_v44, 0.0  ;;  %v606_v52 = vmul.f32 %v1115_v58, %v1115_v58 }
  0xd2   : > { %515 = vst.msk [vmem:[%s1014_s29 + $0xf8] sm:$0xff] %vm483_vm3, %v1181_v60 }
  0xd3   : > { %v637_v31 = vadd.f32 %v636_v27, %v635_v56  ;;  %v538_v61 = vadd.f32 %v537_v57, %v536_v55  ;;  %v656_v56 = vsel %vm483_vm3, %v605_v49, 0.0  ;;  %v607_v27 = vmul.f32 %v1139_v15, %v1139_v15 }
  0xd4   : > { %v610_v15 = vmul.f32 %v1049_v32, %v1049_v32 }
  0xd5   : > { %v540_v3 = vadd.f32 %v539_v0, %v538_v61  ;;  %v639_v35 = vadd.f32 %v638_v63, %v637_v31  ;;  %v658_v31 = vsel %vm483_vm3, %v606_v52, 0.0  ;;  %v608_v61 = vmul.f32 %v1171_v54, %v1171_v54 }
  0xd6   : > { %v660_v58 = vsel %vm483_vm3, %v607_v27, 0.0 }
  0xd7   : > { %v542_v7 = vadd.f32 %v541_v5, %v540_v3  ;;  %v641_v8 = vadd.f32 %v640_v4, %v639_v35  ;;  %v561_v3 = vsel %vm483_vm3, %v1171_v54, 0.0  ;;  %v563_v5 = vsel %vm483_vm3, %v1032_v28, 0.0 }
  0xd8   : > { %v662_v6 = vsel %vm483_vm3, %v608_v61, 0.0  ;;  %v611_v54 = vmul.f32 %v1066_v36, %v1066_v36  ;;  %v567_v28 = vsel %vm483_vm3, %v1066_v36, 0.0  ;;  %v571_v36 = vsel %vm483_vm3, %v1100_v45, 0.0 }
  0xd9   : > { %v544_v11 = vadd.f32 %v543_v39, %v542_v7  ;;  %v643_v12 = vadd.f32 %v642_v9, %v641_v8  ;;  %v664_v9 = vsel %vm483_vm3, %v609_v1, 0.0  ;;  %v565_v39 = vsel %vm483_vm3, %v1049_v32, 0.0 }
  0xda   : > { %v569_v32 = vsel %vm483_vm3, %v1083_v40, 0.0  ;;  %v573_v40 = vsel %vm483_vm3, %v1126_v2, 0.0 }
  0xdb   : > { %v645_v16 = vadd.f32 %v644_v14, %v643_v12  ;;  %v546_v17 = vadd.f32 %v545_v43, %v544_v11  ;;  %v666_v12 = vsel %vm483_vm3, %v610_v15, 0.0 }
  0xdd   : > { %v548_v21 = vadd.f32 %v547_v18, %v546_v17  ;;  %v647_v22 = vadd.f32 %v646_v62, %v645_v16  ;;  %v668_v16 = vsel %vm483_vm3, %v611_v54, 0.0  ;;  %v613_v17 = vmul.f32 %v1100_v45, %v1100_v45 }
  0xde   : > { %v670_v62 = vsel %vm483_vm3, %v612_v13, 0.0  ;;  %v575_v45 = vsel %vm483_vm3, %v1149_v23, 0.0 }
  0xdf   : > { %v550_v34 = vadd.f32 %v549_v30, %v548_v21  ;;  %v649_v38 = vadd.f32 %v648_v26, %v647_v22  ;;  %v614_v21 = vmul.f32 %v1126_v2, %v1126_v2  ;;  %v672_v30 = vsel %vm483_vm3, %v613_v17, 0.0 }
  0xe0   : > { %v577_v2 = vsel %vm483_vm3, %v1181_v60, 0.0 }
  0xe1   : > { %v552_v46 = vadd.f32 %v551_v25, %v550_v34  ;;  %v651_v47 = vadd.f32 %v650_v42, %v649_v38  ;;  %v674_v42 = vsel %vm483_vm3, %v614_v21, 0.0  ;;  %v616_v25 = vmul.f32 %v1181_v60, %v1181_v60 }
  0xe3   : > { %v653_v24 = vadd.f32 %v652_v48, %v651_v47  ;;  %v554_v50 = vadd.f32 %v553_v29, %v552_v46  ;;  %v676_v47 = vsel %vm483_vm3, %v615_v19, 0.0  ;;  %v678_v49 = vsel %vm483_vm3, %v616_v25, 0.0 }
  0xe5   : > { %v556_v53 = vadd.f32 %v555_v33, %v554_v50  ;;  %v655_v55 = vadd.f32 %v654_v51, %v653_v24 }
  0xe7   : > { %v558_v57 = vadd.f32 %v557_v37, %v556_v53  ;;  %v657_v59 = vadd.f32 %v656_v56, %v655_v55 }
  0xe9   : > { %v659_v63 = vadd.f32 %v658_v31, %v657_v59  ;;  %v560_v0 = vadd.f32 %v559_v41, %v558_v57 }
  0xeb   : > { %v661_v35 = vadd.f32 %v660_v58, %v659_v63  ;;  %v562_v4 = vadd.f32 %v561_v3, %v560_v0 }
  0xed   : > { %v564_v7 = vadd.f32 %v563_v5, %v562_v4  ;;  %v663_v8 = vadd.f32 %v662_v6, %v661_v35 }
  0xef   : > { %v566_v10 = vadd.f32 %v565_v39, %v564_v7  ;;  %v665_v11 = vadd.f32 %v664_v9, %v663_v8 }
  0xf1   : > { %v568_v14 = vadd.f32 %v567_v28, %v566_v10  ;;  %v667_v43 = vadd.f32 %v666_v12, %v665_v11 }
  0xf3   : > { %v669_v18 = vadd.f32 %v668_v16, %v667_v43  ;;  %v570_v20 = vadd.f32 %v569_v32, %v568_v14 }
  0xf5   : > { %v572_v22 = vadd.f32 %v571_v36, %v570_v20  ;;  %v671_v26 = vadd.f32 %v670_v62, %v669_v18 }
  0xf7   : > { %v574_v34 = vadd.f32 %v573_v40, %v572_v22  ;;  %v673_v38 = vadd.f32 %v672_v30, %v671_v26 }
  0xf9   : > { %v675_v44 = vadd.f32 %v674_v42, %v673_v38  ;;  %v576_v46 = vadd.f32 %v575_v45, %v574_v34 }
  0xfb   : > { %v677_v48 = vadd.f32 %v676_v47, %v675_v44  ;;  %v578_v29 = vadd.f32 %v577_v2, %v576_v46 }
  0xfd   : > { %v579_v24 = vrot.slane %v578_v29, 4  ;;  %v679_v50 = vadd.f32 %v678_v49, %v677_v48 }
  0xff   : > { %v580_v51 = vadd.f32 %v579_v24, %v578_v29  ;;  %v680_v23 = vrot.slane %v679_v50, 4 }
 0x101   : > { %v581_v33 = vrot.slane %v580_v51, 2  ;;  %v681_v52 = vadd.f32 %v680_v23, %v679_v50 }
 0x103   : > { %v582_v53 = vadd.f32 %v581_v33, %v580_v51  ;;  %v682_v55 = vrot.slane %v681_v52, 2 }
 0x105   : > { %v583_v56 = vrot.slane %v582_v53, 1  ;;  %v683_v37 = vadd.f32 %v682_v55, %v681_v52 }
 0x107   : > { %v584_v60 = vadd.f32 %v583_v56, %v582_v53  ;;  %v684_v27 = vrot.slane %v683_v37, 1 }
 0x109   : > { %v685_v57 = vadd.f32 %v684_v27, %v683_v37  ;;  %687 = vst.msk [vmem:[%s214_s6] sm:$0x1] %vm686_vm4, %v584_v60 }
 0x10b   : > { %688 = vst.msk [vmem:[%s217_s9] sm:$0x1] %vm686_vm4, %v685_v57 }
 0x10c PF: > { %s15_s15 = sadd.s32 1, %s925_s15  }
 0x10d   : > { %p12_p5 = scmp.ge.s32.totalorder %s15_s15, 4  }
 0x10f   :  { %14 = sbr.rel (!%p12_p5) target bundleno = 1 (0x1), region = 82 }

// kernel: _lambda_.24
= control target key start
LH: loop header
LB: loop body
LE: loop exit
PB: predicated region body
PF: predicated region fallthrough
CT: control target
= control target key end

     0   :  { %s2484_s15 = smov 0   ;;  %s3046_s0 = inlined_call_operand.vmem [shape: bf16[512,576], index: 0, kind: input, shape index: {}]   ;;  %s3047_s1 = inlined_call_operand.vmem [shape: bf16[576,64], index: 1, kind: input, shape index: {}]   ;;  %s3048_s2 = inlined_call_operand.vmem [shape: f32[512,64], index: 2, kind: output, shape index: {0}]   ;;  %s3049_s3 = inlined_call_operand.vmem [shape: f32[2,1,64], index: 3, kind: output, shape index: {1}]   ;;  %s3050_s4 = inlined_call_operand.vmem [shape: f32[2,1,64], index: 4, kind: output, shape index: {2}]  }
   0x1 LB: > { %s2490_s16 = sadd.s32 4294967295, %s2457_s15   ;;  %p1815_p0 = scmp.ge.s32.totalorder %s2457_s15, 1  ;;  %s2457_s15 = sphi %s2484_s15, %s15_s15  }
   0x2   : > { %p169_p1 = scmp.lt.s32.totalorder %s2457_s15, 3 }
   0x4   : > { %p170_p2 = pnand %p1815_p0, %p169_p1 }
   0x5   : > { %s1816_s23 = sshll.u32 (!%p170_p2), %s2490_s16, 5  ;;  %p215_p4 = scmp.lt.s32.totalorder (!%p170_p2), %s2490_s16, 1 }
   0x6   : > { %173 = sbr.rel (%p170_p2) target bundleno = 511 (0x1ff), region = 28  ;;  %p203_p3 = scmp.lt.s32.totalorder (!%p170_p2), %s1816_s23, 63 }
   0xb   : > { %v2389_v0 = vld [vmem:[%s3047_s1 + $0x38] sm:$0xff]  ;;  %v2388_v1 = vld [vmem:[%s3047_s1 + $0x30] sm:$0xff]  ;;  %v2387_v2 = vld [vmem:[%s3047_s1 + $0x28] sm:$0xff]  ;;  %s3052_s23 = smov (!%p203_p3, %s1816_s23), 63  ;;  %vm1006_vm0 = vcmask 523264   ;;  %s3054_s16 = smov (!%p215_p4, %s2490_s16), 1 }
   0xc   : > { %2418 = vmatpush.bf16.msra.mxu1 %v2389_v0  ;;  %2419 = vmatpush.bf16.msra.mxu2 %v2389_v0  ;;  %v2386_v3 = vld [vmem:[%s3047_s1 + $0x20] sm:$0xff]  ;;  %v2385_v4 = vld [vmem:[%s3047_s1 + $0x18] sm:$0xff]  ;;  %v2384_v5 = vld [vmem:[%s3047_s1 + $0x10] sm:$0xff]  ;;  %s2442_s30 = smul.u32 20, %s3052_s23  ;;  %s1819_s27 = sshll.u32 %s3052_s23, 3  ;;  %vm1702_vm1 = vcmask 516096  }
   0xd   : > { %2420 = vmatpush.bf16.msra.mxu3 %v2389_v0  ;;  %1055 = vmatpush.bf16.msra.mxu0 %v2389_v0  ;;  %v2383_v6 = vld [vmem:[%s3047_s1 + $0x8] sm:$0xff]  ;;  %v2382_v7 = vld [vmem:[%s3047_s1] sm:$0xff]  ;;  %v2405_v16 = vld [vmem:[%s3047_s1 + $0xb8] sm:$0xff]  ;;  %s217_s5 = scalar_lea.vmem %s3049_s3, %s3054_s16  ;;  %s220_s8 = scalar_lea.vmem %s3050_s4, %s3054_s16 }
   0xe   : > { %s2522_s9 = scalar_lea.vmem %s3046_s0, %s2442_s30  ;;  %v2413_v17 = vld [vmem:[%s3047_s1 + $0xf8] sm:$0xff]  ;;  %v2404_v24 = vld [vmem:[%s3047_s1 + $0xb0] sm:$0xff]  ;;  %v2403_v28 = vld [vmem:[%s3047_s1 + $0xa8] sm:$0xff]  ;;  %s2793_s30 = scalar_lea.vmem %s3048_s2, %s1819_s27 }
   0xf   : > { %v1902_v8 = vld [vmem:[%s2522_s9 + $0xa0] sm:$0xf]  ;;  %v2324_v9 = vld [vmem:[%s2522_s9 + $0xb0] sm:$0xf0]  ;;  %v2397_v22 = vld [vmem:[%s3047_s1 + $0x78] sm:$0xff] }
  0x10   : > { %2421 = vmatpush.bf16.msra.mxu1 %v2388_v1  ;;  %2422 = vmatpush.bf16.msra.mxu2 %v2388_v1  ;;  %v1982_v10 = vld [vmem:[%s2522_s9 + $0x140] sm:$0xf]  ;;  %v2344_v11 = vld [vmem:[%s2522_s9 + $0x150] sm:$0xf0]  ;;  %v1903_v18 = vor.u32 %v2324_v9, %v1902_v8  ;;  %v2417_v23 = vld [vmem:[%s3047_s1 + $0x118] sm:$0xff] }
  0x11   : > { %2423 = vmatpush.bf16.msra.mxu3 %v2388_v1  ;;  %1056 = vmatpush.bf16.msra.mxu0 %v2388_v1  ;;  %v2062_v12 = vld [vmem:[%s2522_s9 + $0x1e0] sm:$0xf]  ;;  %v2364_v13 = vld [vmem:[%s2522_s9 + $0x1f0] sm:$0xf0]  ;;  %v1983_v19 = vor.u32 %v2344_v11, %v1982_v10  ;;  %v2411_v29 = vld [vmem:[%s3047_s1 + $0xe8] sm:$0xff] }
  0x12   : > { %v1822_v14 = vld [vmem:[%s2522_s9] sm:$0xf]  ;;  %v2304_v15 = vld [vmem:[%s2522_s9 + $0x10] sm:$0xf0]  ;;  %v2063_v20 = vor.u32 %v2364_v13, %v2062_v12  ;;  %v2395_v30 = vld [vmem:[%s3047_s1 + $0x68] sm:$0xff] }
  0x13   : > { %v1823_v21 = vor.u32 %v2304_v15, %v1822_v14  ;;  %v2412_v25 = vld [vmem:[%s3047_s1 + $0xf0] sm:$0xff]  ;;  %v2415_v31 = vld [vmem:[%s3047_s1 + $0x108] sm:$0xff]  ;;  %v2402_v32 = vld [vmem:[%s3047_s1 + $0xa0] sm:$0xff] }
  0x14   : > { %2424 = vmatpush.bf16.msra.mxu1 %v2387_v2  ;;  %2425 = vmatpush.bf16.msra.mxu2 %v2387_v2  ;;  %v2396_v26 = vld [vmem:[%s3047_s1 + $0x70] sm:$0xff]  ;;  %v2410_v33 = vld [vmem:[%s3047_s1 + $0xe0] sm:$0xff]  ;;  %v1922_v34 = vld [vmem:[%s2522_s9 + $0xc8] sm:$0xf] }
  0x15   : > { %2426 = vmatpush.bf16.msra.mxu3 %v2387_v2  ;;  %1057 = vmatpush.bf16.msra.mxu0 %v2387_v2  ;;  %v2416_v27 = vld [vmem:[%s3047_s1 + $0x110] sm:$0xff]  ;;  %v2329_v35 = vld [vmem:[%s2522_s9 + $0xd8] sm:$0xf0]  ;;  %v2002_v36 = vld [vmem:[%s2522_s9 + $0x168] sm:$0xf] }
  0x16   : > { %v2349_v37 = vld [vmem:[%s2522_s9 + $0x178] sm:$0xf0]  ;;  %v2082_v38 = vld [vmem:[%s2522_s9 + $0x208] sm:$0xf]  ;;  %v2394_v42 = vld [vmem:[%s3047_s1 + $0x60] sm:$0xff]  ;;  %v1923_v45 = vor.u32 %v2329_v35, %v1922_v34 }
  0x17   : > { %v2369_v39 = vld [vmem:[%s2522_s9 + $0x218] sm:$0xf0]  ;;  %v1842_v40 = vld [vmem:[%s2522_s9 + $0x28] sm:$0xf]  ;;  %v2003_v46 = vor.u32 %v2349_v37, %v2002_v36  ;;  %v2400_v50 = vld [vmem:[%s3047_s1 + $0x90] sm:$0xff] }
  0x18   : > { %2427 = vmatpush.bf16.msra.mxu1 %v2386_v3  ;;  %2428 = vmatpush.bf16.msra.mxu2 %v2386_v3  ;;  %v2309_v41 = vld [vmem:[%s2522_s9 + $0x38] sm:$0xf0]  ;;  %v2083_v47 = vor.u32 %v2369_v39, %v2082_v38  ;;  %v2408_v51 = vld [vmem:[%s3047_s1 + $0xd0] sm:$0xff]  ;;  %v2414_v53 = vld [vmem:[%s3047_s1 + $0x100] sm:$0xff] }
  0x19   : > { %2429 = vmatpush.bf16.msra.mxu3 %v2386_v3  ;;  %1058 = vmatpush.bf16.msra.mxu0 %v2386_v3  ;;  %v2401_v43 = vld [vmem:[%s3047_s1 + $0x98] sm:$0xff]  ;;  %v1843_v48 = vor.u32 %v2309_v41, %v1842_v40  ;;  %v2392_v52 = vld [vmem:[%s3047_s1 + $0x50] sm:$0xff]  ;;  %v2399_v54 = vld [vmem:[%s3047_s1 + $0x88] sm:$0xff] }
  0x1a   : > { %v2409_v44 = vld [vmem:[%s3047_s1 + $0xd8] sm:$0xff]  ;;  %v2407_v55 = vld [vmem:[%s3047_s1 + $0xc8] sm:$0xff]  ;;  %v2398_v57 = vld [vmem:[%s3047_s1 + $0x80] sm:$0xff] }
  0x1b   : > { %v2393_v49 = vld [vmem:[%s3047_s1 + $0x58] sm:$0xff]  ;;  %v2391_v56 = vld [vmem:[%s3047_s1 + $0x48] sm:$0xff]  ;;  %v2406_v58 = vld [vmem:[%s3047_s1 + $0xc0] sm:$0xff] }
  0x1c   : > { %2430 = vmatpush.bf16.msra.mxu1 %v2385_v4  ;;  %2431 = vmatpush.bf16.msra.mxu2 %v2385_v4  ;;  %v1942_v59 = vld [vmem:[%s2522_s9 + $0xf0] sm:$0xf]  ;;  %v2334_v60 = vld [vmem:[%s2522_s9 + $0x100] sm:$0xf0]  ;;  %v1962_v8 = vld [vmem:[%s2522_s9 + $0x118] sm:$0xf] }
  0x1d   : > { %2432 = vmatpush.bf16.msra.mxu3 %v2385_v4  ;;  %1059 = vmatpush.bf16.msra.mxu0 %v2385_v4  ;;  %v2022_v61 = vld [vmem:[%s2522_s9 + $0x190] sm:$0xf]  ;;  %v2354_v62 = vld [vmem:[%s2522_s9 + $0x1a0] sm:$0xf0]  ;;  %v1943_v4 = vor.u32 %v2334_v60, %v1942_v59  ;;  %v2339_v9 = vld [vmem:[%s2522_s9 + $0x128] sm:$0xf0] }
  0x1e   : > { %v2102_v63 = vld [vmem:[%s2522_s9 + $0x230] sm:$0xf]  ;;  %v2374_v0 = vld [vmem:[%s2522_s9 + $0x240] sm:$0xf0]  ;;  %v2042_v10 = vld [vmem:[%s2522_s9 + $0x1b8] sm:$0xf] }
  0x1f   : > { %v1862_v1 = vld [vmem:[%s2522_s9 + $0x50] sm:$0xf]  ;;  %v2314_v2 = vld [vmem:[%s2522_s9 + $0x60] sm:$0xf0]  ;;  %v2359_v11 = vld [vmem:[%s2522_s9 + $0x1c8] sm:$0xf0] }
  0x20   : > { %2433 = vmatpush.bf16.msra.mxu1 %v2384_v5  ;;  %2434 = vmatpush.bf16.msra.mxu2 %v2384_v5  ;;  %v2390_v3 = vld [vmem:[%s3047_s1 + $0x40] sm:$0xff]  ;;  %v2122_v12 = vld [vmem:[%s2522_s9 + $0x258] sm:$0xf]  ;;  %v2379_v13 = vld [vmem:[%s2522_s9 + $0x268] sm:$0xf0] }
  0x21   : > { %2435 = vmatpush.bf16.msra.mxu3 %v2384_v5  ;;  %1060 = vmatpush.bf16.msra.mxu0 %v2384_v5  ;;  %v2023_v5 = vor.u32 %v2354_v62, %v2022_v61  ;;  %v1882_v14 = vld [vmem:[%s2522_s9 + $0x78] sm:$0xf]  ;;  %v2319_v15 = vld [vmem:[%s2522_s9 + $0x88] sm:$0xf0]  ;;  %v1850_v34 = vld [vmem:[%s2522_s9 + $0x30] sm:$0xf] }
  0x22   : > { %v2310_v35 = vld [vmem:[%s2522_s9 + $0x40] sm:$0xf0]  ;;  %v2308_v36 = vld [vmem:[%s2522_s9 + $0x34] sm:$0xf]  ;;  %v1852_v37 = vld [vmem:[%s2522_s9 + $0x44] sm:$0xf0] }
  0x23   : > { %v1858_v38 = vld [vmem:[%s2522_s9 + $0x38] sm:$0xf]  ;;  %v2311_v39 = vld [vmem:[%s2522_s9 + $0x48] sm:$0xf0]  ;;  %v1851_v41 = vor.u32 %v2310_v35, %v1850_v34  ;;  %v2320_v59 = vld [vmem:[%s2522_s9 + $0x90] sm:$0xf0] }
  0x24   : > { %2436 = vmatpush.bf16.msra.mxu1 %v2383_v6  ;;  %2437 = vmatpush.bf16.msra.mxu2 %v2383_v6  ;;  %v2318_v60 = vld [vmem:[%s2522_s9 + $0x84] sm:$0xf]  ;;  %v1892_v61 = vld [vmem:[%s2522_s9 + $0x94] sm:$0xf0]  ;;  %v1898_v62 = vld [vmem:[%s2522_s9 + $0x88] sm:$0xf] }
  0x25   : > { %2438 = vmatpush.bf16.msra.mxu3 %v2383_v6  ;;  %1061 = vmatpush.bf16.msra.mxu0 %v2383_v6  ;;  %v2103_v6 = vor.u32 %v2374_v0, %v2102_v63  ;;  %v2321_v63 = vld [vmem:[%s2522_s9 + $0x98] sm:$0xf0] }
  0x28   : > { %2439 = vmatpush.bf16.msra.mxu1 %v2382_v7  ;;  %2440 = vmatpush.bf16.msra.mxu2 %v2382_v7 }
  0x29   : > { %2441 = vmatpush.bf16.msra.mxu3 %v2382_v7  ;;  %1062 = vmatpush.bf16.msra.mxu0 %v2382_v7  ;;  %v1863_v7 = vor.u32 %v2314_v2, %v1862_v1  ;;  %v1895_v2 = vor.u32 %v2318_v60, %v1892_v61 }
  0x2b   : > { %1083 = vmatmul.bf16.vlgmr.msra.gmra.mxu1 %v1903_v18  ;;  %1103 = vmatmul.bf16.vlgmr.msra.gmra.mxu2 %v1983_v19  ;;  %v2123_v18 = vor.u32 %v2379_v13, %v2122_v12  ;;  %v1883_v19 = vor.u32 %v2319_v15, %v1882_v14 }
  0x2c   : > { %1233 = vmatpush.bf16.msrb.mxu2 %v2405_v16  ;;  %1123 = vmatmul.bf16.vlgmr.msra.gmra.mxu3 %v2063_v20  ;;  %v1963_v16 = vor.u32 %v2339_v9, %v1962_v8  ;;  %v2302_v20 = vld [vmem:[%s2522_s9 + $0x4] sm:$0xf]  ;;  %v2323_v8 = vld [vmem:[%s2522_s9 + $0xac] sm:$0xf]  ;;  %v1912_v9 = vld [vmem:[%s2522_s9 + $0xbc] sm:$0xf0] }
  0x2d   : > { %1322 = vmatpush.bf16.msrb.mxu3 %v2413_v17  ;;  %1063 = vmatmul.bf16.vlgmr.msra.gmra.mxu0 %v1823_v21  ;;  %v2043_v17 = vor.u32 %v2359_v11, %v2042_v10  ;;  %v1824_v21 = vld [vmem:[%s2522_s9 + $0x14] sm:$0xf0]  ;;  %v1918_v10 = vld [vmem:[%s2522_s9 + $0xb0] sm:$0xf]  ;;  %v2326_v11 = vld [vmem:[%s2522_s9 + $0xc0] sm:$0xf0]  ;;  %v1915_v15 = vor.u32 %v2323_v8, %v1912_v9 }
  0x2e   : > { %1144 = vmatpush.bf16.msrb.mxu1 %v2397_v22  ;;  %1415 = vmatpush.bf16.msrb.mxu0 %v2417_v23  ;;  %v1830_v22 = vld [vmem:[%s2522_s9 + $0x8] sm:$0xf]  ;;  %v2305_v23 = vld [vmem:[%s2522_s9 + $0x18] sm:$0xf0] }
  0x30   : > { %1234 = vmatpush.bf16.msrb.mxu2 %v2404_v24  ;;  %v2303_v24 = vld [vmem:[%s2522_s9 + $0xc] sm:$0xf] }
  0x31   : > { %1323 = vmatpush.bf16.msrb.mxu3 %v2412_v25  ;;  %v1832_v25 = vld [vmem:[%s2522_s9 + $0x1c] sm:$0xf0] }
  0x32   : > { %1145 = vmatpush.bf16.msrb.mxu1 %v2396_v26  ;;  %1416 = vmatpush.bf16.msrb.mxu0 %v2416_v27  ;;  %v1838_v26 = vld [vmem:[%s2522_s9 + $0x10] sm:$0xf]  ;;  %v2306_v27 = vld [vmem:[%s2522_s9 + $0x20] sm:$0xf0] }
  0x34   : > { %1235 = vmatpush.bf16.msrb.mxu2 %v2403_v28  ;;  %v1827_v28 = vor.u32 %v2302_v20, %v1824_v21 }
  0x35   : > { %1324 = vmatpush.bf16.msrb.mxu3 %v2411_v29  ;;  %v1831_v29 = vor.u32 %v2305_v23, %v1830_v22  ;;  %v2327_v22 = vld [vmem:[%s2522_s9 + $0xcc] sm:$0xf]  ;;  %v1924_v23 = vld [vmem:[%s2522_s9 + $0xdc] sm:$0xf0] }
  0x36   : > { %1146 = vmatpush.bf16.msrb.mxu1 %v2395_v30  ;;  %1417 = vmatpush.bf16.msrb.mxu0 %v2415_v31  ;;  %v1835_v30 = vor.u32 %v2303_v24, %v1832_v25  ;;  %v1839_v31 = vor.u32 %v2306_v27, %v1838_v26  ;;  %v1930_v24 = vld [vmem:[%s2522_s9 + $0xd0] sm:$0xf]  ;;  %v2330_v25 = vld [vmem:[%s2522_s9 + $0xe0] sm:$0xf0]  ;;  %v2328_v26 = vld [vmem:[%s2522_s9 + $0xd4] sm:$0xf] }
  0x37   : > { %v1932_v27 = vld [vmem:[%s2522_s9 + $0xe4] sm:$0xf0] }
  0x38   : > { %1236 = vmatpush.bf16.msrb.mxu2 %v2402_v32  ;;  %v2307_v32 = vld [vmem:[%s2522_s9 + $0x2c] sm:$0xf]  ;;  %v1935_v35 = vor.u32 %v2328_v26, %v1932_v27  ;;  %v1990_v26 = vld [vmem:[%s2522_s9 + $0x148] sm:$0xf]  ;;  %v2345_v27 = vld [vmem:[%s2522_s9 + $0x158] sm:$0xf0] }
  0x39   : > { %1325 = vmatpush.bf16.msrb.mxu3 %v2410_v33  ;;  %v1844_v33 = vld [vmem:[%s2522_s9 + $0x3c] sm:$0xf0] }
  0x3a   : > { %1147 = vmatpush.bf16.msrb.mxu1 %v2394_v42  ;;  %1418 = vmatpush.bf16.msrb.mxu0 %v2414_v53  ;;  %v1847_v40 = vor.u32 %v2307_v32, %v1844_v33  ;;  %v1855_v42 = vor.u32 %v2308_v36, %v1852_v37  ;;  %v1927_v32 = vor.u32 %v2327_v22, %v1924_v23 }
  0x3b   : > { %1088 = vmatmul.bf16.gmra.mxu1 %v1923_v45  ;;  %1108 = vmatmul.bf16.gmra.mxu2 %v2003_v46  ;;  %v1864_v45 = vld [vmem:[%s2522_s9 + $0x64] sm:$0xf0]  ;;  %v1870_v46 = vld [vmem:[%s2522_s9 + $0x58] sm:$0xf]  ;;  %v1931_v33 = vor.u32 %v2330_v25, %v1930_v24  ;;  %v2342_v24 = vld [vmem:[%s2522_s9 + $0x144] sm:$0xf] }
  0x3c   : > { %1237 = vmatpush.bf16.msrb.mxu2 %v2401_v43  ;;  %1128 = vmatmul.bf16.gmra.mxu3 %v2083_v47  ;;  %v1859_v43 = vor.u32 %v2311_v39, %v1858_v38  ;;  %v2315_v47 = vld [vmem:[%s2522_s9 + $0x68] sm:$0xf0]  ;;  %v1984_v25 = vld [vmem:[%s2522_s9 + $0x154] sm:$0xf0] }
  0x3d   : > { %1326 = vmatpush.bf16.msrb.mxu3 %v2409_v44  ;;  %1068 = vmatmul.bf16.gmra.mxu0 %v1843_v48  ;;  %v2312_v44 = vld [vmem:[%s2522_s9 + $0x54] sm:$0xf]  ;;  %v2313_v48 = vld [vmem:[%s2522_s9 + $0x5c] sm:$0xf]  ;;  %v1871_v53 = vor.u32 %v2315_v47, %v1870_v46  ;;  %v1952_v47 = vld [vmem:[%s2522_s9 + $0x10c] sm:$0xf0] }
  0x3e   : > { %1148 = vmatpush.bf16.msrb.mxu1 %v2393_v49  ;;  %v1872_v49 = vld [vmem:[%s2522_s9 + $0x6c] sm:$0xf0]  ;;  %v2333_v46 = vld [vmem:[%s2522_s9 + $0xfc] sm:$0xf] }
  0x40   : > { %1238 = vmatpush.bf16.msrb.mxu2 %v2400_v50  ;;  %v1878_v50 = vld [vmem:[%s2522_s9 + $0x60] sm:$0xf] }
  0x41   : > { %1327 = vmatpush.bf16.msrb.mxu3 %v2408_v51  ;;  %v2316_v51 = vld [vmem:[%s2522_s9 + $0x70] sm:$0xf0] }
  0x42   : > { %1149 = vmatpush.bf16.msrb.mxu1 %v2392_v52  ;;  %v1867_v52 = vor.u32 %v2312_v44, %v1864_v45  ;;  %v1950_v44 = vld [vmem:[%s2522_s9 + $0xf8] sm:$0xf]  ;;  %v2335_v45 = vld [vmem:[%s2522_s9 + $0x108] sm:$0xf0] }
  0x44   : > { %1239 = vmatpush.bf16.msrb.mxu2 %v2399_v54  ;;  %v1875_v54 = vor.u32 %v2313_v48, %v1872_v49  ;;  %v1958_v48 = vld [vmem:[%s2522_s9 + $0x100] sm:$0xf]  ;;  %v2336_v49 = vld [vmem:[%s2522_s9 + $0x110] sm:$0xf0] }
  0x45   : > { %1328 = vmatpush.bf16.msrb.mxu3 %v2407_v55  ;;  %v1879_v55 = vor.u32 %v2316_v51, %v1878_v50 }
  0x46   : > { %1150 = vmatpush.bf16.msrb.mxu1 %v2391_v56  ;;  %v2317_v56 = vld [vmem:[%s2522_s9 + $0x7c] sm:$0xf] }
  0x48   : > { %1240 = vmatpush.bf16.msrb.mxu2 %v2398_v57  ;;  %v1884_v57 = vld [vmem:[%s2522_s9 + $0x8c] sm:$0xf0] }
  0x49   : > { %1329 = vmatpush.bf16.msrb.mxu3 %v2406_v58  ;;  %v1890_v58 = vld [vmem:[%s2522_s9 + $0x80] sm:$0xf]  ;;  %v1887_v0 = vor.u32 %v2317_v56, %v1884_v57  ;;  %v1959_v56 = vor.u32 %v2336_v49, %v1958_v48 }
  0x4a   : > { %1151 = vmatpush.bf16.msrb.mxu1 %v2390_v3  ;;  %v1891_v1 = vor.u32 %v2320_v59, %v1890_v58  ;;  %v1899_v3 = vor.u32 %v2321_v63, %v1898_v62  ;;  %v2337_v62 = vld [vmem:[%s2522_s9 + $0x11c] sm:$0xf]  ;;  %v1964_v63 = vld [vmem:[%s2522_s9 + $0x12c] sm:$0xf0] }
  0x4b   : > { %1093 = vmatmul.bf16.gmra.mxu1 %v1943_v4  ;;  %1113 = vmatmul.bf16.gmra.mxu2 %v2023_v5  ;;  %v2322_v4 = vld [vmem:[%s2522_s9 + $0xa4] sm:$0xf]  ;;  %v1904_v5 = vld [vmem:[%s2522_s9 + $0xb4] sm:$0xf0]  ;;  %v1967_v8 = vor.u32 %v2337_v62, %v1964_v63 }
  0x4c   : > { %1133 = vmatmul.bf16.gmra.mxu3 %v2103_v6  ;;  %v1910_v6 = vld [vmem:[%s2522_s9 + $0xa8] sm:$0xf]  ;;  %v1907_v12 = vor.u32 %v2322_v4, %v1904_v5  ;;  %v2341_v5 = vld [vmem:[%s2522_s9 + $0x138] sm:$0xf0] }
  0x4d   : > { %1073 = vmatmul.bf16.gmra.mxu0 %v1863_v7  ;;  %v2325_v7 = vld [vmem:[%s2522_s9 + $0xb8] sm:$0xf0]  ;;  %v1978_v4 = vld [vmem:[%s2522_s9 + $0x128] sm:$0xf] }
  0x4e   : > { %v1911_v13 = vor.u32 %v2325_v7, %v1910_v6 }
  0x5b   : > { %1098 = vmatmul.bf16.gmra.mxu1 %v1963_v16  ;;  %1118 = vmatmul.bf16.gmra.mxu2 %v2043_v17  ;;  %v1919_v16 = vor.u32 %v2326_v11, %v1918_v10 }
  0x5c   : > { %1138 = vmatmul.bf16.gmra.mxu3 %v2123_v18 }
  0x5d   : > { %1078 = vmatmul.bf16.gmra.mxu0 %v1883_v19 }
  0x6b   : > { %1152 = vmatmul.bf16.vlgmr.msrb.gmra.mxu1 %v1827_v28  ;;  %1241 = vmatmul.bf16.vlgmr.msrb.gmra.mxu2 %v1831_v29  ;;  %v1938_v28 = vld [vmem:[%s2522_s9 + $0xd8] sm:$0xf]  ;;  %v2331_v29 = vld [vmem:[%s2522_s9 + $0xe8] sm:$0xf0] }
  0x6c   : > { %1330 = vmatmul.bf16.vlgmr.msrb.gmra.mxu3 %v1835_v30  ;;  %v1939_v36 = vor.u32 %v2331_v29, %v1938_v28  ;;  %v2343_v28 = vld [vmem:[%s2522_s9 + $0x14c] sm:$0xf]  ;;  %v1992_v29 = vld [vmem:[%s2522_s9 + $0x15c] sm:$0xf0] }
  0x6d   : > { %2284 = vmatmul.msk.bf16.vlgmr.msrb.gmra.mxu0 %vm1006_vm0, %v1839_v31 }
  0x7b   : > { %1157 = vmatmul.bf16.gmra.mxu1 %v1847_v40  ;;  %1246 = vmatmul.bf16.gmra.mxu2 %v1851_v41 }
  0x7c   : > { %1335 = vmatmul.bf16.gmra.mxu3 %v1855_v42  ;;  %v2332_v42 = vld [vmem:[%s2522_s9 + $0xf4] sm:$0xf] }
  0x7d   : > { %2285 = vmatmul.msk.bf16.gmra.mxu0 %vm1006_vm0, %v1859_v43  ;;  %v1944_v43 = vld [vmem:[%s2522_s9 + $0x104] sm:$0xf0] }
  0x8b   : > { %1162 = vmatmul.bf16.gmra.mxu1 %v1867_v52  ;;  %1251 = vmatmul.bf16.gmra.mxu2 %v1871_v53  ;;  %v1947_v52 = vor.u32 %v2332_v42, %v1944_v43  ;;  %v1951_v53 = vor.u32 %v2335_v45, %v1950_v44  ;;  %v1987_v42 = vor.u32 %v2342_v24, %v1984_v25 }
  0x8c   : > { %1340 = vmatmul.bf16.gmra.mxu3 %v1875_v54  ;;  %v1991_v43 = vor.u32 %v2345_v27, %v1990_v26  ;;  %v1995_v45 = vor.u32 %v2343_v28, %v1992_v29 }
  0x8d   : > { %2286 = vmatmul.msk.bf16.gmra.mxu0 %vm1006_vm0, %v1879_v55  ;;  %v1955_v55 = vor.u32 %v2333_v46, %v1952_v47 }
  0x9b   : > { %1167 = vmatmul.bf16.gmra.mxu1 %v1887_v0  ;;  %1256 = vmatmul.bf16.gmra.mxu2 %v1891_v1  ;;  %v1970_v0 = vld [vmem:[%s2522_s9 + $0x120] sm:$0xf]  ;;  %v2340_v1 = vld [vmem:[%s2522_s9 + $0x130] sm:$0xf0] }
  0x9c   : > { %1345 = vmatmul.bf16.gmra.mxu3 %v1895_v2  ;;  %v2338_v2 = vld [vmem:[%s2522_s9 + $0x124] sm:$0xf]  ;;  %v1971_v9 = vor.u32 %v2340_v1, %v1970_v0  ;;  %v2347_v0 = vld [vmem:[%s2522_s9 + $0x16c] sm:$0xf]  ;;  %v2004_v1 = vld [vmem:[%s2522_s9 + $0x17c] sm:$0xf0] }
  0x9d   : > { %2287 = vmatmul.msk.bf16.gmra.mxu0 %vm1006_vm0, %v1899_v3  ;;  %v1972_v3 = vld [vmem:[%s2522_s9 + $0x134] sm:$0xf0]  ;;  %v2007_v25 = vor.u32 %v2347_v0, %v2004_v1 }
  0x9e   : > { %v1975_v11 = vor.u32 %v2338_v2, %v1972_v3  ;;  %v2010_v2 = vld [vmem:[%s2522_s9 + $0x170] sm:$0xf]  ;;  %v2348_v3 = vld [vmem:[%s2522_s9 + $0x174] sm:$0xf] }
  0xa8   : > { %v2687_v14 = vpop.f32.mrf.mxu1 }
  0xaa   : > { %v2689_v17 = vpop.f32.mrf.mxu0 }
  0xab   : > { %1172 = vmatmul.bf16.gmra.mxu1 %v1907_v12  ;;  %1261 = vmatmul.bf16.gmra.mxu2 %v1911_v13  ;;  %v1979_v12 = vor.u32 %v2341_v5, %v1978_v4  ;;  %v2012_v4 = vld [vmem:[%s2522_s9 + $0x184] sm:$0xf0] }
  0xac   : > { %1350 = vmatmul.bf16.gmra.mxu3 %v1915_v15  ;;  %v2015_v28 = vor.u32 %v2348_v3, %v2012_v4  ;;  %v2355_v3 = vld [vmem:[%s2522_s9 + $0x1a8] sm:$0xf0]  ;;  %v2353_v4 = vld [vmem:[%s2522_s9 + $0x19c] sm:$0xf] }
  0xad   : > { %2288 = vmatmul.msk.bf16.gmra.mxu0 %vm1006_vm0, %v1919_v16 }
  0xae   : > { %v2692_v18 = vpop.f32.mrf.mxu2 }
  0xaf   : > { %v2694_v19 = vpop.f32.mrf.mxu3 }
  0xb0   : > { %v2696_v20 = vpop.f32.mrf.mxu1 }
  0xb2   : > { %v2698_v21 = vpop.f32.mrf.mxu0 }
  0xb6   : > { %v2708_v30 = vpop.f32.mrf.mxu2 }
  0xb7   : > { %v2710_v31 = vpop.f32.mrf.mxu3 }
  0xb8   : > { %v2712_v34 = vpop.f32.mrf.mxu1 }
  0xba   : > { %v2714_v37 = vpop.f32.mrf.mxu0 }
  0xbb   : > { %1177 = vmatmul.bf16.gmra.mxu1 %v1927_v32  ;;  %1266 = vmatmul.bf16.gmra.mxu2 %v1931_v33  ;;  %v1998_v32 = vld [vmem:[%s2522_s9 + $0x150] sm:$0xf]  ;;  %v2346_v33 = vld [vmem:[%s2522_s9 + $0x160] sm:$0xf0] }
  0xbc   : > { %1355 = vmatmul.bf16.gmra.mxu3 %v1935_v35  ;;  %v1999_v46 = vor.u32 %v2346_v33, %v1998_v32 }
  0xbd   : > { %2289 = vmatmul.msk.bf16.gmra.mxu0 %vm1006_vm0, %v1939_v36 }
  0xbe   : > { %v2717_v38 = vpop.f32.mrf.mxu2 }
  0xbf   : > { %v2719_v39 = vpop.f32.mrf.mxu3 }
  0xc0   : > { %v2721_v40 = vpop.f32.mrf.mxu1 }
  0xc2   : > { %v2723_v41 = vpop.f32.mrf.mxu0 }
  0xc6   : > { %v2733_v50 = vpop.f32.mrf.mxu2 }
  0xc7   : > { %v2735_v51 = vpop.f32.mrf.mxu3 }
  0xc8   : > { %v2737_v54 = vpop.f32.mrf.mxu1 }
  0xca   : > { %v2739_v57 = vpop.f32.mrf.mxu0 }
  0xcb   : > { %1182 = vmatmul.bf16.gmra.mxu1 %v1947_v52  ;;  %1271 = vmatmul.bf16.gmra.mxu2 %v1951_v53 }
  0xcc   : > { %1360 = vmatmul.bf16.gmra.mxu3 %v1955_v55 }
  0xcd   : > { %2290 = vmatmul.msk.bf16.gmra.mxu0 %vm1006_vm0, %v1959_v56 }
  0xce   : > { %v2742_v58 = vpop.f32.mrf.mxu2 }
  0xcf   : > { %v2744_v59 = vpop.f32.mrf.mxu3 }
  0xd0   : > { %v2746_v60 = vpop.f32.mrf.mxu1 }
  0xd2   : > { %v2748_v61 = vpop.f32.mrf.mxu0 }
  0xd6   : > { %v2758_v6 = vpop.f32.mrf.mxu2 }
  0xd7   : > { %v2760_v7 = vpop.f32.mrf.mxu3 }
  0xd8   : > { %v2762_v10 = vpop.f32.mrf.mxu1 }
  0xda   : > { %v2764_v13 = vpop.f32.mrf.mxu0 }
  0xdb   : > { %1187 = vmatmul.bf16.gmra.mxu1 %v1967_v8  ;;  %1276 = vmatmul.bf16.gmra.mxu2 %v1971_v9  ;;  %v2018_v8 = vld [vmem:[%s2522_s9 + $0x178] sm:$0xf]  ;;  %v2351_v9 = vld [vmem:[%s2522_s9 + $0x188] sm:$0xf0] }
  0xdc   : > { %1365 = vmatmul.bf16.gmra.mxu3 %v1975_v11  ;;  %v2019_v29 = vor.u32 %v2351_v9, %v2018_v8 }
  0xdd   : > { %2291 = vmatmul.msk.bf16.gmra.mxu0 %vm1006_vm0, %v1979_v12 }
  0xde   : > { %v2767_v15 = vpop.f32.mrf.mxu2 }
  0xdf   : > { %v2769_v16 = vpop.f32.mrf.mxu3 }
  0xe0   : > { %v2771_v22 = vpop.f32.mrf.mxu1 }
  0xe2   : > { %v2773_v23 = vpop.f32.mrf.mxu0 }
  0xe6   : > { %v2783_v35 = vpop.f32.mrf.mxu2 }
  0xe7   : > { %v2785_v36 = vpop.f32.mrf.mxu3 }
  0xe8   : > { %v1153_v44 = vpop.f32.mrf.mxu1 }
  0xe9   : > { %v1154_v48 = vadd.f32 %v1153_v44, %v2689_v17  ;;  %v2350_v17 = vld [vmem:[%s2522_s9 + $0x180] sm:$0xf0] }
  0xea   : > { %v1420_v47 = vpop.f32.mrf.mxu0  ;;  %v2011_v26 = vor.u32 %v2350_v17, %v2010_v2  ;;  %v2352_v2 = vld [vmem:[%s2522_s9 + $0x194] sm:$0xf]  ;;  %v2030_v17 = vld [vmem:[%s2522_s9 + $0x198] sm:$0xf] }
  0xeb   : > { %1192 = vmatmul.bf16.gmra.mxu1 %v1987_v42  ;;  %1281 = vmatmul.bf16.gmra.mxu2 %v1991_v43 }
  0xec   : > { %1370 = vmatmul.bf16.gmra.mxu3 %v1995_v45 }
  0xed   : > { %2292 = vmatmul.msk.bf16.gmra.mxu0 %vm1006_vm0, %v1999_v46 }
  0xee   : > { %v1242_v49 = vpop.f32.mrf.mxu2 }
  0xef   : > { %v1243_v52 = vadd.f32 %v1242_v49, %v1154_v48  ;;  %v1331_v53 = vpop.f32.mrf.mxu3 }
  0xf0   : > { %v1155_v55 = vpop.f32.mrf.mxu1 }
  0xf1   : > { %v1332_v56 = vadd.f32 %v1331_v53, %v1243_v52  ;;  %v1156_v5 = vadd.f32 %v1155_v55, %v2698_v21 }
  0xf2   : > { %v1422_v62 = vpop.f32.mrf.mxu0 }
  0xf3   : > { %v1421_v63 = vadd.f32 %v1420_v47, %v1332_v56 }
  0xf5   : > { %1500 = vst.msk [vmem:[%s2793_s30] sm:$0xff] %vm1006_vm0, %v1421_v63  ;;  %v1601_v42 = vmul.f32 %v1421_v63, %v1421_v63  ;;  %v1532_v21 = vsel %vm1006_vm0, %v1421_v63, 0.0 }
  0xf6   : > { %v1244_v11 = vpop.f32.mrf.mxu2 }
  0xf7   : > { %v1245_v12 = vadd.f32 %v1244_v11, %v1156_v5  ;;  %v1333_v24 = vpop.f32.mrf.mxu3  ;;  %v1633_v49 = vsel %vm1006_vm0, %v1601_v42, 0.0  ;;  %v2032_v5 = vld [vmem:[%s2522_s9 + $0x1ac] sm:$0xf0] }
  0xf8   : > { %v1158_v27 = vpop.f32.mrf.mxu1 }
  0xf9   : > { %v1334_v32 = vadd.f32 %v1333_v24, %v1245_v12  ;;  %v1159_v46 = vadd.f32 %v1158_v27, %v2714_v37  ;;  %v2024_v37 = vld [vmem:[%s2522_s9 + $0x1a4] sm:$0xf0]  ;;  %v2038_v12 = vld [vmem:[%s2522_s9 + $0x1a0] sm:$0xf]  ;;  %v2356_v24 = vld [vmem:[%s2522_s9 + $0x1b0] sm:$0xf0] }
  0xfa   : > { %v1425_v33 = vpop.f32.mrf.mxu0 }
  0xfb   : > { %v1423_v43 = vadd.f32 %v1422_v62, %v1334_v32  ;;  %1197 = vmatmul.bf16.gmra.mxu1 %v2007_v25  ;;  %1286 = vmatmul.bf16.gmra.mxu2 %v2011_v26  ;;  %v2027_v32 = vor.u32 %v2352_v2, %v2024_v37 }
  0xfc   : > { %1375 = vmatmul.bf16.gmra.mxu3 %v2015_v28 }
  0xfd   : > { %2293 = vmatmul.msk.bf16.gmra.mxu0 %vm1006_vm0, %v2019_v29  ;;  %1501 = vst.msk [vmem:[%s2793_s30 + $0x8] sm:$0xff] %vm1006_vm0, %v1423_v43  ;;  %v1533_v44 = vsel %vm1006_vm0, %v1423_v43, 0.0  ;;  %v1602_v45 = vmul.f32 %v1423_v43, %v1423_v43 }
  0xfe   : > { %v1534_v47 = vadd.f32 %v1533_v44, %v1532_v21  ;;  %v1247_v48 = vpop.f32.mrf.mxu2  ;;  %v2035_v21 = vor.u32 %v2353_v4, %v2032_v5  ;;  %v2039_v44 = vor.u32 %v2356_v24, %v2038_v12  ;;  %v2050_v4 = vld [vmem:[%s2522_s9 + $0x1c0] sm:$0xf]  ;;  %v2360_v5 = vld [vmem:[%s2522_s9 + $0x1d0] sm:$0xf0]  ;;  %v2058_v24 = vld [vmem:[%s2522_s9 + $0x1c8] sm:$0xf] }
  0xff   : > { %v1634_v52 = vsel %vm1006_vm0, %v1602_v45, 0.0  ;;  %v1248_v53 = vadd.f32 %v1247_v48, %v1159_v46  ;;  %v1336_v55 = vpop.f32.mrf.mxu3 }
 0x100   : > { %v1635_v56 = vadd.f32 %v1634_v52, %v1633_v49  ;;  %v1160_v62 = vpop.f32.mrf.mxu1 }
 0x101   : > { %v1337_v63 = vadd.f32 %v1336_v55, %v1248_v53  ;;  %v1161_v11 = vadd.f32 %v1160_v62, %v2723_v41 }
 0x102   : > { %v1427_v0 = vpop.f32.mrf.mxu0 }
 0x103   : > { %v1426_v1 = vadd.f32 %v1425_v33, %v1337_v63  ;;  %v2031_v33 = vor.u32 %v2355_v3, %v2030_v17  ;;  %v2357_v17 = vld [vmem:[%s2522_s9 + $0x1bc] sm:$0xf]  ;;  %v2044_v3 = vld [vmem:[%s2522_s9 + $0x1cc] sm:$0xf0] }
 0x105   : > { %1502 = vst.msk [vmem:[%s2793_s30 + $0x10] sm:$0xff] %vm1006_vm0, %v1426_v1  ;;  %v1535_v8 = vsel %vm1006_vm0, %v1426_v1, 0.0  ;;  %v1603_v9 = vmul.f32 %v1426_v1, %v1426_v1 }
 0x106   : > { %v1536_v25 = vadd.f32 %v1535_v8, %v1534_v47  ;;  %v1249_v26 = vpop.f32.mrf.mxu2  ;;  %v2052_v8 = vld [vmem:[%s2522_s9 + $0x1d4] sm:$0xf0] }
 0x107   : > { %v1636_v27 = vsel %vm1006_vm0, %v1603_v9, 0.0  ;;  %v1250_v28 = vadd.f32 %v1249_v26, %v1161_v11  ;;  %v1338_v29 = vpop.f32.mrf.mxu3 }
 0x108   : > { %v1637_v42 = vadd.f32 %v1636_v27, %v1635_v56  ;;  %v1163_v43 = vpop.f32.mrf.mxu1 }
 0x109   : > { %v1339_v45 = vadd.f32 %v1338_v29, %v1250_v28  ;;  %v1164_v49 = vadd.f32 %v1163_v43, %v2739_v57  ;;  %v2358_v57 = vld [vmem:[%s2522_s9 + $0x1c4] sm:$0xf] }
 0x10a   : > { %v1430_v46 = vpop.f32.mrf.mxu0 }
 0x10b   : > { %v1428_v48 = vadd.f32 %v1427_v0, %v1339_v45  ;;  %1202 = vmatmul.bf16.gmra.mxu1 %v2027_v32  ;;  %1291 = vmatmul.bf16.gmra.mxu2 %v2031_v33  ;;  %v2047_v33 = vor.u32 %v2357_v17, %v2044_v3  ;;  %v2362_v17 = vld [vmem:[%s2522_s9 + $0x1e4] sm:$0xf]  ;;  %v2064_v3 = vld [vmem:[%s2522_s9 + $0x1f4] sm:$0xf0] }
 0x10c   : > { %1380 = vmatmul.bf16.gmra.mxu3 %v2035_v21 }
 0x10d   : > { %2294 = vmatmul.msk.bf16.gmra.mxu0 %vm1006_vm0, %v2039_v44  ;;  %1503 = vst.msk [vmem:[%s2793_s30 + $0x18] sm:$0xff] %vm1006_vm0, %v1428_v48  ;;  %v1537_v41 = vsel %vm1006_vm0, %v1428_v48, 0.0  ;;  %v1604_v47 = vmul.f32 %v1428_v48, %v1428_v48  ;;  %v2055_v44 = vor.u32 %v2358_v57, %v2052_v8  ;;  %v2072_v57 = vld [vmem:[%s2522_s9 + $0x1fc] sm:$0xf0] }
 0x10e   : > { %v1538_v52 = vadd.f32 %v1537_v41, %v1536_v25  ;;  %v1252_v53 = vpop.f32.mrf.mxu2  ;;  %v2361_v25 = vld [vmem:[%s2522_s9 + $0x1d8] sm:$0xf0] }
 0x10f   : > { %v1638_v55 = vsel %vm1006_vm0, %v1604_v47, 0.0  ;;  %v1253_v56 = vadd.f32 %v1252_v53, %v1164_v49  ;;  %v1341_v62 = vpop.f32.mrf.mxu3  ;;  %v2059_v45 = vor.u32 %v2361_v25, %v2058_v24  ;;  %v2366_v24 = vld [vmem:[%s2522_s9 + $0x200] sm:$0xf0] }
 0x110   : > { %v1639_v63 = vadd.f32 %v1638_v55, %v1637_v42  ;;  %v1165_v0 = vpop.f32.mrf.mxu1  ;;  %v2051_v42 = vor.u32 %v2360_v5, %v2050_v4  ;;  %v2070_v4 = vld [vmem:[%s2522_s9 + $0x1e8] sm:$0xf]  ;;  %v2365_v5 = vld [vmem:[%s2522_s9 + $0x1f8] sm:$0xf0] }
 0x111   : > { %v1342_v1 = vadd.f32 %v1341_v62, %v1253_v56  ;;  %v1166_v12 = vadd.f32 %v1165_v0, %v2748_v61 }
 0x112   : > { %v1432_v2 = vpop.f32.mrf.mxu0 }
 0x113   : > { %v1431_v37 = vadd.f32 %v1430_v46, %v1342_v1 }
 0x115   : > { %1504 = vst.msk [vmem:[%s2793_s30 + $0x20] sm:$0xff] %vm1006_vm0, %v1431_v37  ;;  %v1539_v9 = vsel %vm1006_vm0, %v1431_v37, 0.0  ;;  %v1605_v11 = vmul.f32 %v1431_v37, %v1431_v37 }
 0x116   : > { %v1540_v26 = vadd.f32 %v1539_v9, %v1538_v52  ;;  %v1254_v27 = vpop.f32.mrf.mxu2 }
 0x117   : > { %v1640_v28 = vsel %vm1006_vm0, %v1605_v11, 0.0  ;;  %v1255_v29 = vadd.f32 %v1254_v27, %v1166_v12  ;;  %v1343_v32 = vpop.f32.mrf.mxu3  ;;  %v2078_v12 = vld [vmem:[%s2522_s9 + $0x1f0] sm:$0xf] }
 0x118   : > { %v1641_v43 = vadd.f32 %v1640_v28, %v1639_v63  ;;  %v1168_v21 = vpop.f32.mrf.mxu1 }
 0x119   : > { %v1344_v46 = vadd.f32 %v1343_v32, %v1255_v29  ;;  %v1169_v49 = vadd.f32 %v1168_v21, %v2764_v13  ;;  %v2363_v13 = vld [vmem:[%s2522_s9 + $0x1ec] sm:$0xf]  ;;  %v2067_v32 = vor.u32 %v2362_v17, %v2064_v3  ;;  %v2090_v17 = vld [vmem:[%s2522_s9 + $0x210] sm:$0xf]  ;;  %v2370_v3 = vld [vmem:[%s2522_s9 + $0x220] sm:$0xf0] }
 0x11a   : > { %v1435_v48 = vpop.f32.mrf.mxu0  ;;  %v2075_v21 = vor.u32 %v2363_v13, %v2072_v57 }
 0x11b   : > { %v1433_v41 = vadd.f32 %v1432_v2, %v1344_v46  ;;  %1207 = vmatmul.bf16.gmra.mxu1 %v2047_v33  ;;  %1296 = vmatmul.bf16.gmra.mxu2 %v2051_v42  ;;  %v2071_v33 = vor.u32 %v2365_v5, %v2070_v4  ;;  %v2092_v4 = vld [vmem:[%s2522_s9 + $0x224] sm:$0xf0] }
 0x11c   : > { %1385 = vmatmul.bf16.gmra.mxu3 %v2055_v44  ;;  %v2079_v44 = vor.u32 %v2366_v24, %v2078_v12 }
 0x11d   : > { %2295 = vmatmul.msk.bf16.gmra.mxu0 %vm1006_vm0, %v2059_v45  ;;  %1505 = vst.msk [vmem:[%s2793_s30 + $0x28] sm:$0xff] %vm1006_vm0, %v1433_v41  ;;  %v1541_v61 = vsel %vm1006_vm0, %v1433_v41, 0.0  ;;  %v1606_v47 = vmul.f32 %v1433_v41, %v1433_v41 }
 0x11e   : > { %v1542_v52 = vadd.f32 %v1541_v61, %v1540_v26  ;;  %v1257_v53 = vpop.f32.mrf.mxu2 }
 0x11f   : > { %v1642_v55 = vsel %vm1006_vm0, %v1606_v47, 0.0  ;;  %v1258_v56 = vadd.f32 %v1257_v53, %v1169_v49  ;;  %v1346_v62 = vpop.f32.mrf.mxu3 }
 0x120   : > { %v1643_v63 = vadd.f32 %v1642_v55, %v1641_v43  ;;  %v1170_v0 = vpop.f32.mrf.mxu1 }
 0x121   : > { %v1347_v1 = vadd.f32 %v1346_v62, %v1258_v56  ;;  %v1171_v11 = vadd.f32 %v1170_v0, %v2773_v23 }
 0x122   : > { %v1437_v2 = vpop.f32.mrf.mxu0 }
 0x123   : > { %v1436_v37 = vadd.f32 %v1435_v48, %v1347_v1 }
 0x125   : > { %1506 = vst.msk [vmem:[%s2793_s30 + $0x30] sm:$0xff] %vm1006_vm0, %v1436_v37  ;;  %v1543_v8 = vsel %vm1006_vm0, %v1436_v37, 0.0  ;;  %v1607_v9 = vmul.f32 %v1436_v37, %v1436_v37  ;;  %v2084_v37 = vld [vmem:[%s2522_s9 + $0x21c] sm:$0xf0] }
 0x126   : > { %v1544_v25 = vadd.f32 %v1543_v8, %v1542_v52  ;;  %v1259_v26 = vpop.f32.mrf.mxu2  ;;  %v2098_v8 = vld [vmem:[%s2522_s9 + $0x218] sm:$0xf] }
 0x127   : > { %v1644_v27 = vsel %vm1006_vm0, %v1607_v9, 0.0  ;;  %v1260_v28 = vadd.f32 %v1259_v26, %v1171_v11  ;;  %v1348_v29 = vpop.f32.mrf.mxu3  ;;  %v2371_v9 = vld [vmem:[%s2522_s9 + $0x228] sm:$0xf0] }
 0x128   : > { %v1645_v42 = vadd.f32 %v1644_v27, %v1643_v63  ;;  %v1173_v43 = vpop.f32.mrf.mxu1 }
 0x129   : > { %v1349_v45 = vadd.f32 %v1348_v29, %v1260_v28  ;;  %v1174_v61 = vadd.f32 %v1173_v43, %v2687_v14  ;;  %v2368_v14 = vld [vmem:[%s2522_s9 + $0x214] sm:$0xf]  ;;  %v2091_v28 = vor.u32 %v2370_v3, %v2090_v17 }
 0x12a   : > { %v1440_v46 = vpop.f32.mrf.mxu0 }
 0x12b   : > { %v1438_v48 = vadd.f32 %v1437_v2, %v1349_v45  ;;  %1212 = vmatmul.bf16.gmra.mxu1 %v2067_v32  ;;  %1301 = vmatmul.bf16.gmra.mxu2 %v2071_v33  ;;  %v2367_v2 = vld [vmem:[%s2522_s9 + $0x20c] sm:$0xf]  ;;  %v2095_v33 = vor.u32 %v2368_v14, %v2092_v4  ;;  %v2118_v14 = vld [vmem:[%s2522_s9 + $0x240] sm:$0xf]  ;;  %v2376_v4 = vld [vmem:[%s2522_s9 + $0x250] sm:$0xf0] }
 0x12c   : > { %1390 = vmatmul.bf16.gmra.mxu3 %v2075_v21  ;;  %v2087_v27 = vor.u32 %v2367_v2, %v2084_v37  ;;  %v2112_v2 = vld [vmem:[%s2522_s9 + $0x24c] sm:$0xf0] }
 0x12d   : > { %2296 = vmatmul.msk.bf16.gmra.mxu0 %vm1006_vm0, %v2079_v44  ;;  %1507 = vst.msk [vmem:[%s2793_s30 + $0x38] sm:$0xff] %vm1006_vm0, %v1438_v48  ;;  %v1545_v23 = vsel %vm1006_vm0, %v1438_v48, 0.0  ;;  %v1608_v41 = vmul.f32 %v1438_v48, %v1438_v48 }
 0x12e   : > { %v1546_v47 = vadd.f32 %v1545_v23, %v1544_v25  ;;  %v1262_v49 = vpop.f32.mrf.mxu2 }
 0x12f   : > { %v1646_v52 = vsel %vm1006_vm0, %v1608_v41, 0.0  ;;  %v1263_v53 = vadd.f32 %v1262_v49, %v1174_v61  ;;  %v1351_v55 = vpop.f32.mrf.mxu3 }
 0x130   : > { %v1647_v56 = vadd.f32 %v1646_v52, %v1645_v42  ;;  %v1175_v62 = vpop.f32.mrf.mxu1  ;;  %v2099_v42 = vor.u32 %v2371_v9, %v2098_v8 }
 0x131   : > { %v1352_v63 = vadd.f32 %v1351_v55, %v1263_v53  ;;  %v1176_v57 = vadd.f32 %v1175_v62, %v2696_v20  ;;  %v2372_v62 = vld [vmem:[%s2522_s9 + $0x234] sm:$0xf] }
 0x132   : > { %v1442_v0 = vpop.f32.mrf.mxu0 }
 0x133   : > { %v1441_v1 = vadd.f32 %v1440_v46, %v1352_v63  ;;  %v2104_v63 = vld [vmem:[%s2522_s9 + $0x244] sm:$0xf0] }
 0x135   : > { %1508 = vst.msk [vmem:[%s2793_s30 + $0x40] sm:$0xff] %vm1006_vm0, %v1441_v1  ;;  %v1547_v5 = vsel %vm1006_vm0, %v1441_v1, 0.0  ;;  %v1609_v13 = vmul.f32 %v1441_v1, %v1441_v1  ;;  %v2375_v1 = vld [vmem:[%s2522_s9 + $0x248] sm:$0xf0] }
 0x136   : > { %v1548_v11 = vadd.f32 %v1547_v5, %v1546_v47  ;;  %v1264_v12 = vpop.f32.mrf.mxu2 }
 0x137   : > { %v1648_v24 = vsel %vm1006_vm0, %v1609_v13, 0.0  ;;  %v1265_v25 = vadd.f32 %v1264_v12, %v1176_v57  ;;  %v1353_v26 = vpop.f32.mrf.mxu3 }
 0x138   : > { %v1649_v29 = vadd.f32 %v1648_v24, %v1647_v56  ;;  %v1178_v32 = vpop.f32.mrf.mxu1 }
 0x139   : > { %v1354_v43 = vadd.f32 %v1353_v26, %v1265_v25  ;;  %v1179_v46 = vadd.f32 %v1178_v32, %v2712_v34  ;;  %v2373_v34 = vld [vmem:[%s2522_s9 + $0x23c] sm:$0xf] }
 0x13a   : > { %v1445_v21 = vpop.f32.mrf.mxu0  ;;  %v2115_v26 = vor.u32 %v2373_v34, %v2112_v2 }
 0x13b   : > { %v1443_v44 = vadd.f32 %v1442_v0, %v1354_v43  ;;  %1217 = vmatmul.bf16.gmra.mxu1 %v2087_v27  ;;  %1306 = vmatmul.bf16.gmra.mxu2 %v2091_v28  ;;  %v2110_v0 = vld [vmem:[%s2522_s9 + $0x238] sm:$0xf]  ;;  %v2119_v27 = vor.u32 %v2376_v4, %v2118_v14 }
 0x13c   : > { %1395 = vmatmul.bf16.gmra.mxu3 %v2095_v33  ;;  %v2111_v12 = vor.u32 %v2375_v1, %v2110_v0  ;;  %v2138_v0 = vld [vmem:[%s2522_s9 + $0x268] sm:$0xf]  ;;  %v2381_v1 = vld [vmem:[%s2522_s9 + $0x278] sm:$0xf0] }
 0x13d   : > { %2297 = vmatmul.msk.bf16.gmra.mxu0 %vm1006_vm0, %v2099_v42  ;;  %1509 = vst.msk [vmem:[%s2793_s30 + $0x48] sm:$0xff] %vm1006_vm0, %v1443_v44  ;;  %v1549_v20 = vsel %vm1006_vm0, %v1443_v44, 0.0  ;;  %v1610_v45 = vmul.f32 %v1443_v44, %v1443_v44 }
 0x13e   : > { %v1550_v48 = vadd.f32 %v1549_v20, %v1548_v11  ;;  %v1267_v23 = vpop.f32.mrf.mxu2  ;;  %v2107_v11 = vor.u32 %v2372_v62, %v2104_v63 }
 0x13f   : > { %v1650_v41 = vsel %vm1006_vm0, %v1610_v45, 0.0  ;;  %v1268_v61 = vadd.f32 %v1267_v23, %v1179_v46  ;;  %v1356_v47 = vpop.f32.mrf.mxu3 }
 0x140   : > { %v1651_v49 = vadd.f32 %v1650_v41, %v1649_v29  ;;  %v1180_v52 = vpop.f32.mrf.mxu1 }
 0x141   : > { %v1357_v53 = vadd.f32 %v1356_v47, %v1268_v61  ;;  %v1181_v3 = vadd.f32 %v1180_v52, %v2721_v40  ;;  %v2377_v47 = vld [vmem:[%s2522_s9 + $0x25c] sm:$0xf]  ;;  %v2130_v52 = vld [vmem:[%s2522_s9 + $0x260] sm:$0xf] }
 0x142   : > { %v1447_v55 = vpop.f32.mrf.mxu0 }
 0x143   : > { %v1446_v56 = vadd.f32 %v1445_v21, %v1357_v53  ;;  %v2380_v53 = vld [vmem:[%s2522_s9 + $0x270] sm:$0xf0] }
 0x144   : > { %v2131_v4 = vor.u32 %v2380_v53, %v2130_v52 }
 0x145   : > { %1510 = vst.msk [vmem:[%s2793_s30 + $0x50] sm:$0xff] %vm1006_vm0, %v1446_v56  ;;  %v1551_v37 = vsel %vm1006_vm0, %v1446_v56, 0.0  ;;  %v1611_v17 = vmul.f32 %v1446_v56, %v1446_v56 }
 0x146   : > { %v1552_v5 = vadd.f32 %v1551_v37, %v1550_v48  ;;  %v1269_v13 = vpop.f32.mrf.mxu2 }
 0x147   : > { %v1652_v57 = vsel %vm1006_vm0, %v1611_v17, 0.0  ;;  %v1270_v8 = vadd.f32 %v1269_v13, %v1181_v3  ;;  %v1358_v9 = vpop.f32.mrf.mxu3 }
 0x148   : > { %v1653_v24 = vadd.f32 %v1652_v57, %v1651_v49  ;;  %v1183_v25 = vpop.f32.mrf.mxu1  ;;  %v2124_v49 = vld [vmem:[%s2522_s9 + $0x26c] sm:$0xf0] }
 0x149   : > { %v1359_v28 = vadd.f32 %v1358_v9, %v1270_v8  ;;  %v1184_v42 = vadd.f32 %v1183_v25, %v2737_v54  ;;  %v2378_v54 = vld [vmem:[%s2522_s9 + $0x264] sm:$0xf]  ;;  %v2127_v14 = vor.u32 %v2377_v47, %v2124_v49  ;;  %v2139_v8 = vor.u32 %v2381_v1, %v2138_v0 }
 0x14a   : > { %v1450_v29 = vpop.f32.mrf.mxu0 }
 0x14b   : > { %v1448_v32 = vadd.f32 %v1447_v55, %v1359_v28  ;;  %1222 = vmatmul.bf16.gmra.mxu1 %v2107_v11  ;;  %1311 = vmatmul.bf16.gmra.mxu2 %v2111_v12  ;;  %v2132_v55 = vld [vmem:[%s2522_s9 + $0x274] sm:$0xf0] }
 0x14c   : > { %1400 = vmatmul.bf16.gmra.mxu3 %v2115_v26  ;;  %v2135_v57 = vor.u32 %v2378_v54, %v2132_v55 }
 0x14d   : > { %2298 = vmatmul.msk.bf16.gmra.mxu0 %vm1006_vm0, %v2119_v27  ;;  %1511 = vst.msk [vmem:[%s2793_s30 + $0x58] sm:$0xff] %vm1006_vm0, %v1448_v32  ;;  %v1553_v40 = vsel %vm1006_vm0, %v1448_v32, 0.0  ;;  %v1612_v33 = vmul.f32 %v1448_v32, %v1448_v32 }
 0x14e   : > { %v1554_v43 = vadd.f32 %v1553_v40, %v1552_v5  ;;  %v1272_v21 = vpop.f32.mrf.mxu2 }
 0x14f   : > { %v1654_v44 = vsel %vm1006_vm0, %v1612_v33, 0.0  ;;  %v1273_v20 = vadd.f32 %v1272_v21, %v1184_v42  ;;  %v1361_v45 = vpop.f32.mrf.mxu3 }
 0x150   : > { %v1655_v46 = vadd.f32 %v1654_v44, %v1653_v24  ;;  %v1185_v48 = vpop.f32.mrf.mxu1 }
 0x151   : > { %v1362_v23 = vadd.f32 %v1361_v45, %v1273_v20  ;;  %v1186_v63 = vadd.f32 %v1185_v48, %v2746_v60 }
 0x152   : > { %v1452_v41 = vpop.f32.mrf.mxu0 }
 0x153   : > { %v1451_v61 = vadd.f32 %v1450_v29, %v1362_v23 }
 0x155   : > { %1512 = vst.msk [vmem:[%s2793_s30 + $0x60] sm:$0xff] %vm1006_vm0, %v1451_v61  ;;  %v1555_v56 = vsel %vm1006_vm0, %v1451_v61, 0.0  ;;  %v1613_v62 = vmul.f32 %v1451_v61, %v1451_v61 }
 0x156   : > { %v1556_v34 = vadd.f32 %v1555_v56, %v1554_v43  ;;  %v1274_v2 = vpop.f32.mrf.mxu2 }
 0x157   : > { %v1656_v37 = vsel %vm1006_vm0, %v1613_v62, 0.0  ;;  %v1275_v17 = vadd.f32 %v1274_v2, %v1186_v63  ;;  %v1363_v3 = vpop.f32.mrf.mxu3 }
 0x158   : > { %v1657_v5 = vadd.f32 %v1656_v37, %v1655_v46  ;;  %v1188_v13 = vpop.f32.mrf.mxu1 }
 0x159   : > { %v1364_v9 = vadd.f32 %v1363_v3, %v1275_v17  ;;  %v1189_v25 = vadd.f32 %v1188_v13, %v2762_v10 }
 0x15a   : > { %v1455_v11 = vpop.f32.mrf.mxu0 }
 0x15b   : > { %v1453_v12 = vadd.f32 %v1452_v41, %v1364_v9  ;;  %1227 = vmatmul.bf16.gmra.mxu1 %v2127_v14  ;;  %1316 = vmatmul.bf16.gmra.mxu2 %v2131_v4 }
 0x15c   : > { %1405 = vmatmul.bf16.gmra.mxu3 %v2135_v57 }
 0x15d   : > { %2299 = vmatmul.msk.bf16.gmra.mxu0 %vm1006_vm0, %v2139_v8  ;;  %1513 = vst.msk [vmem:[%s2793_s30 + $0x68] sm:$0xff] %vm1006_vm0, %v1453_v12  ;;  %v1557_v60 = vsel %vm1006_vm0, %v1453_v12, 0.0  ;;  %v1614_v24 = vmul.f32 %v1453_v12, %v1453_v12 }
 0x15e   : > { %v1558_v26 = vadd.f32 %v1557_v60, %v1556_v34  ;;  %v1277_v27 = vpop.f32.mrf.mxu2 }
 0x15f   : > { %v1658_v28 = vsel %vm1006_vm0, %v1614_v24, 0.0  ;;  %v1278_v29 = vadd.f32 %v1277_v27, %v1189_v25  ;;  %v1366_v32 = vpop.f32.mrf.mxu3 }
 0x160   : > { %v1659_v40 = vadd.f32 %v1658_v28, %v1657_v5  ;;  %v1190_v33 = vpop.f32.mrf.mxu1 }
 0x161   : > { %v1367_v42 = vadd.f32 %v1366_v32, %v1278_v29  ;;  %v1191_v45 = vadd.f32 %v1190_v33, %v2771_v22 }
 0x162   : > { %v1457_v43 = vpop.f32.mrf.mxu0 }
 0x163   : > { %v1456_v21 = vadd.f32 %v1455_v11, %v1367_v42 }
 0x165   : > { %1514 = vst.msk [vmem:[%s2793_s30 + $0x70] sm:$0xff] %vm1006_vm0, %v1456_v21  ;;  %v1559_v44 = vsel %vm1006_vm0, %v1456_v21, 0.0  ;;  %v1615_v20 = vmul.f32 %v1456_v21, %v1456_v21 }
 0x166   : > { %v1560_v10 = vadd.f32 %v1559_v44, %v1558_v26  ;;  %v1279_v46 = vpop.f32.mrf.mxu2 }
 0x167   : > { %v1660_v48 = vsel %vm1006_vm0, %v1615_v20, 0.0  ;;  %v1280_v23 = vadd.f32 %v1279_v46, %v1191_v45  ;;  %v1368_v41 = vpop.f32.mrf.mxu3 }
 0x168   : > { %v1661_v61 = vadd.f32 %v1660_v48, %v1659_v40  ;;  %v1193_v47 = vpop.f32.mrf.mxu1 }
 0x169   : > { %v1369_v49 = vadd.f32 %v1368_v41, %v1280_v23  ;;  %v1194_v56 = vadd.f32 %v1193_v47, %v2692_v18 }
 0x16a   : > { %v1460_v52 = vpop.f32.mrf.mxu0 }
 0x16b   : > { %v1458_v53 = vadd.f32 %v1457_v43, %v1369_v49 }
 0x16d   : > { %1515 = vst.msk [vmem:[%s2793_s30 + $0x78] sm:$0xff] %vm1006_vm0, %v1458_v53  ;;  %v1561_v54 = vsel %vm1006_vm0, %v1458_v53, 0.0  ;;  %v1616_v55 = vmul.f32 %v1458_v53, %v1458_v53 }
 0x16e   : > { %v1562_v22 = vadd.f32 %v1561_v54, %v1560_v10  ;;  %v1282_v62 = vpop.f32.mrf.mxu2 }
 0x16f   : > { %v1662_v63 = vsel %vm1006_vm0, %v1616_v55, 0.0  ;;  %v1283_v0 = vadd.f32 %v1282_v62, %v1194_v56  ;;  %v1371_v1 = vpop.f32.mrf.mxu3 }
 0x170   : > { %v1663_v34 = vadd.f32 %v1662_v63, %v1661_v61  ;;  %v1195_v2 = vpop.f32.mrf.mxu1 }
 0x171   : > { %v1372_v37 = vadd.f32 %v1371_v1, %v1283_v0  ;;  %v1196_v5 = vadd.f32 %v1195_v2, %v2708_v30 }
 0x172   : > { %v1462_v17 = vpop.f32.mrf.mxu0 }
 0x173   : > { %v1461_v3 = vadd.f32 %v1460_v52, %v1372_v37 }
 0x175   : > { %1516 = vst.msk [vmem:[%s2793_s30 + $0x80] sm:$0xff] %vm1006_vm0, %v1461_v3  ;;  %v1563_v14 = vsel %vm1006_vm0, %v1461_v3, 0.0  ;;  %v1617_v4 = vmul.f32 %v1461_v3, %v1461_v3 }
 0x176   : > { %v1564_v18 = vadd.f32 %v1563_v14, %v1562_v22  ;;  %v1284_v13 = vpop.f32.mrf.mxu2 }
 0x177   : > { %v1664_v57 = vsel %vm1006_vm0, %v1617_v4, 0.0  ;;  %v1285_v8 = vadd.f32 %v1284_v13, %v1196_v5  ;;  %v1373_v9 = vpop.f32.mrf.mxu3 }
 0x178   : > { %v1665_v11 = vadd.f32 %v1664_v57, %v1663_v34  ;;  %v1198_v12 = vpop.f32.mrf.mxu1 }
 0x179   : > { %v1374_v60 = vadd.f32 %v1373_v9, %v1285_v8  ;;  %v1199_v28 = vadd.f32 %v1198_v12, %v2717_v38 }
 0x17a   : > { %v1465_v24 = vpop.f32.mrf.mxu0 }
 0x17b   : > { %v1463_v25 = vadd.f32 %v1462_v17, %v1374_v60 }
 0x17d   : > { %1517 = vst.msk [vmem:[%s2793_s30 + $0x88] sm:$0xff] %vm1006_vm0, %v1463_v25  ;;  %v1565_v26 = vsel %vm1006_vm0, %v1463_v25, 0.0  ;;  %v1618_v27 = vmul.f32 %v1463_v25, %v1463_v25 }
 0x17e   : > { %v1566_v30 = vadd.f32 %v1565_v26, %v1564_v18  ;;  %v1287_v29 = vpop.f32.mrf.mxu2 }
 0x17f   : > { %v1666_v32 = vsel %vm1006_vm0, %v1618_v27, 0.0  ;;  %v1288_v40 = vadd.f32 %v1287_v29, %v1199_v28  ;;  %v1376_v33 = vpop.f32.mrf.mxu3 }
 0x180   : > { %v1667_v42 = vadd.f32 %v1666_v32, %v1665_v11  ;;  %v1200_v43 = vpop.f32.mrf.mxu1 }
 0x181   : > { %v1377_v21 = vadd.f32 %v1376_v33, %v1288_v40  ;;  %v1201_v46 = vadd.f32 %v1200_v43, %v2733_v50 }
 0x182   : > { %v1467_v44 = vpop.f32.mrf.mxu0 }
 0x183   : > { %v1466_v20 = vadd.f32 %v1465_v24, %v1377_v21 }
 0x185   : > { %1518 = vst.msk [vmem:[%s2793_s30 + $0x90] sm:$0xff] %vm1006_vm0, %v1466_v20  ;;  %v1567_v45 = vsel %vm1006_vm0, %v1466_v20, 0.0  ;;  %v1619_v10 = vmul.f32 %v1466_v20, %v1466_v20 }
 0x186   : > { %v1568_v38 = vadd.f32 %v1567_v45, %v1566_v30  ;;  %v1289_v48 = vpop.f32.mrf.mxu2 }
 0x187   : > { %v1668_v23 = vsel %vm1006_vm0, %v1619_v10, 0.0  ;;  %v1290_v41 = vadd.f32 %v1289_v48, %v1201_v46  ;;  %v1378_v61 = vpop.f32.mrf.mxu3 }
 0x188   : > { %v1669_v47 = vadd.f32 %v1668_v23, %v1667_v42  ;;  %v1203_v49 = vpop.f32.mrf.mxu1 }
 0x189   : > { %v1379_v52 = vadd.f32 %v1378_v61, %v1290_v41  ;;  %v1204_v22 = vadd.f32 %v1203_v49, %v2742_v58 }
 0x18a   : > { %v1470_v53 = vpop.f32.mrf.mxu0 }
 0x18b   : > { %v1468_v54 = vadd.f32 %v1467_v44, %v1379_v52 }
 0x18d   : > { %1519 = vst.msk [vmem:[%s2793_s30 + $0x98] sm:$0xff] %vm1006_vm0, %v1468_v54  ;;  %v1569_v55 = vsel %vm1006_vm0, %v1468_v54, 0.0  ;;  %v1620_v56 = vmul.f32 %v1468_v54, %v1468_v54 }
 0x18e   : > { %v1570_v50 = vadd.f32 %v1569_v55, %v1568_v38  ;;  %v1292_v62 = vpop.f32.mrf.mxu2 }
 0x18f   : > { %v1670_v63 = vsel %vm1006_vm0, %v1620_v56, 0.0  ;;  %v1293_v0 = vadd.f32 %v1292_v62, %v1204_v22  ;;  %v1381_v1 = vpop.f32.mrf.mxu3 }
 0x190   : > { %v1671_v34 = vadd.f32 %v1670_v63, %v1669_v47  ;;  %v1205_v2 = vpop.f32.mrf.mxu1 }
 0x191   : > { %v1382_v37 = vadd.f32 %v1381_v1, %v1293_v0  ;;  %v1206_v5 = vadd.f32 %v1205_v2, %v2758_v6 }
 0x192   : > { %v1472_v17 = vpop.f32.mrf.mxu0 }
 0x193   : > { %v1471_v3 = vadd.f32 %v1470_v53, %v1382_v37 }
 0x195   : > { %1520 = vst.msk [vmem:[%s2793_s30 + $0xa0] sm:$0xff] %vm1006_vm0, %v1471_v3  ;;  %v1571_v14 = vsel %vm1006_vm0, %v1471_v3, 0.0  ;;  %v1621_v4 = vmul.f32 %v1471_v3, %v1471_v3 }
 0x196   : > { %v2962_v58 = vadd.f32 %v1571_v14, %v1570_v50  ;;  %v1294_v18 = vpop.f32.mrf.mxu2 }
 0x197   : > { %v1672_v13 = vsel %vm1006_vm0, %v1621_v4, 0.0  ;;  %v1295_v57 = vadd.f32 %v1294_v18, %v1206_v5  ;;  %v1383_v8 = vpop.f32.mrf.mxu3 }
 0x198   : > { %v2965_v9 = vadd.f32 %v1672_v13, %v1671_v34  ;;  %v1208_v11 = vpop.f32.mrf.mxu1 }
 0x199   : > { %v1384_v12 = vadd.f32 %v1383_v8, %v1295_v57  ;;  %v1209_v6 = vadd.f32 %v1208_v11, %v2767_v15 }
 0x19a   : > { %v1475_v60 = vpop.f32.mrf.mxu0 }
 0x19b   : > { %v2967_v24 = vadd.f32 %v1472_v17, %v1384_v12 }
 0x19d   : > { %1521 = vst.msk [vmem:[%s2793_s30 + $0xa8] sm:$0xff] %vm1006_vm0, %v2967_v24 }
 0x19e   : > { %v1297_v25 = vpop.f32.mrf.mxu2 }
 0x19f   : > { %v1298_v26 = vadd.f32 %v1297_v25, %v1209_v6  ;;  %v1386_v27 = vpop.f32.mrf.mxu3 }
 0x1a0   : > { %v1210_v28 = vpop.f32.mrf.mxu1 }
 0x1a1   : > { %v1387_v30 = vadd.f32 %v1386_v27, %v1298_v26  ;;  %v1211_v40 = vadd.f32 %v1210_v28, %v2783_v35  ;;  %v1573_v26 = vsel %vm1006_vm0, %v2967_v24, 0.0 }
 0x1a2   : > { %v1477_v29 = vpop.f32.mrf.mxu0 }
 0x1a3   : > { %v2973_v32 = vadd.f32 %v1475_v60, %v1387_v30 }
 0x1a5   : > { %1522 = vst.msk [vmem:[%s2793_s30 + $0xb0] sm:$0xff] %vm1006_vm0, %v2973_v32 }
 0x1a6   : > { %v1299_v33 = vpop.f32.mrf.mxu2 }
 0x1a7   : > { %v1300_v42 = vadd.f32 %v1299_v33, %v1211_v40  ;;  %v1388_v43 = vpop.f32.mrf.mxu3  ;;  %v1575_v40 = vsel %vm1006_vm0, %v2973_v32, 0.0 }
 0x1a8   : > { %v1213_v21 = vpop.f32.mrf.mxu1 }
 0x1a9   : > { %v1389_v15 = vadd.f32 %v1388_v43, %v1300_v42  ;;  %v1214_v45 = vadd.f32 %v1213_v21, %v2694_v19 }
 0x1aa   : > { %v1480_v44 = vpop.f32.mrf.mxu0 }
 0x1ab   : > { %v1478_v20 = vadd.f32 %v1477_v29, %v1389_v15 }
 0x1ad   : > { %1523 = vst.msk [vmem:[%s2793_s30 + $0xb8] sm:$0xff] %vm1006_vm0, %v1478_v20  ;;  %v1624_v33 = vmul.f32 %v1478_v20, %v1478_v20 }
 0x1ae   : > { %v1302_v10 = vpop.f32.mrf.mxu2 }
 0x1af   : > { %v1303_v46 = vadd.f32 %v1302_v10, %v1214_v45  ;;  %v1391_v38 = vpop.f32.mrf.mxu3  ;;  %v1678_v10 = vsel %vm1006_vm0, %v1624_v33, 0.0 }
 0x1b0   : > { %v1215_v48 = vpop.f32.mrf.mxu1 }
 0x1b1   : > { %v1392_v23 = vadd.f32 %v1391_v38, %v1303_v46  ;;  %v1216_v61 = vadd.f32 %v1215_v48, %v2710_v31 }
 0x1b2   : > { %v1482_v41 = vpop.f32.mrf.mxu0 }
 0x1b3   : > { %v1481_v35 = vadd.f32 %v1480_v44, %v1392_v23 }
 0x1b5   : > { %1524 = vst.msk [vmem:[%s2793_s30 + $0xc0] sm:$0xff] %vm1006_vm0, %v1481_v35  ;;  %v1625_v21 = vmul.f32 %v1481_v35, %v1481_v35  ;;  %v1579_v46 = vsel %vm1006_vm0, %v1481_v35, 0.0 }
 0x1b6   : > { %v1304_v47 = vpop.f32.mrf.mxu2 }
 0x1b7   : > { %v1305_v49 = vadd.f32 %v1304_v47, %v1216_v61  ;;  %v1393_v52 = vpop.f32.mrf.mxu3 }
 0x1b8   : > { %v1218_v53 = vpop.f32.mrf.mxu1 }
 0x1b9   : > { %v1394_v54 = vadd.f32 %v1393_v52, %v1305_v49  ;;  %v1219_v56 = vadd.f32 %v1218_v53, %v2719_v39 }
 0x1ba   : > { %v1485_v55 = vpop.f32.mrf.mxu0 }
 0x1bb   : > { %v1483_v19 = vadd.f32 %v1482_v41, %v1394_v54  ;;  %v1680_v41 = vsel %vm1006_vm0, %v1625_v21, 0.0 }
 0x1bd   : > { %1525 = vst.msk [vmem:[%s2793_s30 + $0xc8] sm:$0xff] %vm1006_vm0, %v1483_v19  ;;  %v1626_v38 = vmul.f32 %v1483_v19, %v1483_v19 }
 0x1be   : > { %v1307_v22 = vpop.f32.mrf.mxu2 }
 0x1bf   : > { %v1308_v50 = vadd.f32 %v1307_v22, %v1219_v56  ;;  %v1396_v62 = vpop.f32.mrf.mxu3  ;;  %v1682_v35 = vsel %vm1006_vm0, %v1626_v38, 0.0 }
 0x1c0   : > { %v1220_v63 = vpop.f32.mrf.mxu1 }
 0x1c1   : > { %v1397_v0 = vadd.f32 %v1396_v62, %v1308_v50  ;;  %v1221_v34 = vadd.f32 %v1220_v63, %v2735_v51  ;;  %v1622_v51 = vmul.f32 %v2967_v24, %v2967_v24  ;;  %v1577_v24 = vsel %vm1006_vm0, %v1478_v20, 0.0 }
 0x1c2   : > { %v1487_v1 = vpop.f32.mrf.mxu0  ;;  %v1581_v20 = vsel %vm1006_vm0, %v1483_v19, 0.0 }
 0x1c3   : > { %v1486_v31 = vadd.f32 %v1485_v55, %v1397_v0  ;;  %v1674_v29 = vsel %vm1006_vm0, %v1622_v51, 0.0 }
 0x1c4   : > { %v1675_v44 = vadd.f32 %v1674_v29, %v2965_v9 }
 0x1c5   : > { %1526 = vst.msk [vmem:[%s2793_s30 + $0xd0] sm:$0xff] %vm1006_vm0, %v1486_v31  ;;  %v1627_v61 = vmul.f32 %v1486_v31, %v1486_v31  ;;  %v1583_v54 = vsel %vm1006_vm0, %v1486_v31, 0.0 }
 0x1c6   : > { %v1309_v2 = vpop.f32.mrf.mxu2 }
 0x1c7   : > { %v1310_v37 = vadd.f32 %v1309_v2, %v1221_v34  ;;  %v1398_v17 = vpop.f32.mrf.mxu3  ;;  %v1684_v62 = vsel %vm1006_vm0, %v1627_v61, 0.0 }
 0x1c8   : > { %v1223_v3 = vpop.f32.mrf.mxu1 }
 0x1c9   : > { %v1399_v14 = vadd.f32 %v1398_v17, %v1310_v37  ;;  %v1224_v5 = vadd.f32 %v1223_v3, %v2744_v59  ;;  %v1623_v59 = vmul.f32 %v2973_v32, %v2973_v32 }
 0x1ca   : > { %v1490_v39 = vpop.f32.mrf.mxu0 }
 0x1cb   : > { %v1488_v4 = vadd.f32 %v1487_v1, %v1399_v14  ;;  %v1676_v43 = vsel %vm1006_vm0, %v1623_v59, 0.0 }
 0x1cc   : > { %v1677_v48 = vadd.f32 %v1676_v43, %v1675_v44 }
 0x1cd   : > { %1527 = vst.msk [vmem:[%s2793_s30 + $0xd8] sm:$0xff] %vm1006_vm0, %v1488_v4  ;;  %v1628_v55 = vmul.f32 %v1488_v4, %v1488_v4  ;;  %v1585_v19 = vsel %vm1006_vm0, %v1488_v4, 0.0 }
 0x1ce   : > { %v1312_v18 = vpop.f32.mrf.mxu2  ;;  %v1679_v49 = vadd.f32 %v1678_v10, %v1677_v48 }
 0x1cf   : > { %v1313_v13 = vadd.f32 %v1312_v18, %v1224_v5  ;;  %v1401_v57 = vpop.f32.mrf.mxu3  ;;  %v1686_v2 = vsel %vm1006_vm0, %v1628_v55, 0.0 }
 0x1d0   : > { %v1225_v8 = vpop.f32.mrf.mxu1  ;;  %v1681_v56 = vadd.f32 %v1680_v41, %v1679_v49 }
 0x1d1   : > { %v1402_v11 = vadd.f32 %v1401_v57, %v1313_v13  ;;  %v1226_v60 = vadd.f32 %v1225_v8, %v2760_v7  ;;  %v1574_v7 = vadd.f32 %v1573_v26, %v2962_v58 }
 0x1d2   : > { %v1492_v6 = vpop.f32.mrf.mxu0  ;;  %v1683_v1 = vadd.f32 %v1682_v35, %v1681_v56 }
 0x1d3   : > { %v1491_v12 = vadd.f32 %v1490_v39, %v1402_v11  ;;  %v1576_v45 = vadd.f32 %v1575_v40, %v1574_v7 }
 0x1d4   : > { %v1685_v3 = vadd.f32 %v1684_v62, %v1683_v1 }
 0x1d5   : > { %1528 = vst.msk [vmem:[%s2793_s30 + $0xe0] sm:$0xff] %vm1006_vm0, %v1491_v12  ;;  %v1578_v58 = vadd.f32 %v1577_v24, %v1576_v45  ;;  %v1629_v63 = vmul.f32 %v1491_v12, %v1491_v12  ;;  %v1587_v37 = vsel %vm1006_vm0, %v1491_v12, 0.0 }
 0x1d6   : > { %v1314_v25 = vpop.f32.mrf.mxu2  ;;  %v1687_v57 = vadd.f32 %v1686_v2, %v1685_v3 }
 0x1d7   : > { %v1315_v27 = vadd.f32 %v1314_v25, %v1226_v60  ;;  %v1403_v28 = vpop.f32.mrf.mxu3  ;;  %v1580_v52 = vadd.f32 %v1579_v46, %v1578_v58  ;;  %v1688_v5 = vsel %vm1006_vm0, %v1629_v63, 0.0 }
 0x1d8   : > { %v1228_v30 = vpop.f32.mrf.mxu1 }
 0x1d9   : > { %v1404_v42 = vadd.f32 %v1403_v28, %v1315_v27  ;;  %v1229_v32 = vadd.f32 %v1228_v30, %v2769_v16  ;;  %v1582_v22 = vadd.f32 %v1581_v20, %v1580_v52 }
 0x1da   : > { %v1495_v53 = vpop.f32.mrf.mxu0 }
 0x1db   : > { %v1493_v15 = vadd.f32 %v1492_v6, %v1404_v42  ;;  %v1584_v34 = vadd.f32 %v1583_v54, %v1582_v22 }
 0x1dd   : > { %1529 = vst.msk [vmem:[%s2793_s30 + $0xe8] sm:$0xff] %vm1006_vm0, %v1493_v15  ;;  %v1630_v17 = vmul.f32 %v1493_v15, %v1493_v15  ;;  %v1586_v14 = vadd.f32 %v1585_v19, %v1584_v34  ;;  %v1589_v4 = vsel %vm1006_vm0, %v1493_v15, 0.0 }
 0x1de   : > { %v1317_v23 = vpop.f32.mrf.mxu2 }
 0x1df   : > { %v1318_v47 = vadd.f32 %v1317_v23, %v1229_v32  ;;  %v1406_v9 = vpop.f32.mrf.mxu3  ;;  %v1588_v8 = vadd.f32 %v1587_v37, %v1586_v14  ;;  %v1690_v12 = vsel %vm1006_vm0, %v1630_v17, 0.0 }
 0x1e0   : > { %v1230_v50 = vpop.f32.mrf.mxu1 }
 0x1e1   : > { %v1407_v16 = vadd.f32 %v1406_v9, %v1318_v47  ;;  %v1231_v31 = vadd.f32 %v1230_v50, %v2785_v36  ;;  %v1689_v36 = vadd.f32 %v1688_v5, %v1687_v57  ;;  %v1590_v6 = vadd.f32 %v1589_v4, %v1588_v8 }
 0x1e2   : > { %v1497_v25 = vpop.f32.mrf.mxu0 }
 0x1e3   : > { %v1496_v0 = vadd.f32 %v1495_v53, %v1407_v16  ;;  %v1691_v27 = vadd.f32 %v1690_v12, %v1689_v36 }
 0x1e5   : > { %1530 = vst.msk [vmem:[%s2793_s30 + $0xf0] sm:$0xff] %vm1006_vm0, %v1496_v0  ;;  %v1631_v18 = vmul.f32 %v1496_v0, %v1496_v0  ;;  %v1591_v51 = vsel %vm1006_vm0, %v1496_v0, 0.0 }
 0x1e6   : > { %v1319_v39 = vpop.f32.mrf.mxu2  ;;  %v1592_v28 = vadd.f32 %v1591_v51, %v1590_v6 }
 0x1e7   : > { %v1320_v13 = vadd.f32 %v1319_v39, %v1231_v31  ;;  %v1408_v11 = vpop.f32.mrf.mxu3  ;;  %v1692_v26 = vsel %vm1006_vm0, %v1631_v18, 0.0 }
 0x1e8   : > { %v1693_v40 = vadd.f32 %v1692_v26, %v1691_v27 }
 0x1e9   : > { %v1409_v60 = vadd.f32 %v1408_v11, %v1320_v13 }
 0x1eb   : > { %v1498_v59 = vadd.f32 %v1497_v25, %v1409_v60 }
 0x1ed   : > { %1531 = vst.msk [vmem:[%s2793_s30 + $0xf8] sm:$0xff] %vm1006_vm0, %v1498_v59  ;;  %v1593_v30 = vsel %vm1006_vm0, %v1498_v59, 0.0  ;;  %v1632_v29 = vmul.f32 %v1498_v59, %v1498_v59 }
 0x1ee   : > { %v1594_v33 = vadd.f32 %v1593_v30, %v1592_v28 }
 0x1ef   : > { %v1694_v42 = vsel %vm1006_vm0, %v1632_v29, 0.0 }
 0x1f0   : > { %v1595_v7 = vrot.slane %v1594_v33, 4  ;;  %v1695_v43 = vadd.f32 %v1694_v42, %v1693_v40 }
 0x1f2   : > { %v1596_v24 = vadd.f32 %v1595_v7, %v1594_v33  ;;  %v1696_v21 = vrot.slane %v1695_v43, 4 }
 0x1f4   : > { %v1597_v15 = vrot.slane %v1596_v24, 2  ;;  %v1697_v44 = vadd.f32 %v1696_v21, %v1695_v43 }
 0x1f6   : > { %v1598_v45 = vadd.f32 %v1597_v15, %v1596_v24  ;;  %v1698_v10 = vrot.slane %v1697_v44, 2 }
 0x1f8   : > { %v1599_v46 = vrot.slane %v1598_v45, 1  ;;  %v1699_v38 = vadd.f32 %v1698_v10, %v1697_v44 }
 0x1fa   : > { %v1600_v32 = vadd.f32 %v1599_v46, %v1598_v45  ;;  %v1700_v48 = vrot.slane %v1699_v38, 1 }
 0x1fc   : > { %v1701_v58 = vadd.f32 %v1700_v48, %v1699_v38  ;;  %1703 = vst.msk [vmem:[%s217_s5] sm:$0x1] %vm1702_vm1, %v1600_v32 }
 0x1fe   : > { %1704 = vst.msk [vmem:[%s220_s8] sm:$0x1] %vm1702_vm1, %v1701_v58 }
 0x1ff PF: > { %s15_s15 = sadd.s32 1, %s2457_s15  }
 0x200   : > { %p12_p5 = scmp.ge.s32.totalorder %s15_s15, 4  }
 0x202   :  { %14 = sbr.rel (!%p12_p5) target bundleno = 1 (0x1), region = 82 }

// kernel: _lambda_.27
= control target key start
LH: loop header
LB: loop body
LE: loop exit
PB: predicated region body
PF: predicated region fallthrough
CT: control target
= control target key end

     0   :  { %vm102_vm0 = vcmask 519168   ;;  %s299_s0 = inlined_call_operand.vmem [shape: f32[128,64], index: 0, kind: input, shape index: {}]   ;;  %s300_s1 = inlined_call_operand.vmem [shape: f32[1,64], index: 1, kind: input, shape index: {}]   ;;  %s301_s2 = inlined_call_operand.vmem [shape: f32[1,64], index: 2, kind: input, shape index: {}]   ;;  %s302_s3 = inlined_call_operand.vmem [shape: bf16[128,64], index: 3, kind: output, shape index: {}]  }
   0x1   :  { %v14_v0 = vld [vmem:[%s299_s0] sm:$0xff]  ;;  %v15_v3 = vld [vmem:[%s299_s0 + $0x8] sm:$0xff]  ;;  %v16_v6 = vld [vmem:[%s299_s0 + $0x10] sm:$0xff] }
   0x2   :  { %v151_v1 = vld [vmem:[%s300_s1] ss:$0 sm:$0xff]  ;;  %v17_v7 = vld [vmem:[%s299_s0 + $0x18] sm:$0xff]  ;;  %v19_v12 = vld [vmem:[%s299_s0 + $0x28] sm:$0xff] }
   0x3   :  { %v156_v2 = vld [vmem:[%s301_s2] ss:$0 sm:$0xff]  ;;  %v34_v4 = vmul.f32 %v151_v1, %v14_v0  ;;  %v35_v5 = vmul.f32 %v151_v1, %v15_v3  ;;  %v36_v9 = vmul.f32 %v151_v1, %v16_v6  ;;  %v37_v10 = vmul.f32 %v151_v1, %v17_v7  ;;  %v20_v13 = vld [vmem:[%s299_s0 + $0x30] sm:$0xff]  ;;  %v21_v14 = vld [vmem:[%s299_s0 + $0x38] sm:$0xff] }
   0x4   :  { %v18_v8 = vld [vmem:[%s299_s0 + $0x20] sm:$0xff]  ;;  %v39_v17 = vmul.f32 %v151_v1, %v19_v12  ;;  %v40_v18 = vmul.f32 %v151_v1, %v20_v13  ;;  %v41_v22 = vmul.f32 %v151_v1, %v21_v14  ;;  %v23_v32 = vld [vmem:[%s299_s0 + $0x48] sm:$0xff]  ;;  %v24_v37 = vld [vmem:[%s299_s0 + $0x50] sm:$0xff] }
   0x5   :  { %v38_v11 = vmul.f32 %v151_v1, %v18_v8  ;;  %v54_v15 = vadd.f32 %v156_v2, %v34_v4  ;;  %v55_v16 = vadd.f32 %v156_v2, %v35_v5  ;;  %v56_v19 = vadd.f32 %v156_v2, %v36_v9  ;;  %v22_v31 = vld [vmem:[%s299_s0 + $0x40] sm:$0xff]  ;;  %v25_v38 = vld [vmem:[%s299_s0 + $0x58] sm:$0xff]  ;;  %v27_v44 = vld [vmem:[%s299_s0 + $0x68] sm:$0xff] }
   0x6   :  { %v57_v20 = vadd.f32 %v156_v2, %v37_v10  ;;  %v59_v25 = vadd.f32 %v156_v2, %v39_v17  ;;  %v60_v26 = vadd.f32 %v156_v2, %v40_v18  ;;  %v61_v30 = vadd.f32 %v156_v2, %v41_v22  ;;  %v26_v39 = vld [vmem:[%s299_s0 + $0x60] sm:$0xff]  ;;  %v28_v45 = vld [vmem:[%s299_s0 + $0x70] sm:$0xff]  ;;  %v29_v50 = vld [vmem:[%s299_s0 + $0x78] sm:$0xff] }
   0x7   :  { %v58_v21 = vadd.f32 %v156_v2, %v38_v11  ;;  %v70_v23 = vmax.f32 %v54_v15, 0.0  ;;  %v71_v24 = vmax.f32 %v55_v16, 0.0  ;;  %v72_v27 = vmax.f32 %v56_v19, 0.0 }
   0x8   :  { %v73_v28 = vmax.f32 %v57_v20, 0.0  ;;  %v75_v35 = vmax.f32 %v59_v25, 0.0  ;;  %v76_v36 = vmax.f32 %v60_v26, 0.0  ;;  %v77_v43 = vmax.f32 %v61_v30, 0.0 }
   0x9   :  { %v74_v29 = vmax.f32 %v58_v21, 0.0  ;;  %v86_v33 = vpack.c.bf16 %v70_v23, %v70_v23  ;;  %v87_v34 = vpack.c.bf16 %v71_v24, %v71_v24  ;;  %v88_v40 = vpack.c.bf16 %v72_v27, %v72_v27 }
   0xa   :  { %v89_v41 = vpack.c.bf16 %v73_v28, %v73_v28  ;;  %v91_v46 = vpack.c.bf16 %v75_v35, %v75_v35  ;;  %v92_v47 = vpack.c.bf16 %v76_v36, %v76_v36  ;;  %v42_v48 = vmul.f32 %v151_v1, %v22_v31 }
   0xb   :  { %v90_v42 = vpack.c.bf16 %v74_v29, %v74_v29  ;;  %103 = vst.msk [vmem:[%s302_s3] sm:$0xf] %vm102_vm0, %v86_v33  ;;  %v43_v49 = vmul.f32 %v151_v1, %v23_v32  ;;  %v93_v51 = vpack.c.bf16 %v77_v43, %v77_v43  ;;  %v44_v52 = vmul.f32 %v151_v1, %v24_v37 }
   0xc   :  { %104 = vst.msk [vmem:[%s302_s3 + $0x4] sm:$0xf] %vm102_vm0, %v87_v34  ;;  %v45_v53 = vmul.f32 %v151_v1, %v25_v38  ;;  %v46_v54 = vmul.f32 %v151_v1, %v26_v39  ;;  %v62_v55 = vadd.f32 %v156_v2, %v42_v48  ;;  %v47_v57 = vmul.f32 %v151_v1, %v27_v44 }
   0xd   :  { %105 = vst.msk [vmem:[%s302_s3 + $0x8] sm:$0xf] %vm102_vm0, %v88_v40  ;;  %v63_v56 = vadd.f32 %v156_v2, %v43_v49  ;;  %v48_v58 = vmul.f32 %v151_v1, %v28_v45  ;;  %v64_v59 = vadd.f32 %v156_v2, %v44_v52  ;;  %v49_v62 = vmul.f32 %v151_v1, %v29_v50 }
   0xe   :  { %106 = vst.msk [vmem:[%s302_s3 + $0xc] sm:$0xf] %vm102_vm0, %v89_v41  ;;  %v65_v60 = vadd.f32 %v156_v2, %v45_v53  ;;  %v66_v61 = vadd.f32 %v156_v2, %v46_v54  ;;  %v78_v63 = vmax.f32 %v62_v55, 0.0  ;;  %v67_v3 = vadd.f32 %v156_v2, %v47_v57 }
   0xf   :  { %107 = vst.msk [vmem:[%s302_s3 + $0x10] sm:$0xf] %vm102_vm0, %v90_v42  ;;  %v79_v0 = vmax.f32 %v63_v56, 0.0  ;;  %v68_v4 = vadd.f32 %v156_v2, %v48_v58  ;;  %v80_v5 = vmax.f32 %v64_v59, 0.0  ;;  %v69_v1 = vadd.f32 %v156_v2, %v49_v62 }
  0x10   :  { %108 = vst.msk [vmem:[%s302_s3 + $0x14] sm:$0xf] %vm102_vm0, %v91_v46  ;;  %v81_v6 = vmax.f32 %v65_v60, 0.0  ;;  %v82_v7 = vmax.f32 %v66_v61, 0.0  ;;  %v94_v8 = vpack.c.bf16 %v78_v63, %v78_v63  ;;  %v83_v10 = vmax.f32 %v67_v3, 0.0 }
  0x11   :  { %109 = vst.msk [vmem:[%s302_s3 + $0x18] sm:$0xf] %vm102_vm0, %v92_v47  ;;  %v95_v9 = vpack.c.bf16 %v79_v0, %v79_v0  ;;  %v84_v11 = vmax.f32 %v68_v4, 0.0  ;;  %v96_v12 = vpack.c.bf16 %v80_v5, %v80_v5  ;;  %v85_v14 = vmax.f32 %v69_v1, 0.0 }
  0x12   :  { %110 = vst.msk [vmem:[%s302_s3 + $0x1c] sm:$0xf] %vm102_vm0, %v93_v51  ;;  %v97_v13 = vpack.c.bf16 %v81_v6, %v81_v6  ;;  %v98_v2 = vpack.c.bf16 %v82_v7, %v82_v7  ;;  %v99_v15 = vpack.c.bf16 %v83_v10, %v83_v10 }
  0x13   :  { %111 = vst.msk [vmem:[%s302_s3 + $0x20] sm:$0xf] %vm102_vm0, %v94_v8  ;;  %v100_v16 = vpack.c.bf16 %v84_v11, %v84_v11  ;;  %v101_v17 = vpack.c.bf16 %v85_v14, %v85_v14 }
  0x14   :  { %112 = vst.msk [vmem:[%s302_s3 + $0x24] sm:$0xf] %vm102_vm0, %v95_v9 }
  0x15   :  { %113 = vst.msk [vmem:[%s302_s3 + $0x28] sm:$0xf] %vm102_vm0, %v96_v12 }
  0x16   :  { %114 = vst.msk [vmem:[%s302_s3 + $0x2c] sm:$0xf] %vm102_vm0, %v97_v13 }
  0x17   :  { %115 = vst.msk [vmem:[%s302_s3 + $0x30] sm:$0xf] %vm102_vm0, %v98_v2 }
  0x18   :  { %116 = vst.msk [vmem:[%s302_s3 + $0x34] sm:$0xf] %vm102_vm0, %v99_v15 }
  0x19   :  { %117 = vst.msk [vmem:[%s302_s3 + $0x38] sm:$0xf] %vm102_vm0, %v100_v16 }
  0x1a   :  { %118 = vst.msk [vmem:[%s302_s3 + $0x3c] sm:$0xf] %vm102_vm0, %v101_v17 }

// kernel: _lambda_.26
= control target key start
LH: loop header
LB: loop body
LE: loop exit
PB: predicated region body
PF: predicated region fallthrough
CT: control target
= control target key end

     0   :  { %vm551_vm0 = vcmask 523264   ;;  %vm927_vm1 = vcmask 516096   ;;  %s1879_s1 = inlined_call_operand.vmem [shape: bf16[576,64], index: 1, kind: input, shape index: {}]   ;;  %s1880_s0 = inlined_call_operand.vmem [shape: bf16[128,576], index: 0, kind: input, shape index: {}]   ;;  %s1881_s2 = inlined_call_operand.vmem [shape: f32[128,64], index: 2, kind: output, shape index: {0}]   ;;  %s1882_s3 = inlined_call_operand.vmem [shape: f32[1,1,64], index: 3, kind: output, shape index: {1}]   ;;  %s1883_s4 = inlined_call_operand.vmem [shape: f32[1,1,64], index: 4, kind: output, shape index: {2}]  }
   0x1   :  { %v1301_v0 = vld [vmem:[%s1879_s1 + $0x38] sm:$0xff]  ;;  %v1300_v1 = vld [vmem:[%s1879_s1 + $0x30] sm:$0xff]  ;;  %v1299_v2 = vld [vmem:[%s1879_s1 + $0x28] sm:$0xff] }
   0x2   :  { %1330 = vmatpush.bf16.msra.mxu1 %v1301_v0  ;;  %1331 = vmatpush.bf16.msra.mxu2 %v1301_v0  ;;  %v1298_v3 = vld [vmem:[%s1879_s1 + $0x20] sm:$0xff]  ;;  %v1297_v4 = vld [vmem:[%s1879_s1 + $0x18] sm:$0xff]  ;;  %v1296_v5 = vld [vmem:[%s1879_s1 + $0x10] sm:$0xff] }
   0x3   :  { %1332 = vmatpush.bf16.msra.mxu3 %v1301_v0  ;;  %576 = vmatpush.bf16.msra.mxu0 %v1301_v0  ;;  %v1295_v6 = vld [vmem:[%s1879_s1 + $0x8] sm:$0xff]  ;;  %v1294_v7 = vld [vmem:[%s1879_s1] sm:$0xff]  ;;  %v984_v8 = vld [vmem:[%s1880_s0 + $0x50] sm:$0xf] }
   0x4   :  { %v1266_v9 = vld [vmem:[%s1880_s0 + $0x60] sm:$0xf0]  ;;  %v1024_v10 = vld [vmem:[%s1880_s0 + $0xa0] sm:$0xf]  ;;  %v1276_v11 = vld [vmem:[%s1880_s0 + $0xb0] sm:$0xf0] }
   0x5   :  { %v1064_v12 = vld [vmem:[%s1880_s0 + $0xf0] sm:$0xf]  ;;  %v1286_v13 = vld [vmem:[%s1880_s0 + $0x100] sm:$0xf0]  ;;  %v944_v14 = vld [vmem:[%s1880_s0] sm:$0xf]  ;;  %v985_v18 = vor.u32 %v1266_v9, %v984_v8  ;;  %v1025_v19 = vor.u32 %v1276_v11, %v1024_v10 }
   0x6   :  { %1333 = vmatpush.bf16.msra.mxu1 %v1300_v1  ;;  %1334 = vmatpush.bf16.msra.mxu2 %v1300_v1  ;;  %v1256_v15 = vld [vmem:[%s1880_s0 + $0x10] sm:$0xf0]  ;;  %v1317_v16 = vld [vmem:[%s1879_s1 + $0xb8] sm:$0xff]  ;;  %v1065_v20 = vor.u32 %v1286_v13, %v1064_v12  ;;  %v1315_v28 = vld [vmem:[%s1879_s1 + $0xa8] sm:$0xff] }
   0x7   :  { %1335 = vmatpush.bf16.msra.mxu3 %v1300_v1  ;;  %577 = vmatpush.bf16.msra.mxu0 %v1300_v1  ;;  %v1309_v17 = vld [vmem:[%s1879_s1 + $0x78] sm:$0xff]  ;;  %v945_v21 = vor.u32 %v1256_v15, %v944_v14  ;;  %v1316_v24 = vld [vmem:[%s1879_s1 + $0xb0] sm:$0xff]  ;;  %v1307_v29 = vld [vmem:[%s1879_s1 + $0x68] sm:$0xff] }
   0x8   :  { %v1325_v22 = vld [vmem:[%s1879_s1 + $0xf8] sm:$0xff]  ;;  %v1308_v25 = vld [vmem:[%s1879_s1 + $0x70] sm:$0xff]  ;;  %v1323_v30 = vld [vmem:[%s1879_s1 + $0xe8] sm:$0xff] }
   0x9   :  { %v1329_v23 = vld [vmem:[%s1879_s1 + $0x118] sm:$0xff]  ;;  %v1324_v26 = vld [vmem:[%s1879_s1 + $0xf0] sm:$0xff]  ;;  %v1327_v31 = vld [vmem:[%s1879_s1 + $0x108] sm:$0xff] }
   0xa   :  { %1336 = vmatpush.bf16.msra.mxu1 %v1299_v2  ;;  %1337 = vmatpush.bf16.msra.mxu2 %v1299_v2  ;;  %v1328_v27 = vld [vmem:[%s1879_s1 + $0x110] sm:$0xff]  ;;  %v1314_v32 = vld [vmem:[%s1879_s1 + $0xa0] sm:$0xff]  ;;  %v1004_v35 = vld [vmem:[%s1880_s0 + $0x78] sm:$0xf] }
   0xb   :  { %1338 = vmatpush.bf16.msra.mxu3 %v1299_v2  ;;  %578 = vmatpush.bf16.msra.mxu0 %v1299_v2  ;;  %v1306_v33 = vld [vmem:[%s1879_s1 + $0x60] sm:$0xff]  ;;  %v1271_v36 = vld [vmem:[%s1880_s0 + $0x88] sm:$0xf0]  ;;  %v1044_v37 = vld [vmem:[%s1880_s0 + $0xc8] sm:$0xf] }
   0xc   :  { %v1322_v34 = vld [vmem:[%s1879_s1 + $0xe0] sm:$0xff]  ;;  %v1281_v38 = vld [vmem:[%s1880_s0 + $0xd8] sm:$0xf0]  ;;  %v1084_v39 = vld [vmem:[%s1880_s0 + $0x118] sm:$0xf]  ;;  %v1005_v46 = vor.u32 %v1271_v36, %v1004_v35 }
   0xd   :  { %v1291_v40 = vld [vmem:[%s1880_s0 + $0x128] sm:$0xf0]  ;;  %v964_v41 = vld [vmem:[%s1880_s0 + $0x28] sm:$0xf]  ;;  %v1261_v42 = vld [vmem:[%s1880_s0 + $0x38] sm:$0xf0]  ;;  %v1045_v47 = vor.u32 %v1281_v38, %v1044_v37 }
   0xe   :  { %1339 = vmatpush.bf16.msra.mxu1 %v1298_v3  ;;  %1340 = vmatpush.bf16.msra.mxu2 %v1298_v3  ;;  %v1326_v43 = vld [vmem:[%s1879_s1 + $0x100] sm:$0xff]  ;;  %v1313_v44 = vld [vmem:[%s1879_s1 + $0x98] sm:$0xff]  ;;  %v1085_v48 = vor.u32 %v1291_v40, %v1084_v39  ;;  %v965_v49 = vor.u32 %v1261_v42, %v964_v41  ;;  %v1312_v51 = vld [vmem:[%s1879_s1 + $0x90] sm:$0xff] }
   0xf   :  { %1341 = vmatpush.bf16.msra.mxu3 %v1298_v3  ;;  %579 = vmatpush.bf16.msra.mxu0 %v1298_v3  ;;  %v1305_v45 = vld [vmem:[%s1879_s1 + $0x58] sm:$0xff]  ;;  %v1304_v52 = vld [vmem:[%s1879_s1 + $0x50] sm:$0xff]  ;;  %v1311_v54 = vld [vmem:[%s1879_s1 + $0x88] sm:$0xff] }
  0x10   :  { %v1321_v50 = vld [vmem:[%s1879_s1 + $0xd8] sm:$0xff]  ;;  %v1320_v53 = vld [vmem:[%s1879_s1 + $0xd0] sm:$0xff]  ;;  %v1303_v55 = vld [vmem:[%s1879_s1 + $0x48] sm:$0xff] }
  0x11   :  { %v1319_v56 = vld [vmem:[%s1879_s1 + $0xc8] sm:$0xff]  ;;  %v1310_v57 = vld [vmem:[%s1879_s1 + $0x80] sm:$0xff]  ;;  %v946_v61 = vld [vmem:[%s1880_s0 + $0x14] sm:$0xf0] }
  0x12   :  { %1342 = vmatpush.bf16.msra.mxu1 %v1297_v4  ;;  %1343 = vmatpush.bf16.msra.mxu2 %v1297_v4  ;;  %v1302_v58 = vld [vmem:[%s1879_s1 + $0x40] sm:$0xff]  ;;  %v952_v62 = vld [vmem:[%s1880_s0 + $0x8] sm:$0xf]  ;;  %v1257_v63 = vld [vmem:[%s1880_s0 + $0x18] sm:$0xf0] }
  0x13   :  { %1344 = vmatpush.bf16.msra.mxu3 %v1297_v4  ;;  %580 = vmatpush.bf16.msra.mxu0 %v1297_v4  ;;  %v1318_v59 = vld [vmem:[%s1879_s1 + $0xc0] sm:$0xff]  ;;  %v1255_v0 = vld [vmem:[%s1880_s0 + $0xc] sm:$0xf]  ;;  %v960_v2 = vld [vmem:[%s1880_s0 + $0x10] sm:$0xf] }
  0x14   :  { %v1254_v60 = vld [vmem:[%s1880_s0 + $0x4] sm:$0xf]  ;;  %v954_v1 = vld [vmem:[%s1880_s0 + $0x1c] sm:$0xf0]  ;;  %v1259_v8 = vld [vmem:[%s1880_s0 + $0x2c] sm:$0xf] }
  0x15   :  { %v1258_v3 = vld [vmem:[%s1880_s0 + $0x20] sm:$0xf0]  ;;  %v949_v4 = vor.u32 %v1254_v60, %v946_v61  ;;  %v966_v9 = vld [vmem:[%s1880_s0 + $0x3c] sm:$0xf0]  ;;  %v972_v10 = vld [vmem:[%s1880_s0 + $0x30] sm:$0xf] }
  0x16   :  { %1345 = vmatpush.bf16.msra.mxu1 %v1296_v5  ;;  %1346 = vmatpush.bf16.msra.mxu2 %v1296_v5  ;;  %v1262_v11 = vld [vmem:[%s1880_s0 + $0x40] sm:$0xf0]  ;;  %v1260_v12 = vld [vmem:[%s1880_s0 + $0x34] sm:$0xf]  ;;  %v974_v13 = vld [vmem:[%s1880_s0 + $0x44] sm:$0xf0] }
  0x17   :  { %1347 = vmatpush.bf16.msra.mxu3 %v1296_v5  ;;  %581 = vmatpush.bf16.msra.mxu0 %v1296_v5  ;;  %v953_v5 = vor.u32 %v1257_v63, %v952_v62  ;;  %v980_v14 = vld [vmem:[%s1880_s0 + $0x38] sm:$0xf]  ;;  %v1263_v15 = vld [vmem:[%s1880_s0 + $0x48] sm:$0xf0]  ;;  %v1272_v35 = vld [vmem:[%s1880_s0 + $0x90] sm:$0xf0] }
  0x18   :  { %v1270_v36 = vld [vmem:[%s1880_s0 + $0x84] sm:$0xf]  ;;  %v1014_v37 = vld [vmem:[%s1880_s0 + $0x94] sm:$0xf0]  ;;  %v1020_v38 = vld [vmem:[%s1880_s0 + $0x88] sm:$0xf] }
  0x19   :  { %v1273_v39 = vld [vmem:[%s1880_s0 + $0x98] sm:$0xf0]  ;;  %v1017_v42 = vor.u32 %v1270_v36, %v1014_v37  ;;  %v1280_v60 = vld [vmem:[%s1880_s0 + $0xd4] sm:$0xf]  ;;  %v1054_v61 = vld [vmem:[%s1880_s0 + $0xe4] sm:$0xf0] }
  0x1a   :  { %1348 = vmatpush.bf16.msra.mxu1 %v1295_v6  ;;  %1349 = vmatpush.bf16.msra.mxu2 %v1295_v6  ;;  %v1060_v62 = vld [vmem:[%s1880_s0 + $0xd8] sm:$0xf]  ;;  %v1283_v63 = vld [vmem:[%s1880_s0 + $0xe8] sm:$0xf0] }
  0x1b   :  { %1350 = vmatpush.bf16.msra.mxu3 %v1295_v6  ;;  %582 = vmatpush.bf16.msra.mxu0 %v1295_v6  ;;  %v957_v6 = vor.u32 %v1255_v0, %v954_v1 }
  0x1e   :  { %1351 = vmatpush.bf16.msra.mxu1 %v1294_v7  ;;  %1352 = vmatpush.bf16.msra.mxu2 %v1294_v7 }
  0x1f   :  { %1353 = vmatpush.bf16.msra.mxu3 %v1294_v7  ;;  %583 = vmatpush.bf16.msra.mxu0 %v1294_v7  ;;  %v961_v7 = vor.u32 %v1258_v3, %v960_v2  ;;  %v1057_v2 = vor.u32 %v1280_v60, %v1054_v61  ;;  %v1061_v3 = vor.u32 %v1283_v63, %v1060_v62 }
  0x21   :  { %594 = vmatmul.bf16.vlgmr.msra.gmra.mxu1 %v985_v18  ;;  %604 = vmatmul.bf16.vlgmr.msra.gmra.mxu2 %v1025_v19  ;;  %v977_v18 = vor.u32 %v1260_v12, %v974_v13  ;;  %v981_v19 = vor.u32 %v1263_v15, %v980_v14 }
  0x22   :  { %674 = vmatpush.bf16.msrb.mxu2 %v1317_v16  ;;  %625 = vmatpush.bf16.msrb.mxu1 %v1309_v17  ;;  %v969_v16 = vor.u32 %v1259_v8, %v966_v9  ;;  %v973_v17 = vor.u32 %v1262_v11, %v972_v10  ;;  %v1285_v8 = vld [vmem:[%s1880_s0 + $0xfc] sm:$0xf]  ;;  %v1074_v9 = vld [vmem:[%s1880_s0 + $0x10c] sm:$0xf0]  ;;  %v1080_v10 = vld [vmem:[%s1880_s0 + $0x100] sm:$0xf] }
  0x23   :  { %614 = vmatmul.bf16.vlgmr.msra.gmra.mxu3 %v1065_v20  ;;  %584 = vmatmul.bf16.vlgmr.msra.gmra.mxu0 %v945_v21  ;;  %v1264_v20 = vld [vmem:[%s1880_s0 + $0x54] sm:$0xf]  ;;  %v986_v21 = vld [vmem:[%s1880_s0 + $0x64] sm:$0xf0]  ;;  %v1077_v15 = vor.u32 %v1285_v8, %v1074_v9 }
  0x24   :  { %723 = vmatpush.bf16.msrb.mxu3 %v1325_v22  ;;  %776 = vmatpush.bf16.msrb.mxu0 %v1329_v23  ;;  %v992_v22 = vld [vmem:[%s1880_s0 + $0x58] sm:$0xf]  ;;  %v1267_v23 = vld [vmem:[%s1880_s0 + $0x68] sm:$0xf0]  ;;  %v1288_v11 = vld [vmem:[%s1880_s0 + $0x110] sm:$0xf0] }
  0x26   :  { %675 = vmatpush.bf16.msrb.mxu2 %v1316_v24  ;;  %626 = vmatpush.bf16.msrb.mxu1 %v1308_v25  ;;  %v1265_v24 = vld [vmem:[%s1880_s0 + $0x5c] sm:$0xf]  ;;  %v994_v25 = vld [vmem:[%s1880_s0 + $0x6c] sm:$0xf0] }
  0x28   :  { %724 = vmatpush.bf16.msrb.mxu3 %v1324_v26  ;;  %777 = vmatpush.bf16.msrb.mxu0 %v1328_v27  ;;  %v1000_v26 = vld [vmem:[%s1880_s0 + $0x60] sm:$0xf]  ;;  %v1268_v27 = vld [vmem:[%s1880_s0 + $0x70] sm:$0xf0] }
  0x2a   :  { %676 = vmatpush.bf16.msrb.mxu2 %v1315_v28  ;;  %627 = vmatpush.bf16.msrb.mxu1 %v1307_v29  ;;  %v989_v28 = vor.u32 %v1264_v20, %v986_v21  ;;  %v993_v29 = vor.u32 %v1267_v23, %v992_v22  ;;  %v1289_v22 = vld [vmem:[%s1880_s0 + $0x11c] sm:$0xf]  ;;  %v1086_v23 = vld [vmem:[%s1880_s0 + $0x12c] sm:$0xf0] }
  0x2c   :  { %725 = vmatpush.bf16.msrb.mxu3 %v1323_v30  ;;  %778 = vmatpush.bf16.msrb.mxu0 %v1327_v31  ;;  %v997_v30 = vor.u32 %v1265_v24, %v994_v25  ;;  %v1001_v31 = vor.u32 %v1268_v27, %v1000_v26  ;;  %v1092_v24 = vld [vmem:[%s1880_s0 + $0x120] sm:$0xf]  ;;  %v1292_v25 = vld [vmem:[%s1880_s0 + $0x130] sm:$0xf0]  ;;  %v1290_v26 = vld [vmem:[%s1880_s0 + $0x124] sm:$0xf] }
  0x2d   :  { %v1094_v27 = vld [vmem:[%s1880_s0 + $0x134] sm:$0xf0] }
  0x2e   :  { %677 = vmatpush.bf16.msrb.mxu2 %v1314_v32  ;;  %628 = vmatpush.bf16.msrb.mxu1 %v1306_v33  ;;  %v1269_v32 = vld [vmem:[%s1880_s0 + $0x7c] sm:$0xf]  ;;  %v1006_v33 = vld [vmem:[%s1880_s0 + $0x8c] sm:$0xf0] }
  0x2f   :  { %v1009_v40 = vor.u32 %v1269_v32, %v1006_v33  ;;  %v1089_v32 = vor.u32 %v1289_v22, %v1086_v23  ;;  %v1093_v33 = vor.u32 %v1292_v25, %v1092_v24 }
  0x30   :  { %726 = vmatpush.bf16.msrb.mxu3 %v1322_v34  ;;  %779 = vmatpush.bf16.msrb.mxu0 %v1326_v43  ;;  %v1012_v34 = vld [vmem:[%s1880_s0 + $0x80] sm:$0xf]  ;;  %v1021_v43 = vor.u32 %v1273_v39, %v1020_v38 }
  0x31   :  { %599 = vmatmul.bf16.gmra.mxu1 %v1005_v46  ;;  %609 = vmatmul.bf16.gmra.mxu2 %v1045_v47  ;;  %v1013_v41 = vor.u32 %v1272_v35, %v1012_v34  ;;  %v1032_v46 = vld [vmem:[%s1880_s0 + $0xa8] sm:$0xf]  ;;  %v1277_v47 = vld [vmem:[%s1880_s0 + $0xb8] sm:$0xf0]  ;;  %v1097_v35 = vor.u32 %v1290_v26, %v1094_v27 }
  0x32   :  { %678 = vmatpush.bf16.msrb.mxu2 %v1313_v44  ;;  %629 = vmatpush.bf16.msrb.mxu1 %v1305_v45  ;;  %v1274_v44 = vld [vmem:[%s1880_s0 + $0xa4] sm:$0xf]  ;;  %v1026_v45 = vld [vmem:[%s1880_s0 + $0xb4] sm:$0xf0] }
  0x33   :  { %619 = vmatmul.bf16.gmra.mxu3 %v1085_v48  ;;  %589 = vmatmul.bf16.gmra.mxu0 %v965_v49  ;;  %v1275_v48 = vld [vmem:[%s1880_s0 + $0xac] sm:$0xf]  ;;  %v1034_v49 = vld [vmem:[%s1880_s0 + $0xbc] sm:$0xf0] }
  0x34   :  { %727 = vmatpush.bf16.msrb.mxu3 %v1321_v50  ;;  %v1040_v50 = vld [vmem:[%s1880_s0 + $0xb0] sm:$0xf] }
  0x36   :  { %679 = vmatpush.bf16.msrb.mxu2 %v1312_v51  ;;  %630 = vmatpush.bf16.msrb.mxu1 %v1304_v52  ;;  %v1278_v51 = vld [vmem:[%s1880_s0 + $0xc0] sm:$0xf0]  ;;  %v1029_v52 = vor.u32 %v1274_v44, %v1026_v45 }
  0x38   :  { %728 = vmatpush.bf16.msrb.mxu3 %v1320_v53  ;;  %v1033_v53 = vor.u32 %v1277_v47, %v1032_v46 }
  0x3a   :  { %680 = vmatpush.bf16.msrb.mxu2 %v1311_v54  ;;  %631 = vmatpush.bf16.msrb.mxu1 %v1303_v55  ;;  %v1037_v54 = vor.u32 %v1275_v48, %v1034_v49  ;;  %v1041_v55 = vor.u32 %v1278_v51, %v1040_v50 }
  0x3c   :  { %729 = vmatpush.bf16.msrb.mxu3 %v1319_v56  ;;  %v1279_v56 = vld [vmem:[%s1880_s0 + $0xcc] sm:$0xf] }
  0x3e   :  { %681 = vmatpush.bf16.msrb.mxu2 %v1310_v57  ;;  %632 = vmatpush.bf16.msrb.mxu1 %v1302_v58  ;;  %v1046_v57 = vld [vmem:[%s1880_s0 + $0xdc] sm:$0xf0]  ;;  %v1052_v58 = vld [vmem:[%s1880_s0 + $0xd0] sm:$0xf] }
  0x3f   :  { %v1049_v0 = vor.u32 %v1279_v56, %v1046_v57 }
  0x40   :  { %730 = vmatpush.bf16.msrb.mxu3 %v1318_v59  ;;  %v1282_v59 = vld [vmem:[%s1880_s0 + $0xe0] sm:$0xf0] }
  0x41   :  { %633 = vmatmul.bf16.vlgmr.msrb.gmra.mxu1 %v949_v4  ;;  %682 = vmatmul.bf16.vlgmr.msrb.gmra.mxu2 %v953_v5  ;;  %v1053_v1 = vor.u32 %v1282_v59, %v1052_v58  ;;  %v1284_v4 = vld [vmem:[%s1880_s0 + $0xf4] sm:$0xf]  ;;  %v1066_v5 = vld [vmem:[%s1880_s0 + $0x104] sm:$0xf0] }
  0x42   :  { %v1069_v12 = vor.u32 %v1284_v4, %v1066_v5 }
  0x43   :  { %731 = vmatmul.bf16.vlgmr.msrb.gmra.mxu3 %v957_v6  ;;  %1246 = vmatmul.msk.bf16.vlgmr.msrb.gmra.mxu0 %vm551_vm0, %v961_v7  ;;  %v1072_v6 = vld [vmem:[%s1880_s0 + $0xf8] sm:$0xf]  ;;  %v1287_v7 = vld [vmem:[%s1880_s0 + $0x108] sm:$0xf0] }
  0x44   :  { %v1073_v13 = vor.u32 %v1287_v7, %v1072_v6 }
  0x51   :  { %638 = vmatmul.bf16.gmra.mxu1 %v969_v16  ;;  %687 = vmatmul.bf16.gmra.mxu2 %v973_v17  ;;  %v1081_v16 = vor.u32 %v1288_v11, %v1080_v10 }
  0x53   :  { %736 = vmatmul.bf16.gmra.mxu3 %v977_v18  ;;  %1247 = vmatmul.msk.bf16.gmra.mxu0 %vm551_vm0, %v981_v19 }
  0x61   :  { %643 = vmatmul.bf16.gmra.mxu1 %v989_v28  ;;  %692 = vmatmul.bf16.gmra.mxu2 %v993_v29  ;;  %v1100_v28 = vld [vmem:[%s1880_s0 + $0x128] sm:$0xf]  ;;  %v1293_v29 = vld [vmem:[%s1880_s0 + $0x138] sm:$0xf0] }
  0x62   :  { %v1101_v36 = vor.u32 %v1293_v29, %v1100_v28 }
  0x63   :  { %741 = vmatmul.bf16.gmra.mxu3 %v997_v30  ;;  %1248 = vmatmul.msk.bf16.gmra.mxu0 %vm551_vm0, %v1001_v31 }
  0x71   :  { %648 = vmatmul.bf16.gmra.mxu1 %v1009_v40  ;;  %697 = vmatmul.bf16.gmra.mxu2 %v1013_v41 }
  0x73   :  { %746 = vmatmul.bf16.gmra.mxu3 %v1017_v42  ;;  %1249 = vmatmul.msk.bf16.gmra.mxu0 %vm551_vm0, %v1021_v43 }
  0x81   :  { %653 = vmatmul.bf16.gmra.mxu1 %v1029_v52  ;;  %702 = vmatmul.bf16.gmra.mxu2 %v1033_v53 }
  0x83   :  { %751 = vmatmul.bf16.gmra.mxu3 %v1037_v54  ;;  %1250 = vmatmul.msk.bf16.gmra.mxu0 %vm551_vm0, %v1041_v55 }
  0x91   :  { %658 = vmatmul.bf16.gmra.mxu1 %v1049_v0  ;;  %707 = vmatmul.bf16.gmra.mxu2 %v1053_v1 }
  0x93   :  { %756 = vmatmul.bf16.gmra.mxu3 %v1057_v2  ;;  %1251 = vmatmul.msk.bf16.gmra.mxu0 %vm551_vm0, %v1061_v3 }
  0x9e   :  { %v1709_v14 = vpop.f32.mrf.mxu1 }
  0xa0   :  { %v585_v17 = vpop.f32.mrf.mxu0 }
  0xa1   :  { %663 = vmatmul.bf16.gmra.mxu1 %v1069_v12  ;;  %712 = vmatmul.bf16.gmra.mxu2 %v1073_v13 }
  0xa3   :  { %761 = vmatmul.bf16.gmra.mxu3 %v1077_v15  ;;  %1252 = vmatmul.msk.bf16.gmra.mxu0 %vm551_vm0, %v1081_v16 }
  0xa4   :  { %v1712_v18 = vpop.f32.mrf.mxu2 }
  0xa6   :  { %v1714_v19 = vpop.f32.mrf.mxu3  ;;  %v1716_v20 = vpop.f32.mrf.mxu1 }
  0xa8   :  { %v587_v21 = vpop.f32.mrf.mxu0 }
  0xac   :  { %v1742_v30 = vpop.f32.mrf.mxu2 }
  0xae   :  { %v1744_v31 = vpop.f32.mrf.mxu3  ;;  %v1746_v34 = vpop.f32.mrf.mxu1 }
  0xb0   :  { %v590_v37 = vpop.f32.mrf.mxu0 }
  0xb1   :  { %668 = vmatmul.bf16.gmra.mxu1 %v1089_v32  ;;  %717 = vmatmul.bf16.gmra.mxu2 %v1093_v33 }
  0xb3   :  { %766 = vmatmul.bf16.gmra.mxu3 %v1097_v35  ;;  %1253 = vmatmul.msk.bf16.gmra.mxu0 %vm551_vm0, %v1101_v36 }
  0xb4   :  { %v1749_v38 = vpop.f32.mrf.mxu2 }
  0xb6   :  { %v1751_v39 = vpop.f32.mrf.mxu3  ;;  %v1753_v40 = vpop.f32.mrf.mxu1 }
  0xb8   :  { %v592_v41 = vpop.f32.mrf.mxu0 }
  0xbc   :  { %v1755_v42 = vpop.f32.mrf.mxu2 }
  0xbe   :  { %v1757_v43 = vpop.f32.mrf.mxu3  ;;  %v634_v44 = vpop.f32.mrf.mxu1 }
  0xbf   :  { %v635_v46 = vadd.f32 %v634_v44, %v585_v17 }
  0xc0   :  { %v781_v45 = vpop.f32.mrf.mxu0 }
  0xc4   :  { %v683_v47 = vpop.f32.mrf.mxu2 }
  0xc5   :  { %v684_v48 = vadd.f32 %v683_v47, %v635_v46 }
  0xc6   :  { %v732_v49 = vpop.f32.mrf.mxu3  ;;  %v636_v50 = vpop.f32.mrf.mxu1 }
  0xc7   :  { %v733_v51 = vadd.f32 %v732_v49, %v684_v48  ;;  %v637_v54 = vadd.f32 %v636_v50, %v587_v21 }
  0xc8   :  { %v783_v52 = vpop.f32.mrf.mxu0 }
  0xc9   :  { %v782_v53 = vadd.f32 %v781_v45, %v733_v51 }
  0xcb   :  { %821 = vst.msk [vmem:[%s1881_s2] sm:$0xff] %vm551_vm0, %v782_v53  ;;  %v874_v61 = vmul.f32 %v782_v53, %v782_v53  ;;  %v837_v63 = vsel %vm551_vm0, %v782_v53, 0.0 }
  0xcc   :  { %v685_v55 = vpop.f32.mrf.mxu2 }
  0xcd   :  { %v686_v56 = vadd.f32 %v685_v55, %v637_v54  ;;  %v890_v5 = vsel %vm551_vm0, %v874_v61, 0.0 }
  0xce   :  { %v734_v57 = vpop.f32.mrf.mxu3  ;;  %v639_v58 = vpop.f32.mrf.mxu1 }
  0xcf   :  { %v735_v59 = vadd.f32 %v734_v57, %v686_v56  ;;  %v640_v2 = vadd.f32 %v639_v58, %v590_v37 }
  0xd0   :  { %v786_v60 = vpop.f32.mrf.mxu0 }
  0xd1   :  { %v784_v62 = vadd.f32 %v783_v52, %v735_v59 }
  0xd3   :  { %822 = vst.msk [vmem:[%s1881_s2 + $0x8] sm:$0xff] %vm551_vm0, %v784_v62  ;;  %v838_v0 = vsel %vm551_vm0, %v784_v62, 0.0  ;;  %v875_v1 = vmul.f32 %v784_v62, %v784_v62 }
  0xd4   :  { %v839_v3 = vadd.f32 %v838_v0, %v837_v63  ;;  %v688_v4 = vpop.f32.mrf.mxu2 }
  0xd5   :  { %v891_v6 = vsel %vm551_vm0, %v875_v1, 0.0  ;;  %v689_v7 = vadd.f32 %v688_v4, %v640_v2 }
  0xd6   :  { %v737_v8 = vpop.f32.mrf.mxu3  ;;  %v892_v9 = vadd.f32 %v891_v6, %v890_v5  ;;  %v641_v10 = vpop.f32.mrf.mxu1 }
  0xd7   :  { %v738_v11 = vadd.f32 %v737_v8, %v689_v7  ;;  %v642_v17 = vadd.f32 %v641_v10, %v592_v41 }
  0xd8   :  { %v788_v12 = vpop.f32.mrf.mxu0 }
  0xd9   :  { %v787_v13 = vadd.f32 %v786_v60, %v738_v11 }
  0xdb   :  { %823 = vst.msk [vmem:[%s1881_s2 + $0x10] sm:$0xff] %vm551_vm0, %v787_v13  ;;  %v840_v15 = vsel %vm551_vm0, %v787_v13, 0.0  ;;  %v876_v16 = vmul.f32 %v787_v13, %v787_v13 }
  0xdc   :  { %v841_v21 = vadd.f32 %v840_v15, %v839_v3  ;;  %v690_v22 = vpop.f32.mrf.mxu2 }
  0xdd   :  { %v893_v23 = vsel %vm551_vm0, %v876_v16, 0.0  ;;  %v691_v24 = vadd.f32 %v690_v22, %v642_v17 }
  0xde   :  { %v739_v25 = vpop.f32.mrf.mxu3  ;;  %v894_v26 = vadd.f32 %v893_v23, %v892_v9  ;;  %v644_v27 = vpop.f32.mrf.mxu1 }
  0xdf   :  { %v740_v28 = vadd.f32 %v739_v25, %v691_v24  ;;  %v645_v36 = vadd.f32 %v644_v27, %v1709_v14 }
  0xe0   :  { %v791_v29 = vpop.f32.mrf.mxu0 }
  0xe1   :  { %v789_v32 = vadd.f32 %v788_v12, %v740_v28 }
  0xe3   :  { %824 = vst.msk [vmem:[%s1881_s2 + $0x18] sm:$0xff] %vm551_vm0, %v789_v32  ;;  %v842_v33 = vsel %vm551_vm0, %v789_v32, 0.0  ;;  %v877_v35 = vmul.f32 %v789_v32, %v789_v32 }
  0xe4   :  { %v843_v37 = vadd.f32 %v842_v33, %v841_v21  ;;  %v693_v41 = vpop.f32.mrf.mxu2 }
  0xe5   :  { %v895_v44 = vsel %vm551_vm0, %v877_v35, 0.0  ;;  %v694_v45 = vadd.f32 %v693_v41, %v645_v36 }
  0xe6   :  { %v742_v46 = vpop.f32.mrf.mxu3  ;;  %v896_v47 = vadd.f32 %v895_v44, %v894_v26  ;;  %v646_v48 = vpop.f32.mrf.mxu1 }
  0xe7   :  { %v743_v49 = vadd.f32 %v742_v46, %v694_v45  ;;  %v647_v14 = vadd.f32 %v646_v48, %v1716_v20 }
  0xe8   :  { %v793_v50 = vpop.f32.mrf.mxu0 }
  0xe9   :  { %v792_v51 = vadd.f32 %v791_v29, %v743_v49 }
  0xeb   :  { %825 = vst.msk [vmem:[%s1881_s2 + $0x20] sm:$0xff] %vm551_vm0, %v792_v51  ;;  %v844_v52 = vsel %vm551_vm0, %v792_v51, 0.0  ;;  %v878_v53 = vmul.f32 %v792_v51, %v792_v51 }
  0xec   :  { %v845_v54 = vadd.f32 %v844_v52, %v843_v37  ;;  %v695_v55 = vpop.f32.mrf.mxu2 }
  0xed   :  { %v897_v56 = vsel %vm551_vm0, %v878_v53, 0.0  ;;  %v696_v57 = vadd.f32 %v695_v55, %v647_v14 }
  0xee   :  { %v744_v58 = vpop.f32.mrf.mxu3  ;;  %v898_v59 = vadd.f32 %v897_v56, %v896_v47  ;;  %v649_v60 = vpop.f32.mrf.mxu1 }
  0xef   :  { %v745_v61 = vadd.f32 %v744_v58, %v696_v57  ;;  %v650_v20 = vadd.f32 %v649_v60, %v1746_v34 }
  0xf0   :  { %v796_v62 = vpop.f32.mrf.mxu0 }
  0xf1   :  { %v794_v63 = vadd.f32 %v793_v50, %v745_v61 }
  0xf3   :  { %826 = vst.msk [vmem:[%s1881_s2 + $0x28] sm:$0xff] %vm551_vm0, %v794_v63  ;;  %v846_v0 = vsel %vm551_vm0, %v794_v63, 0.0  ;;  %v879_v1 = vmul.f32 %v794_v63, %v794_v63 }
  0xf4   :  { %v847_v2 = vadd.f32 %v846_v0, %v845_v54  ;;  %v698_v3 = vpop.f32.mrf.mxu2 }
  0xf5   :  { %v899_v4 = vsel %vm551_vm0, %v879_v1, 0.0  ;;  %v699_v5 = vadd.f32 %v698_v3, %v650_v20 }
  0xf6   :  { %v747_v6 = vpop.f32.mrf.mxu3  ;;  %v900_v7 = vadd.f32 %v899_v4, %v898_v59  ;;  %v651_v8 = vpop.f32.mrf.mxu1 }
  0xf7   :  { %v748_v9 = vadd.f32 %v747_v6, %v699_v5  ;;  %v652_v34 = vadd.f32 %v651_v8, %v1753_v40 }
  0xf8   :  { %v798_v10 = vpop.f32.mrf.mxu0 }
  0xf9   :  { %v797_v11 = vadd.f32 %v796_v62, %v748_v9 }
  0xfb   :  { %827 = vst.msk [vmem:[%s1881_s2 + $0x30] sm:$0xff] %vm551_vm0, %v797_v11  ;;  %v848_v12 = vsel %vm551_vm0, %v797_v11, 0.0  ;;  %v880_v13 = vmul.f32 %v797_v11, %v797_v11 }
  0xfc   :  { %v849_v15 = vadd.f32 %v848_v12, %v847_v2  ;;  %v700_v16 = vpop.f32.mrf.mxu2 }
  0xfd   :  { %v901_v17 = vsel %vm551_vm0, %v880_v13, 0.0  ;;  %v701_v21 = vadd.f32 %v700_v16, %v652_v34 }
  0xfe   :  { %v749_v22 = vpop.f32.mrf.mxu3  ;;  %v902_v23 = vadd.f32 %v901_v17, %v900_v7  ;;  %v654_v24 = vpop.f32.mrf.mxu1 }
  0xff   :  { %v750_v25 = vadd.f32 %v749_v22, %v701_v21  ;;  %v655_v40 = vadd.f32 %v654_v24, %v1712_v18 }
 0x100   :  { %v801_v26 = vpop.f32.mrf.mxu0 }
 0x101   :  { %v799_v27 = vadd.f32 %v798_v10, %v750_v25 }
 0x103   :  { %828 = vst.msk [vmem:[%s1881_s2 + $0x38] sm:$0xff] %vm551_vm0, %v799_v27  ;;  %v850_v28 = vsel %vm551_vm0, %v799_v27, 0.0  ;;  %v881_v29 = vmul.f32 %v799_v27, %v799_v27 }
 0x104   :  { %v1811_v32 = vadd.f32 %v850_v28, %v849_v15  ;;  %v703_v33 = vpop.f32.mrf.mxu2 }
 0x105   :  { %v903_v35 = vsel %vm551_vm0, %v881_v29, 0.0  ;;  %v704_v36 = vadd.f32 %v703_v33, %v655_v40 }
 0x106   :  { %v752_v37 = vpop.f32.mrf.mxu3  ;;  %v1814_v41 = vadd.f32 %v903_v35, %v902_v23  ;;  %v656_v44 = vpop.f32.mrf.mxu1 }
 0x107   :  { %v753_v45 = vadd.f32 %v752_v37, %v704_v36  ;;  %v657_v18 = vadd.f32 %v656_v44, %v1742_v30 }
 0x108   :  { %v803_v46 = vpop.f32.mrf.mxu0 }
 0x109   :  { %v802_v47 = vadd.f32 %v801_v26, %v753_v45 }
 0x10b   :  { %829 = vst.msk [vmem:[%s1881_s2 + $0x40] sm:$0xff] %vm551_vm0, %v802_v47  ;;  %v852_v17 = vsel %vm551_vm0, %v802_v47, 0.0 }
 0x10c   :  { %v705_v48 = vpop.f32.mrf.mxu2  ;;  %v853_v28 = vadd.f32 %v852_v17, %v1811_v32 }
 0x10d   :  { %v706_v49 = vadd.f32 %v705_v48, %v657_v18 }
 0x10e   :  { %v754_v50 = vpop.f32.mrf.mxu3  ;;  %v659_v51 = vpop.f32.mrf.mxu1 }
 0x10f   :  { %v755_v52 = vadd.f32 %v754_v50, %v706_v49  ;;  %v660_v54 = vadd.f32 %v659_v51, %v1749_v38 }
 0x110   :  { %v806_v53 = vpop.f32.mrf.mxu0 }
 0x111   :  { %v804_v14 = vadd.f32 %v803_v46, %v755_v52 }
 0x113   :  { %830 = vst.msk [vmem:[%s1881_s2 + $0x48] sm:$0xff] %vm551_vm0, %v804_v14  ;;  %v883_v21 = vmul.f32 %v804_v14, %v804_v14  ;;  %v854_v24 = vsel %vm551_vm0, %v804_v14, 0.0 }
 0x114   :  { %v708_v55 = vpop.f32.mrf.mxu2 }
 0x115   :  { %v709_v56 = vadd.f32 %v708_v55, %v660_v54  ;;  %v907_v40 = vsel %vm551_vm0, %v883_v21, 0.0 }
 0x116   :  { %v757_v57 = vpop.f32.mrf.mxu3  ;;  %v661_v58 = vpop.f32.mrf.mxu1 }
 0x117   :  { %v758_v59 = vadd.f32 %v757_v57, %v709_v56  ;;  %v662_v61 = vadd.f32 %v661_v58, %v1755_v42 }
 0x118   :  { %v808_v30 = vpop.f32.mrf.mxu0 }
 0x119   :  { %v807_v60 = vadd.f32 %v806_v53, %v758_v59 }
 0x11b   :  { %831 = vst.msk [vmem:[%s1881_s2 + $0x50] sm:$0xff] %vm551_vm0, %v807_v60  ;;  %v884_v25 = vmul.f32 %v807_v60, %v807_v60  ;;  %v856_v33 = vsel %vm551_vm0, %v807_v60, 0.0 }
 0x11c   :  { %v710_v62 = vpop.f32.mrf.mxu2 }
 0x11d   :  { %v711_v63 = vadd.f32 %v710_v62, %v662_v61  ;;  %v909_v45 = vsel %vm551_vm0, %v884_v25, 0.0 }
 0x11e   :  { %v759_v0 = vpop.f32.mrf.mxu3  ;;  %v664_v1 = vpop.f32.mrf.mxu1 }
 0x11f   :  { %v760_v20 = vadd.f32 %v759_v0, %v711_v63  ;;  %v665_v3 = vadd.f32 %v664_v1, %v1714_v19  ;;  %v882_v19 = vmul.f32 %v802_v47, %v802_v47 }
 0x120   :  { %v811_v2 = vpop.f32.mrf.mxu0 }
 0x121   :  { %v809_v38 = vadd.f32 %v808_v30, %v760_v20 }
 0x123   :  { %832 = vst.msk [vmem:[%s1881_s2 + $0x58] sm:$0xff] %vm551_vm0, %v809_v38  ;;  %v885_v35 = vmul.f32 %v809_v38, %v809_v38  ;;  %v858_v46 = vsel %vm551_vm0, %v809_v38, 0.0 }
 0x124   :  { %v713_v4 = vpop.f32.mrf.mxu2 }
 0x125   :  { %v714_v5 = vadd.f32 %v713_v4, %v665_v3  ;;  %v911_v32 = vsel %vm551_vm0, %v885_v35, 0.0 }
 0x126   :  { %v762_v6 = vpop.f32.mrf.mxu3  ;;  %v666_v7 = vpop.f32.mrf.mxu1 }
 0x127   :  { %v763_v8 = vadd.f32 %v762_v6, %v714_v5  ;;  %v667_v9 = vadd.f32 %v666_v7, %v1744_v31  ;;  %v905_v31 = vsel %vm551_vm0, %v882_v19, 0.0 }
 0x128   :  { %v813_v10 = vpop.f32.mrf.mxu0  ;;  %v906_v37 = vadd.f32 %v905_v31, %v1814_v41 }
 0x129   :  { %v812_v42 = vadd.f32 %v811_v2, %v763_v8 }
 0x12a   :  { %v908_v48 = vadd.f32 %v907_v40, %v906_v37 }
 0x12b   :  { %833 = vst.msk [vmem:[%s1881_s2 + $0x60] sm:$0xff] %vm551_vm0, %v812_v42  ;;  %v886_v47 = vmul.f32 %v812_v42, %v812_v42  ;;  %v860_v50 = vsel %vm551_vm0, %v812_v42, 0.0 }
 0x12c   :  { %v715_v11 = vpop.f32.mrf.mxu2  ;;  %v910_v52 = vadd.f32 %v909_v45, %v908_v48 }
 0x12d   :  { %v716_v12 = vadd.f32 %v715_v11, %v667_v9  ;;  %v913_v54 = vsel %vm551_vm0, %v886_v47, 0.0 }
 0x12e   :  { %v764_v13 = vpop.f32.mrf.mxu3  ;;  %v669_v34 = vpop.f32.mrf.mxu1  ;;  %v912_v58 = vadd.f32 %v911_v32, %v910_v52 }
 0x12f   :  { %v765_v15 = vadd.f32 %v764_v13, %v716_v12  ;;  %v670_v22 = vadd.f32 %v669_v34, %v1751_v39  ;;  %v855_v39 = vadd.f32 %v854_v24, %v853_v28 }
 0x130   :  { %v816_v29 = vpop.f32.mrf.mxu0  ;;  %v914_v63 = vadd.f32 %v913_v54, %v912_v58 }
 0x131   :  { %v814_v16 = vadd.f32 %v813_v10, %v765_v15  ;;  %v857_v49 = vadd.f32 %v856_v33, %v855_v39 }
 0x133   :  { %834 = vst.msk [vmem:[%s1881_s2 + $0x68] sm:$0xff] %vm551_vm0, %v814_v16  ;;  %v887_v51 = vmul.f32 %v814_v16, %v814_v16  ;;  %v859_v53 = vadd.f32 %v858_v46, %v857_v49  ;;  %v862_v55 = vsel %vm551_vm0, %v814_v16, 0.0 }
 0x134   :  { %v718_v23 = vpop.f32.mrf.mxu2 }
 0x135   :  { %v719_v26 = vadd.f32 %v718_v23, %v670_v22  ;;  %v861_v59 = vadd.f32 %v860_v50, %v859_v53  ;;  %v915_v60 = vsel %vm551_vm0, %v887_v51, 0.0 }
 0x136   :  { %v767_v27 = vpop.f32.mrf.mxu3  ;;  %v671_v44 = vpop.f32.mrf.mxu1  ;;  %v916_v38 = vadd.f32 %v915_v60, %v914_v63 }
 0x137   :  { %v768_v36 = vadd.f32 %v767_v27, %v719_v26  ;;  %v672_v41 = vadd.f32 %v671_v44, %v1757_v43  ;;  %v863_v0 = vadd.f32 %v862_v55, %v861_v59 }
 0x138   :  { %v818_v43 = vpop.f32.mrf.mxu0 }
 0x139   :  { %v817_v18 = vadd.f32 %v816_v29, %v768_v36 }
 0x13b   :  { %835 = vst.msk [vmem:[%s1881_s2 + $0x70] sm:$0xff] %vm551_vm0, %v817_v18  ;;  %v888_v56 = vmul.f32 %v817_v18, %v817_v18  ;;  %v864_v61 = vsel %vm551_vm0, %v817_v18, 0.0 }
 0x13c   :  { %v720_v14 = vpop.f32.mrf.mxu2  ;;  %v865_v2 = vadd.f32 %v864_v61, %v863_v0 }
 0x13d   :  { %v721_v57 = vadd.f32 %v720_v14, %v672_v41  ;;  %v917_v1 = vsel %vm551_vm0, %v888_v56, 0.0 }
 0x13e   :  { %v769_v30 = vpop.f32.mrf.mxu3  ;;  %v918_v5 = vadd.f32 %v917_v1, %v916_v38 }
 0x13f   :  { %v770_v62 = vadd.f32 %v769_v30, %v721_v57 }
 0x141   :  { %v819_v20 = vadd.f32 %v818_v43, %v770_v62 }
 0x143   :  { %836 = vst.msk [vmem:[%s1881_s2 + $0x78] sm:$0xff] %vm551_vm0, %v819_v20  ;;  %v866_v3 = vsel %vm551_vm0, %v819_v20, 0.0  ;;  %v889_v4 = vmul.f32 %v819_v20, %v819_v20 }
 0x144   :  { %v867_v6 = vadd.f32 %v866_v3, %v865_v2 }
 0x145   :  { %v919_v7 = vsel %vm551_vm0, %v889_v4, 0.0 }
 0x146   :  { %v868_v8 = vrot.slane %v867_v6, 4  ;;  %v920_v42 = vadd.f32 %v919_v7, %v918_v5 }
 0x148   :  { %v869_v9 = vadd.f32 %v868_v8, %v867_v6  ;;  %v921_v10 = vrot.slane %v920_v42, 4 }
 0x14a   :  { %v870_v11 = vrot.slane %v869_v9, 2  ;;  %v922_v12 = vadd.f32 %v921_v10, %v920_v42 }
 0x14c   :  { %v871_v13 = vadd.f32 %v870_v11, %v869_v9  ;;  %v923_v34 = vrot.slane %v922_v12, 2 }
 0x14e   :  { %v872_v15 = vrot.slane %v871_v13, 1  ;;  %v924_v19 = vadd.f32 %v923_v34, %v922_v12 }
 0x150   :  { %v873_v16 = vadd.f32 %v872_v15, %v871_v13  ;;  %v925_v17 = vrot.slane %v924_v19, 1 }
 0x152   :  { %v926_v21 = vadd.f32 %v925_v17, %v924_v19  ;;  %928 = vst.msk [vmem:[%s1882_s3] sm:$0x1] %vm927_vm1, %v873_v16 }
 0x154   :  { %929 = vst.msk [vmem:[%s1883_s4] sm:$0x1] %vm927_vm1, %v926_v21 }

// kernel: _lambda_.31
= control target key start
LH: loop header
LB: loop body
LE: loop exit
PB: predicated region body
PF: predicated region fallthrough
CT: control target
= control target key end

     0   :  { %s107_s0 = inlined_call_operand.vmem [shape: f32[32,128], index: 0, kind: input, shape index: {}]   ;;  %s108_s1 = inlined_call_operand.vmem [shape: f32[1,128], index: 1, kind: input, shape index: {}]   ;;  %s109_s2 = inlined_call_operand.vmem [shape: f32[1,128], index: 2, kind: input, shape index: {}]   ;;  %s110_s3 = inlined_call_operand.vmem [shape: bf16[32,128], index: 3, kind: output, shape index: {}]  }
   0x1   :  { %v14_v0 = vld [vmem:[%s107_s0] sm:$0xff]  ;;  %v15_v1 = vld [vmem:[%s107_s0 + $0x8] sm:$0xff]  ;;  %v16_v4 = vld [vmem:[%s107_s0 + $0x10] sm:$0xff] }
   0x2   :  { %v61_v2 = vld [vmem:[%s108_s1] ss:$0 sm:$0xff]  ;;  %v17_v5 = vld [vmem:[%s107_s0 + $0x18] sm:$0xff] }
   0x3   :  { %v62_v3 = vld [vmem:[%s109_s2] ss:$0 sm:$0xff]  ;;  %v22_v6 = vmul.f32 %v61_v2, %v14_v0  ;;  %v23_v7 = vmul.f32 %v61_v2, %v15_v1  ;;  %v24_v8 = vmul.f32 %v61_v2, %v16_v4  ;;  %v25_v9 = vmul.f32 %v61_v2, %v17_v5 }
   0x5   :  { %v30_v10 = vadd.f32 %v62_v3, %v22_v6  ;;  %v31_v11 = vadd.f32 %v62_v3, %v23_v7  ;;  %v32_v12 = vadd.f32 %v62_v3, %v24_v8  ;;  %v33_v13 = vadd.f32 %v62_v3, %v25_v9 }
   0x7   :  { %v34_v14 = vmax.f32 %v30_v10, 0.0  ;;  %v35_v15 = vmax.f32 %v31_v11, 0.0  ;;  %v36_v16 = vmax.f32 %v32_v12, 0.0  ;;  %v37_v17 = vmax.f32 %v33_v13, 0.0 }
   0x9   :  { %v53_v18 = vpack.c.bf16 %v35_v15, %v34_v14  ;;  %v58_v19 = vpack.c.bf16 %v37_v17, %v36_v16 }
   0xb   :  { %54 = vst [vmem:[%s110_s3] sm:$0xff] %v53_v18  }
   0xc   :  { %60 = vst [vmem:[%s110_s3 + $0x8] sm:$0xff] %v58_v19  }

// kernel: _lambda_.30
= control target key start
LH: loop header
LB: loop body
LE: loop exit
PB: predicated region body
PF: predicated region fallthrough
CT: control target
= control target key end

     0   :  { %vm365_vm0 = vcmask 523264   ;;  %s954_s1 = inlined_call_operand.vmem [shape: bf16[576,128], index: 1, kind: input, shape index: {}]   ;;  %s955_s0 = inlined_call_operand.vmem [shape: bf16[32,576], index: 0, kind: input, shape index: {}]   ;;  %s956_s2 = inlined_call_operand.vmem [shape: f32[32,128], index: 2, kind: output, shape index: {0}]   ;;  %s957_s3 = inlined_call_operand.vmem [shape: f32[1,1,128], index: 3, kind: output, shape index: {1}]   ;;  %s958_s4 = inlined_call_operand.vmem [shape: f32[1,1,128], index: 4, kind: output, shape index: {2}]  }
   0x1   :  { %v710_v0 = vld [vmem:[%s954_s1 + $0x38] sm:$0xff]  ;;  %v709_v4 = vld [vmem:[%s954_s1 + $0x30] sm:$0xff]  ;;  %v708_v8 = vld [vmem:[%s954_s1 + $0x28] sm:$0xff] }
   0x2   :  { %v718_v1 = vld [vmem:[%s954_s1 + $0x78] sm:$0xff]  ;;  %372 = vmatpush.bf16.msra.mxu0 %v710_v0  ;;  %v717_v5 = vld [vmem:[%s954_s1 + $0x70] sm:$0xff]  ;;  %v716_v9 = vld [vmem:[%s954_s1 + $0x68] sm:$0xff] }
   0x3   :  { %v726_v2 = vld [vmem:[%s954_s1 + $0xb8] sm:$0xff]  ;;  %391 = vmatpush.bf16.msra.mxu1 %v718_v1  ;;  %v725_v6 = vld [vmem:[%s954_s1 + $0xb0] sm:$0xff]  ;;  %v724_v10 = vld [vmem:[%s954_s1 + $0xa8] sm:$0xff] }
   0x4   :  { %v734_v3 = vld [vmem:[%s954_s1 + $0xf8] sm:$0xff]  ;;  %410 = vmatpush.bf16.msra.mxu2 %v726_v2  ;;  %v733_v7 = vld [vmem:[%s954_s1 + $0xf0] sm:$0xff]  ;;  %v732_v11 = vld [vmem:[%s954_s1 + $0xe8] sm:$0xff] }
   0x5   :  { %429 = vmatpush.bf16.msra.mxu3 %v734_v3  ;;  %v707_v12 = vld [vmem:[%s954_s1 + $0x20] sm:$0xff]  ;;  %v706_v16 = vld [vmem:[%s954_s1 + $0x18] sm:$0xff]  ;;  %v705_v20 = vld [vmem:[%s954_s1 + $0x10] sm:$0xff] }
   0x6   :  { %373 = vmatpush.bf16.msra.mxu0 %v709_v4  ;;  %v715_v13 = vld [vmem:[%s954_s1 + $0x60] sm:$0xff]  ;;  %v714_v17 = vld [vmem:[%s954_s1 + $0x58] sm:$0xff]  ;;  %v713_v21 = vld [vmem:[%s954_s1 + $0x50] sm:$0xff] }
   0x7   :  { %392 = vmatpush.bf16.msra.mxu1 %v717_v5  ;;  %v723_v14 = vld [vmem:[%s954_s1 + $0xa0] sm:$0xff]  ;;  %v722_v18 = vld [vmem:[%s954_s1 + $0x98] sm:$0xff]  ;;  %v721_v22 = vld [vmem:[%s954_s1 + $0x90] sm:$0xff] }
   0x8   :  { %411 = vmatpush.bf16.msra.mxu2 %v725_v6  ;;  %v731_v15 = vld [vmem:[%s954_s1 + $0xe0] sm:$0xff]  ;;  %v730_v19 = vld [vmem:[%s954_s1 + $0xd8] sm:$0xff]  ;;  %v729_v23 = vld [vmem:[%s954_s1 + $0xd0] sm:$0xff] }
   0x9   :  { %430 = vmatpush.bf16.msra.mxu3 %v733_v7  ;;  %v704_v24 = vld [vmem:[%s954_s1 + $0x8] sm:$0xff]  ;;  %v703_v28 = vld [vmem:[%s954_s1] sm:$0xff]  ;;  %v695_v33 = vld [vmem:[%s955_s0 + $0x10] sm:$0xf0] }
   0xa   :  { %374 = vmatpush.bf16.msra.mxu0 %v708_v8  ;;  %v712_v25 = vld [vmem:[%s954_s1 + $0x48] sm:$0xff]  ;;  %v711_v29 = vld [vmem:[%s954_s1 + $0x40] sm:$0xff]  ;;  %v511_v35 = vld [vmem:[%s955_s0 + $0x14] sm:$0xf0] }
   0xb   :  { %393 = vmatpush.bf16.msra.mxu1 %v716_v9  ;;  %v720_v26 = vld [vmem:[%s954_s1 + $0x88] sm:$0xff]  ;;  %v719_v30 = vld [vmem:[%s954_s1 + $0x80] sm:$0xff]  ;;  %v696_v37 = vld [vmem:[%s955_s0 + $0x18] sm:$0xf0] }
   0xc   :  { %412 = vmatpush.bf16.msra.mxu2 %v724_v10  ;;  %v728_v27 = vld [vmem:[%s954_s1 + $0xc8] sm:$0xff]  ;;  %v727_v31 = vld [vmem:[%s954_s1 + $0xc0] sm:$0xff]  ;;  %v738_v40 = vld [vmem:[%s954_s1 + $0x118] sm:$0xff] }
   0xd   :  { %431 = vmatpush.bf16.msra.mxu3 %v732_v11  ;;  %v509_v32 = vld [vmem:[%s955_s0] sm:$0xf]  ;;  %v693_v34 = vld [vmem:[%s955_s0 + $0x4] sm:$0xf]  ;;  %v517_v36 = vld [vmem:[%s955_s0 + $0x8] sm:$0xf] }
   0xe   :  { %375 = vmatpush.bf16.msra.mxu0 %v707_v12  ;;  %v694_v38 = vld [vmem:[%s955_s0 + $0xc] sm:$0xf]  ;;  %v519_v39 = vld [vmem:[%s955_s0 + $0x1c] sm:$0xf0]  ;;  %v510_v41 = vor.u32 %v695_v33, %v509_v32  ;;  %v514_v42 = vor.u32 %v693_v34, %v511_v35  ;;  %v518_v43 = vor.u32 %v696_v37, %v517_v36  ;;  %v737_v45 = vld [vmem:[%s954_s1 + $0x110] sm:$0xff] }
   0xf   :  { %394 = vmatpush.bf16.msra.mxu1 %v715_v13  ;;  %v522_v44 = vor.u32 %v694_v38, %v519_v39  ;;  %v736_v46 = vld [vmem:[%s954_s1 + $0x108] sm:$0xff]  ;;  %v735_v47 = vld [vmem:[%s954_s1 + $0x100] sm:$0xff]  ;;  %v700_v49 = vld [vmem:[%s955_s0 + $0x38] sm:$0xf0] }
  0x10   :  { %413 = vmatpush.bf16.msra.mxu2 %v723_v14  ;;  %v529_v48 = vld [vmem:[%s955_s0 + $0x28] sm:$0xf]  ;;  %v698_v50 = vld [vmem:[%s955_s0 + $0x2c] sm:$0xf]  ;;  %v531_v51 = vld [vmem:[%s955_s0 + $0x3c] sm:$0xf0] }
  0x11   :  { %432 = vmatpush.bf16.msra.mxu3 %v731_v15  ;;  %v537_v52 = vld [vmem:[%s955_s0 + $0x30] sm:$0xf]  ;;  %v701_v53 = vld [vmem:[%s955_s0 + $0x40] sm:$0xf0]  ;;  %v699_v54 = vld [vmem:[%s955_s0 + $0x34] sm:$0xf]  ;;  %v530_v56 = vor.u32 %v700_v49, %v529_v48  ;;  %v534_v57 = vor.u32 %v698_v50, %v531_v51 }
  0x12   :  { %376 = vmatpush.bf16.msra.mxu0 %v706_v16  ;;  %v539_v55 = vld [vmem:[%s955_s0 + $0x44] sm:$0xf0]  ;;  %v538_v58 = vor.u32 %v701_v53, %v537_v52  ;;  %v525_v60 = vld [vmem:[%s955_s0 + $0x10] sm:$0xf]  ;;  %v697_v61 = vld [vmem:[%s955_s0 + $0x20] sm:$0xf0] }
  0x13   :  { %395 = vmatpush.bf16.msra.mxu1 %v714_v17  ;;  %v542_v59 = vor.u32 %v699_v54, %v539_v55  ;;  %v545_v62 = vld [vmem:[%s955_s0 + $0x38] sm:$0xf]  ;;  %v702_v63 = vld [vmem:[%s955_s0 + $0x48] sm:$0xf0]  ;;  %v526_v0 = vor.u32 %v697_v61, %v525_v60 }
  0x14   :  { %414 = vmatpush.bf16.msra.mxu2 %v722_v18  ;;  %v546_v1 = vor.u32 %v702_v63, %v545_v62 }
  0x15   :  { %433 = vmatpush.bf16.msra.mxu3 %v730_v19 }
  0x16   :  { %377 = vmatpush.bf16.msra.mxu0 %v705_v20 }
  0x17   :  { %396 = vmatpush.bf16.msra.mxu1 %v713_v21 }
  0x18   :  { %415 = vmatpush.bf16.msra.mxu2 %v721_v22 }
  0x19   :  { %434 = vmatpush.bf16.msra.mxu3 %v729_v23 }
  0x1a   :  { %378 = vmatpush.bf16.msra.mxu0 %v704_v24 }
  0x1b   :  { %397 = vmatpush.bf16.msra.mxu1 %v712_v25 }
  0x1c   :  { %416 = vmatpush.bf16.msra.mxu2 %v720_v26 }
  0x1d   :  { %435 = vmatpush.bf16.msra.mxu3 %v728_v27 }
  0x1e   :  { %379 = vmatpush.bf16.msra.mxu0 %v703_v28 }
  0x1f   :  { %398 = vmatpush.bf16.msra.mxu1 %v711_v29 }
  0x20   :  { %417 = vmatpush.bf16.msra.mxu2 %v719_v30 }
  0x21   :  { %436 = vmatpush.bf16.msra.mxu3 %v727_v31  ;;  %380 = vmatmul.bf16.vlgmr.msra.gmra.mxu0 %v510_v41 }
  0x22   :  { %452 = vmatpush.bf16.msrb.mxu0 %v738_v40  ;;  %399 = vmatmul.bf16.vlgmr.msra.gmra.mxu1 %v514_v42 }
  0x23   :  { %739 = vmatpush.bf16.msrb.mxu1 %v738_v40  ;;  %418 = vmatmul.bf16.vlgmr.msra.gmra.mxu2 %v518_v43 }
  0x24   :  { %437 = vmatmul.bf16.vlgmr.msra.gmra.mxu3 %v522_v44 }
  0x26   :  { %453 = vmatpush.bf16.msrb.mxu0 %v737_v45 }
  0x27   :  { %740 = vmatpush.bf16.msrb.mxu1 %v737_v45 }
  0x2a   :  { %454 = vmatpush.bf16.msrb.mxu0 %v736_v46 }
  0x2b   :  { %741 = vmatpush.bf16.msrb.mxu1 %v736_v46 }
  0x2e   :  { %455 = vmatpush.bf16.msrb.mxu0 %v735_v47 }
  0x2f   :  { %742 = vmatpush.bf16.msrb.mxu1 %v735_v47 }
  0x31   :  { %385 = vmatmul.bf16.gmra.mxu0 %v530_v56 }
  0x32   :  { %404 = vmatmul.bf16.gmra.mxu1 %v534_v57 }
  0x33   :  { %423 = vmatmul.bf16.gmra.mxu2 %v538_v58 }
  0x34   :  { %442 = vmatmul.bf16.gmra.mxu3 %v542_v59 }
  0x41   :  { %691 = vmatmul.msk.bf16.vlgmr.msrb.gmra.mxu0 %vm365_vm0, %v526_v0 }
  0x42   :  { %692 = vmatmul.msk.bf16.vlgmr.msrb.gmra.mxu1 %vm365_vm0, %v546_v1 }
  0x9e   :  { %v381_v2 = vpop.f32.mrf.mxu0 }
  0x9f   :  { %v400_v3 = vpop.f32.mrf.mxu1 }
  0xa0   :  { %v401_v15 = vadd.f32 %v400_v3, %v381_v2 }
  0xa6   :  { %v419_v4 = vpop.f32.mrf.mxu2  ;;  %v383_v6 = vpop.f32.mrf.mxu0 }
  0xa7   :  { %v438_v5 = vpop.f32.mrf.mxu3  ;;  %v402_v7 = vpop.f32.mrf.mxu1  ;;  %v420_v18 = vadd.f32 %v419_v4, %v401_v15 }
  0xa8   :  { %v403_v25 = vadd.f32 %v402_v7, %v383_v6 }
  0xa9   :  { %v439_v20 = vadd.f32 %v438_v5, %v420_v18 }
  0xae   :  { %v421_v8 = vpop.f32.mrf.mxu2  ;;  %v386_v10 = vpop.f32.mrf.mxu0 }
  0xaf   :  { %v440_v9 = vpop.f32.mrf.mxu3  ;;  %v405_v11 = vpop.f32.mrf.mxu1  ;;  %v422_v29 = vadd.f32 %v421_v8, %v403_v25 }
  0xb0   :  { %v406_v16 = vadd.f32 %v405_v11, %v386_v10 }
  0xb1   :  { %v441_v32 = vadd.f32 %v440_v9, %v422_v29 }
  0xb6   :  { %v424_v12 = vpop.f32.mrf.mxu2  ;;  %v388_v13 = vpop.f32.mrf.mxu0 }
  0xb7   :  { %v407_v14 = vpop.f32.mrf.mxu1  ;;  %v443_v17 = vpop.f32.mrf.mxu3  ;;  %v425_v19 = vadd.f32 %v424_v12, %v406_v16 }
  0xb8   :  { %v408_v26 = vadd.f32 %v407_v14, %v388_v13 }
  0xb9   :  { %v444_v21 = vadd.f32 %v443_v17, %v425_v19 }
  0xbe   :  { %v426_v22 = vpop.f32.mrf.mxu2  ;;  %v457_v23 = vpop.f32.mrf.mxu0 }
  0xbf   :  { %v462_v24 = vpop.f32.mrf.mxu1  ;;  %v458_v27 = vadd.f32 %v457_v23, %v439_v20  ;;  %v427_v30 = vadd.f32 %v426_v22, %v408_v26  ;;  %v445_v31 = vpop.f32.mrf.mxu3 }
  0xc0   :  { %v463_v28 = vadd.f32 %v462_v24, %v444_v21 }
  0xc1   :  { %467 = vst [vmem:[%s956_s2] sm:$0xff] %v458_v27  ;;  %v446_v33 = vadd.f32 %v445_v31, %v427_v30  ;;  %v480_v38 = vmul.f32 %v458_v27, %v458_v27 }
  0xc2   :  { %469 = vst [vmem:[%s956_s2 + $0x10] sm:$0xff] %v463_v28  ;;  %v482_v41 = vmul.f32 %v463_v28, %v463_v28 }
  0xc6   :  { %v459_v34 = vpop.f32.mrf.mxu0 }
  0xc7   :  { %v464_v35 = vpop.f32.mrf.mxu1  ;;  %v460_v36 = vadd.f32 %v459_v34, %v441_v32 }
  0xc8   :  { %v465_v37 = vadd.f32 %v464_v35, %v446_v33 }
  0xc9   :  { %468 = vst [vmem:[%s956_s2 + $0x8] sm:$0xff] %v460_v36  ;;  %v471_v39 = vadd.f32 %v460_v36, %v458_v27  ;;  %v481_v40 = vmul.f32 %v460_v36, %v460_v36 }
  0xca   :  { %470 = vst [vmem:[%s956_s2 + $0x18] sm:$0xff] %v465_v37  ;;  %v483_v45 = vmul.f32 %v465_v37, %v465_v37 }
  0xcb   :  { %v484_v42 = vadd.f32 %v481_v40, %v480_v38  ;;  %v472_v43 = vadd.f32 %v471_v39, %v463_v28 }
  0xcd   :  { %v473_v44 = vadd.f32 %v472_v43, %v465_v37  ;;  %v485_v46 = vadd.f32 %v484_v42, %v482_v41 }
  0xcf   :  { %v474_v47 = vrot.slane %v473_v44, 4  ;;  %v486_v48 = vadd.f32 %v485_v46, %v483_v45 }
  0xd1   :  { %v475_v49 = vadd.f32 %v474_v47, %v473_v44  ;;  %v487_v50 = vrot.slane %v486_v48, 4 }
  0xd3   :  { %v476_v51 = vrot.slane %v475_v49, 2  ;;  %v488_v52 = vadd.f32 %v487_v50, %v486_v48 }
  0xd5   :  { %v477_v53 = vadd.f32 %v476_v51, %v475_v49  ;;  %v489_v54 = vrot.slane %v488_v52, 2 }
  0xd7   :  { %v478_v55 = vrot.slane %v477_v53, 1  ;;  %v490_v56 = vadd.f32 %v489_v54, %v488_v52 }
  0xd9   :  { %v479_v57 = vadd.f32 %v478_v55, %v477_v53  ;;  %v491_v58 = vrot.slane %v490_v56, 1 }
  0xdb   :  { %v492_v59 = vadd.f32 %v491_v58, %v490_v56  ;;  %493 = vst [vmem:[%s957_s3] sm:$0x1] %v479_v57 }
  0xdd   :  { %494 = vst [vmem:[%s958_s4] sm:$0x1] %v492_v59 }

// kernel: _lambda_.35
= control target key start
LH: loop header
LB: loop body
LE: loop exit
PB: predicated region body
PF: predicated region fallthrough
CT: control target
= control target key end

     0   :  { %s66_s0 = inlined_call_operand.vmem [shape: f32[8,128], index: 0, kind: input, shape index: {}]   ;;  %s67_s1 = inlined_call_operand.vmem [shape: f32[1,128], index: 1, kind: input, shape index: {}]   ;;  %s68_s2 = inlined_call_operand.vmem [shape: f32[1,128], index: 2, kind: input, shape index: {}]   ;;  %s69_s3 = inlined_call_operand.vmem [shape: bf16[8,128], index: 3, kind: output, shape index: {}]  }
   0x1   :  { %v14_v0 = vld [vmem:[%s66_s0] sm:$0xff] }
   0x2   :  { %v32_v1 = vld [vmem:[%s67_s1] ss:$0 sm:$0xff] }
   0x3   :  { %v33_v2 = vld [vmem:[%s68_s2] ss:$0 sm:$0xff]  ;;  %v19_v3 = vmul.f32 %v32_v1, %v14_v0 }
   0x5   :  { %v24_v4 = vadd.f32 %v33_v2, %v19_v3 }
   0x7   :  { %v25_v5 = vmax.f32 %v24_v4, 0.0 }
   0x9   :  { %v26_v6 = vpack.c.bf16 %v25_v5, %v25_v5 }
   0xb   :  { %27 = vst [vmem:[%s69_s3] sm:$0xf] %v26_v6 }

// kernel: _lambda_.34
= control target key start
LH: loop header
LB: loop body
LE: loop exit
PB: predicated region body
PF: predicated region fallthrough
CT: control target
= control target key end

     0   :  { %s1397_s1 = inlined_call_operand.vmem [shape: bf16[1152,128], index: 1, kind: input, shape index: {}]   ;;  %s1398_s0 = inlined_call_operand.vmem [shape: bf16[8,1152], index: 0, kind: input, shape index: {}]   ;;  %s1399_s2 = inlined_call_operand.vmem [shape: f32[8,128], index: 2, kind: output, shape index: {0}]   ;;  %s1400_s3 = inlined_call_operand.vmem [shape: f32[1,1,128], index: 3, kind: output, shape index: {1}]   ;;  %s1401_s4 = inlined_call_operand.vmem [shape: f32[1,1,128], index: 4, kind: output, shape index: {2}]  }
   0x1   :  { %v1067_v0 = vld [vmem:[%s1397_s1 + $0x38] sm:$0xff]  ;;  %v1066_v4 = vld [vmem:[%s1397_s1 + $0x30] sm:$0xff]  ;;  %v1065_v8 = vld [vmem:[%s1397_s1 + $0x28] sm:$0xff] }
   0x2   :  { %v1083_v1 = vld [vmem:[%s1397_s1 + $0xb8] sm:$0xff]  ;;  %627 = vmatpush.bf16.msra.mxu0 %v1067_v0  ;;  %v1082_v5 = vld [vmem:[%s1397_s1 + $0xb0] sm:$0xff]  ;;  %v1081_v9 = vld [vmem:[%s1397_s1 + $0xa8] sm:$0xff] }
   0x3   :  { %v1091_v2 = vld [vmem:[%s1397_s1 + $0xf8] sm:$0xff]  ;;  %653 = vmatpush.bf16.msra.mxu2 %v1083_v1  ;;  %v1090_v6 = vld [vmem:[%s1397_s1 + $0xf0] sm:$0xff]  ;;  %v1089_v10 = vld [vmem:[%s1397_s1 + $0xe8] sm:$0xff] }
   0x4   :  { %v1075_v3 = vld [vmem:[%s1397_s1 + $0x78] sm:$0xff]  ;;  %666 = vmatpush.bf16.msra.mxu3 %v1091_v2  ;;  %v1074_v7 = vld [vmem:[%s1397_s1 + $0x70] sm:$0xff]  ;;  %v1073_v11 = vld [vmem:[%s1397_s1 + $0x68] sm:$0xff] }
   0x5   :  { %640 = vmatpush.bf16.msra.mxu1 %v1075_v3  ;;  %v1064_v12 = vld [vmem:[%s1397_s1 + $0x20] sm:$0xff]  ;;  %v1063_v16 = vld [vmem:[%s1397_s1 + $0x18] sm:$0xff]  ;;  %v1062_v20 = vld [vmem:[%s1397_s1 + $0x10] sm:$0xff] }
   0x6   :  { %628 = vmatpush.bf16.msra.mxu0 %v1066_v4  ;;  %v1080_v13 = vld [vmem:[%s1397_s1 + $0xa0] sm:$0xff]  ;;  %v1079_v17 = vld [vmem:[%s1397_s1 + $0x98] sm:$0xff]  ;;  %v1078_v21 = vld [vmem:[%s1397_s1 + $0x90] sm:$0xff] }
   0x7   :  { %654 = vmatpush.bf16.msra.mxu2 %v1082_v5  ;;  %v1088_v14 = vld [vmem:[%s1397_s1 + $0xe0] sm:$0xff]  ;;  %v1087_v18 = vld [vmem:[%s1397_s1 + $0xd8] sm:$0xff]  ;;  %v1086_v22 = vld [vmem:[%s1397_s1 + $0xd0] sm:$0xff] }
   0x8   :  { %667 = vmatpush.bf16.msra.mxu3 %v1090_v6  ;;  %v1072_v15 = vld [vmem:[%s1397_s1 + $0x60] sm:$0xff]  ;;  %v1071_v19 = vld [vmem:[%s1397_s1 + $0x58] sm:$0xff]  ;;  %v1070_v23 = vld [vmem:[%s1397_s1 + $0x50] sm:$0xff] }
   0x9   :  { %641 = vmatpush.bf16.msra.mxu1 %v1074_v7  ;;  %v1061_v24 = vld [vmem:[%s1397_s1 + $0x8] sm:$0xff]  ;;  %v14_v29 = vld [vmem:[%s1398_s0] sm:$0xff]  ;;  %v1099_v34 = vld [vmem:[%s1397_s1 + $0x138] sm:$0xff] }
   0xa   :  { %629 = vmatpush.bf16.msra.mxu0 %v1065_v8  ;;  %v1077_v25 = vld [vmem:[%s1397_s1 + $0x88] sm:$0xff]  ;;  %v1060_v30 = vld [vmem:[%s1397_s1] sm:$0xff]  ;;  %v168_v33 = vunpack.c.l.b16 %v14_v29  ;;  %v1115_v35 = vld [vmem:[%s1397_s1 + $0x1b8] sm:$0xff]  ;;  %v169_v39 = vunpack.c.h.b16 %v14_v29 }
   0xb   :  { %655 = vmatpush.bf16.msra.mxu2 %v1081_v9  ;;  %v1085_v26 = vld [vmem:[%s1397_s1 + $0xc8] sm:$0xff]  ;;  %v1076_v31 = vld [vmem:[%s1397_s1 + $0x80] sm:$0xff]  ;;  %v1123_v40 = vld [vmem:[%s1397_s1 + $0x1f8] sm:$0xff] }
   0xc   :  { %668 = vmatpush.bf16.msra.mxu3 %v1089_v10  ;;  %v1069_v27 = vld [vmem:[%s1397_s1 + $0x48] sm:$0xff]  ;;  %v1084_v36 = vld [vmem:[%s1397_s1 + $0xc0] sm:$0xff]  ;;  %v1107_v41 = vld [vmem:[%s1397_s1 + $0x178] sm:$0xff]  ;;  %v177_v43 = vpack.c.b16 %v168_v33, %v168_v33  ;;  %v178_v47 = vpack.c.b16 %v169_v39, %v169_v39 }
   0xd   :  { %642 = vmatpush.bf16.msra.mxu1 %v1073_v11  ;;  %v15_v28 = vld [vmem:[%s1398_s0 + $0x8] sm:$0xff]  ;;  %v1068_v37 = vld [vmem:[%s1397_s1 + $0x40] sm:$0xff]  ;;  %v1098_v44 = vld [vmem:[%s1397_s1 + $0x130] sm:$0xff] }
   0xe   :  { %630 = vmatpush.bf16.msra.mxu0 %v1064_v12  ;;  %v170_v32 = vunpack.c.l.b16 %v15_v28  ;;  %v171_v38 = vunpack.c.h.b16 %v15_v28  ;;  %v1114_v45 = vld [vmem:[%s1397_s1 + $0x1b0] sm:$0xff]  ;;  %v1097_v50 = vld [vmem:[%s1397_s1 + $0x128] sm:$0xff]  ;;  %v1096_v54 = vld [vmem:[%s1397_s1 + $0x120] sm:$0xff] }
   0xf   :  { %656 = vmatpush.bf16.msra.mxu2 %v1080_v13  ;;  %v1122_v48 = vld [vmem:[%s1397_s1 + $0x1f0] sm:$0xff]  ;;  %v1113_v51 = vld [vmem:[%s1397_s1 + $0x1a8] sm:$0xff]  ;;  %v1112_v55 = vld [vmem:[%s1397_s1 + $0x1a0] sm:$0xff] }
  0x10   :  { %669 = vmatpush.bf16.msra.mxu3 %v1088_v14  ;;  %v179_v42 = vpack.c.b16 %v170_v32, %v170_v32  ;;  %v180_v46 = vpack.c.b16 %v171_v38, %v171_v38  ;;  %v1106_v49 = vld [vmem:[%s1397_s1 + $0x170] sm:$0xff]  ;;  %v1121_v52 = vld [vmem:[%s1397_s1 + $0x1e8] sm:$0xff]  ;;  %v1120_v56 = vld [vmem:[%s1397_s1 + $0x1e0] sm:$0xff] }
  0x11   :  { %643 = vmatpush.bf16.msra.mxu1 %v1072_v15  ;;  %v1105_v53 = vld [vmem:[%s1397_s1 + $0x168] sm:$0xff]  ;;  %v1104_v57 = vld [vmem:[%s1397_s1 + $0x160] sm:$0xff]  ;;  %v1095_v58 = vld [vmem:[%s1397_s1 + $0x118] sm:$0xff] }
  0x12   :  { %631 = vmatpush.bf16.msra.mxu0 %v1063_v16  ;;  %v1111_v59 = vld [vmem:[%s1397_s1 + $0x198] sm:$0xff]  ;;  %v1094_v62 = vld [vmem:[%s1397_s1 + $0x110] sm:$0xff]  ;;  %v1093_v2 = vld [vmem:[%s1397_s1 + $0x108] sm:$0xff] }
  0x13   :  { %657 = vmatpush.bf16.msra.mxu2 %v1079_v17  ;;  %v1119_v60 = vld [vmem:[%s1397_s1 + $0x1d8] sm:$0xff]  ;;  %v1110_v63 = vld [vmem:[%s1397_s1 + $0x190] sm:$0xff]  ;;  %v1109_v3 = vld [vmem:[%s1397_s1 + $0x188] sm:$0xff] }
  0x14   :  { %670 = vmatpush.bf16.msra.mxu3 %v1087_v18  ;;  %v1103_v61 = vld [vmem:[%s1397_s1 + $0x158] sm:$0xff]  ;;  %v1118_v0 = vld [vmem:[%s1397_s1 + $0x1d0] sm:$0xff]  ;;  %v1117_v6 = vld [vmem:[%s1397_s1 + $0x1c8] sm:$0xff] }
  0x15   :  { %644 = vmatpush.bf16.msra.mxu1 %v1071_v19  ;;  %v1102_v1 = vld [vmem:[%s1397_s1 + $0x150] sm:$0xff]  ;;  %v17_v4 = vld [vmem:[%s1398_s0 + $0x18] sm:$0xff]  ;;  %v1101_v7 = vld [vmem:[%s1397_s1 + $0x148] sm:$0xff] }
  0x16   :  { %632 = vmatpush.bf16.msra.mxu0 %v1062_v20  ;;  %v16_v5 = vld [vmem:[%s1398_s0 + $0x10] sm:$0xff]  ;;  %v174_v8 = vunpack.c.l.b16 %v17_v4  ;;  %v1092_v10 = vld [vmem:[%s1397_s1 + $0x100] sm:$0xff]  ;;  %v1131_v12 = vld [vmem:[%s1397_s1 + $0x238] sm:$0xff]  ;;  %v175_v13 = vunpack.c.h.b16 %v17_v4 }
  0x17   :  { %658 = vmatpush.bf16.msra.mxu2 %v1078_v21  ;;  %v172_v9 = vunpack.c.l.b16 %v16_v5  ;;  %v1108_v11 = vld [vmem:[%s1397_s1 + $0x180] sm:$0xff]  ;;  %v173_v16 = vunpack.c.h.b16 %v16_v5  ;;  %v1130_v19 = vld [vmem:[%s1397_s1 + $0x230] sm:$0xff] }
  0x18   :  { %671 = vmatpush.bf16.msra.mxu3 %v1086_v22  ;;  %v1116_v14 = vld [vmem:[%s1397_s1 + $0x1c0] sm:$0xff]  ;;  %v183_v17 = vpack.c.b16 %v174_v8, %v174_v8  ;;  %v184_v20 = vpack.c.b16 %v175_v13, %v175_v13  ;;  %v1129_v22 = vld [vmem:[%s1397_s1 + $0x228] sm:$0xff] }
  0x19   :  { %645 = vmatpush.bf16.msra.mxu1 %v1070_v23  ;;  %v1100_v15 = vld [vmem:[%s1397_s1 + $0x140] sm:$0xff]  ;;  %v181_v18 = vpack.c.b16 %v172_v9, %v172_v9  ;;  %v182_v21 = vpack.c.b16 %v173_v16, %v173_v16 }
  0x1a   :  { %633 = vmatpush.bf16.msra.mxu0 %v1061_v24  ;;  %v1128_v23 = vld [vmem:[%s1397_s1 + $0x220] sm:$0xff]  ;;  %v1127_v24 = vld [vmem:[%s1397_s1 + $0x218] sm:$0xff] }
  0x1b   :  { %659 = vmatpush.bf16.msra.mxu2 %v1077_v25  ;;  %v1126_v25 = vld [vmem:[%s1397_s1 + $0x210] sm:$0xff]  ;;  %v1124_v29 = vld [vmem:[%s1397_s1 + $0x200] sm:$0xff] }
  0x1c   :  { %672 = vmatpush.bf16.msra.mxu3 %v1085_v26  ;;  %v1125_v26 = vld [vmem:[%s1397_s1 + $0x208] sm:$0xff] }
  0x1d   :  { %646 = vmatpush.bf16.msra.mxu1 %v1069_v27  ;;  %v18_v27 = vld [vmem:[%s1398_s0 + $0x20] sm:$0xf] }
  0x1e   :  { %634 = vmatpush.bf16.msra.mxu0 %v1060_v30  ;;  %v176_v28 = vunpack.c.l.b16 %v18_v27 }
  0x1f   :  { %660 = vmatpush.bf16.msra.mxu2 %v1076_v31 }
  0x20   :  { %673 = vmatpush.bf16.msra.mxu3 %v1084_v36  ;;  %v185_v30 = vpack.c.b16 %v176_v28, %v176_v28 }
  0x21   :  { %647 = vmatpush.bf16.msra.mxu1 %v1068_v37  ;;  %635 = vmatmul.bf16.vlgmr.msra.gmra.mxu0 %v177_v43 }
  0x22   :  { %679 = vmatpush.bf16.msrb.mxu0 %v1099_v34  ;;  %661 = vmatmul.bf16.vlgmr.msra.gmra.mxu2 %v179_v42 }
  0x23   :  { %705 = vmatpush.bf16.msrb.mxu2 %v1115_v35  ;;  %674 = vmatmul.bf16.vlgmr.msra.gmra.mxu3 %v180_v46 }
  0x24   :  { %718 = vmatpush.bf16.msrb.mxu3 %v1123_v40  ;;  %648 = vmatmul.bf16.vlgmr.msra.gmra.mxu1 %v178_v47 }
  0x25   :  { %692 = vmatpush.bf16.msrb.mxu1 %v1107_v41 }
  0x26   :  { %680 = vmatpush.bf16.msrb.mxu0 %v1098_v44 }
  0x27   :  { %706 = vmatpush.bf16.msrb.mxu2 %v1114_v45 }
  0x28   :  { %719 = vmatpush.bf16.msrb.mxu3 %v1122_v48 }
  0x29   :  { %693 = vmatpush.bf16.msrb.mxu1 %v1106_v49 }
  0x2a   :  { %681 = vmatpush.bf16.msrb.mxu0 %v1097_v50 }
  0x2b   :  { %707 = vmatpush.bf16.msrb.mxu2 %v1113_v51 }
  0x2c   :  { %720 = vmatpush.bf16.msrb.mxu3 %v1121_v52 }
  0x2d   :  { %694 = vmatpush.bf16.msrb.mxu1 %v1105_v53 }
  0x2e   :  { %682 = vmatpush.bf16.msrb.mxu0 %v1096_v54 }
  0x2f   :  { %708 = vmatpush.bf16.msrb.mxu2 %v1112_v55 }
  0x30   :  { %721 = vmatpush.bf16.msrb.mxu3 %v1120_v56 }
  0x31   :  { %695 = vmatpush.bf16.msrb.mxu1 %v1104_v57 }
  0x32   :  { %683 = vmatpush.bf16.msrb.mxu0 %v1095_v58 }
  0x33   :  { %709 = vmatpush.bf16.msrb.mxu2 %v1111_v59 }
  0x34   :  { %722 = vmatpush.bf16.msrb.mxu3 %v1119_v60 }
  0x35   :  { %696 = vmatpush.bf16.msrb.mxu1 %v1103_v61 }
  0x36   :  { %684 = vmatpush.bf16.msrb.mxu0 %v1094_v62 }
  0x37   :  { %710 = vmatpush.bf16.msrb.mxu2 %v1110_v63 }
  0x38   :  { %723 = vmatpush.bf16.msrb.mxu3 %v1118_v0 }
  0x39   :  { %697 = vmatpush.bf16.msrb.mxu1 %v1102_v1 }
  0x3a   :  { %685 = vmatpush.bf16.msrb.mxu0 %v1093_v2 }
  0x3b   :  { %711 = vmatpush.bf16.msrb.mxu2 %v1109_v3 }
  0x3c   :  { %724 = vmatpush.bf16.msrb.mxu3 %v1117_v6 }
  0x3d   :  { %698 = vmatpush.bf16.msrb.mxu1 %v1101_v7 }
  0x3e   :  { %686 = vmatpush.bf16.msrb.mxu0 %v1092_v10 }
  0x3f   :  { %712 = vmatpush.bf16.msrb.mxu2 %v1108_v11 }
  0x40   :  { %725 = vmatpush.bf16.msrb.mxu3 %v1116_v14 }
  0x41   :  { %699 = vmatpush.bf16.msrb.mxu1 %v1100_v15  ;;  %687 = vmatmul.bf16.vlgmr.msrb.gmra.mxu0 %v181_v18 }
  0x42   :  { %731 = vmatpush.bf16.msra.mxu0 %v1131_v12  ;;  %713 = vmatmul.bf16.vlgmr.msrb.gmra.mxu2 %v183_v17 }
  0x43   :  { %726 = vmatmul.bf16.vlgmr.msrb.gmra.mxu3 %v184_v20 }
  0x44   :  { %700 = vmatmul.bf16.vlgmr.msrb.gmra.mxu1 %v182_v21 }
  0x46   :  { %732 = vmatpush.bf16.msra.mxu0 %v1130_v19 }
  0x4a   :  { %733 = vmatpush.bf16.msra.mxu0 %v1129_v22 }
  0x4e   :  { %734 = vmatpush.bf16.msra.mxu0 %v1128_v23 }
  0x52   :  { %735 = vmatpush.bf16.msra.mxu0 %v1127_v24 }
  0x56   :  { %736 = vmatpush.bf16.msra.mxu0 %v1126_v25 }
  0x5a   :  { %737 = vmatpush.bf16.msra.mxu0 %v1125_v26 }
  0x5e   :  { %738 = vmatpush.bf16.msra.mxu0 %v1124_v29 }
  0x61   :  { %739 = vmatmul.bf16.vlgmr.msra.gmra.mxu0 %v185_v30 }
  0x9e   :  { %v636_v31 = vpop.f32.mrf.mxu0 }
  0xa1   :  { %v649_v32 = vpop.f32.mrf.mxu1 }
  0xa2   :  { %v650_v41 = vadd.f32 %v649_v32, %v636_v31 }
  0xa5   :  { %v662_v33 = vpop.f32.mrf.mxu2 }
  0xa6   :  { %v675_v34 = vpop.f32.mrf.mxu3  ;;  %v638_v35 = vpop.f32.mrf.mxu0  ;;  %v663_v43 = vadd.f32 %v662_v33, %v650_v41 }
  0xa8   :  { %v676_v47 = vadd.f32 %v675_v34, %v663_v43 }
  0xa9   :  { %v651_v36 = vpop.f32.mrf.mxu1 }
  0xad   :  { %v664_v37 = vpop.f32.mrf.mxu2 }
  0xae   :  { %v677_v38 = vpop.f32.mrf.mxu3 }
  0xbe   :  { %v688_v39 = vpop.f32.mrf.mxu0 }
  0xbf   :  { %v689_v49 = vadd.f32 %v688_v39, %v676_v47 }
  0xc1   :  { %v701_v40 = vpop.f32.mrf.mxu1 }
  0xc2   :  { %v702_v51 = vadd.f32 %v701_v40, %v689_v49 }
  0xc5   :  { %v714_v42 = vpop.f32.mrf.mxu2 }
  0xc6   :  { %v727_v44 = vpop.f32.mrf.mxu3  ;;  %v690_v45 = vpop.f32.mrf.mxu0  ;;  %v715_v52 = vadd.f32 %v714_v42, %v702_v51 }
  0xc8   :  { %v728_v53 = vadd.f32 %v727_v44, %v715_v52 }
  0xc9   :  { %v703_v46 = vpop.f32.mrf.mxu1 }
  0xcd   :  { %v716_v48 = vpop.f32.mrf.mxu2 }
  0xce   :  { %v729_v50 = vpop.f32.mrf.mxu3 }
  0xde   :  { %v740_v54 = vpop.f32.mrf.mxu0 }
  0xdf   :  { %v741_v55 = vadd.f32 %v740_v54, %v728_v53 }
  0xe1   :  { %744 = vst [vmem:[%s1399_s2] sm:$0xff] %v741_v55  ;;  %v745_v56 = vrot.slane %v741_v55, 4  ;;  %v751_v57 = vmul.f32 %v741_v55, %v741_v55 }
  0xe3   :  { %v746_v58 = vadd.f32 %v745_v56, %v741_v55  ;;  %v752_v59 = vrot.slane %v751_v57, 4 }
  0xe5   :  { %v747_v60 = vrot.slane %v746_v58, 2  ;;  %v753_v61 = vadd.f32 %v752_v59, %v751_v57 }
  0xe6   :  { %v742_v62 = vpop.f32.mrf.mxu0 }
  0xe7   :  { %v748_v63 = vadd.f32 %v747_v60, %v746_v58  ;;  %v754_v0 = vrot.slane %v753_v61, 2 }
  0xe9   :  { %v749_v1 = vrot.slane %v748_v63, 1  ;;  %v755_v2 = vadd.f32 %v754_v0, %v753_v61 }
  0xeb   :  { %v750_v3 = vadd.f32 %v749_v1, %v748_v63  ;;  %v756_v4 = vrot.slane %v755_v2, 1 }
  0xed   :  { %v757_v5 = vadd.f32 %v756_v4, %v755_v2  ;;  %758 = vst [vmem:[%s1400_s3] sm:$0x1] %v750_v3 }
  0xef   :  { %759 = vst [vmem:[%s1401_s4] sm:$0x1] %v757_v5 }

// kernel: _lambda_.32
= control target key start
LH: loop header
LB: loop body
LE: loop exit
PB: predicated region body
PF: predicated region fallthrough
CT: control target
= control target key end

     0   :  { %s1738_s1 = inlined_call_operand.vmem [shape: bf16[1152,128], index: 1, kind: input, shape index: {}]   ;;  %s1739_s0 = inlined_call_operand.vmem [shape: bf16[32,1152], index: 0, kind: input, shape index: {}]   ;;  %s1740_s2 = inlined_call_operand.vmem [shape: f32[32,128], index: 2, kind: output, shape index: {0}]   ;;  %s1741_s3 = inlined_call_operand.vmem [shape: f32[1,1,128], index: 3, kind: output, shape index: {1}]   ;;  %s1742_s4 = inlined_call_operand.vmem [shape: f32[1,1,128], index: 4, kind: output, shape index: {2}]  }
   0x1   :  { %v1298_v0 = vld [vmem:[%s1738_s1 + $0x38] sm:$0xff]  ;;  %v1297_v4 = vld [vmem:[%s1738_s1 + $0x30] sm:$0xff]  ;;  %v1296_v8 = vld [vmem:[%s1738_s1 + $0x28] sm:$0xff] }
   0x2   :  { %v1306_v1 = vld [vmem:[%s1738_s1 + $0x78] sm:$0xff]  ;;  %702 = vmatpush.bf16.msra.mxu0 %v1298_v0  ;;  %v1305_v5 = vld [vmem:[%s1738_s1 + $0x70] sm:$0xff]  ;;  %v1304_v9 = vld [vmem:[%s1738_s1 + $0x68] sm:$0xff] }
   0x3   :  { %v1314_v2 = vld [vmem:[%s1738_s1 + $0xb8] sm:$0xff]  ;;  %721 = vmatpush.bf16.msra.mxu1 %v1306_v1  ;;  %v1313_v6 = vld [vmem:[%s1738_s1 + $0xb0] sm:$0xff]  ;;  %v1312_v10 = vld [vmem:[%s1738_s1 + $0xa8] sm:$0xff] }
   0x4   :  { %v1322_v3 = vld [vmem:[%s1738_s1 + $0xf8] sm:$0xff]  ;;  %740 = vmatpush.bf16.msra.mxu2 %v1314_v2  ;;  %v1321_v7 = vld [vmem:[%s1738_s1 + $0xf0] sm:$0xff]  ;;  %v1320_v11 = vld [vmem:[%s1738_s1 + $0xe8] sm:$0xff] }
   0x5   :  { %759 = vmatpush.bf16.msra.mxu3 %v1322_v3  ;;  %v1295_v12 = vld [vmem:[%s1738_s1 + $0x20] sm:$0xff]  ;;  %v1294_v16 = vld [vmem:[%s1738_s1 + $0x18] sm:$0xff]  ;;  %v1293_v20 = vld [vmem:[%s1738_s1 + $0x10] sm:$0xff] }
   0x6   :  { %703 = vmatpush.bf16.msra.mxu0 %v1297_v4  ;;  %v1303_v13 = vld [vmem:[%s1738_s1 + $0x60] sm:$0xff]  ;;  %v1302_v17 = vld [vmem:[%s1738_s1 + $0x58] sm:$0xff]  ;;  %v1301_v21 = vld [vmem:[%s1738_s1 + $0x50] sm:$0xff] }
   0x7   :  { %722 = vmatpush.bf16.msra.mxu1 %v1305_v5  ;;  %v1311_v14 = vld [vmem:[%s1738_s1 + $0xa0] sm:$0xff]  ;;  %v1310_v18 = vld [vmem:[%s1738_s1 + $0x98] sm:$0xff]  ;;  %v1309_v22 = vld [vmem:[%s1738_s1 + $0x90] sm:$0xff] }
   0x8   :  { %741 = vmatpush.bf16.msra.mxu2 %v1313_v6  ;;  %v1319_v15 = vld [vmem:[%s1738_s1 + $0xe0] sm:$0xff]  ;;  %v1318_v19 = vld [vmem:[%s1738_s1 + $0xd8] sm:$0xff]  ;;  %v1317_v23 = vld [vmem:[%s1738_s1 + $0xd0] sm:$0xff] }
   0x9   :  { %760 = vmatpush.bf16.msra.mxu3 %v1321_v7  ;;  %v1292_v24 = vld [vmem:[%s1738_s1 + $0x8] sm:$0xff]  ;;  %v1291_v28 = vld [vmem:[%s1738_s1] sm:$0xff]  ;;  %v925_v39 = vld [vmem:[%s1739_s0 + $0x2c] sm:$0xf0] }
   0xa   :  { %704 = vmatpush.bf16.msra.mxu0 %v1296_v8  ;;  %v1300_v25 = vld [vmem:[%s1738_s1 + $0x48] sm:$0xff]  ;;  %v1299_v29 = vld [vmem:[%s1738_s1 + $0x40] sm:$0xff]  ;;  %v1330_v40 = vld [vmem:[%s1738_s1 + $0x138] sm:$0xff] }
   0xb   :  { %723 = vmatpush.bf16.msra.mxu1 %v1304_v9  ;;  %v1308_v26 = vld [vmem:[%s1738_s1 + $0x88] sm:$0xff]  ;;  %v1307_v30 = vld [vmem:[%s1738_s1 + $0x80] sm:$0xff]  ;;  %v1338_v41 = vld [vmem:[%s1738_s1 + $0x178] sm:$0xff] }
   0xc   :  { %742 = vmatpush.bf16.msra.mxu2 %v1312_v10  ;;  %v1316_v27 = vld [vmem:[%s1738_s1 + $0xc8] sm:$0xff]  ;;  %v1315_v31 = vld [vmem:[%s1738_s1 + $0xc0] sm:$0xff]  ;;  %v1346_v46 = vld [vmem:[%s1738_s1 + $0x1b8] sm:$0xff] }
   0xd   :  { %761 = vmatpush.bf16.msra.mxu3 %v1320_v11  ;;  %v915_v32 = vld [vmem:[%s1739_s0] sm:$0xf]  ;;  %v1277_v33 = vld [vmem:[%s1739_s0 + $0x20] sm:$0xf0]  ;;  %v917_v35 = vld [vmem:[%s1739_s0 + $0x24] sm:$0xf0] }
   0xe   :  { %705 = vmatpush.bf16.msra.mxu0 %v1295_v12  ;;  %v1273_v34 = vld [vmem:[%s1739_s0 + $0x4] sm:$0xf]  ;;  %v923_v36 = vld [vmem:[%s1739_s0 + $0x8] sm:$0xf]  ;;  %v1278_v37 = vld [vmem:[%s1739_s0 + $0x28] sm:$0xf0]  ;;  %v916_v42 = vor.u32 %v1277_v33, %v915_v32 }
   0xf   :  { %724 = vmatpush.bf16.msra.mxu1 %v1303_v13  ;;  %v1274_v38 = vld [vmem:[%s1739_s0 + $0xc] sm:$0xf]  ;;  %v920_v43 = vor.u32 %v1273_v34, %v917_v35  ;;  %v924_v44 = vor.u32 %v1278_v37, %v923_v36  ;;  %v1354_v47 = vld [vmem:[%s1738_s1 + $0x1f8] sm:$0xff]  ;;  %v1329_v48 = vld [vmem:[%s1738_s1 + $0x130] sm:$0xff] }
  0x10   :  { %743 = vmatpush.bf16.msra.mxu2 %v1311_v14  ;;  %v928_v45 = vor.u32 %v1274_v38, %v925_v39  ;;  %v1337_v49 = vld [vmem:[%s1738_s1 + $0x170] sm:$0xff]  ;;  %v1328_v52 = vld [vmem:[%s1738_s1 + $0x128] sm:$0xff]  ;;  %v1327_v56 = vld [vmem:[%s1738_s1 + $0x120] sm:$0xff] }
  0x11   :  { %762 = vmatpush.bf16.msra.mxu3 %v1319_v15  ;;  %v1345_v50 = vld [vmem:[%s1738_s1 + $0x1b0] sm:$0xff]  ;;  %v1336_v53 = vld [vmem:[%s1738_s1 + $0x168] sm:$0xff]  ;;  %v1335_v57 = vld [vmem:[%s1738_s1 + $0x160] sm:$0xff] }
  0x12   :  { %706 = vmatpush.bf16.msra.mxu0 %v1294_v16  ;;  %v1353_v51 = vld [vmem:[%s1738_s1 + $0x1f0] sm:$0xff]  ;;  %v1344_v54 = vld [vmem:[%s1738_s1 + $0x1a8] sm:$0xff]  ;;  %v1343_v58 = vld [vmem:[%s1738_s1 + $0x1a0] sm:$0xff] }
  0x13   :  { %725 = vmatpush.bf16.msra.mxu1 %v1302_v17  ;;  %v1352_v55 = vld [vmem:[%s1738_s1 + $0x1e8] sm:$0xff]  ;;  %v1351_v59 = vld [vmem:[%s1738_s1 + $0x1e0] sm:$0xff]  ;;  %v953_v63 = vld [vmem:[%s1739_s0 + $0x6c] sm:$0xf0] }
  0x14   :  { %744 = vmatpush.bf16.msra.mxu2 %v1310_v18  ;;  %v951_v60 = vld [vmem:[%s1739_s0 + $0x48] sm:$0xf]  ;;  %v1286_v61 = vld [vmem:[%s1739_s0 + $0x68] sm:$0xf0]  ;;  %v959_v0 = vld [vmem:[%s1739_s0 + $0x50] sm:$0xf] }
  0x15   :  { %763 = vmatpush.bf16.msra.mxu3 %v1318_v19  ;;  %v1282_v62 = vld [vmem:[%s1739_s0 + $0x4c] sm:$0xf]  ;;  %v1287_v1 = vld [vmem:[%s1739_s0 + $0x70] sm:$0xf0]  ;;  %v961_v3 = vld [vmem:[%s1739_s0 + $0x74] sm:$0xf0]  ;;  %v952_v6 = vor.u32 %v1286_v61, %v951_v60 }
  0x16   :  { %707 = vmatpush.bf16.msra.mxu0 %v1293_v20  ;;  %v1283_v2 = vld [vmem:[%s1739_s0 + $0x54] sm:$0xf]  ;;  %v1326_v4 = vld [vmem:[%s1738_s1 + $0x118] sm:$0xff]  ;;  %v956_v7 = vor.u32 %v1282_v62, %v953_v63  ;;  %v960_v8 = vor.u32 %v1287_v1, %v959_v0  ;;  %v1324_v16 = vld [vmem:[%s1738_s1 + $0x108] sm:$0xff] }
  0x17   :  { %726 = vmatpush.bf16.msra.mxu1 %v1301_v21  ;;  %v1334_v5 = vld [vmem:[%s1738_s1 + $0x158] sm:$0xff]  ;;  %v964_v9 = vor.u32 %v1283_v2, %v961_v3  ;;  %v1325_v12 = vld [vmem:[%s1738_s1 + $0x110] sm:$0xff]  ;;  %v1332_v17 = vld [vmem:[%s1738_s1 + $0x148] sm:$0xff] }
  0x18   :  { %745 = vmatpush.bf16.msra.mxu2 %v1309_v22  ;;  %v1342_v10 = vld [vmem:[%s1738_s1 + $0x198] sm:$0xff]  ;;  %v1333_v13 = vld [vmem:[%s1738_s1 + $0x150] sm:$0xff]  ;;  %v1340_v18 = vld [vmem:[%s1738_s1 + $0x188] sm:$0xff] }
  0x19   :  { %764 = vmatpush.bf16.msra.mxu3 %v1317_v23  ;;  %v1350_v11 = vld [vmem:[%s1738_s1 + $0x1d8] sm:$0xff]  ;;  %v1341_v14 = vld [vmem:[%s1738_s1 + $0x190] sm:$0xff]  ;;  %v1348_v19 = vld [vmem:[%s1738_s1 + $0x1c8] sm:$0xff] }
  0x1a   :  { %708 = vmatpush.bf16.msra.mxu0 %v1292_v24  ;;  %v1349_v15 = vld [vmem:[%s1738_s1 + $0x1d0] sm:$0xff]  ;;  %v1323_v20 = vld [vmem:[%s1738_s1 + $0x100] sm:$0xff]  ;;  %v1360_v38 = vld [vmem:[%s1738_s1 + $0x228] sm:$0xff] }
  0x1b   :  { %727 = vmatpush.bf16.msra.mxu1 %v1300_v25  ;;  %v1331_v21 = vld [vmem:[%s1738_s1 + $0x140] sm:$0xff]  ;;  %v931_v24 = vld [vmem:[%s1739_s0 + $0x10] sm:$0xf]  ;;  %v1279_v25 = vld [vmem:[%s1739_s0 + $0x30] sm:$0xf0] }
  0x1c   :  { %746 = vmatpush.bf16.msra.mxu2 %v1308_v26  ;;  %v1339_v22 = vld [vmem:[%s1738_s1 + $0x180] sm:$0xff]  ;;  %v1362_v26 = vld [vmem:[%s1738_s1 + $0x238] sm:$0xff]  ;;  %v932_v33 = vor.u32 %v1279_v25, %v931_v24  ;;  %v1361_v37 = vld [vmem:[%s1738_s1 + $0x230] sm:$0xff] }
  0x1d   :  { %765 = vmatpush.bf16.msra.mxu3 %v1316_v27  ;;  %v1347_v23 = vld [vmem:[%s1738_s1 + $0x1c0] sm:$0xff]  ;;  %v1275_v27 = vld [vmem:[%s1739_s0 + $0x14] sm:$0xf] }
  0x1e   :  { %709 = vmatpush.bf16.msra.mxu0 %v1291_v28  ;;  %v933_v28 = vld [vmem:[%s1739_s0 + $0x34] sm:$0xf0]  ;;  %v941_v32 = vld [vmem:[%s1739_s0 + $0x3c] sm:$0xf0] }
  0x1f   :  { %728 = vmatpush.bf16.msra.mxu1 %v1299_v29  ;;  %v939_v29 = vld [vmem:[%s1739_s0 + $0x18] sm:$0xf]  ;;  %v936_v34 = vor.u32 %v1275_v27, %v933_v28  ;;  %v1359_v39 = vld [vmem:[%s1738_s1 + $0x220] sm:$0xff] }
  0x20   :  { %747 = vmatpush.bf16.msra.mxu2 %v1307_v30  ;;  %v1280_v30 = vld [vmem:[%s1739_s0 + $0x38] sm:$0xf0] }
  0x21   :  { %766 = vmatpush.bf16.msra.mxu3 %v1315_v31  ;;  %710 = vmatmul.bf16.vlgmr.msra.gmra.mxu0 %v916_v42  ;;  %v1276_v31 = vld [vmem:[%s1739_s0 + $0x1c] sm:$0xf]  ;;  %v940_v35 = vor.u32 %v1280_v30, %v939_v29 }
  0x22   :  { %778 = vmatpush.bf16.msrb.mxu0 %v1330_v40  ;;  %729 = vmatmul.bf16.vlgmr.msra.gmra.mxu1 %v920_v43  ;;  %v944_v36 = vor.u32 %v1276_v31, %v941_v32  ;;  %v967_v40 = vld [vmem:[%s1739_s0 + $0x58] sm:$0xf]  ;;  %v1284_v42 = vld [vmem:[%s1739_s0 + $0x5c] sm:$0xf]  ;;  %v969_v43 = vld [vmem:[%s1739_s0 + $0x7c] sm:$0xf0] }
  0x23   :  { %797 = vmatpush.bf16.msrb.mxu1 %v1338_v41  ;;  %748 = vmatmul.bf16.vlgmr.msra.gmra.mxu2 %v924_v44  ;;  %v1288_v41 = vld [vmem:[%s1739_s0 + $0x78] sm:$0xf0]  ;;  %v975_v44 = vld [vmem:[%s1739_s0 + $0x60] sm:$0xf] }
  0x24   :  { %767 = vmatmul.bf16.vlgmr.msra.gmra.mxu3 %v928_v45  ;;  %816 = vmatpush.bf16.msrb.mxu2 %v1346_v46  ;;  %v1289_v45 = vld [vmem:[%s1739_s0 + $0x80] sm:$0xf0]  ;;  %v1358_v46 = vld [vmem:[%s1738_s1 + $0x218] sm:$0xff] }
  0x25   :  { %835 = vmatpush.bf16.msrb.mxu3 %v1354_v47  ;;  %v1285_v47 = vld [vmem:[%s1739_s0 + $0x64] sm:$0xf] }
  0x26   :  { %779 = vmatpush.bf16.msrb.mxu0 %v1329_v48  ;;  %v977_v48 = vld [vmem:[%s1739_s0 + $0x84] sm:$0xf0] }
  0x27   :  { %798 = vmatpush.bf16.msrb.mxu1 %v1337_v49  ;;  %v968_v49 = vor.u32 %v1288_v41, %v967_v40 }
  0x28   :  { %817 = vmatpush.bf16.msrb.mxu2 %v1345_v50  ;;  %v972_v50 = vor.u32 %v1284_v42, %v969_v43 }
  0x29   :  { %836 = vmatpush.bf16.msrb.mxu3 %v1353_v51  ;;  %v976_v51 = vor.u32 %v1289_v45, %v975_v44 }
  0x2a   :  { %780 = vmatpush.bf16.msrb.mxu0 %v1328_v52  ;;  %v980_v52 = vor.u32 %v1285_v47, %v977_v48 }
  0x2b   :  { %799 = vmatpush.bf16.msrb.mxu1 %v1336_v53  ;;  %v1357_v53 = vld [vmem:[%s1738_s1 + $0x210] sm:$0xff] }
  0x2c   :  { %818 = vmatpush.bf16.msrb.mxu2 %v1344_v54  ;;  %v1356_v54 = vld [vmem:[%s1738_s1 + $0x208] sm:$0xff] }
  0x2d   :  { %837 = vmatpush.bf16.msrb.mxu3 %v1352_v55  ;;  %v1355_v55 = vld [vmem:[%s1738_s1 + $0x200] sm:$0xff] }
  0x2e   :  { %781 = vmatpush.bf16.msrb.mxu0 %v1327_v56  ;;  %v947_v56 = vld [vmem:[%s1739_s0 + $0x20] sm:$0xf] }
  0x2f   :  { %800 = vmatpush.bf16.msrb.mxu1 %v1335_v57  ;;  %v1281_v57 = vld [vmem:[%s1739_s0 + $0x40] sm:$0xf0] }
  0x30   :  { %819 = vmatpush.bf16.msrb.mxu2 %v1343_v58  ;;  %v983_v58 = vld [vmem:[%s1739_s0 + $0x68] sm:$0xf]  ;;  %v948_v60 = vor.u32 %v1281_v57, %v947_v56 }
  0x31   :  { %838 = vmatpush.bf16.msrb.mxu3 %v1351_v59  ;;  %715 = vmatmul.bf16.gmra.mxu0 %v952_v6  ;;  %v1290_v59 = vld [vmem:[%s1739_s0 + $0x88] sm:$0xf0] }
  0x32   :  { %782 = vmatpush.bf16.msrb.mxu0 %v1326_v4  ;;  %734 = vmatmul.bf16.gmra.mxu1 %v956_v7  ;;  %v984_v61 = vor.u32 %v1290_v59, %v983_v58 }
  0x33   :  { %801 = vmatpush.bf16.msrb.mxu1 %v1334_v5  ;;  %753 = vmatmul.bf16.gmra.mxu2 %v960_v8 }
  0x34   :  { %772 = vmatmul.bf16.gmra.mxu3 %v964_v9  ;;  %820 = vmatpush.bf16.msrb.mxu2 %v1342_v10 }
  0x35   :  { %839 = vmatpush.bf16.msrb.mxu3 %v1350_v11 }
  0x36   :  { %783 = vmatpush.bf16.msrb.mxu0 %v1325_v12 }
  0x37   :  { %802 = vmatpush.bf16.msrb.mxu1 %v1333_v13 }
  0x38   :  { %821 = vmatpush.bf16.msrb.mxu2 %v1341_v14 }
  0x39   :  { %840 = vmatpush.bf16.msrb.mxu3 %v1349_v15 }
  0x3a   :  { %784 = vmatpush.bf16.msrb.mxu0 %v1324_v16 }
  0x3b   :  { %803 = vmatpush.bf16.msrb.mxu1 %v1332_v17 }
  0x3c   :  { %822 = vmatpush.bf16.msrb.mxu2 %v1340_v18 }
  0x3d   :  { %841 = vmatpush.bf16.msrb.mxu3 %v1348_v19 }
  0x3e   :  { %785 = vmatpush.bf16.msrb.mxu0 %v1323_v20 }
  0x3f   :  { %804 = vmatpush.bf16.msrb.mxu1 %v1331_v21 }
  0x40   :  { %823 = vmatpush.bf16.msrb.mxu2 %v1339_v22 }
  0x41   :  { %842 = vmatpush.bf16.msrb.mxu3 %v1347_v23  ;;  %786 = vmatmul.bf16.vlgmr.msrb.gmra.mxu0 %v932_v33 }
  0x42   :  { %854 = vmatpush.bf16.msra.mxu0 %v1362_v26  ;;  %805 = vmatmul.bf16.vlgmr.msrb.gmra.mxu1 %v936_v34 }
  0x43   :  { %1363 = vmatpush.bf16.msra.mxu1 %v1362_v26  ;;  %824 = vmatmul.bf16.vlgmr.msrb.gmra.mxu2 %v940_v35 }
  0x44   :  { %843 = vmatmul.bf16.vlgmr.msrb.gmra.mxu3 %v944_v36 }
  0x46   :  { %855 = vmatpush.bf16.msra.mxu0 %v1361_v37 }
  0x47   :  { %1364 = vmatpush.bf16.msra.mxu1 %v1361_v37 }
  0x4a   :  { %856 = vmatpush.bf16.msra.mxu0 %v1360_v38 }
  0x4b   :  { %1365 = vmatpush.bf16.msra.mxu1 %v1360_v38 }
  0x4e   :  { %857 = vmatpush.bf16.msra.mxu0 %v1359_v39 }
  0x4f   :  { %1366 = vmatpush.bf16.msra.mxu1 %v1359_v39 }
  0x51   :  { %791 = vmatmul.bf16.gmra.mxu0 %v968_v49 }
  0x52   :  { %858 = vmatpush.bf16.msra.mxu0 %v1358_v46  ;;  %810 = vmatmul.bf16.gmra.mxu1 %v972_v50 }
  0x53   :  { %1367 = vmatpush.bf16.msra.mxu1 %v1358_v46  ;;  %829 = vmatmul.bf16.gmra.mxu2 %v976_v51 }
  0x54   :  { %848 = vmatmul.bf16.gmra.mxu3 %v980_v52 }
  0x56   :  { %859 = vmatpush.bf16.msra.mxu0 %v1357_v53 }
  0x57   :  { %1368 = vmatpush.bf16.msra.mxu1 %v1357_v53 }
  0x5a   :  { %860 = vmatpush.bf16.msra.mxu0 %v1356_v54 }
  0x5b   :  { %1369 = vmatpush.bf16.msra.mxu1 %v1356_v54 }
  0x5e   :  { %861 = vmatpush.bf16.msra.mxu0 %v1355_v55 }
  0x5f   :  { %1370 = vmatpush.bf16.msra.mxu1 %v1355_v55 }
  0x61   :  { %862 = vmatmul.bf16.vlgmr.msra.gmra.mxu0 %v948_v60 }
  0x62   :  { %867 = vmatmul.bf16.vlgmr.msra.gmra.mxu1 %v984_v61 }
  0x9e   :  { %v711_v62 = vpop.f32.mrf.mxu0 }
  0x9f   :  { %v730_v63 = vpop.f32.mrf.mxu1 }
  0xa0   :  { %v731_v20 = vadd.f32 %v730_v63, %v711_v62 }
  0xa6   :  { %v749_v0 = vpop.f32.mrf.mxu2  ;;  %v713_v2 = vpop.f32.mrf.mxu0 }
  0xa7   :  { %v768_v1 = vpop.f32.mrf.mxu3  ;;  %v732_v3 = vpop.f32.mrf.mxu1  ;;  %v750_v22 = vadd.f32 %v749_v0, %v731_v20 }
  0xa8   :  { %v733_v30 = vadd.f32 %v732_v3, %v713_v2 }
  0xa9   :  { %v769_v28 = vadd.f32 %v768_v1, %v750_v22 }
  0xae   :  { %v751_v4 = vpop.f32.mrf.mxu2  ;;  %v716_v6 = vpop.f32.mrf.mxu0 }
  0xaf   :  { %v770_v5 = vpop.f32.mrf.mxu3  ;;  %v735_v7 = vpop.f32.mrf.mxu1  ;;  %v752_v34 = vadd.f32 %v751_v4, %v733_v30 }
  0xb0   :  { %v736_v21 = vadd.f32 %v735_v7, %v716_v6 }
  0xb1   :  { %v771_v42 = vadd.f32 %v770_v5, %v752_v34 }
  0xb6   :  { %v754_v8 = vpop.f32.mrf.mxu2  ;;  %v718_v10 = vpop.f32.mrf.mxu0 }
  0xb7   :  { %v773_v9 = vpop.f32.mrf.mxu3  ;;  %v737_v11 = vpop.f32.mrf.mxu1  ;;  %v755_v23 = vadd.f32 %v754_v8, %v736_v21 }
  0xb8   :  { %v738_v31 = vadd.f32 %v737_v11, %v718_v10 }
  0xb9   :  { %v774_v29 = vadd.f32 %v773_v9, %v755_v23 }
  0xbe   :  { %v756_v12 = vpop.f32.mrf.mxu2  ;;  %v787_v14 = vpop.f32.mrf.mxu0 }
  0xbf   :  { %v775_v13 = vpop.f32.mrf.mxu3  ;;  %v806_v15 = vpop.f32.mrf.mxu1  ;;  %v788_v32 = vadd.f32 %v787_v14, %v769_v28  ;;  %v757_v35 = vadd.f32 %v756_v12, %v738_v31 }
  0xc1   :  { %v807_v39 = vadd.f32 %v806_v15, %v788_v32  ;;  %v776_v43 = vadd.f32 %v775_v13, %v757_v35 }
  0xc6   :  { %v825_v16 = vpop.f32.mrf.mxu2  ;;  %v789_v18 = vpop.f32.mrf.mxu0 }
  0xc7   :  { %v844_v17 = vpop.f32.mrf.mxu3  ;;  %v808_v19 = vpop.f32.mrf.mxu1  ;;  %v826_v44 = vadd.f32 %v825_v16, %v807_v39  ;;  %v790_v46 = vadd.f32 %v789_v18, %v771_v42 }
  0xc9   :  { %v845_v48 = vadd.f32 %v844_v17, %v826_v44  ;;  %v809_v53 = vadd.f32 %v808_v19, %v790_v46 }
  0xce   :  { %v827_v24 = vpop.f32.mrf.mxu2  ;;  %v792_v26 = vpop.f32.mrf.mxu0 }
  0xcf   :  { %v846_v25 = vpop.f32.mrf.mxu3  ;;  %v811_v27 = vpop.f32.mrf.mxu1  ;;  %v793_v33 = vadd.f32 %v792_v26, %v774_v29  ;;  %v828_v57 = vadd.f32 %v827_v24, %v809_v53 }
  0xd1   :  { %v812_v40 = vadd.f32 %v811_v27, %v793_v33  ;;  %v847_v60 = vadd.f32 %v846_v25, %v828_v57 }
  0xd6   :  { %v830_v36 = vpop.f32.mrf.mxu2  ;;  %v794_v37 = vpop.f32.mrf.mxu0 }
  0xd7   :  { %v813_v38 = vpop.f32.mrf.mxu1  ;;  %v849_v41 = vpop.f32.mrf.mxu3  ;;  %v831_v45 = vadd.f32 %v830_v36, %v812_v40  ;;  %v795_v47 = vadd.f32 %v794_v37, %v776_v43 }
  0xd9   :  { %v850_v49 = vadd.f32 %v849_v41, %v831_v45  ;;  %v814_v54 = vadd.f32 %v813_v38, %v795_v47 }
  0xde   :  { %v832_v50 = vpop.f32.mrf.mxu2  ;;  %v863_v51 = vpop.f32.mrf.mxu0 }
  0xdf   :  { %v868_v52 = vpop.f32.mrf.mxu1  ;;  %v864_v55 = vadd.f32 %v863_v51, %v845_v48  ;;  %v833_v58 = vadd.f32 %v832_v50, %v814_v54  ;;  %v851_v59 = vpop.f32.mrf.mxu3 }
  0xe0   :  { %v869_v56 = vadd.f32 %v868_v52, %v850_v49 }
  0xe1   :  { %873 = vst [vmem:[%s1740_s2] sm:$0xff] %v864_v55  ;;  %v852_v61 = vadd.f32 %v851_v59, %v833_v58  ;;  %v886_v2 = vmul.f32 %v864_v55, %v864_v55 }
  0xe2   :  { %875 = vst [vmem:[%s1740_s2 + $0x10] sm:$0xff] %v869_v56  ;;  %v888_v5 = vmul.f32 %v869_v56, %v869_v56 }
  0xe6   :  { %v865_v62 = vpop.f32.mrf.mxu0 }
  0xe7   :  { %v870_v63 = vpop.f32.mrf.mxu1  ;;  %v866_v0 = vadd.f32 %v865_v62, %v847_v60 }
  0xe8   :  { %v871_v1 = vadd.f32 %v870_v63, %v852_v61 }
  0xe9   :  { %874 = vst [vmem:[%s1740_s2 + $0x8] sm:$0xff] %v866_v0  ;;  %v877_v3 = vadd.f32 %v866_v0, %v864_v55  ;;  %v887_v4 = vmul.f32 %v866_v0, %v866_v0 }
  0xea   :  { %876 = vst [vmem:[%s1740_s2 + $0x18] sm:$0xff] %v871_v1  ;;  %v889_v9 = vmul.f32 %v871_v1, %v871_v1 }
  0xeb   :  { %v890_v6 = vadd.f32 %v887_v4, %v886_v2  ;;  %v878_v7 = vadd.f32 %v877_v3, %v869_v56 }
  0xed   :  { %v879_v8 = vadd.f32 %v878_v7, %v871_v1  ;;  %v891_v10 = vadd.f32 %v890_v6, %v888_v5 }
  0xef   :  { %v880_v11 = vrot.slane %v879_v8, 4  ;;  %v892_v12 = vadd.f32 %v891_v10, %v889_v9 }
  0xf1   :  { %v881_v13 = vadd.f32 %v880_v11, %v879_v8  ;;  %v893_v14 = vrot.slane %v892_v12, 4 }
  0xf3   :  { %v882_v15 = vrot.slane %v881_v13, 2  ;;  %v894_v16 = vadd.f32 %v893_v14, %v892_v12 }
  0xf5   :  { %v883_v17 = vadd.f32 %v882_v15, %v881_v13  ;;  %v895_v18 = vrot.slane %v894_v16, 2 }
  0xf7   :  { %v884_v19 = vrot.slane %v883_v17, 1  ;;  %v896_v20 = vadd.f32 %v895_v18, %v894_v16 }
  0xf9   :  { %v885_v21 = vadd.f32 %v884_v19, %v883_v17  ;;  %v897_v22 = vrot.slane %v896_v20, 1 }
  0xfb   :  { %v898_v23 = vadd.f32 %v897_v22, %v896_v20  ;;  %899 = vst [vmem:[%s1741_s3] sm:$0x1] %v885_v21 }
  0xfd   :  { %900 = vst [vmem:[%s1742_s4] sm:$0x1] %v898_v23 }

// kernel: _lambda_.39
= control target key start
LH: loop header
LB: loop body
LE: loop exit
PB: predicated region body
PF: predicated region fallthrough
CT: control target
= control target key end

     0   :  { %s75_s0 = inlined_call_operand.vmem [shape: f32[8,256], index: 0, kind: input, shape index: {}]   ;;  %s76_s1 = inlined_call_operand.vmem [shape: f32[1,256], index: 1, kind: input, shape index: {}]   ;;  %s77_s2 = inlined_call_operand.vmem [shape: f32[1,256], index: 2, kind: input, shape index: {}]   ;;  %s78_s3 = inlined_call_operand.vmem [shape: bf16[8,256], index: 3, kind: output, shape index: {}]  }
   0x1   :  { %v14_v0 = vld [vmem:[%s75_s0] sm:$0xff]  ;;  %v15_v1 = vld [vmem:[%s75_s0 + $0x8] sm:$0xff] }
   0x2   :  { %v16_v2 = vld [vmem:[%s76_s1] sm:$0x3] }
   0x3   :  { %v18_v3 = vperm.slane %v16_v2, 0  ;;  %v19_v4 = vperm.slane %v16_v2, 1  ;;  %v24_v5 = vld [vmem:[%s77_s2] sm:$0x3] }
   0x4   :  { %v26_v6 = vperm.slane %v24_v5, 0  ;;  %v27_v7 = vperm.slane %v24_v5, 1 }
   0x5   :  { %v22_v8 = vmul.f32 %v18_v3, %v14_v0  ;;  %v23_v9 = vmul.f32 %v19_v4, %v15_v1 }
   0x7   :  { %v30_v10 = vadd.f32 %v26_v6, %v22_v8  ;;  %v31_v11 = vadd.f32 %v27_v7, %v23_v9 }
   0x9   :  { %v32_v12 = vmax.f32 %v30_v10, 0.0  ;;  %v33_v13 = vmax.f32 %v31_v11, 0.0 }
   0xb   :  { %v34_v14 = vpack.c.bf16 %v33_v13, %v32_v12 }
   0xd   :  { %35 = vst [vmem:[%s78_s3] sm:$0xff] %v34_v14 }

// kernel: _lambda_.40
= control target key start
LH: loop header
LB: loop body
LE: loop exit
PB: predicated region body
PF: predicated region fallthrough
CT: control target
= control target key end

     0   :  { %s384_s0 = inlined_call_operand.vmem [shape: bf16[8,256], index: 0, kind: input, shape index: {}]   ;;  %s385_s1 = inlined_call_operand.vmem [shape: bf16[256,128], index: 1, kind: input, shape index: {}]   ;;  %s386_s2 = inlined_call_operand.vmem [shape: f32[1,128], index: 2, kind: input, shape index: {}]   ;;  %s387_s3 = inlined_call_operand.hbm [shape: f32[8,128], index: 3, kind: output, shape index: {}]  }
   0x1   :  { %v269_v0 = vld [vmem:[%s385_s1 + $0x38] sm:$0xff]  ;;  %v268_v2 = vld [vmem:[%s385_s1 + $0x30] sm:$0xff]  ;;  %v267_v4 = vld [vmem:[%s385_s1 + $0x28] sm:$0xff] }
   0x2   :  { %v277_v1 = vld [vmem:[%s385_s1 + $0x78] sm:$0xff]  ;;  %155 = vmatpush.bf16.msra.mxu0 %v269_v0  ;;  %v276_v3 = vld [vmem:[%s385_s1 + $0x70] sm:$0xff]  ;;  %v275_v5 = vld [vmem:[%s385_s1 + $0x68] sm:$0xff] }
   0x3   :  { %168 = vmatpush.bf16.msra.mxu1 %v277_v1 }
   0x6   :  { %156 = vmatpush.bf16.msra.mxu0 %v268_v2 }
   0x7   :  { %169 = vmatpush.bf16.msra.mxu1 %v276_v3 }
   0x8   :  { %8 = vsyncpa [#allocation3], 0  ;;  %v266_v6 = vld [vmem:[%s385_s1 + $0x20] sm:$0xff]  ;;  %v265_v8 = vld [vmem:[%s385_s1 + $0x18] sm:$0xff]  ;;  %s306_s20 = smov [#allocation2]   ;;  %s189_s24 = sshll.u32 %s387_s3, 4  ;;  %s190_s24 = int_to_ptr.hbm [resolvable:$true] %s189_s24 }
   0x9   :  { %v274_v7 = vld [vmem:[%s385_s1 + $0x60] sm:$0xff]  ;;  %v273_v9 = vld [vmem:[%s385_s1 + $0x58] sm:$0xff]  ;;  %v264_v10 = vld [vmem:[%s385_s1 + $0x10] sm:$0xff]  ;;  %s187_s21 = sshll.u32 %s306_s20, 4  ;;  %s188_s21 = int_to_ptr.vmem [resolvable:$true] %s187_s21 }
   0xa   :  { %157 = vmatpush.bf16.msra.mxu0 %v267_v4  ;;  %v272_v11 = vld [vmem:[%s385_s1 + $0x50] sm:$0xff]  ;;  %v263_v12 = vld [vmem:[%s385_s1 + $0x8] sm:$0xff]  ;;  %v15_v14 = vld [vmem:[%s384_s0] sm:$0xff] }
   0xb   :  { %170 = vmatpush.bf16.msra.mxu1 %v275_v5  ;;  %v271_v13 = vld [vmem:[%s385_s1 + $0x48] sm:$0xff]  ;;  %v53_v15 = vunpack.c.l.b16 %v15_v14  ;;  %v54_v16 = vunpack.c.h.b16 %v15_v14  ;;  %v262_v17 = vld [vmem:[%s385_s1] sm:$0xff] }
   0xc   :  { %v270_v18 = vld [vmem:[%s385_s1 + $0x40] sm:$0xff] }
   0xd   :  { %v55_v19 = vpack.c.b16 %v53_v15, %v53_v15  ;;  %v56_v20 = vpack.c.b16 %v54_v16, %v54_v16  ;;  %v279_v21 = vld [vmem:[%s386_s2] ss:$0 sm:$0xff] }
   0xe   :  { %158 = vmatpush.bf16.msra.mxu0 %v266_v6 }
   0xf   :  { %171 = vmatpush.bf16.msra.mxu1 %v274_v7 }
  0x12   :  { %159 = vmatpush.bf16.msra.mxu0 %v265_v8 }
  0x13   :  { %172 = vmatpush.bf16.msra.mxu1 %v273_v9 }
  0x16   :  { %160 = vmatpush.bf16.msra.mxu0 %v264_v10 }
  0x17   :  { %173 = vmatpush.bf16.msra.mxu1 %v272_v11 }
  0x1a   :  { %161 = vmatpush.bf16.msra.mxu0 %v263_v12 }
  0x1b   :  { %174 = vmatpush.bf16.msra.mxu1 %v271_v13 }
  0x1e   :  { %162 = vmatpush.bf16.msra.mxu0 %v262_v17 }
  0x1f   :  { %175 = vmatpush.bf16.msra.mxu1 %v270_v18 }
  0x21   :  { %163 = vmatmul.bf16.vlgmr.msra.gmra.mxu0 %v55_v19 }
  0x22   :  { %176 = vmatmul.bf16.vlgmr.msra.gmra.mxu1 %v56_v20 }
  0x9e   :  { %v164_v22 = vpop.f32.mrf.mxu0 }
  0x9f   :  { %v177_v23 = vpop.f32.mrf.mxu1  ;;  %v165_v24 = vadd.f32 %v279_v21, %v164_v22 }
  0xa1   :  { %v178_v25 = vadd.f32 %v177_v23, %v165_v24 }
  0xa3   :  { %181 = vst [vmem:[#allocation2] sm:$0xff] %v178_v25 }
  0xa4   :  { %192 = dma.vmem_to_hbm [thread:$0]  %s188_s21, 128, %s190_s24, [#allocation3]  }
  0xa6   :  { %v166_v26 = vpop.f32.mrf.mxu0 }
  0xa7   :  { %v179_v27 = vpop.f32.mrf.mxu1 }
  0xa8   :  { %304 = dma.done.wait [#allocation3], 128  }
  0xa9   :  { %305 = vsyncadd [#allocation3], 4294967168 }
  0xaa   :  { %197 = vsyncpa [#allocation3], 1 }

// kernel: _lambda_.43
= control target key start
LH: loop header
LB: loop body
LE: loop exit
PB: predicated region body
PF: predicated region fallthrough
CT: control target
= control target key end

     0   :  { %s681_s1 = inlined_call_operand.vmem [shape: bf16[256,256], index: 1, kind: input, shape index: {}]   ;;  %s682_s0 = inlined_call_operand.vmem [shape: bf16[8,256], index: 0, kind: input, shape index: {}]   ;;  %s683_s2 = inlined_call_operand.vmem [shape: f32[1,256], index: 2, kind: input, shape index: {}]   ;;  %s684_s3 = inlined_call_operand.vmem [shape: f32[8,256], index: 3, kind: output, shape index: {}]  }
   0x1   :  { %v353_v0 = vld [vmem:[%s681_s1 + $0x70] sm:$0xf]  ;;  %v438_v1 = vld [vmem:[%s681_s1 + $0x74] sm:$0xf0]  ;;  %v437_v5 = vld [vmem:[%s681_s1 + $0x74] sm:$0xf] }
   0x2   :  { %v417_v2 = vld [vmem:[%s681_s1 + $0xf0] sm:$0xf]  ;;  %v354_v3 = vor.u32 %v438_v1, %v353_v0  ;;  %v454_v4 = vld [vmem:[%s681_s1 + $0xf4] sm:$0xf0]  ;;  %v355_v6 = vld [vmem:[%s681_s1 + $0x78] sm:$0xf0] }
   0x3   :  { %v418_v7 = vor.u32 %v454_v4, %v417_v2  ;;  %v358_v8 = vor.u32 %v437_v5, %v355_v6  ;;  %v453_v9 = vld [vmem:[%s681_s1 + $0xf4] sm:$0xf]  ;;  %v419_v10 = vld [vmem:[%s681_s1 + $0xf8] sm:$0xf0]  ;;  %v345_v11 = vld [vmem:[%s681_s1 + $0x60] sm:$0xf] }
   0x4   :  { %220 = vmatpush.bf16.msra.mxu0 %v354_v3  ;;  %v422_v12 = vor.u32 %v453_v9, %v419_v10  ;;  %v436_v13 = vld [vmem:[%s681_s1 + $0x64] sm:$0xf0]  ;;  %v409_v14 = vld [vmem:[%s681_s1 + $0xe0] sm:$0xf]  ;;  %v435_v18 = vld [vmem:[%s681_s1 + $0x64] sm:$0xf] }
   0x5   :  { %v452_v15 = vld [vmem:[%s681_s1 + $0xe4] sm:$0xf0]  ;;  %233 = vmatpush.bf16.msra.mxu1 %v418_v7  ;;  %246 = vmatpush.bf16.msra.mxu2 %v358_v8  ;;  %v346_v16 = vor.u32 %v436_v13, %v345_v11  ;;  %v347_v19 = vld [vmem:[%s681_s1 + $0x68] sm:$0xf0]  ;;  %v451_v20 = vld [vmem:[%s681_s1 + $0xe4] sm:$0xf] }
   0x6   :  { %v410_v17 = vor.u32 %v452_v15, %v409_v14  ;;  %259 = vmatpush.bf16.msra.mxu3 %v422_v12  ;;  %v350_v21 = vor.u32 %v435_v18, %v347_v19  ;;  %v411_v22 = vld [vmem:[%s681_s1 + $0xe8] sm:$0xf0]  ;;  %v337_v23 = vld [vmem:[%s681_s1 + $0x50] sm:$0xf]  ;;  %v434_v24 = vld [vmem:[%s681_s1 + $0x54] sm:$0xf0] }
   0x7   :  { %v414_v25 = vor.u32 %v451_v20, %v411_v22  ;;  %v401_v26 = vld [vmem:[%s681_s1 + $0xd0] sm:$0xf]  ;;  %v450_v27 = vld [vmem:[%s681_s1 + $0xd4] sm:$0xf0]  ;;  %v433_v28 = vld [vmem:[%s681_s1 + $0x54] sm:$0xf]  ;;  %v338_v29 = vor.u32 %v434_v24, %v337_v23 }
   0x8   :  { %221 = vmatpush.bf16.msra.mxu0 %v346_v16  ;;  %v339_v30 = vld [vmem:[%s681_s1 + $0x58] sm:$0xf0]  ;;  %v449_v31 = vld [vmem:[%s681_s1 + $0xd4] sm:$0xf]  ;;  %v402_v33 = vor.u32 %v450_v27, %v401_v26  ;;  %v329_v35 = vld [vmem:[%s681_s1 + $0x40] sm:$0xf] }
   0x9   :  { %v403_v32 = vld [vmem:[%s681_s1 + $0xd8] sm:$0xf0]  ;;  %234 = vmatpush.bf16.msra.mxu1 %v410_v17  ;;  %247 = vmatpush.bf16.msra.mxu2 %v350_v21  ;;  %v342_v34 = vor.u32 %v433_v28, %v339_v30  ;;  %v432_v36 = vld [vmem:[%s681_s1 + $0x44] sm:$0xf0]  ;;  %v393_v37 = vld [vmem:[%s681_s1 + $0xc0] sm:$0xf] }
   0xa   :  { %260 = vmatpush.bf16.msra.mxu3 %v414_v25  ;;  %v406_v38 = vor.u32 %v449_v31, %v403_v32  ;;  %v448_v39 = vld [vmem:[%s681_s1 + $0xc4] sm:$0xf0]  ;;  %v431_v40 = vld [vmem:[%s681_s1 + $0x44] sm:$0xf]  ;;  %v331_v41 = vld [vmem:[%s681_s1 + $0x48] sm:$0xf0]  ;;  %v330_v44 = vor.u32 %v432_v36, %v329_v35 }
   0xb   :  { %v447_v42 = vld [vmem:[%s681_s1 + $0xc4] sm:$0xf]  ;;  %v395_v43 = vld [vmem:[%s681_s1 + $0xc8] sm:$0xf0]  ;;  %v394_v45 = vor.u32 %v448_v39, %v393_v37  ;;  %v334_v46 = vor.u32 %v431_v40, %v331_v41  ;;  %v321_v47 = vld [vmem:[%s681_s1 + $0x30] sm:$0xf] }
   0xc   :  { %222 = vmatpush.bf16.msra.mxu0 %v338_v29  ;;  %v430_v48 = vld [vmem:[%s681_s1 + $0x34] sm:$0xf0]  ;;  %v385_v49 = vld [vmem:[%s681_s1 + $0xb0] sm:$0xf]  ;;  %v398_v50 = vor.u32 %v447_v42, %v395_v43  ;;  %v429_v52 = vld [vmem:[%s681_s1 + $0x34] sm:$0xf] }
   0xd   :  { %235 = vmatpush.bf16.msra.mxu1 %v402_v33  ;;  %248 = vmatpush.bf16.msra.mxu2 %v342_v34  ;;  %v446_v51 = vld [vmem:[%s681_s1 + $0xb4] sm:$0xf0]  ;;  %v323_v53 = vld [vmem:[%s681_s1 + $0x38] sm:$0xf0]  ;;  %v445_v54 = vld [vmem:[%s681_s1 + $0xb4] sm:$0xf]  ;;  %v322_v56 = vor.u32 %v430_v48, %v321_v47 }
   0xe   :  { %261 = vmatpush.bf16.msra.mxu3 %v406_v38  ;;  %v387_v55 = vld [vmem:[%s681_s1 + $0xb8] sm:$0xf0]  ;;  %v386_v57 = vor.u32 %v446_v51, %v385_v49  ;;  %v326_v58 = vor.u32 %v429_v52, %v323_v53  ;;  %v313_v59 = vld [vmem:[%s681_s1 + $0x20] sm:$0xf]  ;;  %v428_v60 = vld [vmem:[%s681_s1 + $0x24] sm:$0xf0] }
   0xf   :  { %v377_v61 = vld [vmem:[%s681_s1 + $0xa0] sm:$0xf]  ;;  %v390_v62 = vor.u32 %v445_v54, %v387_v55  ;;  %v444_v63 = vld [vmem:[%s681_s1 + $0xa4] sm:$0xf0]  ;;  %v427_v0 = vld [vmem:[%s681_s1 + $0x24] sm:$0xf]  ;;  %v314_v4 = vor.u32 %v428_v60, %v313_v59 }
  0x10   :  { %223 = vmatpush.bf16.msra.mxu0 %v330_v44  ;;  %v315_v1 = vld [vmem:[%s681_s1 + $0x28] sm:$0xf0]  ;;  %v443_v2 = vld [vmem:[%s681_s1 + $0xa4] sm:$0xf]  ;;  %v378_v5 = vor.u32 %v444_v63, %v377_v61  ;;  %v305_v7 = vld [vmem:[%s681_s1 + $0x10] sm:$0xf] }
  0x11   :  { %236 = vmatpush.bf16.msra.mxu1 %v394_v45  ;;  %249 = vmatpush.bf16.msra.mxu2 %v334_v46  ;;  %v379_v3 = vld [vmem:[%s681_s1 + $0xa8] sm:$0xf0]  ;;  %v318_v6 = vor.u32 %v427_v0, %v315_v1  ;;  %v426_v8 = vld [vmem:[%s681_s1 + $0x14] sm:$0xf0]  ;;  %v369_v9 = vld [vmem:[%s681_s1 + $0x90] sm:$0xf] }
  0x12   :  { %262 = vmatpush.bf16.msra.mxu3 %v398_v50  ;;  %v382_v10 = vor.u32 %v443_v2, %v379_v3  ;;  %v442_v11 = vld [vmem:[%s681_s1 + $0x94] sm:$0xf0]  ;;  %v425_v12 = vld [vmem:[%s681_s1 + $0x14] sm:$0xf]  ;;  %v307_v13 = vld [vmem:[%s681_s1 + $0x18] sm:$0xf0]  ;;  %v306_v16 = vor.u32 %v426_v8, %v305_v7 }
  0x13   :  { %v441_v14 = vld [vmem:[%s681_s1 + $0x94] sm:$0xf]  ;;  %v371_v15 = vld [vmem:[%s681_s1 + $0x98] sm:$0xf0]  ;;  %v14_v17 = vld [vmem:[%s682_s0] sm:$0xff]  ;;  %v370_v18 = vor.u32 %v442_v11, %v369_v9  ;;  %v310_v19 = vor.u32 %v425_v12, %v307_v13 }
  0x14   :  { %224 = vmatpush.bf16.msra.mxu0 %v322_v56  ;;  %v297_v20 = vld [vmem:[%s681_s1] sm:$0xf]  ;;  %v424_v21 = vld [vmem:[%s681_s1 + $0x4] sm:$0xf0]  ;;  %v374_v23 = vor.u32 %v441_v14, %v371_v15  ;;  %v423_v25 = vld [vmem:[%s681_s1 + $0x4] sm:$0xf]  ;;  %v54_v29 = vunpack.c.l.b16 %v14_v17  ;;  %v55_v31 = vunpack.c.h.b16 %v14_v17 }
  0x15   :  { %237 = vmatpush.bf16.msra.mxu1 %v386_v57  ;;  %250 = vmatpush.bf16.msra.mxu2 %v326_v58  ;;  %v361_v22 = vld [vmem:[%s681_s1 + $0x80] sm:$0xf]  ;;  %v440_v24 = vld [vmem:[%s681_s1 + $0x84] sm:$0xf0]  ;;  %v299_v26 = vld [vmem:[%s681_s1 + $0x8] sm:$0xf0]  ;;  %v298_v30 = vor.u32 %v424_v21, %v297_v20 }
  0x16   :  { %263 = vmatpush.bf16.msra.mxu3 %v390_v62  ;;  %v439_v27 = vld [vmem:[%s681_s1 + $0x84] sm:$0xf]  ;;  %v363_v28 = vld [vmem:[%s681_s1 + $0x88] sm:$0xf0]  ;;  %v362_v32 = vor.u32 %v440_v24, %v361_v22  ;;  %v302_v33 = vor.u32 %v423_v25, %v299_v26  ;;  %v56_v35 = vpack.c.b16 %v54_v29, %v54_v29  ;;  %v57_v36 = vpack.c.b16 %v55_v31, %v55_v31  ;;  %v47_v37 = vld [vmem:[%s683_s2] sm:$0x3] }
  0x17   :  { %v366_v34 = vor.u32 %v439_v27, %v363_v28  ;;  %v49_v38 = vperm.slane %v47_v37, 0  ;;  %v50_v42 = vperm.slane %v47_v37, 1 }
  0x18   :  { %225 = vmatpush.bf16.msra.mxu0 %v314_v4 }
  0x19   :  { %238 = vmatpush.bf16.msra.mxu1 %v378_v5  ;;  %251 = vmatpush.bf16.msra.mxu2 %v318_v6 }
  0x1a   :  { %264 = vmatpush.bf16.msra.mxu3 %v382_v10 }
  0x1c   :  { %226 = vmatpush.bf16.msra.mxu0 %v306_v16 }
  0x1d   :  { %239 = vmatpush.bf16.msra.mxu1 %v370_v18  ;;  %252 = vmatpush.bf16.msra.mxu2 %v310_v19 }
  0x1e   :  { %265 = vmatpush.bf16.msra.mxu3 %v374_v23 }
  0x20   :  { %227 = vmatpush.bf16.msra.mxu0 %v298_v30 }
  0x21   :  { %240 = vmatpush.bf16.msra.mxu1 %v362_v32  ;;  %253 = vmatpush.bf16.msra.mxu2 %v302_v33 }
  0x22   :  { %266 = vmatpush.bf16.msra.mxu3 %v366_v34 }
  0x23   :  { %228 = vmatmul.bf16.vlgmr.msra.gmra.mxu0 %v56_v35 }
  0x24   :  { %241 = vmatmul.bf16.vlgmr.msra.gmra.mxu1 %v57_v36  ;;  %254 = vmatmul.bf16.vlgmr.msra.gmra.mxu2 %v56_v35 }
  0x25   :  { %267 = vmatmul.bf16.vlgmr.msra.gmra.mxu3 %v57_v36 }
  0xa0   :  { %v229_v39 = vpop.f32.mrf.mxu0 }
  0xa1   :  { %v242_v40 = vpop.f32.mrf.mxu1  ;;  %v230_v41 = vadd.f32 %v229_v39, %v49_v38 }
  0xa3   :  { %v243_v43 = vadd.f32 %v242_v40, %v230_v41 }
  0xa5   :  { %v272_v50 = vmul.f32 %v243_v43, %v243_v43 }
  0xa7   :  { %v255_v44 = vpop.f32.mrf.mxu2 }
  0xa8   :  { %v256_v45 = vadd.f32 %v255_v44, %v50_v42  ;;  %v268_v46 = vpop.f32.mrf.mxu3  ;;  %v231_v47 = vpop.f32.mrf.mxu0 }
  0xa9   :  { %v244_v48 = vpop.f32.mrf.mxu1 }
  0xaa   :  { %v269_v49 = vadd.f32 %v268_v46, %v256_v45 }
  0xac   :  { %v273_v51 = vmul.f32 %v269_v49, %v269_v49 }
  0xae   :  { %v274_v52 = vadd.f32 %v273_v51, %v272_v50 }
  0xaf   :  { %v257_v53 = vpop.f32.mrf.mxu2 }
  0xb0   :  { %v270_v54 = vpop.f32.mrf.mxu3  ;;  %275 = vadd.xlane.f32.xlu0 %v274_v52 }
 0x123   :  { %v276_v55 = vpop.xlane.xlu0 %275 }
 0x124   :  { %455 = vrsqrt.f32 %v276_v55  ;;  %vm283_vm1 = vweird.f32 %v276_v55 }
 0x12a   :  { %v456_v56 = vpop.eup %455 }
 0x12b   :  { %v278_v57 = vmul.f32 %v456_v56, %v276_v55  ;;  %vm284_vm0 = vweird.f32 %v456_v56 }
 0x12c   :  { %vm285_vm2 = vmor %vm283_vm1, %vm284_vm0 }
 0x12d   :  { %v279_v58 = vmul.f32 %v456_v56, %v278_v57 }
 0x12f   :  { %v280_v59 = vmul.f32 0.5, %v279_v58 }
 0x131   :  { %v281_v60 = vsub.f32 1.5, %v280_v59 }
 0x133   :  { %v282_v61 = vmul.f32 %v456_v56, %v281_v60 }
 0x135   :  { %v286_v62 = vsel %vm285_vm2, %v456_v56, %v282_v61 }
 0x136   :  { %v287_v63 = vmul.f32 %v286_v62, %v243_v43  ;;  %v288_v0 = vmul.f32 %v286_v62, %v269_v49 }
 0x138   :  { %289 = vst [vmem:[%s684_s3] sm:$0xff] %v287_v63 }
 0x139   :  { %290 = vst [vmem:[%s684_s3 + $0x8] sm:$0xff] %v288_v0 }

// kernel: _lambda_.38
= control target key start
LH: loop header
LB: loop body
LE: loop exit
PB: predicated region body
PF: predicated region fallthrough
CT: control target
= control target key end

     0   :  { %vm1180_vm0 = vcmask 1040384   ;;  %s2878_s1 = inlined_call_operand.vmem [shape: bf16[1152,256], index: 1, kind: input, shape index: {}]   ;;  %s2879_s0 = inlined_call_operand.vmem [shape: bf16[8,1152], index: 0, kind: input, shape index: {}]   ;;  %s2880_s2 = inlined_call_operand.vmem [shape: f32[8,256], index: 2, kind: output, shape index: {0}]   ;;  %s2881_s3 = inlined_call_operand.vmem [shape: f32[1,1,256], index: 3, kind: output, shape index: {1}]   ;;  %s2882_s4 = inlined_call_operand.vmem [shape: f32[1,1,256], index: 4, kind: output, shape index: {2}]  }
   0x1   :  { %v1264_v0 = vld [vmem:[%s2878_s1 + $0x70] sm:$0xf]  ;;  %v1797_v1 = vld [vmem:[%s2878_s1 + $0x74] sm:$0xf0]  ;;  %v1256_v11 = vld [vmem:[%s2878_s1 + $0x60] sm:$0xf] }
   0x2   :  { %v1328_v2 = vld [vmem:[%s2878_s1 + $0xf0] sm:$0xf]  ;;  %v1265_v3 = vor.u32 %v1797_v1, %v1264_v0  ;;  %v1813_v4 = vld [vmem:[%s2878_s1 + $0xf4] sm:$0xf0]  ;;  %v1795_v13 = vld [vmem:[%s2878_s1 + $0x64] sm:$0xf0] }
   0x3   :  { %v1392_v5 = vld [vmem:[%s2878_s1 + $0x170] sm:$0xf]  ;;  %v1829_v6 = vld [vmem:[%s2878_s1 + $0x174] sm:$0xf0]  ;;  %v1329_v7 = vor.u32 %v1813_v4, %v1328_v2  ;;  %v1320_v14 = vld [vmem:[%s2878_s1 + $0xe0] sm:$0xf]  ;;  %v1257_v16 = vor.u32 %v1795_v13, %v1256_v11 }
   0x4   :  { %v1393_v8 = vor.u32 %v1829_v6, %v1392_v5  ;;  %v1456_v9 = vld [vmem:[%s2878_s1 + $0x1f0] sm:$0xf]  ;;  %v1845_v10 = vld [vmem:[%s2878_s1 + $0x1f4] sm:$0xf0]  ;;  %915 = vmatpush.bf16.msra.mxu0 %v1265_v3  ;;  %v1811_v15 = vld [vmem:[%s2878_s1 + $0xe4] sm:$0xf0] }
   0x5   :  { %v1457_v12 = vor.u32 %v1845_v10, %v1456_v9  ;;  %928 = vmatpush.bf16.msra.mxu1 %v1329_v7  ;;  %v1321_v17 = vor.u32 %v1811_v15, %v1320_v14  ;;  %v1384_v18 = vld [vmem:[%s2878_s1 + $0x160] sm:$0xf]  ;;  %v1827_v19 = vld [vmem:[%s2878_s1 + $0x164] sm:$0xf0]  ;;  %v1248_v23 = vld [vmem:[%s2878_s1 + $0x50] sm:$0xf] }
   0x6   :  { %941 = vmatpush.bf16.msra.mxu2 %v1393_v8  ;;  %v1448_v20 = vld [vmem:[%s2878_s1 + $0x1e0] sm:$0xf]  ;;  %v1385_v21 = vor.u32 %v1827_v19, %v1384_v18  ;;  %v1843_v22 = vld [vmem:[%s2878_s1 + $0x1e4] sm:$0xf0]  ;;  %v1793_v24 = vld [vmem:[%s2878_s1 + $0x54] sm:$0xf0] }
   0x7   :  { %954 = vmatpush.bf16.msra.mxu3 %v1457_v12  ;;  %v1449_v25 = vor.u32 %v1843_v22, %v1448_v20  ;;  %v1312_v26 = vld [vmem:[%s2878_s1 + $0xd0] sm:$0xf]  ;;  %v1809_v27 = vld [vmem:[%s2878_s1 + $0xd4] sm:$0xf0]  ;;  %v1249_v29 = vor.u32 %v1793_v24, %v1248_v23  ;;  %v1240_v35 = vld [vmem:[%s2878_s1 + $0x40] sm:$0xf] }
   0x8   :  { %v1376_v28 = vld [vmem:[%s2878_s1 + $0x150] sm:$0xf]  ;;  %916 = vmatpush.bf16.msra.mxu0 %v1257_v16  ;;  %v1825_v30 = vld [vmem:[%s2878_s1 + $0x154] sm:$0xf0]  ;;  %v1313_v33 = vor.u32 %v1809_v27, %v1312_v26  ;;  %v1791_v36 = vld [vmem:[%s2878_s1 + $0x44] sm:$0xf0] }
   0x9   :  { %v1440_v31 = vld [vmem:[%s2878_s1 + $0x1d0] sm:$0xf]  ;;  %v1841_v32 = vld [vmem:[%s2878_s1 + $0x1d4] sm:$0xf0]  ;;  %929 = vmatpush.bf16.msra.mxu1 %v1321_v17  ;;  %v1377_v34 = vor.u32 %v1825_v30, %v1376_v28  ;;  %v1304_v37 = vld [vmem:[%s2878_s1 + $0xc0] sm:$0xf]  ;;  %v1241_v44 = vor.u32 %v1791_v36, %v1240_v35 }
   0xa   :  { %942 = vmatpush.bf16.msra.mxu2 %v1385_v21  ;;  %v1441_v38 = vor.u32 %v1841_v32, %v1440_v31  ;;  %v1807_v39 = vld [vmem:[%s2878_s1 + $0xc4] sm:$0xf0]  ;;  %v1368_v40 = vld [vmem:[%s2878_s1 + $0x140] sm:$0xf]  ;;  %v1232_v47 = vld [vmem:[%s2878_s1 + $0x30] sm:$0xf] }
   0xb   :  { %955 = vmatpush.bf16.msra.mxu3 %v1449_v25  ;;  %v1823_v41 = vld [vmem:[%s2878_s1 + $0x144] sm:$0xf0]  ;;  %v1432_v42 = vld [vmem:[%s2878_s1 + $0x1c0] sm:$0xf]  ;;  %v1305_v45 = vor.u32 %v1807_v39, %v1304_v37  ;;  %v1789_v48 = vld [vmem:[%s2878_s1 + $0x34] sm:$0xf0] }
   0xc   :  { %v1839_v43 = vld [vmem:[%s2878_s1 + $0x1c4] sm:$0xf0]  ;;  %917 = vmatpush.bf16.msra.mxu0 %v1249_v29  ;;  %v1369_v46 = vor.u32 %v1823_v41, %v1368_v40  ;;  %v1296_v49 = vld [vmem:[%s2878_s1 + $0xb0] sm:$0xf]  ;;  %v1805_v51 = vld [vmem:[%s2878_s1 + $0xb4] sm:$0xf0]  ;;  %v1233_v56 = vor.u32 %v1789_v48, %v1232_v47 }
   0xd   :  { %930 = vmatpush.bf16.msra.mxu1 %v1313_v33  ;;  %v1433_v50 = vor.u32 %v1839_v43, %v1432_v42  ;;  %v1360_v52 = vld [vmem:[%s2878_s1 + $0x130] sm:$0xf]  ;;  %v1821_v53 = vld [vmem:[%s2878_s1 + $0x134] sm:$0xf0]  ;;  %v1297_v57 = vor.u32 %v1805_v51, %v1296_v49  ;;  %v1224_v59 = vld [vmem:[%s2878_s1 + $0x20] sm:$0xf] }
   0xe   :  { %943 = vmatpush.bf16.msra.mxu2 %v1377_v34  ;;  %v1424_v54 = vld [vmem:[%s2878_s1 + $0x1b0] sm:$0xf]  ;;  %v1837_v55 = vld [vmem:[%s2878_s1 + $0x1b4] sm:$0xf0]  ;;  %v1361_v58 = vor.u32 %v1821_v53, %v1360_v52  ;;  %v1787_v60 = vld [vmem:[%s2878_s1 + $0x24] sm:$0xf0] }
   0xf   :  { %956 = vmatpush.bf16.msra.mxu3 %v1441_v38  ;;  %v1288_v61 = vld [vmem:[%s2878_s1 + $0xa0] sm:$0xf]  ;;  %v1425_v62 = vor.u32 %v1837_v55, %v1424_v54  ;;  %v1803_v63 = vld [vmem:[%s2878_s1 + $0xa4] sm:$0xf0]  ;;  %v1225_v4 = vor.u32 %v1787_v60, %v1224_v59  ;;  %v1216_v7 = vld [vmem:[%s2878_s1 + $0x10] sm:$0xf] }
  0x10   :  { %918 = vmatpush.bf16.msra.mxu0 %v1241_v44  ;;  %v1352_v0 = vld [vmem:[%s2878_s1 + $0x120] sm:$0xf]  ;;  %v1819_v1 = vld [vmem:[%s2878_s1 + $0x124] sm:$0xf0]  ;;  %v1289_v5 = vor.u32 %v1803_v63, %v1288_v61  ;;  %v1785_v8 = vld [vmem:[%s2878_s1 + $0x14] sm:$0xf0] }
  0x11   :  { %931 = vmatpush.bf16.msra.mxu1 %v1305_v45  ;;  %v1416_v2 = vld [vmem:[%s2878_s1 + $0x1a0] sm:$0xf]  ;;  %v1835_v3 = vld [vmem:[%s2878_s1 + $0x1a4] sm:$0xf0]  ;;  %v1353_v6 = vor.u32 %v1819_v1, %v1352_v0  ;;  %v1280_v9 = vld [vmem:[%s2878_s1 + $0x90] sm:$0xf]  ;;  %v1217_v16 = vor.u32 %v1785_v8, %v1216_v7 }
  0x12   :  { %944 = vmatpush.bf16.msra.mxu2 %v1369_v46  ;;  %v1417_v10 = vor.u32 %v1835_v3, %v1416_v2  ;;  %v1801_v11 = vld [vmem:[%s2878_s1 + $0x94] sm:$0xf0]  ;;  %v1344_v12 = vld [vmem:[%s2878_s1 + $0x110] sm:$0xf]  ;;  %v1208_v17 = vld [vmem:[%s2878_s1] sm:$0xf] }
  0x13   :  { %957 = vmatpush.bf16.msra.mxu3 %v1433_v50  ;;  %v1817_v13 = vld [vmem:[%s2878_s1 + $0x114] sm:$0xf0]  ;;  %v1408_v14 = vld [vmem:[%s2878_s1 + $0x190] sm:$0xf]  ;;  %v1783_v18 = vld [vmem:[%s2878_s1 + $0x4] sm:$0xf0]  ;;  %v1281_v19 = vor.u32 %v1801_v11, %v1280_v9 }
  0x14   :  { %919 = vmatpush.bf16.msra.mxu0 %v1233_v56  ;;  %v1833_v15 = vld [vmem:[%s2878_s1 + $0x194] sm:$0xf0]  ;;  %v1345_v20 = vor.u32 %v1817_v13, %v1344_v12  ;;  %v1272_v21 = vld [vmem:[%s2878_s1 + $0x80] sm:$0xf]  ;;  %v1799_v22 = vld [vmem:[%s2878_s1 + $0x84] sm:$0xf0]  ;;  %v1209_v31 = vor.u32 %v1783_v18, %v1208_v17 }
  0x15   :  { %932 = vmatpush.bf16.msra.mxu1 %v1297_v57  ;;  %v1336_v23 = vld [vmem:[%s2878_s1 + $0x100] sm:$0xf]  ;;  %v1409_v24 = vor.u32 %v1833_v15, %v1408_v14  ;;  %v1815_v25 = vld [vmem:[%s2878_s1 + $0x104] sm:$0xf0]  ;;  %v1520_v26 = vld [vmem:[%s2878_s1 + $0x270] sm:$0xf]  ;;  %v1273_v35 = vor.u32 %v1799_v22, %v1272_v21 }
  0x16   :  { %945 = vmatpush.bf16.msra.mxu2 %v1361_v58  ;;  %v1861_v27 = vld [vmem:[%s2878_s1 + $0x274] sm:$0xf0]  ;;  %v1584_v28 = vld [vmem:[%s2878_s1 + $0x2f0] sm:$0xf]  ;;  %v1400_v33 = vld [vmem:[%s2878_s1 + $0x180] sm:$0xf]  ;;  %v1337_v36 = vor.u32 %v1815_v25, %v1336_v23 }
  0x17   :  { %958 = vmatpush.bf16.msra.mxu3 %v1425_v62  ;;  %v1877_v29 = vld [vmem:[%s2878_s1 + $0x2f4] sm:$0xf0]  ;;  %v1648_v30 = vld [vmem:[%s2878_s1 + $0x370] sm:$0xf]  ;;  %v1831_v34 = vld [vmem:[%s2878_s1 + $0x184] sm:$0xf0]  ;;  %v1521_v39 = vor.u32 %v1861_v27, %v1520_v26 }
  0x18   :  { %920 = vmatpush.bf16.msra.mxu0 %v1225_v4  ;;  %v1893_v32 = vld [vmem:[%s2878_s1 + $0x374] sm:$0xf0]  ;;  %v1712_v37 = vld [vmem:[%s2878_s1 + $0x3f0] sm:$0xf]  ;;  %v1585_v40 = vor.u32 %v1877_v29, %v1584_v28  ;;  %v1512_v41 = vld [vmem:[%s2878_s1 + $0x260] sm:$0xf]  ;;  %v1401_v43 = vor.u32 %v1831_v34, %v1400_v33 }
  0x19   :  { %933 = vmatpush.bf16.msra.mxu1 %v1289_v5  ;;  %v1909_v38 = vld [vmem:[%s2878_s1 + $0x3f4] sm:$0xf0]  ;;  %v1649_v42 = vor.u32 %v1893_v32, %v1648_v30  ;;  %v1859_v44 = vld [vmem:[%s2878_s1 + $0x264] sm:$0xf0]  ;;  %v1576_v45 = vld [vmem:[%s2878_s1 + $0x2e0] sm:$0xf] }
  0x1a   :  { %946 = vmatpush.bf16.msra.mxu2 %v1353_v6  ;;  %v1875_v46 = vld [vmem:[%s2878_s1 + $0x2e4] sm:$0xf0]  ;;  %v1713_v47 = vor.u32 %v1909_v38, %v1712_v37  ;;  %v1640_v48 = vld [vmem:[%s2878_s1 + $0x360] sm:$0xf]  ;;  %v1513_v52 = vor.u32 %v1859_v44, %v1512_v41  ;;  %v1504_v54 = vld [vmem:[%s2878_s1 + $0x250] sm:$0xf] }
  0x1b   :  { %959 = vmatpush.bf16.msra.mxu3 %v1417_v10  ;;  %v1891_v49 = vld [vmem:[%s2878_s1 + $0x364] sm:$0xf0]  ;;  %v1704_v50 = vld [vmem:[%s2878_s1 + $0x3e0] sm:$0xf]  ;;  %v1577_v53 = vor.u32 %v1875_v46, %v1576_v45  ;;  %v1857_v55 = vld [vmem:[%s2878_s1 + $0x254] sm:$0xf0] }
  0x1c   :  { %921 = vmatpush.bf16.msra.mxu0 %v1217_v16  ;;  %v1907_v51 = vld [vmem:[%s2878_s1 + $0x3e4] sm:$0xf0]  ;;  %v1641_v57 = vor.u32 %v1891_v49, %v1640_v48  ;;  %v1568_v58 = vld [vmem:[%s2878_s1 + $0x2d0] sm:$0xf]  ;;  %v1873_v59 = vld [vmem:[%s2878_s1 + $0x2d4] sm:$0xf0]  ;;  %v1505_v4 = vor.u32 %v1857_v55, %v1504_v54 }
  0x1d   :  { %934 = vmatpush.bf16.msra.mxu1 %v1281_v19  ;;  %v15_v56 = vld [vmem:[%s2879_s0 + $0x8] sm:$0xff]  ;;  %v14_v61 = vld [vmem:[%s2879_s0] sm:$0xff]  ;;  %v1705_v63 = vor.u32 %v1907_v51, %v1704_v50  ;;  %v1632_v0 = vld [vmem:[%s2878_s1 + $0x350] sm:$0xf]  ;;  %v1569_v9 = vor.u32 %v1873_v59, %v1568_v58 }
  0x1e   :  { %947 = vmatpush.bf16.msra.mxu2 %v1345_v20  ;;  %v170_v60 = vunpack.c.l.b16 %v15_v56  ;;  %v171_v62 = vunpack.c.h.b16 %v15_v56  ;;  %v1889_v1 = vld [vmem:[%s2878_s1 + $0x354] sm:$0xf0]  ;;  %v168_v2 = vunpack.c.l.b16 %v14_v61  ;;  %v169_v3 = vunpack.c.h.b16 %v14_v61  ;;  %v1696_v5 = vld [vmem:[%s2878_s1 + $0x3d0] sm:$0xf]  ;;  %v1496_v10 = vld [vmem:[%s2878_s1 + $0x240] sm:$0xf] }
  0x1f   :  { %960 = vmatpush.bf16.msra.mxu3 %v1409_v24  ;;  %v1905_v6 = vld [vmem:[%s2878_s1 + $0x3d4] sm:$0xf0]  ;;  %v1633_v13 = vor.u32 %v1889_v1, %v1632_v0  ;;  %v1855_v14 = vld [vmem:[%s2878_s1 + $0x244] sm:$0xf0]  ;;  %v1560_v15 = vld [vmem:[%s2878_s1 + $0x2c0] sm:$0xf] }
  0x20   :  { %922 = vmatpush.bf16.msra.mxu0 %v1209_v31  ;;  %v2221_v7 = vpack.c.b16 %v170_v60, %v170_v60  ;;  %v2223_v8 = vpack.c.b16 %v171_v62, %v171_v62  ;;  %v2228_v11 = vpack.c.b16 %v168_v2, %v168_v2  ;;  %v2230_v12 = vpack.c.b16 %v169_v3, %v169_v3  ;;  %v1871_v16 = vld [vmem:[%s2878_s1 + $0x2c4] sm:$0xf0]  ;;  %v1624_v18 = vld [vmem:[%s2878_s1 + $0x340] sm:$0xf]  ;;  %v1488_v24 = vld [vmem:[%s2878_s1 + $0x230] sm:$0xf] }
  0x21   :  { %935 = vmatpush.bf16.msra.mxu1 %v1273_v35  ;;  %v1697_v17 = vor.u32 %v1905_v6, %v1696_v5  ;;  %v1887_v19 = vld [vmem:[%s2878_s1 + $0x344] sm:$0xf0]  ;;  %v1688_v20 = vld [vmem:[%s2878_s1 + $0x3c0] sm:$0xf]  ;;  %v1497_v22 = vor.u32 %v1855_v14, %v1496_v10  ;;  %v1561_v23 = vor.u32 %v1871_v16, %v1560_v15  ;;  %v1853_v26 = vld [vmem:[%s2878_s1 + $0x234] sm:$0xf0] }
  0x22   :  { %948 = vmatpush.bf16.msra.mxu2 %v1337_v36  ;;  %v1903_v21 = vld [vmem:[%s2878_s1 + $0x3c4] sm:$0xf0]  ;;  %v1625_v25 = vor.u32 %v1887_v19, %v1624_v18  ;;  %v1552_v27 = vld [vmem:[%s2878_s1 + $0x2b0] sm:$0xf]  ;;  %v1869_v28 = vld [vmem:[%s2878_s1 + $0x2b4] sm:$0xf0]  ;;  %v1489_v34 = vor.u32 %v1853_v26, %v1488_v24 }
  0x23   :  { %961 = vmatpush.bf16.msra.mxu3 %v1401_v43  ;;  %923 = vmatmul.bf16.vlgmr.msra.gmra.mxu0 %v2228_v11  ;;  %v1689_v29 = vor.u32 %v1903_v21, %v1688_v20  ;;  %v1616_v30 = vld [vmem:[%s2878_s1 + $0x330] sm:$0xf]  ;;  %v1885_v31 = vld [vmem:[%s2878_s1 + $0x334] sm:$0xf0]  ;;  %v1553_v35 = vor.u32 %v1869_v28, %v1552_v27  ;;  %v1480_v36 = vld [vmem:[%s2878_s1 + $0x220] sm:$0xf] }
  0x24   :  { %967 = vmatpush.bf16.msrb.mxu0 %v1521_v39  ;;  %936 = vmatmul.bf16.vlgmr.msra.gmra.mxu1 %v2230_v12  ;;  %v1680_v32 = vld [vmem:[%s2878_s1 + $0x3b0] sm:$0xf]  ;;  %v1901_v33 = vld [vmem:[%s2878_s1 + $0x3b4] sm:$0xf0]  ;;  %v1617_v37 = vor.u32 %v1885_v31, %v1616_v30  ;;  %v1851_v38 = vld [vmem:[%s2878_s1 + $0x224] sm:$0xf0] }
  0x25   :  { %980 = vmatpush.bf16.msrb.mxu1 %v1585_v40  ;;  %949 = vmatmul.bf16.vlgmr.msra.gmra.mxu2 %v2221_v7  ;;  %v1544_v39 = vld [vmem:[%s2878_s1 + $0x2a0] sm:$0xf]  ;;  %v1867_v40 = vld [vmem:[%s2878_s1 + $0x2a4] sm:$0xf0]  ;;  %v1681_v41 = vor.u32 %v1901_v33, %v1680_v32  ;;  %v1481_v46 = vor.u32 %v1851_v38, %v1480_v36  ;;  %v1472_v48 = vld [vmem:[%s2878_s1 + $0x210] sm:$0xf] }
  0x26   :  { %993 = vmatpush.bf16.msrb.mxu2 %v1649_v42  ;;  %962 = vmatmul.bf16.vlgmr.msra.gmra.mxu3 %v2223_v8  ;;  %v1608_v42 = vld [vmem:[%s2878_s1 + $0x320] sm:$0xf]  ;;  %v1883_v43 = vld [vmem:[%s2878_s1 + $0x324] sm:$0xf0]  ;;  %v1849_v50 = vld [vmem:[%s2878_s1 + $0x214] sm:$0xf0] }
  0x27   :  { %1006 = vmatpush.bf16.msrb.mxu3 %v1713_v47  ;;  %v1672_v44 = vld [vmem:[%s2878_s1 + $0x3a0] sm:$0xf]  ;;  %v1899_v45 = vld [vmem:[%s2878_s1 + $0x3a4] sm:$0xf0]  ;;  %v1545_v47 = vor.u32 %v1867_v40, %v1544_v39  ;;  %v1609_v49 = vor.u32 %v1883_v43, %v1608_v42  ;;  %v1536_v51 = vld [vmem:[%s2878_s1 + $0x290] sm:$0xf]  ;;  %v1473_v60 = vor.u32 %v1849_v50, %v1472_v48 }
  0x28   :  { %968 = vmatpush.bf16.msrb.mxu0 %v1513_v52  ;;  %v1865_v52 = vld [vmem:[%s2878_s1 + $0x294] sm:$0xf0]  ;;  %v1600_v54 = vld [vmem:[%s2878_s1 + $0x310] sm:$0xf]  ;;  %v1464_v58 = vld [vmem:[%s2878_s1 + $0x200] sm:$0xf] }
  0x29   :  { %981 = vmatpush.bf16.msrb.mxu1 %v1577_v53  ;;  %v1673_v53 = vor.u32 %v1899_v45, %v1672_v44  ;;  %v1881_v55 = vld [vmem:[%s2878_s1 + $0x314] sm:$0xf0]  ;;  %v1664_v56 = vld [vmem:[%s2878_s1 + $0x390] sm:$0xf]  ;;  %v1847_v59 = vld [vmem:[%s2878_s1 + $0x204] sm:$0xf0]  ;;  %v1537_v61 = vor.u32 %v1865_v52, %v1536_v51 }
  0x2a   :  { %994 = vmatpush.bf16.msrb.mxu2 %v1641_v57  ;;  %v1897_v57 = vld [vmem:[%s2878_s1 + $0x394] sm:$0xf0]  ;;  %v1528_v62 = vld [vmem:[%s2878_s1 + $0x280] sm:$0xf]  ;;  %v16_v0 = vld [vmem:[%s2879_s0 + $0x10] sm:$0xff]  ;;  %v1601_v1 = vor.u32 %v1881_v55, %v1600_v54 }
  0x2b   :  { %1007 = vmatpush.bf16.msrb.mxu3 %v1705_v63  ;;  %v1863_v63 = vld [vmem:[%s2878_s1 + $0x284] sm:$0xf0]  ;;  %v1592_v2 = vld [vmem:[%s2878_s1 + $0x300] sm:$0xf]  ;;  %v1665_v5 = vor.u32 %v1897_v57, %v1664_v56  ;;  %v1776_v6 = vld [vmem:[%s2878_s1 + $0x470] sm:$0xf]  ;;  %v172_v16 = vunpack.c.l.b16 %v16_v0  ;;  %v173_v26 = vunpack.c.h.b16 %v16_v0 }
  0x2c   :  { %969 = vmatpush.bf16.msrb.mxu0 %v1505_v4  ;;  %v1879_v3 = vld [vmem:[%s2878_s1 + $0x304] sm:$0xf0]  ;;  %v17_v4 = vld [vmem:[%s2879_s0 + $0x18] sm:$0xff]  ;;  %v1796_v10 = vld [vmem:[%s2878_s1 + $0x74] sm:$0xf]  ;;  %v1529_v18 = vor.u32 %v1863_v63, %v1528_v62 }
  0x2d   :  { %982 = vmatpush.bf16.msrb.mxu1 %v1569_v9  ;;  %v1925_v9 = vld [vmem:[%s2878_s1 + $0x474] sm:$0xf0]  ;;  %v1812_v14 = vld [vmem:[%s2878_s1 + $0xf4] sm:$0xf]  ;;  %v1330_v15 = vld [vmem:[%s2878_s1 + $0xf8] sm:$0xf0]  ;;  %v174_v21 = vunpack.c.l.b16 %v17_v4  ;;  %v2401_v36 = vpack.c.b16 %v172_v16, %v172_v16  ;;  %v2411_v43 = vpack.c.b16 %v173_v26, %v173_v26 }
  0x2e   :  { %995 = vmatpush.bf16.msrb.mxu2 %v1633_v13  ;;  %v1266_v13 = vld [vmem:[%s2878_s1 + $0x78] sm:$0xf0]  ;;  %v1656_v19 = vld [vmem:[%s2878_s1 + $0x380] sm:$0xf]  ;;  %v1895_v20 = vld [vmem:[%s2878_s1 + $0x384] sm:$0xf0]  ;;  %v1333_v28 = vor.u32 %v1812_v14, %v1330_v15 }
  0x2f   :  { %1008 = vmatpush.bf16.msrb.mxu3 %v1697_v17  ;;  %v1465_v17 = vor.u32 %v1847_v59, %v1464_v58  ;;  %v1828_v24 = vld [vmem:[%s2878_s1 + $0x174] sm:$0xf]  ;;  %v1269_v27 = vor.u32 %v1796_v10, %v1266_v13  ;;  %v1923_v30 = vld [vmem:[%s2878_s1 + $0x464] sm:$0xf0]  ;;  %v1794_v31 = vld [vmem:[%s2878_s1 + $0x64] sm:$0xf]  ;;  %v1657_v32 = vor.u32 %v1895_v20, %v1656_v19  ;;  %v2403_v39 = vpack.c.b16 %v174_v21, %v174_v21 }
  0x30   :  { %970 = vmatpush.bf16.msrb.mxu0 %v1497_v22  ;;  %v1593_v22 = vor.u32 %v1879_v3, %v1592_v2  ;;  %v1258_v33 = vld [vmem:[%s2878_s1 + $0x68] sm:$0xf0]  ;;  %v1792_v48 = vld [vmem:[%s2878_s1 + $0x54] sm:$0xf]  ;;  %v1250_v50 = vld [vmem:[%s2878_s1 + $0x58] sm:$0xf0] }
  0x31   :  { %983 = vmatpush.bf16.msrb.mxu1 %v1561_v23  ;;  %v1777_v23 = vor.u32 %v1925_v9, %v1776_v6  ;;  %v1386_v42 = vld [vmem:[%s2878_s1 + $0x168] sm:$0xf0]  ;;  %v1261_v44 = vor.u32 %v1794_v31, %v1258_v33  ;;  %v1808_v51 = vld [vmem:[%s2878_s1 + $0xd4] sm:$0xf]  ;;  %v1314_v52 = vld [vmem:[%s2878_s1 + $0xd8] sm:$0xf0]  ;;  %v1253_v57 = vor.u32 %v1792_v48, %v1250_v50 }
  0x32   :  { %996 = vmatpush.bf16.msrb.mxu2 %v1625_v25  ;;  %v1394_v25 = vld [vmem:[%s2878_s1 + $0x178] sm:$0xf0]  ;;  %v1824_v55 = vld [vmem:[%s2878_s1 + $0x154] sm:$0xf]  ;;  %v1317_v58 = vor.u32 %v1808_v51, %v1314_v52  ;;  %v1752_v59 = vld [vmem:[%s2878_s1 + $0x440] sm:$0xf] }
  0x33   :  { %1009 = vmatpush.bf16.msrb.mxu3 %v1689_v29  ;;  %v1768_v29 = vld [vmem:[%s2878_s1 + $0x460] sm:$0xf]  ;;  %v1397_v38 = vor.u32 %v1828_v24, %v1394_v25  ;;  %v1378_v56 = vld [vmem:[%s2878_s1 + $0x158] sm:$0xf0]  ;;  %v1242_v62 = vld [vmem:[%s2878_s1 + $0x48] sm:$0xf0] }
  0x34   :  { %971 = vmatpush.bf16.msrb.mxu0 %v1489_v34  ;;  %v1810_v34 = vld [vmem:[%s2878_s1 + $0xe4] sm:$0xf]  ;;  %v1769_v40 = vor.u32 %v1923_v30, %v1768_v29  ;;  %v1306_v0 = vld [vmem:[%s2878_s1 + $0xc8] sm:$0xf0]  ;;  %v1744_v9 = vld [vmem:[%s2878_s1 + $0x430] sm:$0xf] }
  0x35   :  { %984 = vmatpush.bf16.msrb.mxu1 %v1553_v35  ;;  %v1322_v35 = vld [vmem:[%s2878_s1 + $0xe8] sm:$0xf0]  ;;  %v1806_v63 = vld [vmem:[%s2878_s1 + $0xc4] sm:$0xf]  ;;  %v1917_v10 = vld [vmem:[%s2878_s1 + $0x434] sm:$0xf0] }
  0x36   :  { %997 = vmatpush.bf16.msrb.mxu2 %v1617_v37  ;;  %v175_v37 = vunpack.c.h.b16 %v17_v4  ;;  %v1325_v45 = vor.u32 %v1810_v34, %v1322_v35  ;;  %v1822_v3 = vld [vmem:[%s2878_s1 + $0x144] sm:$0xf]  ;;  %v1370_v4 = vld [vmem:[%s2878_s1 + $0x148] sm:$0xf0]  ;;  %v1309_v6 = vor.u32 %v1806_v63, %v1306_v0  ;;  %v1788_v13 = vld [vmem:[%s2878_s1 + $0x34] sm:$0xf] }
  0x37   :  { %1010 = vmatpush.bf16.msrb.mxu3 %v1681_v41  ;;  %v1826_v41 = vld [vmem:[%s2878_s1 + $0x164] sm:$0xf]  ;;  %v1234_v14 = vld [vmem:[%s2878_s1 + $0x38] sm:$0xf0]  ;;  %v1804_v15 = vld [vmem:[%s2878_s1 + $0xb4] sm:$0xf] }
  0x38   :  { %972 = vmatpush.bf16.msrb.mxu0 %v1481_v46  ;;  %v1760_v46 = vld [vmem:[%s2878_s1 + $0x450] sm:$0xf]  ;;  %v1298_v16 = vld [vmem:[%s2878_s1 + $0xb8] sm:$0xf0]  ;;  %v1820_v19 = vld [vmem:[%s2878_s1 + $0x134] sm:$0xf]  ;;  %v1237_v21 = vor.u32 %v1788_v13, %v1234_v14 }
  0x39   :  { %985 = vmatpush.bf16.msrb.mxu1 %v1545_v47  ;;  %v1921_v47 = vld [vmem:[%s2878_s1 + $0x454] sm:$0xf0]  ;;  %v1362_v20 = vld [vmem:[%s2878_s1 + $0x138] sm:$0xf0]  ;;  %v1915_v24 = vld [vmem:[%s2878_s1 + $0x424] sm:$0xf0] }
  0x3a   :  { %998 = vmatpush.bf16.msrb.mxu2 %v1609_v49  ;;  %v2423_v49 = vpack.c.b16 %v175_v37, %v175_v37  ;;  %v1761_v54 = vor.u32 %v1921_v47, %v1760_v46  ;;  %v1786_v25 = vld [vmem:[%s2878_s1 + $0x24] sm:$0xf]  ;;  %v1226_v26 = vld [vmem:[%s2878_s1 + $0x28] sm:$0xf0]  ;;  %v1365_v29 = vor.u32 %v1820_v19, %v1362_v20  ;;  %v1728_v35 = vld [vmem:[%s2878_s1 + $0x410] sm:$0xf] }
  0x3b   :  { %1011 = vmatpush.bf16.msrb.mxu3 %v1673_v53  ;;  %v1389_v53 = vor.u32 %v1826_v41, %v1386_v42  ;;  %v1818_v31 = vld [vmem:[%s2878_s1 + $0x124] sm:$0xf]  ;;  %v1229_v33 = vor.u32 %v1786_v25, %v1226_v26  ;;  %v1913_v37 = vld [vmem:[%s2878_s1 + $0x414] sm:$0xf0]  ;;  %v1800_v41 = vld [vmem:[%s2878_s1 + $0x94] sm:$0xf] }
  0x3c   :  { %973 = vmatpush.bf16.msrb.mxu0 %v1473_v60  ;;  %v1919_v60 = vld [vmem:[%s2878_s1 + $0x444] sm:$0xf0]  ;;  %v1282_v42 = vld [vmem:[%s2878_s1 + $0x98] sm:$0xf0]  ;;  %v1729_v46 = vor.u32 %v1913_v37, %v1728_v35  ;;  %v1720_v48 = vld [vmem:[%s2878_s1 + $0x400] sm:$0xf] }
  0x3d   :  { %986 = vmatpush.bf16.msrb.mxu1 %v1537_v61  ;;  %v1790_v61 = vld [vmem:[%s2878_s1 + $0x44] sm:$0xf]  ;;  %v1753_v2 = vor.u32 %v1919_v60, %v1752_v59  ;;  %v1346_v47 = vld [vmem:[%s2878_s1 + $0x118] sm:$0xf0]  ;;  %v18_v50 = vld [vmem:[%s2879_s0 + $0x20] sm:$0xf]  ;;  %v1285_v52 = vor.u32 %v1800_v41, %v1282_v42 }
  0x3e   :  { %999 = vmatpush.bf16.msrb.mxu2 %v1601_v1  ;;  %v1381_v1 = vor.u32 %v1824_v55, %v1378_v56  ;;  %v1210_v55 = vld [vmem:[%s2878_s1 + $0x8] sm:$0xf0]  ;;  %v1798_v56 = vld [vmem:[%s2878_s1 + $0x84] sm:$0xf]  ;;  %v1458_v60 = vld [vmem:[%s2878_s1 + $0x1f8] sm:$0xf0]  ;;  %v176_v63 = vunpack.c.l.b16 %v18_v50 }
  0x3f   :  { %1012 = vmatpush.bf16.msrb.mxu3 %v1665_v5  ;;  %v1245_v5 = vor.u32 %v1790_v61, %v1242_v62  ;;  %v1860_v61 = vld [vmem:[%s2878_s1 + $0x274] sm:$0xf]  ;;  %v1522_v62 = vld [vmem:[%s2878_s1 + $0x278] sm:$0xf0]  ;;  %v1858_v19 = vld [vmem:[%s2878_s1 + $0x264] sm:$0xf] }
  0x40   :  { %974 = vmatpush.bf16.msrb.mxu0 %v1465_v17  ;;  %v1373_v17 = vor.u32 %v1822_v3, %v1370_v4  ;;  %v1892_v13 = vld [vmem:[%s2878_s1 + $0x374] sm:$0xf]  ;;  %v1650_v14 = vld [vmem:[%s2878_s1 + $0x378] sm:$0xf0]  ;;  %v1514_v20 = vld [vmem:[%s2878_s1 + $0x268] sm:$0xf0] }
  0x41   :  { %987 = vmatpush.bf16.msrb.mxu1 %v1529_v18  ;;  %v1745_v18 = vor.u32 %v1917_v10, %v1744_v9  ;;  %v1525_v10 = vor.u32 %v1860_v61, %v1522_v62  ;;  %v1517_v26 = vor.u32 %v1858_v19, %v1514_v20  ;;  %v1570_v35 = vld [vmem:[%s2878_s1 + $0x2d8] sm:$0xf0]  ;;  %v1888_v41 = vld [vmem:[%s2878_s1 + $0x354] sm:$0xf] }
  0x42   :  { %1000 = vmatpush.bf16.msrb.mxu2 %v1593_v22  ;;  %v1301_v22 = vor.u32 %v1804_v15, %v1298_v16  ;;  %v1842_v15 = vld [vmem:[%s2878_s1 + $0x1e4] sm:$0xf]  ;;  %v1634_v42 = vld [vmem:[%s2878_s1 + $0x358] sm:$0xf0]  ;;  %v1832_v19 = vld [vmem:[%s2878_s1 + $0x194] sm:$0xf] }
  0x43   :  { %1013 = vmatpush.bf16.msrb.mxu3 %v1657_v32  ;;  %975 = vmatmul.bf16.vlgmr.msrb.gmra.mxu0 %v2401_v36  ;;  %v1354_v32 = vld [vmem:[%s2878_s1 + $0x128] sm:$0xf0]  ;;  %v1637_v50 = vor.u32 %v1888_v41, %v1634_v42  ;;  %v1714_v41 = vld [vmem:[%s2878_s1 + $0x3f8] sm:$0xf0] }
  0x44   :  { %1019 = vmatpush.bf16.msra.mxu0 %v1777_v23  ;;  %988 = vmatmul.bf16.vlgmr.msrb.gmra.mxu1 %v2411_v43  ;;  %v1736_v23 = vld [vmem:[%s2878_s1 + $0x420] sm:$0xf] }
  0x45   :  { %1032 = vmatpush.bf16.msra.mxu1 %v1269_v27  ;;  %1001 = vmatmul.bf16.vlgmr.msrb.gmra.mxu2 %v2403_v39  ;;  %v1802_v27 = vld [vmem:[%s2878_s1 + $0xa4] sm:$0xf]  ;;  %v1737_v30 = vor.u32 %v1915_v24, %v1736_v23  ;;  %v1578_v23 = vld [vmem:[%s2878_s1 + $0x2e8] sm:$0xf0]  ;;  %v1653_v24 = vor.u32 %v1892_v13, %v1650_v14 }
  0x46   :  { %1045 = vmatpush.bf16.msra.mxu2 %v1333_v28  ;;  %1014 = vmatmul.bf16.vlgmr.msrb.gmra.mxu3 %v2423_v49  ;;  %v1290_v28 = vld [vmem:[%s2878_s1 + $0xa8] sm:$0xf0] }
  0x47   :  { %1058 = vmatpush.bf16.msra.mxu3 %v1397_v38  ;;  %v1293_v34 = vor.u32 %v1802_v27, %v1290_v28  ;;  %v1784_v38 = vld [vmem:[%s2878_s1 + $0x14] sm:$0xf]  ;;  %v1890_v27 = vld [vmem:[%s2878_s1 + $0x364] sm:$0xf]  ;;  %v1642_v28 = vld [vmem:[%s2878_s1 + $0x368] sm:$0xf0] }
  0x48   :  { %1020 = vmatpush.bf16.msra.mxu0 %v1769_v40  ;;  %v1218_v40 = vld [vmem:[%s2878_s1 + $0x18] sm:$0xf0]  ;;  %v1645_v37 = vor.u32 %v1890_v27, %v1642_v28  ;;  %v1880_v27 = vld [vmem:[%s2878_s1 + $0x314] sm:$0xf] }
  0x49   :  { %1033 = vmatpush.bf16.msra.mxu1 %v1261_v44  ;;  %v1357_v44 = vor.u32 %v1818_v31, %v1354_v32  ;;  %v1221_v51 = vor.u32 %v1784_v38, %v1218_v40  ;;  %v1442_v31 = vld [vmem:[%s2878_s1 + $0x1d8] sm:$0xf0]  ;;  %v1856_v32 = vld [vmem:[%s2878_s1 + $0x254] sm:$0xf] }
  0x4a   :  { %1046 = vmatpush.bf16.msra.mxu2 %v1325_v45  ;;  %v1816_v45 = vld [vmem:[%s2878_s1 + $0x114] sm:$0xf] }
  0x4b   :  { %1059 = vmatpush.bf16.msra.mxu3 %v1389_v53  ;;  %v1911_v53 = vld [vmem:[%s2878_s1 + $0x404] sm:$0xf0]  ;;  %v1349_v59 = vor.u32 %v1816_v45, %v1346_v47  ;;  %v1854_v45 = vld [vmem:[%s2878_s1 + $0x244] sm:$0xf] }
  0x4c   :  { %1021 = vmatpush.bf16.msra.mxu0 %v1761_v54  ;;  %v1782_v54 = vld [vmem:[%s2878_s1 + $0x4] sm:$0xf]  ;;  %v1721_v0 = vor.u32 %v1911_v53, %v1720_v48  ;;  %v1562_v48 = vld [vmem:[%s2878_s1 + $0x2c8] sm:$0xf0] }
  0x4d   :  { %1034 = vmatpush.bf16.msra.mxu1 %v1253_v57  ;;  %v1274_v57 = vld [vmem:[%s2878_s1 + $0x88] sm:$0xf0]  ;;  %v1213_v3 = vor.u32 %v1782_v54, %v1210_v55  ;;  %v1870_v47 = vld [vmem:[%s2878_s1 + $0x2c4] sm:$0xf]  ;;  %v1836_v54 = vld [vmem:[%s2878_s1 + $0x1b4] sm:$0xf] }
  0x4e   :  { %1047 = vmatpush.bf16.msra.mxu2 %v1317_v58  ;;  %v1844_v58 = vld [vmem:[%s2878_s1 + $0x1f4] sm:$0xf]  ;;  %v1277_v4 = vor.u32 %v1798_v56, %v1274_v57  ;;  %v1886_v53 = vld [vmem:[%s2878_s1 + $0x344] sm:$0xf]  ;;  %v1565_v55 = vor.u32 %v1870_v47, %v1562_v48  ;;  %v1426_v56 = vld [vmem:[%s2878_s1 + $0x1b8] sm:$0xf0] }
  0x4f   :  { %1060 = vmatpush.bf16.msra.mxu3 %v1381_v1  ;;  %v1876_v1 = vld [vmem:[%s2878_s1 + $0x2f4] sm:$0xf]  ;;  %v1461_v9 = vor.u32 %v1844_v58, %v1458_v60  ;;  %v1490_v58 = vld [vmem:[%s2878_s1 + $0x238] sm:$0xf0]  ;;  %v1429_v62 = vor.u32 %v1836_v54, %v1426_v56  ;;  %v1594_v47 = vld [vmem:[%s2878_s1 + $0x308] sm:$0xf0] }
  0x50   :  { %1022 = vmatpush.bf16.msra.mxu0 %v1753_v2  ;;  %v1586_v2 = vld [vmem:[%s2878_s1 + $0x2f8] sm:$0xf0]  ;;  %v1852_v57 = vld [vmem:[%s2878_s1 + $0x234] sm:$0xf]  ;;  %v1922_v54 = vld [vmem:[%s2878_s1 + $0x464] sm:$0xf] }
  0x51   :  { %1035 = vmatpush.bf16.msra.mxu1 %v1245_v5  ;;  %v1814_v5 = vld [vmem:[%s2878_s1 + $0x104] sm:$0xf]  ;;  %v1589_v16 = vor.u32 %v1876_v1, %v1586_v2  ;;  %v1554_v60 = vld [vmem:[%s2878_s1 + $0x2b8] sm:$0xf0] }
  0x52   :  { %1048 = vmatpush.bf16.msra.mxu2 %v1309_v6  ;;  %v1338_v6 = vld [vmem:[%s2878_s1 + $0x108] sm:$0xf0]  ;;  %v1618_v1 = vld [vmem:[%s2878_s1 + $0x338] sm:$0xf0]  ;;  %v1834_v2 = vld [vmem:[%s2878_s1 + $0x1a4] sm:$0xf] }
  0x53   :  { %1061 = vmatpush.bf16.msra.mxu3 %v1373_v17  ;;  %v2593_v17 = vpack.c.b16 %v176_v63, %v176_v63  ;;  %v1493_v63 = vor.u32 %v1852_v57, %v1490_v58  ;;  %v1904_v58 = vld [vmem:[%s2878_s1 + $0x3d4] sm:$0xf] }
  0x54   :  { %1023 = vmatpush.bf16.msra.mxu0 %v1745_v18  ;;  %v1450_v18 = vld [vmem:[%s2878_s1 + $0x1e8] sm:$0xf0] }
  0x55   :  { %1036 = vmatpush.bf16.msra.mxu1 %v1237_v21  ;;  %v1341_v21 = vor.u32 %v1814_v5, %v1338_v6  ;;  %v1453_v25 = vor.u32 %v1842_v15, %v1450_v18  ;;  %v1850_v5 = vld [vmem:[%s2878_s1 + $0x224] sm:$0xf]  ;;  %v1482_v6 = vld [vmem:[%s2878_s1 + $0x228] sm:$0xf0] }
  0x56   :  { %1049 = vmatpush.bf16.msra.mxu2 %v1301_v22  ;;  %v1874_v22 = vld [vmem:[%s2878_s1 + $0x2e4] sm:$0xf]  ;;  %v1485_v15 = vor.u32 %v1850_v5, %v1482_v6  ;;  %v1610_v18 = vld [vmem:[%s2878_s1 + $0x328] sm:$0xf0]  ;;  %v1746_v5 = vld [vmem:[%s2878_s1 + $0x438] sm:$0xf0] }
  0x57   :  { %1062 = vmatpush.bf16.msra.mxu3 %v1365_v29  ;;  %v1840_v29 = vld [vmem:[%s2878_s1 + $0x1d4] sm:$0xf] }
  0x58   :  { %1024 = vmatpush.bf16.msra.mxu0 %v1737_v30  ;;  %v1581_v30 = vor.u32 %v1874_v22, %v1578_v23  ;;  %v1445_v38 = vor.u32 %v1840_v29, %v1442_v31  ;;  %v1848_v22 = vld [vmem:[%s2878_s1 + $0x214] sm:$0xf]  ;;  %v1474_v23 = vld [vmem:[%s2878_s1 + $0x218] sm:$0xf0]  ;;  %v1830_v31 = vld [vmem:[%s2878_s1 + $0x184] sm:$0xf] }
  0x59   :  { %1037 = vmatpush.bf16.msra.mxu1 %v1229_v33  ;;  %v1506_v33 = vld [vmem:[%s2878_s1 + $0x258] sm:$0xf0]  ;;  %v1477_v29 = vor.u32 %v1848_v22, %v1474_v23 }
  0x5a   :  { %1050 = vmatpush.bf16.msra.mxu2 %v1293_v34  ;;  %v1872_v34 = vld [vmem:[%s2878_s1 + $0x2d4] sm:$0xf]  ;;  %v1509_v40 = vor.u32 %v1856_v32, %v1506_v33  ;;  %v1402_v32 = vld [vmem:[%s2878_s1 + $0x188] sm:$0xf0]  ;;  %v1730_v22 = vld [vmem:[%s2878_s1 + $0x418] sm:$0xf0] }
  0x5b   :  { %1063 = vmatpush.bf16.msra.mxu3 %v1357_v44  ;;  %v1573_v44 = vor.u32 %v1872_v34, %v1570_v35  ;;  %v1846_v34 = vld [vmem:[%s2878_s1 + $0x204] sm:$0xf]  ;;  %v1466_v35 = vld [vmem:[%s2878_s1 + $0x208] sm:$0xf0] }
  0x5c   :  { %1025 = vmatpush.bf16.msra.mxu0 %v1729_v46  ;;  %v1498_v46 = vld [vmem:[%s2878_s1 + $0x248] sm:$0xf0] }
  0x5d   :  { %1038 = vmatpush.bf16.msra.mxu1 %v1221_v51 }
  0x5e   :  { %1051 = vmatpush.bf16.msra.mxu2 %v1285_v52  ;;  %v1501_v52 = vor.u32 %v1854_v45, %v1498_v46  ;;  %v1469_v45 = vor.u32 %v1846_v34, %v1466_v35  ;;  %v1878_v46 = vld [vmem:[%s2878_s1 + $0x304] sm:$0xf] }
  0x5f   :  { %1064 = vmatpush.bf16.msra.mxu3 %v1349_v59  ;;  %v1868_v59 = vld [vmem:[%s2878_s1 + $0x2b4] sm:$0xf] }
  0x60   :  { %1026 = vmatpush.bf16.msra.mxu0 %v1721_v0  ;;  %v1884_v0 = vld [vmem:[%s2878_s1 + $0x334] sm:$0xf] }
  0x61   :  { %1039 = vmatpush.bf16.msra.mxu1 %v1213_v3  ;;  %v1557_v3 = vor.u32 %v1868_v59, %v1554_v60  ;;  %v1621_v13 = vor.u32 %v1884_v0, %v1618_v1  ;;  %v1698_v59 = vld [vmem:[%s2878_s1 + $0x3d8] sm:$0xf0]  ;;  %v1920_v60 = vld [vmem:[%s2878_s1 + $0x454] sm:$0xf]  ;;  %v1690_v0 = vld [vmem:[%s2878_s1 + $0x3c8] sm:$0xf0] }
  0x62   :  { %1052 = vmatpush.bf16.msra.mxu2 %v1277_v4  ;;  %v1418_v4 = vld [vmem:[%s2878_s1 + $0x1a8] sm:$0xf0] }
  0x63   :  { %1027 = vmatmul.bf16.vlgmr.msra.gmra.mxu0 %v2593_v17  ;;  %1065 = vmatpush.bf16.msra.mxu3 %v1341_v21  ;;  %v1421_v14 = vor.u32 %v1834_v2, %v1418_v4  ;;  %v1410_v21 = vld [vmem:[%s2878_s1 + $0x198] sm:$0xf0]  ;;  %v1900_v2 = vld [vmem:[%s2878_s1 + $0x3b4] sm:$0xf] }
  0x64   :  { %1071 = vmatpush.bf16.msrb.mxu0 %v1461_v9  ;;  %1040 = vmatmul.bf16.vlgmr.msra.gmra.mxu1 %v2228_v11  ;;  %v1434_v11 = vld [vmem:[%s2878_s1 + $0x1c8] sm:$0xf0]  ;;  %v1866_v9 = vld [vmem:[%s2878_s1 + $0x2a4] sm:$0xf]  ;;  %v1413_v28 = vor.u32 %v1832_v19, %v1410_v21  ;;  %v1916_v4 = vld [vmem:[%s2878_s1 + $0x434] sm:$0xf] }
  0x65   :  { %1084 = vmatpush.bf16.msrb.mxu1 %v1525_v10  ;;  %1053 = vmatmul.bf16.vlgmr.msra.gmra.mxu2 %v2230_v12  ;;  %v1838_v12 = vld [vmem:[%s2878_s1 + $0x1c4] sm:$0xf]  ;;  %v1546_v10 = vld [vmem:[%s2878_s1 + $0x2a8] sm:$0xf0]  ;;  %v1896_v19 = vld [vmem:[%s2878_s1 + $0x394] sm:$0xf] }
  0x66   :  { %1097 = vmatpush.bf16.msrb.mxu2 %v1589_v16  ;;  %1066 = vmatmul.bf16.vlgmr.msra.gmra.mxu3 %v2221_v7  ;;  %v1437_v51 = vor.u32 %v1838_v12, %v1434_v11  ;;  %v1626_v7 = vld [vmem:[%s2878_s1 + $0x348] sm:$0xf0]  ;;  %v1882_v16 = vld [vmem:[%s2878_s1 + $0x324] sm:$0xf]  ;;  %v1549_v20 = vor.u32 %v1866_v9, %v1546_v10  ;;  %v1924_v12 = vld [vmem:[%s2878_s1 + $0x474] sm:$0xf]  ;;  %v1405_v11 = vor.u32 %v1830_v31, %v1402_v32 }
  0x67   :  { %1110 = vmatpush.bf16.msrb.mxu3 %v1653_v24  ;;  %v1629_v61 = vor.u32 %v1886_v53, %v1626_v7  ;;  %v1864_v24 = vld [vmem:[%s2878_s1 + $0x294] sm:$0xf]  ;;  %v1706_v53 = vld [vmem:[%s2878_s1 + $0x3e8] sm:$0xf0]  ;;  %v1597_v7 = vor.u32 %v1878_v46, %v1594_v47  ;;  %v1749_v9 = vor.u32 %v1916_v4, %v1746_v5  ;;  %v1898_v10 = vld [vmem:[%s2878_s1 + $0x3a4] sm:$0xf] }
  0x68   :  { %1072 = vmatpush.bf16.msrb.mxu0 %v1453_v25  ;;  %v1538_v25 = vld [vmem:[%s2878_s1 + $0x298] sm:$0xf0]  ;;  %v1912_v21 = vld [vmem:[%s2878_s1 + $0x414] sm:$0xf] }
  0x69   :  { %1085 = vmatpush.bf16.msrb.mxu1 %v1517_v26  ;;  %v1613_v26 = vor.u32 %v1882_v16, %v1610_v18  ;;  %v1541_v33 = vor.u32 %v1864_v24, %v1538_v25  ;;  %v1733_v24 = vor.u32 %v1912_v21, %v1730_v22  ;;  %v1894_v25 = vld [vmem:[%s2878_s1 + $0x384] sm:$0xf] }
  0x6a   :  { %1098 = vmatpush.bf16.msrb.mxu2 %v1581_v30  ;;  %v1602_v30 = vld [vmem:[%s2878_s1 + $0x318] sm:$0xf0] }
  0x6b   :  { %1111 = vmatpush.bf16.msrb.mxu3 %v1645_v37  ;;  %v1862_v37 = vld [vmem:[%s2878_s1 + $0x284] sm:$0xf]  ;;  %v1605_v42 = vor.u32 %v1880_v27, %v1602_v30 }
  0x6c   :  { %1073 = vmatpush.bf16.msrb.mxu0 %v1445_v38  ;;  %v1530_v38 = vld [vmem:[%s2878_s1 + $0x288] sm:$0xf0]  ;;  %v1910_v27 = vld [vmem:[%s2878_s1 + $0x404] sm:$0xf] }
  0x6d   :  { %1086 = vmatpush.bf16.msrb.mxu1 %v1509_v40  ;;  %v1908_v40 = vld [vmem:[%s2878_s1 + $0x3f4] sm:$0xf]  ;;  %v1533_v48 = vor.u32 %v1862_v37, %v1530_v38 }
  0x6e   :  { %1099 = vmatpush.bf16.msrb.mxu2 %v1573_v44  ;;  %v1778_v44 = vld [vmem:[%s2878_s1 + $0x478] sm:$0xf0] }
  0x6f   :  { %1112 = vmatpush.bf16.msrb.mxu3 %v1637_v50  ;;  %v1717_v50 = vor.u32 %v1908_v40, %v1714_v41 }
  0x70   :  { %1074 = vmatpush.bf16.msrb.mxu0 %v1437_v51  ;;  %v1781_v51 = vor.u32 %v1924_v12, %v1778_v44 }
  0x71   :  { %1087 = vmatpush.bf16.msrb.mxu1 %v1501_v52  ;;  %v1906_v52 = vld [vmem:[%s2878_s1 + $0x3e4] sm:$0xf] }
  0x72   :  { %1100 = vmatpush.bf16.msrb.mxu2 %v1565_v55  ;;  %v1770_v55 = vld [vmem:[%s2878_s1 + $0x468] sm:$0xf0]  ;;  %v1709_v56 = vor.u32 %v1906_v52, %v1706_v53 }
  0x73   :  { %1113 = vmatpush.bf16.msrb.mxu3 %v1629_v61  ;;  %v1773_v57 = vor.u32 %v1922_v54, %v1770_v55  ;;  %v1762_v61 = vld [vmem:[%s2878_s1 + $0x458] sm:$0xf0] }
  0x74   :  { %1075 = vmatpush.bf16.msrb.mxu0 %v1429_v62  ;;  %v1701_v62 = vor.u32 %v1904_v58, %v1698_v59 }
  0x75   :  { %1088 = vmatpush.bf16.msrb.mxu1 %v1493_v63  ;;  %v1765_v63 = vor.u32 %v1920_v60, %v1762_v61 }
  0x76   :  { %1101 = vmatpush.bf16.msrb.mxu2 %v1557_v3  ;;  %v1682_v3 = vld [vmem:[%s2878_s1 + $0x3b8] sm:$0xf0] }
  0x77   :  { %1114 = vmatpush.bf16.msrb.mxu3 %v1621_v13  ;;  %v1685_v6 = vor.u32 %v1900_v2, %v1682_v3  ;;  %v1674_v13 = vld [vmem:[%s2878_s1 + $0x3a8] sm:$0xf0] }
  0x78   :  { %1076 = vmatpush.bf16.msrb.mxu0 %v1421_v14  ;;  %v1914_v14 = vld [vmem:[%s2878_s1 + $0x424] sm:$0xf]  ;;  %v1677_v16 = vor.u32 %v1898_v10, %v1674_v13 }
  0x79   :  { %1089 = vmatpush.bf16.msrb.mxu1 %v1485_v15  ;;  %v1738_v15 = vld [vmem:[%s2878_s1 + $0x428] sm:$0xf0] }
  0x7a   :  { %1102 = vmatpush.bf16.msrb.mxu2 %v1549_v20  ;;  %v1741_v18 = vor.u32 %v1914_v14, %v1738_v15  ;;  %v1666_v20 = vld [vmem:[%s2878_s1 + $0x398] sm:$0xf0] }
  0x7b   :  { %1115 = vmatpush.bf16.msrb.mxu3 %v1613_v26  ;;  %v1669_v23 = vor.u32 %v1896_v19, %v1666_v20  ;;  %v1658_v26 = vld [vmem:[%s2878_s1 + $0x388] sm:$0xf0] }
  0x7c   :  { %1077 = vmatpush.bf16.msrb.mxu0 %v1413_v28  ;;  %v1722_v28 = vld [vmem:[%s2878_s1 + $0x408] sm:$0xf0] }
  0x7d   :  { %1090 = vmatpush.bf16.msrb.mxu1 %v1477_v29  ;;  %v1661_v29 = vor.u32 %v1894_v25, %v1658_v26  ;;  %v1725_v30 = vor.u32 %v1910_v27, %v1722_v28 }
  0x7e   :  { %1103 = vmatpush.bf16.msrb.mxu2 %v1541_v33 }
  0x7f   :  { %1116 = vmatpush.bf16.msrb.mxu3 %v1605_v42 }
  0x80   :  { %1078 = vmatpush.bf16.msrb.mxu0 %v1405_v11 }
  0x81   :  { %1091 = vmatpush.bf16.msrb.mxu1 %v1469_v45 }
  0x82   :  { %1104 = vmatpush.bf16.msrb.mxu2 %v1533_v48 }
  0x83   :  { %1117 = vmatpush.bf16.msrb.mxu3 %v1597_v7  ;;  %1079 = vmatmul.bf16.vlgmr.msrb.gmra.mxu0 %v2223_v8  ;;  %v1902_v8 = vld [vmem:[%s2878_s1 + $0x3c4] sm:$0xf] }
  0x84   :  { %1123 = vmatpush.bf16.msra.mxu0 %v1717_v50  ;;  %1092 = vmatmul.bf16.vlgmr.msrb.gmra.mxu1 %v2401_v36  ;;  %v1754_v36 = vld [vmem:[%s2878_s1 + $0x448] sm:$0xf0]  ;;  %v1693_v1 = vor.u32 %v1902_v8, %v1690_v0 }
  0x85   :  { %1136 = vmatpush.bf16.msra.mxu1 %v1781_v51  ;;  %1105 = vmatmul.bf16.vlgmr.msrb.gmra.mxu2 %v2411_v43  ;;  %v1918_v43 = vld [vmem:[%s2878_s1 + $0x444] sm:$0xf] }
  0x86   :  { %1118 = vmatmul.bf16.vlgmr.msrb.gmra.mxu3 %v2403_v39  ;;  %v1757_v39 = vor.u32 %v1918_v43, %v1754_v36 }
  0x88   :  { %1124 = vmatpush.bf16.msra.mxu0 %v1709_v56 }
  0x89   :  { %1137 = vmatpush.bf16.msra.mxu1 %v1773_v57 }
  0x8c   :  { %1125 = vmatpush.bf16.msra.mxu0 %v1701_v62 }
  0x8d   :  { %1138 = vmatpush.bf16.msra.mxu1 %v1765_v63 }
  0x90   :  { %1126 = vmatpush.bf16.msra.mxu0 %v1693_v1 }
  0x91   :  { %1139 = vmatpush.bf16.msra.mxu1 %v1757_v39 }
  0x94   :  { %1127 = vmatpush.bf16.msra.mxu0 %v1685_v6 }
  0x95   :  { %1140 = vmatpush.bf16.msra.mxu1 %v1749_v9 }
  0x98   :  { %1128 = vmatpush.bf16.msra.mxu0 %v1677_v16 }
  0x99   :  { %1141 = vmatpush.bf16.msra.mxu1 %v1741_v18 }
  0x9c   :  { %1129 = vmatpush.bf16.msra.mxu0 %v1669_v23 }
  0x9d   :  { %1142 = vmatpush.bf16.msra.mxu1 %v1733_v24 }
  0xa0   :  { %1130 = vmatpush.bf16.msra.mxu0 %v1661_v29  ;;  %v924_v31 = vpop.f32.mrf.mxu0 }
  0xa1   :  { %1143 = vmatpush.bf16.msra.mxu1 %v1725_v30  ;;  %v937_v32 = vpop.f32.mrf.mxu1 }
  0xa2   :  { %v938_v12 = vadd.f32 %v937_v32, %v924_v31 }
  0xa3   :  { %1131 = vmatmul.bf16.vlgmr.msra.gmra.mxu0 %v2423_v49 }
  0xa4   :  { %1144 = vmatmul.bf16.vlgmr.msra.gmra.mxu1 %v2593_v17 }
  0xa8   :  { %v950_v34 = vpop.f32.mrf.mxu2  ;;  %v926_v35 = vpop.f32.mrf.mxu0 }
  0xa9   :  { %v963_v33 = vpop.f32.mrf.mxu3  ;;  %v939_v37 = vpop.f32.mrf.mxu1  ;;  %v951_v11 = vadd.f32 %v950_v34, %v938_v12 }
  0xab   :  { %v964_v48 = vadd.f32 %v963_v33, %v951_v11 }
  0xb0   :  { %v952_v40 = vpop.f32.mrf.mxu2 }
  0xb1   :  { %v965_v38 = vpop.f32.mrf.mxu3 }
  0xc0   :  { %v976_v41 = vpop.f32.mrf.mxu0 }
  0xc1   :  { %v989_v42 = vpop.f32.mrf.mxu1  ;;  %v977_v50 = vadd.f32 %v976_v41, %v964_v48  ;;  %v1183_v41 = vlaneseq }
  0xc3   :  { %v990_v51 = vadd.f32 %v989_v42, %v977_v50  ;;  %vm1185_vm1 = vcmp.lt.s32.totalorder %v1183_v41, 256 }
  0xc8   :  { %v1002_v44 = vpop.f32.mrf.mxu2  ;;  %v978_v45 = vpop.f32.mrf.mxu0 }
  0xc9   :  { %v1015_v46 = vpop.f32.mrf.mxu3  ;;  %v991_v47 = vpop.f32.mrf.mxu1  ;;  %v1003_v52 = vadd.f32 %v1002_v44, %v990_v51 }
  0xcb   :  { %v1016_v53 = vadd.f32 %v1015_v46, %v1003_v52 }
  0xd0   :  { %v1004_v49 = vpop.f32.mrf.mxu2 }
  0xd1   :  { %v1017_v17 = vpop.f32.mrf.mxu3 }
  0xe0   :  { %v1028_v7 = vpop.f32.mrf.mxu0 }
  0xe1   :  { %v1029_v54 = vadd.f32 %v1028_v7, %v1016_v53  ;;  %v1041_v55 = vpop.f32.mrf.mxu1 }
  0xe3   :  { %1149 = vst [vmem:[%s2880_s2] sm:$0xff] %v1029_v54  ;;  %v1163_v6 = vmul.f32 %v1029_v54, %v1029_v54  ;;  %v1151_v10 = vrot.slane %v1029_v54, 4 }
  0xe5   :  { %v1165_v13 = vrot.slane %v1163_v6, 4  ;;  %v1152_v16 = vadd.f32 %v1151_v10, %v1029_v54 }
  0xe7   :  { %v1166_v20 = vadd.f32 %v1165_v13, %v1163_v6  ;;  %v1153_v22 = vrot.slane %v1152_v16, 2 }
  0xe8   :  { %v1054_v56 = vpop.f32.mrf.mxu2  ;;  %v1030_v57 = vpop.f32.mrf.mxu0 }
  0xe9   :  { %v1067_v58 = vpop.f32.mrf.mxu3  ;;  %v1043_v59 = vpop.f32.mrf.mxu1  ;;  %v1055_v0 = vadd.f32 %v1054_v56, %v1041_v55  ;;  %v1167_v25 = vrot.slane %v1166_v20, 2  ;;  %v1154_v29 = vadd.f32 %v1153_v22, %v1152_v16 }
  0xeb   :  { %v1068_v39 = vadd.f32 %v1067_v58, %v1055_v0  ;;  %v1168_v33 = vadd.f32 %v1167_v25, %v1166_v20  ;;  %v1155_v37 = vrot.slane %v1154_v29, 1 }
  0xed   :  { %v1169_v42 = vrot.slane %v1168_v33, 1  ;;  %v1156_v11 = vadd.f32 %v1155_v37, %v1154_v29 }
  0xef   :  { %v1170_v47 = vadd.f32 %v1169_v42, %v1168_v33 }
  0xf0   :  { %v1056_v60 = vpop.f32.mrf.mxu2 }
  0xf1   :  { %v1069_v61 = vpop.f32.mrf.mxu3 }
 0x100   :  { %v1080_v62 = vpop.f32.mrf.mxu0 }
 0x101   :  { %v1093_v63 = vpop.f32.mrf.mxu1  ;;  %v1081_v3 = vadd.f32 %v1080_v62, %v1068_v39 }
 0x103   :  { %v1094_v5 = vadd.f32 %v1093_v63, %v1081_v3 }
 0x108   :  { %v1106_v8 = vpop.f32.mrf.mxu2  ;;  %v1082_v43 = vpop.f32.mrf.mxu0 }
 0x109   :  { %v1119_v36 = vpop.f32.mrf.mxu3  ;;  %v1095_v1 = vpop.f32.mrf.mxu1  ;;  %v1107_v9 = vadd.f32 %v1106_v8, %v1094_v5 }
 0x10b   :  { %v1120_v14 = vadd.f32 %v1119_v36, %v1107_v9 }
 0x110   :  { %v1108_v2 = vpop.f32.mrf.mxu2 }
 0x111   :  { %v1121_v4 = vpop.f32.mrf.mxu3 }
 0x120   :  { %v1132_v15 = vpop.f32.mrf.mxu0 }
 0x121   :  { %v1133_v18 = vadd.f32 %v1132_v15, %v1120_v14  ;;  %v1145_v19 = vpop.f32.mrf.mxu1 }
 0x123   :  { %v1146_v21 = vadd.f32 %v1145_v19, %v1133_v18 }
 0x125   :  { %1150 = vst [vmem:[%s2880_s2 + $0x8] sm:$0xff] %v1146_v21  ;;  %v1157_v23 = vrot.slane %v1146_v21, 4  ;;  %v1164_v24 = vmul.f32 %v1146_v21, %v1146_v21 }
 0x127   :  { %v1158_v26 = vadd.f32 %v1157_v23, %v1146_v21  ;;  %v1171_v27 = vrot.slane %v1164_v24, 4 }
 0x128   :  { %v1134_v28 = vpop.f32.mrf.mxu0 }
 0x129   :  { %v1159_v30 = vrot.slane %v1158_v26, 2  ;;  %v1172_v31 = vadd.f32 %v1171_v27, %v1164_v24  ;;  %v1147_v32 = vpop.f32.mrf.mxu1 }
 0x12b   :  { %v1160_v34 = vadd.f32 %v1159_v30, %v1158_v26  ;;  %v1173_v35 = vrot.slane %v1172_v31, 2 }
 0x12d   :  { %v1161_v38 = vrot.slane %v1160_v34, 1  ;;  %v1174_v40 = vadd.f32 %v1173_v35, %v1172_v31 }
 0x12f   :  { %v1162_v12 = vadd.f32 %v1161_v38, %v1160_v34  ;;  %v1175_v44 = vrot.slane %v1174_v40, 1 }
 0x131   :  { %v1176_v45 = vadd.f32 %v1175_v44, %v1174_v40  ;;  %v1179_v46 = vrot.slane %v1162_v12, 7 }
 0x133   :  { %v1181_v48 = vsel %vm1180_vm0, %v1156_v11, %v1179_v46  ;;  %v1190_v49 = vrot.slane %v1176_v45, 7 }
 0x134   :  { %1187 = vst.msk [vmem:[%s2881_s3] sm:$0x3] %vm1185_vm1, %v1181_v48 }
 0x135   :  { %v1191_v50 = vsel %vm1180_vm0, %v1170_v47, %v1190_v49 }
 0x136   :  { %1193 = vst.msk [vmem:[%s2882_s4] sm:$0x3] %vm1185_vm1, %v1191_v50 }

</bundles_post_ra>
